<compile_context>
chip_gen: v6e
topology: v6e:2x2x1
jax: 0.10.0
libtpu: 0.0.40
codegen_flags: <defaults>
</compile_context>

<pallas_src>
import functools
import math

import jax
import jax.numpy as jnp
import numpy as np
from jax.experimental import pallas as pl
from jax.experimental.pallas import tpu as pltpu


# ----------------------------------------------------------------------------
# Helpers: hardware query (with safe fallbacks), tiling & VMEM budgeting.
# ----------------------------------------------------------------------------
def _round_up(x: int, m: int) -> int:
    return ((x + m - 1) // m) * m


def _num_tensorcores() -> int:
    try:
        info = pltpu.get_tpu_info()
    except Exception:
        return 1
    for name in ("tensorcores_per_chip", "num_tensorcores",
                 "num_cores_per_chip", "num_cores"):
        v = getattr(info, name, None)
        if isinstance(v, int) and v > 0:
            return v
    return 1


def _vmem_capacity_bytes() -> int:
    try:
        v = int(pltpu.get_tpu_info().vmem_capacity_bytes)
        if v > 0:
            return v
    except Exception:
        pass
    return 64 * 1024 * 1024          # conservative: v7x has the smallest VMEM


_MULTI_TC = _num_tensorcores() >= 2
_VMEM_FLOOR = 32 * 1024 * 1024                                     # >= default scoped limits
_VMEM_CAP = max(_VMEM_FLOOR, _vmem_capacity_bytes() - (8 << 20))   # headroom vs physical


def _block_bytes(*shape_dtypes) -> int:
    return sum(int(np.prod(s)) * np.dtype(d).itemsize for s, d in shape_dtypes)


def _compiler_params(block_bytes: int, dims):
    # Item #3: scoped-VMEM limit sized to the real tile working set (double
    # buffering included), never below per-chip defaults, never at physical cap.
    limit = int(min(_VMEM_CAP, max(_VMEM_FLOOR, 2 * block_bytes + (4 << 20))))
    return pltpu.CompilerParams(dimension_semantics=dims, vmem_limit_bytes=limit)


def _pick_tm(M: int, tm_max: int = 512) -> int:
    # Items #5/#6: split M across TensorCores only on multi-TC chips, and balance
    # the two tiles by rounding to 16 (bf16 sublane packing), not 32.
    if _MULTI_TC and M > 16:
        tm = _round_up(pl.cdiv(M, 2), 16)
    else:
        tm = _round_up(M, 16)               # 1-TC chips: one large tile (no grid overhead)
    tm = min(tm, tm_max)
    return M if tm >= M else tm             # exact single block when it fits


# ----------------------------------------------------------------------------
# Fused 3x3 / stride-2 conv kernel: time taps gathered in-kernel from a band.
#
#   out[b, t, w, :] = relu( sum_dh  hw[b, 2*t + dh, w, :] @ W[dh]  + bias )
#
# `hw` already carries the 3 freq/width taps along its last axis (kdim = 3*Cin
# for conv2/3; kdim = idim for conv1, whose freq taps + freq subsampling are
# folded into W).  Per grid step the BlockSpecs deliver an overlapping band of
# 2*tto (+2 tail) time rows, so no im2col matrix is ever materialised in HBM.
# ----------------------------------------------------------------------------
def _conv_band_kernel(band_ref, tail_ref, w_ref, b_ref, o_ref):
    two_tto, wo, kdim = band_ref.shape
    tto = two_tto // 2
    nout = w_ref.shape[-1]
    rows = jnp.concatenate([band_ref[...], tail_ref[...]], axis=0)    # (2*tto+2, wo, kdim)
    r = rows.reshape(tto + 1, 2, wo, kdim)                            # leading-dim split (free)
    acc = jnp.zeros((tto * wo, nout), jnp.float32)
    # dh = 0, 1, 2  ->  band rows 2t, 2t+1, 2t+2 (the last one via the tail rows)
    for dh, sub in enumerate((r[:tto, 0], r[:tto, 1], r[1:, 0])):
        a = sub.reshape(tto * wo, kdim)                               # lane dim kept intact
        acc = acc + jnp.dot(a, w_ref[dh], preferred_element_type=jnp.float32)
    acc = jnp.maximum(acc + b_ref[...], 0.0)                          # fused bias + ReLU
    o_ref[...] = acc.reshape(o_ref.shape).astype(o_ref.dtype)


def conv3x3s2_band(hw, w3, bias, *, out_4d, tto_cap, out_dtype=jnp.bfloat16):
    """hw: (B, H, W', kdim) bf16; w3: (3, kdim, nout) bf16; bias: (1, nout) f32."""
    B, H, wo, kdim = hw.shape
    _, _, nout = w3.shape
    hout = (H - 1) // 2                                # == (H - 3) // 2 + 1
    tto = hout if hout <= tto_cap else tto_cap         # cap is a multiple of 16
    ntile = pl.cdiv(hout, tto)
    tail_clamp = hout                                  # 2*hout <= H-1: always in-bounds start

    band_spec = pl.BlockSpec((None, 2 * tto, wo, kdim), lambda b, i: (b, i, 0, 0))
    # One extra pair of rows so the dh=2 tap of the tile's last output row is
    # available; clamped for ragged final tiles (their tail rows are never used).
    tail_spec = pl.BlockSpec(
        (None, 2, wo, kdim),
        lambda b, i: (b, jnp.minimum((i + 1) * tto, tail_clamp), 0, 0))
    w_spec = pl.BlockSpec((3, kdim, nout), lambda b, i: (0, 0, 0))
    b_spec = pl.BlockSpec((1, nout), lambda b, i: (0, 0))
    # TODO(synk): pipeline_mode=pl.Buffered(1) on w_spec/b_spec (constant index
    # maps) to single-buffer the resident operands and free VMEM on v7x.

    if out_4d:
        out_shape = jax.ShapeDtypeStruct((B, hout, wo, nout), out_dtype)
        out_spec = pl.BlockSpec((None, tto, wo, nout), lambda b, i: (b, i, 0, 0))
    else:                                              # conv1: (fo, co) columns stay flat
        out_shape = jax.ShapeDtypeStruct((B, hout, nout), out_dtype)
        out_spec = pl.BlockSpec((None, tto, nout), lambda b, i: (b, i, 0))

    blk = _block_bytes(((2 * tto, wo, kdim), hw.dtype), ((2, wo, kdim), hw.dtype),
                       ((3, kdim, nout), w3.dtype), ((1, nout), bias.dtype),
                       ((tto, wo, nout), out_dtype), ((tto * wo, nout), np.float32))
    return pl.pallas_call(
        _conv_band_kernel,
        out_shape=out_shape,
        grid=(B, ntile),
        in_specs=[band_spec, tail_spec, w_spec, b_spec],
        out_specs=out_spec,
        compiler_params=_compiler_params(blk, ("parallel", "parallel")),
    )(hw, hw, w3, bias)


# ----------------------------------------------------------------------------
# Fused  out = [relu]( A @ W + b )  for the final Linear (bf16 x bf16 -> f32).
# ----------------------------------------------------------------------------
def _mm_bias_act_kernel(a_ref, w_ref, b_ref, o_ref, *, relu: bool):
    acc = jnp.dot(a_ref[...], w_ref[...], preferred_element_type=jnp.float32)
    acc = acc + b_ref[...]
    if relu:
        acc = jnp.maximum(acc, 0.0)
    o_ref[...] = acc.astype(o_ref.dtype)


def matmul_bias_act(a, w, b, *, relu=False, out_dtype=jnp.float32, tm_max=512):
    M, K = a.shape
    K2, N = w.shape
    assert K == K2 and b.shape == (1, N)
    if a.dtype != jnp.bfloat16:
        a = a.astype(jnp.bfloat16)
    tm = _pick_tm(M, tm_max)
    grid_m = pl.cdiv(M, tm)
    blk = _block_bytes(((tm, K), jnp.bfloat16), ((K, N), w.dtype), ((1, N), b.dtype),
                       ((tm, N), out_dtype), ((tm, N), np.float32))
    return pl.pallas_call(
        functools.partial(_mm_bias_act_kernel, relu=relu),
        out_shape=jax.ShapeDtypeStruct((M, N), out_dtype),
        grid=(grid_m,),
        in_specs=[pl.BlockSpec((tm, K), lambda i: (i, 0)),   # streamed row tile of A
                  pl.BlockSpec((K, N), lambda i: (0, 0)),    # resident weights
                  pl.BlockSpec((1, N), lambda i: (0, 0))],   # bias (f32)
        out_specs=pl.BlockSpec((tm, N), lambda i: (i, 0)),
        compiler_params=_compiler_params(blk, ("parallel",)),
    )(a, w, b)


# ----------------------------------------------------------------------------
# Parameters: torch-layout synthetic init + one-time prep into Pallas layouts.
# ----------------------------------------------------------------------------
def init_params(key, idim, odim):
    ks = jax.random.split(key, 8)
    f3 = (((idim - 1) // 2 - 1) // 2 - 1) // 2
    return {
        "conv1_w": jax.random.normal(ks[0], (odim, 1, 3, 3), jnp.float32) * 0.2,
        "conv1_b": jax.random.normal(ks[1], (odim,), jnp.float32) * 0.1,
        "conv2_w": jax.random.normal(ks[2], (odim, odim, 3, 3), jnp.float32) * 0.05,
        "conv2_b": jax.random.normal(ks[3], (odim,), jnp.float32) * 0.1,
        "conv3_w": jax.random.normal(ks[4], (odim, odim, 3, 3), jnp.float32) * 0.05,
        "conv3_b": jax.random.normal(ks[5], (odim,), jnp.float32) * 0.1,
        "lin_w": jax.random.normal(ks[6], (odim, odim * f3), jnp.float32) * 0.05,
        "lin_b": jax.random.normal(ks[7], (odim,), jnp.float32) * 0.1,
    }


def prepare_params(p, idim, odim):
    """Host-side, one-time prep:
       - conv1: fold the 3 freq taps + stride-2 freq subsampling into 3 per-dh
         weight slabs (idim, f1*odim); output columns are (fo, co)-ordered = NHWC.
       - conv2/3: (Cout, Cin, 3, 3) -> (3, 3*Cin, Cout), rows ordered (dw, ci) to
         match the staged freq-tap concat; no lane padding (review item #8).
       - Linear: rows permuted to the NHWC (f, c) flattening; sqrt(d_model)
         xscale of RelPositionalEncoding folded into W and b.
       - weights bf16, biases f32."""
    f1 = (idim - 1) // 2
    f2 = (f1 - 1) // 2
    f3 = (f2 - 1) // 2

    w1 = np.asarray(p["conv1_w"], np.float32)                 # (odim, 1, 3, 3)
    W1 = np.zeros((3, idim, f1, odim), np.float32)
    fo = np.arange(f1)
    for dh in range(3):
        for dw in range(3):
            W1[dh, 2 * fo + dw, fo, :] = w1[:, 0, dh, dw][None, :]
    b1 = np.tile(np.asarray(p["conv1_b"], np.float32)[None, :], (f1, 1))

    def conv_w_dh(w):                                          # (Cout,Cin,3,3)->(3,3*Cin,Cout)
        cout, cin = w.shape[0], w.shape[1]
        return np.asarray(w, np.float32).transpose(2, 3, 1, 0).reshape(3, 3 * cin, cout)

    scale = math.sqrt(odim)                                    # RelPositionalEncoding xscale
    lw = np.asarray(p["lin_w"], np.float32).reshape(odim, odim, f3)   # (o, c, f)
    lw = lw.transpose(2, 1, 0).reshape(f3 * odim, odim) * scale       # rows = (f, c)
    lb = np.asarray(p["lin_b"], np.float32) * scale

    return {
        "conv1_w": jnp.asarray(W1.reshape(3, idim, f1 * odim), jnp.bfloat16),
        "conv1_b": jnp.asarray(b1.reshape(1, f1 * odim), jnp.float32),
        "conv2_w": jnp.asarray(conv_w_dh(p["conv2_w"]), jnp.bfloat16),
        "conv2_b": jnp.asarray(np.asarray(p["conv2_b"], np.float32).reshape(1, odim), jnp.float32),
        "conv3_w": jnp.asarray(conv_w_dh(p["conv3_w"]), jnp.bfloat16),
        "conv3_b": jnp.asarray(np.asarray(p["conv3_b"], np.float32).reshape(1, odim), jnp.float32),
        "lin_w": jnp.asarray(lw, jnp.bfloat16),
        "lin_b": jnp.asarray(lb.reshape(1, odim), jnp.float32),
    }


def _sinusoidal_pe(length, d_model):
    # RelPositionalEncoding.position_encoding(offset=0, size=length); dropout = identity.
    # (Matches the non-mirrored sinusoid table used by this wenet variant.)
    pos = jnp.arange(length, dtype=jnp.float32)[:, None]
    div = jnp.exp(jnp.arange(0, d_model, 2, dtype=jnp.float32)
                  * -(math.log(10000.0) / d_model))
    pe = jnp.zeros((length, d_model), jnp.float32)
    pe = pe.at[:, 0::2].set(jnp.sin(pos * div))
    pe = pe.at[:, 1::2].set(jnp.cos(pos * div))
    return pe[None]  # (1, length, d_model)


# ----------------------------------------------------------------------------
# Forward pass (semantics of RelConv2dSubsampling8.forward, eval mode).
# ----------------------------------------------------------------------------
def rel_conv2d_subsampling8(pp, x, x_mask, odim):
    """x: (B, T, idim) f32, x_mask: (B, 1, T) bool -> ((y, pos_emb), mask)."""
    B, T, idim = x.shape
    f1 = (idim - 1) // 2

    # conv1: freq taps + freq subsampling folded into the weight; time taps are
    # gathered in-kernel from the overlapping band (no im2col HBM traffic at all).
    xb = x.astype(jnp.bfloat16).reshape(B, T, 1, idim)
    h = conv3x3s2_band(xb, pp["conv1_w"], pp["conv1_b"], out_4d=False, tto_cap=64)
    t1 = h.shape[1]
    h = h.reshape(B, t1, f1, odim)                 # free: (fo, co) columns -> NHWC

    # conv2 / conv3: the freq(width) taps are staged by XLA (~1.5x expansion,
    # cheap); the 3x time-axis blow-up is fused into the kernel via the band.
    # TODO(synk): fold the freq-tap gather into the kernel too (sublane-strided
    # in-kernel gather) to remove the remaining staging copy.
    for name in ("conv2", "conv3"):
        wo = (h.shape[2] - 1) // 2
        hw = jnp.concatenate([h[:, :, dw:dw + 2 * wo:2, :] for dw in range(3)], axis=-1)
        h = conv3x3s2_band(hw, pp[f"{name}_w"], pp[f"{name}_b"], out_4d=True, tto_cap=32)

    _, t3, f3, _ = h.shape
    # Same features as torch's x.transpose(1,2).view(b,t,c*f); here flattened in
    # (f, c) order with lin_w pre-permuted (and xscale pre-folded) to match.
    flat = h.reshape(B * t3, f3 * odim)            # free metadata reshape (NHWC row-major)
    out = matmul_bias_act(flat, pp["lin_w"], pp["lin_b"], relu=False, out_dtype=jnp.float32)
    out = out.reshape(B, t3, odim)

    pos_emb = _sinusoidal_pe(t3, odim)             # dropout == identity (eval)
    mask = x_mask[:, :, :-2:2][:, :, :-2:2][:, :, :-2:2]
    return (out, pos_emb), mask


# ----------------------------------------------------------------------------
# Ground-truth reference: true f32 conv / linear in the original torch layout.
# ----------------------------------------------------------------------------
def ref_forward(p, x, x_mask, odim):
    hi = jax.lax.Precision.HIGHEST
    h = x[:, None, :, :]                           # NCHW
    for name in ("conv1", "conv2", "conv3"):
        h = jax.lax.conv_general_dilated(
            h, p[f"{name}_w"], window_strides=(2, 2), padding="VALID",
            dimension_numbers=("NCHW", "OIHW", "NCHW"), precision=hi)
        h = jnp.maximum(h + p[f"{name}_b"][None, :, None, None], 0.0)
    b, c, t, f = h.shape
    flat = h.transpose(0, 2, 1, 3).reshape(b, t, c * f)
    out = (jnp.dot(flat, p["lin_w"].T, precision=hi) + p["lin_b"]) * math.sqrt(odim)
    pos_emb = _sinusoidal_pe(t, odim)
    mask = x_mask[:, :, :-2:2][:, :, :-2:2][:, :, :-2:2]
    return (out, pos_emb), mask


if __name__ == "__main__":
    B, T, IDIM, ODIM = 2, 64, 64, 32
    key = jax.random.PRNGKey(0)
    k_p, k_x = jax.random.split(key)

    params = init_params(k_p, IDIM, ODIM)          # torch-layout parameters
    pp = prepare_params(params, IDIM, ODIM)        # Pallas-ready (reordered / bf16)

    x = jax.random.normal(k_x, (B, T, IDIM), jnp.float32)
    x_mask = jnp.ones((B, 1, T), dtype=bool)

    fwd = jax.jit(functools.partial(rel_conv2d_subsampling8, odim=ODIM))
    (out, pos_emb), mask = fwd(pp, x, x_mask)
    out = jax.block_until_ready(out)
    pos_emb = jax.block_until_ready(pos_emb)
    mask = jax.block_until_ready(mask)

    # shape sanity (matches torch semantics)
    T3 = (((T - 1) // 2 - 1) // 2 - 1) // 2
    assert out.shape == (B, T3, ODIM), out.shape
    assert pos_emb.shape == (1, T3, ODIM), pos_emb.shape
    assert mask.shape == (B, 1, T3), mask.shape

    def rel_l2(a, b):
        a = np.asarray(a, np.float64)
        b = np.asarray(b, np.float64)
        return float(np.linalg.norm(a - b) / (np.linalg.norm(b) + 1e-12))

    # Pallas path vs true f32 conv/linear reference in the original torch layout.
    # bf16 MXU inputs with f32 accumulation are an intentional precision choice;
    # the 5e-2 relative-L2 tolerance reflects that and should not be tightened
    # without revisiting the design.
    (ref, _), ref_mask = ref_forward(params, x, x_mask, ODIM)
    assert rel_l2(out, ref) < 5e-2, rel_l2(out, ref)
    assert bool(jnp.all(mask == ref_mask))

    print("KERNEL_OK")
</pallas_src>

<mosaic_0001>
module attributes {stable_mosaic.version = 11 : i64} {
  func.func @_conv_band_kernel(%arg0: i32, %arg1: i32, %arg2: memref<1x62x1x64xbf16, #tpu.memory_space<vmem>>, %arg3: memref<1x2x1x64xbf16, #tpu.memory_space<vmem>>, %arg4: memref<3x64x992xbf16, #tpu.memory_space<vmem>>, %arg5: memref<1x992xf32, #tpu.memory_space<vmem>>, %arg6: memref<1x31x992xbf16, #tpu.memory_space<vmem>>) attributes {dimension_semantics = [#tpu.dimension_semantics<parallel>, #tpu.dimension_semantics<parallel>], iteration_bounds = array<i64: 2, 1>, scalar_prefetch = 0 : i64, scratch_operands = 0 : i64, tpu.core_type = #tpu.core_type<tc>, window_params = [{transform_indices = @transform_0, window_bounds = array<i64: 1, 62, 1, 64>}, {transform_indices = @transform_1, window_bounds = array<i64: 1, 2, 1, 64>}, {pipeline_mode = #tpu.pipeline_mode<synchronous>, transform_indices = @transform_2, window_bounds = array<i64: 3, 64, 992>}, {pipeline_mode = #tpu.pipeline_mode<synchronous>, transform_indices = @transform_3, window_bounds = array<i64: 1, 992>}, {transform_indices = @transform_4, window_bounds = array<i64: 1, 31, 992>}]} {
    %c0 = arith.constant 0 : index
    %c0_0 = arith.constant 0 : index
    %c0_1 = arith.constant 0 : index
    %c0_2 = arith.constant 0 : index
    %0 = vector.load %arg2[%c0, %c0_0, %c0_1, %c0_2] : memref<1x62x1x64xbf16, #tpu.memory_space<vmem>>, vector<1x62x1x64xbf16>
    %1 = vector.shape_cast %0 : vector<1x62x1x64xbf16> to vector<62x1x64xbf16>
    %c0_3 = arith.constant 0 : index
    %c0_4 = arith.constant 0 : index
    %c0_5 = arith.constant 0 : index
    %c0_6 = arith.constant 0 : index
    %2 = vector.load %arg3[%c0_3, %c0_4, %c0_5, %c0_6] : memref<1x2x1x64xbf16, #tpu.memory_space<vmem>>, vector<1x2x1x64xbf16>
    %3 = vector.shape_cast %2 : vector<1x2x1x64xbf16> to vector<2x1x64xbf16>
    %4 = tpu.concatenate %1, %3 in 0 : vector<62x1x64xbf16>, vector<2x1x64xbf16> -> vector<64x1x64xbf16>
    %5 = vector.shape_cast %4 : vector<64x1x64xbf16> to vector<32x2x1x64xbf16>
    %cst = arith.constant 0.000000e+00 : f32
    %6 = vector.broadcast %cst : f32 to vector<31x992xf32>
    %7 = vector.extract_strided_slice %5 {offsets = [0, 0, 0, 0], sizes = [31, 1, 1, 64], strides = [1, 1, 1, 1]} : vector<32x2x1x64xbf16> to vector<31x1x1x64xbf16>
    %8 = vector.shape_cast %7 : vector<31x1x1x64xbf16> to vector<31x1x64xbf16>
    %9 = vector.extract_strided_slice %5 {offsets = [0, 1, 0, 0], sizes = [31, 1, 1, 64], strides = [1, 1, 1, 1]} : vector<32x2x1x64xbf16> to vector<31x1x1x64xbf16>
    %10 = vector.shape_cast %9 : vector<31x1x1x64xbf16> to vector<31x1x64xbf16>
    %11 = vector.extract_strided_slice %5 {offsets = [1, 0, 0, 0], sizes = [31, 1, 1, 64], strides = [1, 1, 1, 1]} : vector<32x2x1x64xbf16> to vector<31x1x1x64xbf16>
    %12 = vector.shape_cast %11 : vector<31x1x1x64xbf16> to vector<31x1x64xbf16>
    %13 = vector.shape_cast %8 : vector<31x1x64xbf16> to vector<31x64xbf16>
    %c0_7 = arith.constant 0 : index
    %c0_8 = arith.constant 0 : index
    %c0_9 = arith.constant 0 : index
    %14 = vector.load %arg4[%c0_7, %c0_8, %c0_9] : memref<3x64x992xbf16, #tpu.memory_space<vmem>>, vector<1x64x992xbf16>
    %15 = vector.shape_cast %14 : vector<1x64x992xbf16> to vector<64x992xbf16>
    %cst_10 = arith.constant dense<0.000000e+00> : vector<31x992xf32>
    %16 = tpu.matmul %13, %15, %cst_10 {dimension_numbers = #tpu.dot_dimension_numbers<[1], [0], [0], [1], [0, 0, 1, 1], [], []>} : vector<31x64xbf16>, vector<64x992xbf16>, vector<31x992xf32> -> vector<31x992xf32>
    %17 = arith.addf %6, %16 : vector<31x992xf32>
    %18 = vector.shape_cast %10 : vector<31x1x64xbf16> to vector<31x64xbf16>
    %c1 = arith.constant 1 : index
    %c0_11 = arith.constant 0 : index
    %c0_12 = arith.constant 0 : index
    %19 = vector.load %arg4[%c1, %c0_11, %c0_12] : memref<3x64x992xbf16, #tpu.memory_space<vmem>>, vector<1x64x992xbf16>
    %20 = vector.shape_cast %19 : vector<1x64x992xbf16> to vector<64x992xbf16>
    %cst_13 = arith.constant dense<0.000000e+00> : vector<31x992xf32>
    %21 = tpu.matmul %18, %20, %cst_13 {dimension_numbers = #tpu.dot_dimension_numbers<[1], [0], [0], [1], [0, 0, 1, 1], [], []>} : vector<31x64xbf16>, vector<64x992xbf16>, vector<31x992xf32> -> vector<31x992xf32>
    %22 = arith.addf %17, %21 : vector<31x992xf32>
    %23 = vector.shape_cast %12 : vector<31x1x64xbf16> to vector<31x64xbf16>
    %c2 = arith.constant 2 : index
    %c0_14 = arith.constant 0 : index
    %c0_15 = arith.constant 0 : index
    %24 = vector.load %arg4[%c2, %c0_14, %c0_15] : memref<3x64x992xbf16, #tpu.memory_space<vmem>>, vector<1x64x992xbf16>
    %25 = vector.shape_cast %24 : vector<1x64x992xbf16> to vector<64x992xbf16>
    %cst_16 = arith.constant dense<0.000000e+00> : vector<31x992xf32>
    %26 = tpu.matmul %23, %25, %cst_16 {dimension_numbers = #tpu.dot_dimension_numbers<[1], [0], [0], [1], [0, 0, 1, 1], [], []>} : vector<31x64xbf16>, vector<64x992xbf16>, vector<31x992xf32> -> vector<31x992xf32>
    %27 = arith.addf %22, %26 : vector<31x992xf32>
    %c0_17 = arith.constant 0 : index
    %c0_18 = arith.constant 0 : index
    %28 = vector.load %arg5[%c0_17, %c0_18] : memref<1x992xf32, #tpu.memory_space<vmem>>, vector<1x992xf32>
    %29 = vector.broadcast %28 : vector<1x992xf32> to vector<31x992xf32>
    %30 = arith.addf %27, %29 : vector<31x992xf32>
    %cst_19 = arith.constant 0.000000e+00 : f32
    %31 = vector.broadcast %cst_19 : f32 to vector<31x992xf32>
    %32 = arith.maximumf %30, %31 : vector<31x992xf32>
    %33 = arith.truncf %32 : vector<31x992xf32> to vector<31x992xbf16>
    %c0_20 = arith.constant 0 : index
    %c0_21 = arith.constant 0 : index
    %c0_22 = arith.constant 0 : index
    %34 = vector.load %arg6[%c0_20, %c0_21, %c0_22] : memref<1x31x992xbf16, #tpu.memory_space<vmem>>, vector<1x31x992xbf16>
    %35 = vector.shape_cast %34 : vector<1x31x992xbf16> to vector<31x992xbf16>
    %36 = vector.shape_cast %33 : vector<31x992xbf16> to vector<1x31x992xbf16>
    tpu.vector_store %arg6[%c0_20, %c0_21, %c0_22], %36 {strides = array<i32>} : memref<1x31x992xbf16, #tpu.memory_space<vmem>>, vector<1x31x992xbf16>,
    return
  }
  func.func @transform_0(%arg0: i32, %arg1: i32) -> (i32, i32, i32, i32) {
    %c0_i32 = arith.constant 0 : i32
    %c0_i32_0 = arith.constant 0 : i32
    %c0_i32_1 = arith.constant 0 : i32
    return %arg0, %arg1, %c0_i32, %c0_i32_0 : i32, i32, i32, i32
  }
  func.func @transform_1(%arg0: i32, %arg1: i32) -> (i32, i32, i32, i32) {
    %c1_i32 = arith.constant 1 : i32
    %0 = arith.addi %arg1, %c1_i32 : i32
    %c31_i32 = arith.constant 31 : i32
    %1 = arith.muli %0, %c31_i32 : i32
    %c31_i32_0 = arith.constant 31 : i32
    %2 = arith.minsi %1, %c31_i32_0 : i32
    %c0_i32 = arith.constant 0 : i32
    %c0_i32_1 = arith.constant 0 : i32
    %c0_i32_2 = arith.constant 0 : i32
    return %arg0, %2, %c0_i32, %c0_i32_1 : i32, i32, i32, i32
  }
  func.func @transform_2(%arg0: i32, %arg1: i32) -> (i32, i32, i32) {
    %c0_i32 = arith.constant 0 : i32
    %c0_i32_0 = arith.constant 0 : i32
    %c0_i32_1 = arith.constant 0 : i32
    %c0_i32_2 = arith.constant 0 : i32
    return %c0_i32, %c0_i32_0, %c0_i32_1 : i32, i32, i32
  }
  func.func @transform_3(%arg0: i32, %arg1: i32) -> (i32, i32) {
    %c0_i32 = arith.constant 0 : i32
    %c0_i32_0 = arith.constant 0 : i32
    %c0_i32_1 = arith.constant 0 : i32
    return %c0_i32, %c0_i32_0 : i32, i32
  }
  func.func @transform_4(%arg0: i32, %arg1: i32) -> (i32, i32, i32) {
    %c0_i32 = arith.constant 0 : i32
    %c0_i32_0 = arith.constant 0 : i32
    return %arg0, %arg1, %c0_i32 : i32, i32, i32
  }
}

module attributes {stable_mosaic.version = 11 : i64} {
  func.func @_conv_band_kernel(%arg0: i32, %arg1: i32, %arg2: memref<1x30x15x96xbf16, #tpu.memory_space<vmem>>, %arg3: memref<1x2x15x96xbf16, #tpu.memory_space<vmem>>, %arg4: memref<3x96x32xbf16, #tpu.memory_space<vmem>>, %arg5: memref<1x32xf32, #tpu.memory_space<vmem>>, %arg6: memref<1x15x15x32xbf16, #tpu.memory_space<vmem>>) attributes {dimension_semantics = [#tpu.dimension_semantics<parallel>, #tpu.dimension_semantics<parallel>], iteration_bounds = array<i64: 2, 1>, scalar_prefetch = 0 : i64, scratch_operands = 0 : i64, tpu.core_type = #tpu.core_type<tc>, window_params = [{transform_indices = @transform_0, window_bounds = array<i64: 1, 30, 15, 96>}, {transform_indices = @transform_1, window_bounds = array<i64: 1, 2, 15, 96>}, {pipeline_mode = #tpu.pipeline_mode<synchronous>, transform_indices = @transform_2, window_bounds = array<i64: 3, 96, 32>}, {pipeline_mode = #tpu.pipeline_mode<synchronous>, transform_indices = @transform_3, window_bounds = array<i64: 1, 32>}, {transform_indices = @transform_4, window_bounds = array<i64: 1, 15, 15, 32>}]} {
    %c0 = arith.constant 0 : index
    %c0_0 = arith.constant 0 : index
    %c0_1 = arith.constant 0 : index
    %c0_2 = arith.constant 0 : index
    %0 = vector.load %arg2[%c0, %c0_0, %c0_1, %c0_2] : memref<1x30x15x96xbf16, #tpu.memory_space<vmem>>, vector<1x30x15x96xbf16>
    %1 = vector.shape_cast %0 : vector<1x30x15x96xbf16> to vector<30x15x96xbf16>
    %c0_3 = arith.constant 0 : index
    %c0_4 = arith.constant 0 : index
    %c0_5 = arith.constant 0 : index
    %c0_6 = arith.constant 0 : index
    %2 = vector.load %arg3[%c0_3, %c0_4, %c0_5, %c0_6] : memref<1x2x15x96xbf16, #tpu.memory_space<vmem>>, vector<1x2x15x96xbf16>
    %3 = vector.shape_cast %2 : vector<1x2x15x96xbf16> to vector<2x15x96xbf16>
    %4 = tpu.concatenate %1, %3 in 0 : vector<30x15x96xbf16>, vector<2x15x96xbf16> -> vector<32x15x96xbf16>
    %5 = vector.shape_cast %4 : vector<32x15x96xbf16> to vector<16x2x15x96xbf16>
    %cst = arith.constant 0.000000e+00 : f32
    %6 = vector.broadcast %cst : f32 to vector<225x32xf32>
    %7 = vector.extract_strided_slice %5 {offsets = [0, 0, 0, 0], sizes = [15, 1, 15, 96], strides = [1, 1, 1, 1]} : vector<16x2x15x96xbf16> to vector<15x1x15x96xbf16>
    %8 = vector.shape_cast %7 : vector<15x1x15x96xbf16> to vector<15x15x96xbf16>
    %9 = vector.extract_strided_slice %5 {offsets = [0, 1, 0, 0], sizes = [15, 1, 15, 96], strides = [1, 1, 1, 1]} : vector<16x2x15x96xbf16> to vector<15x1x15x96xbf16>
    %10 = vector.shape_cast %9 : vector<15x1x15x96xbf16> to vector<15x15x96xbf16>
    %11 = vector.extract_strided_slice %5 {offsets = [1, 0, 0, 0], sizes = [15, 1, 15, 96], strides = [1, 1, 1, 1]} : vector<16x2x15x96xbf16> to vector<15x1x15x96xbf16>
    %12 = vector.shape_cast %11 : vector<15x1x15x96xbf16> to vector<15x15x96xbf16>
    %13 = vector.shape_cast %8 : vector<15x15x96xbf16> to vector<225x96xbf16>
    %c0_7 = arith.constant 0 : index
    %c0_8 = arith.constant 0 : index
    %c0_9 = arith.constant 0 : index
    %14 = vector.load %arg4[%c0_7, %c0_8, %c0_9] : memref<3x96x32xbf16, #tpu.memory_space<vmem>>, vector<1x96x32xbf16>
    %15 = vector.shape_cast %14 : vector<1x96x32xbf16> to vector<96x32xbf16>
    %cst_10 = arith.constant dense<0.000000e+00> : vector<225x32xf32>
    %16 = tpu.matmul %13, %15, %cst_10 {dimension_numbers = #tpu.dot_dimension_numbers<[1], [0], [0], [1], [0, 0, 1, 1], [], []>} : vector<225x96xbf16>, vector<96x32xbf16>, vector<225x32xf32> -> vector<225x32xf32>
    %17 = arith.addf %6, %16 : vector<225x32xf32>
    %18 = vector.shape_cast %10 : vector<15x15x96xbf16> to vector<225x96xbf16>
    %c1 = arith.constant 1 : index
    %c0_11 = arith.constant 0 : index
    %c0_12 = arith.constant 0 : index
    %19 = vector.load %arg4[%c1, %c0_11, %c0_12] : memref<3x96x32xbf16, #tpu.memory_space<vmem>>, vector<1x96x32xbf16>
    %20 = vector.shape_cast %19 : vector<1x96x32xbf16> to vector<96x32xbf16>
    %cst_13 = arith.constant dense<0.000000e+00> : vector<225x32xf32>
    %21 = tpu.matmul %18, %20, %cst_13 {dimension_numbers = #tpu.dot_dimension_numbers<[1], [0], [0], [1], [0, 0, 1, 1], [], []>} : vector<225x96xbf16>, vector<96x32xbf16>, vector<225x32xf32> -> vector<225x32xf32>
    %22 = arith.addf %17, %21 : vector<225x32xf32>
    %23 = vector.shape_cast %12 : vector<15x15x96xbf16> to vector<225x96xbf16>
    %c2 = arith.constant 2 : index
    %c0_14 = arith.constant 0 : index
    %c0_15 = arith.constant 0 : index
    %24 = vector.load %arg4[%c2, %c0_14, %c0_15] : memref<3x96x32xbf16, #tpu.memory_space<vmem>>, vector<1x96x32xbf16>
    %25 = vector.shape_cast %24 : vector<1x96x32xbf16> to vector<96x32xbf16>
    %cst_16 = arith.constant dense<0.000000e+00> : vector<225x32xf32>
    %26 = tpu.matmul %23, %25, %cst_16 {dimension_numbers = #tpu.dot_dimension_numbers<[1], [0], [0], [1], [0, 0, 1, 1], [], []>} : vector<225x96xbf16>, vector<96x32xbf16>, vector<225x32xf32> -> vector<225x32xf32>
    %27 = arith.addf %22, %26 : vector<225x32xf32>
    %c0_17 = arith.constant 0 : index
    %c0_18 = arith.constant 0 : index
    %28 = vector.load %arg5[%c0_17, %c0_18] : memref<1x32xf32, #tpu.memory_space<vmem>>, vector<1x32xf32>
    %29 = vector.broadcast %28 : vector<1x32xf32> to vector<225x32xf32>
    %30 = arith.addf %27, %29 : vector<225x32xf32>
    %cst_19 = arith.constant 0.000000e+00 : f32
    %31 = vector.broadcast %cst_19 : f32 to vector<225x32xf32>
    %32 = arith.maximumf %30, %31 : vector<225x32xf32>
    %33 = vector.shape_cast %32 : vector<225x32xf32> to vector<15x15x32xf32>
    %34 = arith.truncf %33 : vector<15x15x32xf32> to vector<15x15x32xbf16>
    %c0_20 = arith.constant 0 : index
    %c0_21 = arith.constant 0 : index
    %c0_22 = arith.constant 0 : index
    %c0_23 = arith.constant 0 : index
    %35 = vector.load %arg6[%c0_20, %c0_21, %c0_22, %c0_23] : memref<1x15x15x32xbf16, #tpu.memory_space<vmem>>, vector<1x15x15x32xbf16>
    %36 = vector.shape_cast %35 : vector<1x15x15x32xbf16> to vector<15x15x32xbf16>
    %37 = vector.shape_cast %34 : vector<15x15x32xbf16> to vector<1x15x15x32xbf16>
    tpu.vector_store %arg6[%c0_20, %c0_21, %c0_22, %c0_23], %37 {strides = array<i32>} : memref<1x15x15x32xbf16, #tpu.memory_space<vmem>>, vector<1x15x15x32xbf16>,
    return
  }
  func.func @transform_0(%arg0: i32, %arg1: i32) -> (i32, i32, i32, i32) {
    %c0_i32 = arith.constant 0 : i32
    %c0_i32_0 = arith.constant 0 : i32
    %c0_i32_1 = arith.constant 0 : i32
    return %arg0, %arg1, %c0_i32, %c0_i32_0 : i32, i32, i32, i32
  }
  func.func @transform_1(%arg0: i32, %arg1: i32) -> (i32, i32, i32, i32) {
    %c1_i32 = arith.constant 1 : i32
    %0 = arith.addi %arg1, %c1_i32 : i32
    %c15_i32 = arith.constant 15 : i32
    %1 = arith.muli %0, %c15_i32 : i32
    %c15_i32_0 = arith.constant 15 : i32
    %2 = arith.minsi %1, %c15_i32_0 : i32
    %c0_i32 = arith.constant 0 : i32
    %c0_i32_1 = arith.constant 0 : i32
    %c0_i32_2 = arith.constant 0 : i32
    return %arg0, %2, %c0_i32, %c0_i32_1 : i32, i32, i32, i32
  }
  func.func @transform_2(%arg0: i32, %arg1: i32) -> (i32, i32, i32) {
    %c0_i32 = arith.constant 0 : i32
    %c0_i32_0 = arith.constant 0 : i32
    %c0_i32_1 = arith.constant 0 : i32
    %c0_i32_2 = arith.constant 0 : i32
    return %c0_i32, %c0_i32_0, %c0_i32_1 : i32, i32, i32
  }
  func.func @transform_3(%arg0: i32, %arg1: i32) -> (i32, i32) {
    %c0_i32 = arith.constant 0 : i32
    %c0_i32_0 = arith.constant 0 : i32
    %c0_i32_1 = arith.constant 0 : i32
    return %c0_i32, %c0_i32_0 : i32, i32
  }
  func.func @transform_4(%arg0: i32, %arg1: i32) -> (i32, i32, i32, i32) {
    %c0_i32 = arith.constant 0 : i32
    %c0_i32_0 = arith.constant 0 : i32
    %c0_i32_1 = arith.constant 0 : i32
    return %arg0, %arg1, %c0_i32, %c0_i32_0 : i32, i32, i32, i32
  }
}

module attributes {stable_mosaic.version = 11 : i64} {
  func.func @_conv_band_kernel(%arg0: i32, %arg1: i32, %arg2: memref<1x14x7x96xbf16, #tpu.memory_space<vmem>>, %arg3: memref<1x2x7x96xbf16, #tpu.memory_space<vmem>>, %arg4: memref<3x96x32xbf16, #tpu.memory_space<vmem>>, %arg5: memref<1x32xf32, #tpu.memory_space<vmem>>, %arg6: memref<1x7x7x32xbf16, #tpu.memory_space<vmem>>) attributes {dimension_semantics = [#tpu.dimension_semantics<parallel>, #tpu.dimension_semantics<parallel>], iteration_bounds = array<i64: 2, 1>, scalar_prefetch = 0 : i64, scratch_operands = 0 : i64, tpu.core_type = #tpu.core_type<tc>, window_params = [{transform_indices = @transform_0, window_bounds = array<i64: 1, 14, 7, 96>}, {transform_indices = @transform_1, window_bounds = array<i64: 1, 2, 7, 96>}, {pipeline_mode = #tpu.pipeline_mode<synchronous>, transform_indices = @transform_2, window_bounds = array<i64: 3, 96, 32>}, {pipeline_mode = #tpu.pipeline_mode<synchronous>, transform_indices = @transform_3, window_bounds = array<i64: 1, 32>}, {transform_indices = @transform_4, window_bounds = array<i64: 1, 7, 7, 32>}]} {
    %c0 = arith.constant 0 : index
    %c0_0 = arith.constant 0 : index
    %c0_1 = arith.constant 0 : index
    %c0_2 = arith.constant 0 : index
    %0 = vector.load %arg2[%c0, %c0_0, %c0_1, %c0_2] : memref<1x14x7x96xbf16, #tpu.memory_space<vmem>>, vector<1x14x7x96xbf16>
    %1 = vector.shape_cast %0 : vector<1x14x7x96xbf16> to vector<14x7x96xbf16>
    %c0_3 = arith.constant 0 : index
    %c0_4 = arith.constant 0 : index
    %c0_5 = arith.constant 0 : index
    %c0_6 = arith.constant 0 : index
    %2 = vector.load %arg3[%c0_3, %c0_4, %c0_5, %c0_6] : memref<1x2x7x96xbf16, #tpu.memory_space<vmem>>, vector<1x2x7x96xbf16>
    %3 = vector.shape_cast %2 : vector<1x2x7x96xbf16> to vector<2x7x96xbf16>
    %4 = tpu.concatenate %1, %3 in 0 : vector<14x7x96xbf16>, vector<2x7x96xbf16> -> vector<16x7x96xbf16>
    %5 = vector.shape_cast %4 : vector<16x7x96xbf16> to vector<8x2x7x96xbf16>
    %cst = arith.constant 0.000000e+00 : f32
    %6 = vector.broadcast %cst : f32 to vector<49x32xf32>
    %7 = vector.extract_strided_slice %5 {offsets = [0, 0, 0, 0], sizes = [7, 1, 7, 96], strides = [1, 1, 1, 1]} : vector<8x2x7x96xbf16> to vector<7x1x7x96xbf16>
    %8 = vector.shape_cast %7 : vector<7x1x7x96xbf16> to vector<7x7x96xbf16>
    %9 = vector.extract_strided_slice %5 {offsets = [0, 1, 0, 0], sizes = [7, 1, 7, 96], strides = [1, 1, 1, 1]} : vector<8x2x7x96xbf16> to vector<7x1x7x96xbf16>
    %10 = vector.shape_cast %9 : vector<7x1x7x96xbf16> to vector<7x7x96xbf16>
    %11 = vector.extract_strided_slice %5 {offsets = [1, 0, 0, 0], sizes = [7, 1, 7, 96], strides = [1, 1, 1, 1]} : vector<8x2x7x96xbf16> to vector<7x1x7x96xbf16>
    %12 = vector.shape_cast %11 : vector<7x1x7x96xbf16> to vector<7x7x96xbf16>
    %13 = vector.shape_cast %8 : vector<7x7x96xbf16> to vector<49x96xbf16>
    %c0_7 = arith.constant 0 : index
    %c0_8 = arith.constant 0 : index
    %c0_9 = arith.constant 0 : index
    %14 = vector.load %arg4[%c0_7, %c0_8, %c0_9] : memref<3x96x32xbf16, #tpu.memory_space<vmem>>, vector<1x96x32xbf16>
    %15 = vector.shape_cast %14 : vector<1x96x32xbf16> to vector<96x32xbf16>
    %cst_10 = arith.constant dense<0.000000e+00> : vector<49x32xf32>
    %16 = tpu.matmul %13, %15, %cst_10 {dimension_numbers = #tpu.dot_dimension_numbers<[1], [0], [0], [1], [0, 0, 1, 1], [], []>} : vector<49x96xbf16>, vector<96x32xbf16>, vector<49x32xf32> -> vector<49x32xf32>
    %17 = arith.addf %6, %16 : vector<49x32xf32>
    %18 = vector.shape_cast %10 : vector<7x7x96xbf16> to vector<49x96xbf16>
    %c1 = arith.constant 1 : index
    %c0_11 = arith.constant 0 : index
    %c0_12 = arith.constant 0 : index
    %19 = vector.load %arg4[%c1, %c0_11, %c0_12] : memref<3x96x32xbf16, #tpu.memory_space<vmem>>, vector<1x96x32xbf16>
    %20 = vector.shape_cast %19 : vector<1x96x32xbf16> to vector<96x32xbf16>
    %cst_13 = arith.constant dense<0.000000e+00> : vector<49x32xf32>
    %21 = tpu.matmul %18, %20, %cst_13 {dimension_numbers = #tpu.dot_dimension_numbers<[1], [0], [0], [1], [0, 0, 1, 1], [], []>} : vector<49x96xbf16>, vector<96x32xbf16>, vector<49x32xf32> -> vector<49x32xf32>
    %22 = arith.addf %17, %21 : vector<49x32xf32>
    %23 = vector.shape_cast %12 : vector<7x7x96xbf16> to vector<49x96xbf16>
    %c2 = arith.constant 2 : index
    %c0_14 = arith.constant 0 : index
    %c0_15 = arith.constant 0 : index
    %24 = vector.load %arg4[%c2, %c0_14, %c0_15] : memref<3x96x32xbf16, #tpu.memory_space<vmem>>, vector<1x96x32xbf16>
    %25 = vector.shape_cast %24 : vector<1x96x32xbf16> to vector<96x32xbf16>
    %cst_16 = arith.constant dense<0.000000e+00> : vector<49x32xf32>
    %26 = tpu.matmul %23, %25, %cst_16 {dimension_numbers = #tpu.dot_dimension_numbers<[1], [0], [0], [1], [0, 0, 1, 1], [], []>} : vector<49x96xbf16>, vector<96x32xbf16>, vector<49x32xf32> -> vector<49x32xf32>
    %27 = arith.addf %22, %26 : vector<49x32xf32>
    %c0_17 = arith.constant 0 : index
    %c0_18 = arith.constant 0 : index
    %28 = vector.load %arg5[%c0_17, %c0_18] : memref<1x32xf32, #tpu.memory_space<vmem>>, vector<1x32xf32>
    %29 = vector.broadcast %28 : vector<1x32xf32> to vector<49x32xf32>
    %30 = arith.addf %27, %29 : vector<49x32xf32>
    %cst_19 = arith.constant 0.000000e+00 : f32
    %31 = vector.broadcast %cst_19 : f32 to vector<49x32xf32>
    %32 = arith.maximumf %30, %31 : vector<49x32xf32>
    %33 = vector.shape_cast %32 : vector<49x32xf32> to vector<7x7x32xf32>
    %34 = arith.truncf %33 : vector<7x7x32xf32> to vector<7x7x32xbf16>
    %c0_20 = arith.constant 0 : index
    %c0_21 = arith.constant 0 : index
    %c0_22 = arith.constant 0 : index
    %c0_23 = arith.constant 0 : index
    %35 = vector.load %arg6[%c0_20, %c0_21, %c0_22, %c0_23] : memref<1x7x7x32xbf16, #tpu.memory_space<vmem>>, vector<1x7x7x32xbf16>
    %36 = vector.shape_cast %35 : vector<1x7x7x32xbf16> to vector<7x7x32xbf16>
    %37 = vector.shape_cast %34 : vector<7x7x32xbf16> to vector<1x7x7x32xbf16>
    tpu.vector_store %arg6[%c0_20, %c0_21, %c0_22, %c0_23], %37 {strides = array<i32>} : memref<1x7x7x32xbf16, #tpu.memory_space<vmem>>, vector<1x7x7x32xbf16>,
    return
  }
  func.func @transform_0(%arg0: i32, %arg1: i32) -> (i32, i32, i32, i32) {
    %c0_i32 = arith.constant 0 : i32
    %c0_i32_0 = arith.constant 0 : i32
    %c0_i32_1 = arith.constant 0 : i32
    return %arg0, %arg1, %c0_i32, %c0_i32_0 : i32, i32, i32, i32
  }
  func.func @transform_1(%arg0: i32, %arg1: i32) -> (i32, i32, i32, i32) {
    %c1_i32 = arith.constant 1 : i32
    %0 = arith.addi %arg1, %c1_i32 : i32
    %c7_i32 = arith.constant 7 : i32
    %1 = arith.muli %0, %c7_i32 : i32
    %c7_i32_0 = arith.constant 7 : i32
    %2 = arith.minsi %1, %c7_i32_0 : i32
    %c0_i32 = arith.constant 0 : i32
    %c0_i32_1 = arith.constant 0 : i32
    %c0_i32_2 = arith.constant 0 : i32
    return %arg0, %2, %c0_i32, %c0_i32_1 : i32, i32, i32, i32
  }
  func.func @transform_2(%arg0: i32, %arg1: i32) -> (i32, i32, i32) {
    %c0_i32 = arith.constant 0 : i32
    %c0_i32_0 = arith.constant 0 : i32
    %c0_i32_1 = arith.constant 0 : i32
    %c0_i32_2 = arith.constant 0 : i32
    return %c0_i32, %c0_i32_0, %c0_i32_1 : i32, i32, i32
  }
  func.func @transform_3(%arg0: i32, %arg1: i32) -> (i32, i32) {
    %c0_i32 = arith.constant 0 : i32
    %c0_i32_0 = arith.constant 0 : i32
    %c0_i32_1 = arith.constant 0 : i32
    return %c0_i32, %c0_i32_0 : i32, i32
  }
  func.func @transform_4(%arg0: i32, %arg1: i32) -> (i32, i32, i32, i32) {
    %c0_i32 = arith.constant 0 : i32
    %c0_i32_0 = arith.constant 0 : i32
    %c0_i32_1 = arith.constant 0 : i32
    return %arg0, %arg1, %c0_i32, %c0_i32_0 : i32, i32, i32, i32
  }
}

module attributes {stable_mosaic.version = 11 : i64} {
  func.func @_mm_bias_act_kernel(%arg0: i32, %arg1: memref<14x224xbf16, #tpu.memory_space<vmem>>, %arg2: memref<224x32xbf16, #tpu.memory_space<vmem>>, %arg3: memref<1x32xf32, #tpu.memory_space<vmem>>, %arg4: memref<14x32xf32, #tpu.memory_space<vmem>>) attributes {dimension_semantics = [#tpu.dimension_semantics<parallel>], iteration_bounds = array<i64: 1>, scalar_prefetch = 0 : i64, scratch_operands = 0 : i64, tpu.core_type = #tpu.core_type<tc>, window_params = [{transform_indices = @transform_0, window_bounds = array<i64: 14, 224>}, {pipeline_mode = #tpu.pipeline_mode<synchronous>, transform_indices = @transform_1, window_bounds = array<i64: 224, 32>}, {pipeline_mode = #tpu.pipeline_mode<synchronous>, transform_indices = @transform_2, window_bounds = array<i64: 1, 32>}, {transform_indices = @transform_3, window_bounds = array<i64: 14, 32>}]} {
    %c0 = arith.constant 0 : index
    %c0_0 = arith.constant 0 : index
    %0 = vector.load %arg1[%c0, %c0_0] : memref<14x224xbf16, #tpu.memory_space<vmem>>, vector<14x224xbf16>
    %c0_1 = arith.constant 0 : index
    %c0_2 = arith.constant 0 : index
    %1 = vector.load %arg2[%c0_1, %c0_2] : memref<224x32xbf16, #tpu.memory_space<vmem>>, vector<224x32xbf16>
    %cst = arith.constant dense<0.000000e+00> : vector<14x32xf32>
    %2 = tpu.matmul %0, %1, %cst {dimension_numbers = #tpu.dot_dimension_numbers<[1], [0], [0], [1], [0, 0, 1, 1], [], []>} : vector<14x224xbf16>, vector<224x32xbf16>, vector<14x32xf32> -> vector<14x32xf32>
    %c0_3 = arith.constant 0 : index
    %c0_4 = arith.constant 0 : index
    %3 = vector.load %arg3[%c0_3, %c0_4] : memref<1x32xf32, #tpu.memory_space<vmem>>, vector<1x32xf32>
    %4 = vector.broadcast %3 : vector<1x32xf32> to vector<14x32xf32>
    %5 = arith.addf %2, %4 : vector<14x32xf32>
    %c0_5 = arith.constant 0 : index
    %c0_6 = arith.constant 0 : index
    %6 = vector.load %arg4[%c0_5, %c0_6] : memref<14x32xf32, #tpu.memory_space<vmem>>, vector<14x32xf32>
    tpu.vector_store %arg4[%c0_5, %c0_6], %5 {strides = array<i32>} : memref<14x32xf32, #tpu.memory_space<vmem>>, vector<14x32xf32>,
    return
  }
  func.func @transform_0(%arg0: i32) -> (i32, i32) {
    %c0_i32 = arith.constant 0 : i32
    %c0_i32_0 = arith.constant 0 : i32
    return %arg0, %c0_i32 : i32, i32
  }
  func.func @transform_1(%arg0: i32) -> (i32, i32) {
    %c0_i32 = arith.constant 0 : i32
    %c0_i32_0 = arith.constant 0 : i32
    %c0_i32_1 = arith.constant 0 : i32
    return %c0_i32, %c0_i32_0 : i32, i32
  }
  func.func @transform_2(%arg0: i32) -> (i32, i32) {
    %c0_i32 = arith.constant 0 : i32
    %c0_i32_0 = arith.constant 0 : i32
    %c0_i32_1 = arith.constant 0 : i32
    return %c0_i32, %c0_i32_0 : i32, i32
  }
  func.func @transform_3(%arg0: i32) -> (i32, i32) {
    %c0_i32 = arith.constant 0 : i32
    %c0_i32_0 = arith.constant 0 : i32
    return %arg0, %c0_i32 : i32, i32
  }
}

</mosaic_0001>

<bundles_post_ra>
// kernel: rel_conv2d_subsampling8.4
= control target key start
LH: loop header
LB: loop body
LE: loop exit
PB: predicated region body
PF: predicated region fallthrough
CT: control target
= control target key end

     0   :  { %9 = vsyncpa [#allocation3], 0  ;;  %s3552_s15 = smov 0   ;;  %s3554_s16 = smov 0   ;;  %s4624_s0 = inlined_call_operand.vmem [shape: bf16[2,64,1,64], index: 0, kind: input, shape index: {}, may-alias: {0,1}]   ;;  %s4625_s1 = inlined_call_operand.vmem [shape: bf16[2,64,1,64], index: 1, kind: input, shape index: {}, may-alias: {0,1}]   ;;  %s4626_s2 = inlined_call_operand.hbm [shape: bf16[3,64,992], index: 2, kind: input, shape index: {}]   ;;  %s4627_s3 = inlined_call_operand.vmem [shape: f32[1,992], index: 3, kind: input, shape index: {}]   ;;  %s4628_s4 = inlined_call_operand.vmem [shape: bf16[2,31,992], index: 4, kind: output, shape index: {}]  }
   0x1   :  { %s3556_s17 = smov 0  }
   0x2 LB: > { %s3200_s18 = sadd.s32 4294967295, %s3520_s17   ;;  %s27_s19 = sadd.s32 1, %s3516_s16  ;;  %s3520_s17 = sphi %s3556_s17, %s15_s17   ;;  %s3516_s16 = sphi %s3554_s16, %s4676_s16   ;;  %s3512_s15 = sphi %s3552_s15, %s4675_s15  }
   0x3   : > { %p29_p0 = scmp.ge.s32.totalorder %s27_s19, 2  ;;  %p3202_p1 = scmp.ge.s32.totalorder %s3520_s17, 1 }
   0x4   : > { %p166_p2 = scmp.lt.s32.totalorder %s3520_s17, 3  ;;  %p3577_p4 = scmp.eq.s32.totalorder %s3200_s18, 0 }
   0x5   : > { %s4678_s19 = smov (%p29_p0, %s27_s19), 0  ;;  %s3522_s22 = smov [#allocation2]  }
   0x6   : > { %p3573_p3 = pnand %p3202_p1, %p166_p2  ;;  %s178_s23 = sshll.u32 %s3522_s22, 4  ;;  %s179_s23 = int_to_ptr.vmem [resolvable:$true] %s178_s23 }
   0x7   : > { %s3479_s24 = scalar_lea.vmem %s179_s23, 12288  ;;  %p3487_p11 = scmp.lt.s32.totalorder %s179_s23, %s179_s23 }
   0x8   : > { %p3433_p5 = pneg %p3573_p3  ;;  %p3480_p8 = scmp.ne.s32.totalorder %s179_s23, %s3479_s24 }
   0x9   : > { %p3488_p12 = scmp.lt.s32.totalorder %s3479_s24, %s3479_s24 }
   0xa   : > { %p3434_p6 = pnand %p3577_p4, %p3433_p5 }
   0xb   : > { %p3489_p13 = por %p3488_p12, %p3487_p11 }
   0xc   : > { %p3470_p7 = pneg %p3434_p6 }
   0xe   : > { %p3482_p9 = pnand %p3480_p8, %p3470_p7 }
  0x10   : > { %p3483_p10 = pneg %p3482_p9 }
  0x12   : > { %p3490_p0 = pnand %p3489_p13, %p3483_p10 }
  0x14   : > { %3493 = shalt.err (!%p3490_p0)
}
  0x15   : > { %s3523_s25 = smov 512   ;;  %s3524_s26 = smov 32  }
  0x16   : > { %3436 = dma.hbm_to_vmem [thread:$0]  (!%p3434_p6), %s4626_s2, 12288, %s179_s23, [#allocation3], %s3523_s25, %s3523_s25, %s3524_s26  }
  0x17   : > { %237 = sbr.rel (%p3573_p3) target bundleno = 374 (0x176), region = 36 }
  0x1c   : > { %3507 = dma.done.wait (%p3577_p4), [#allocation3], 12288  }
  0x1d   : > { %3509 = vsyncadd (%p3577_p4), [#allocation3], 4294955008  ;;  %p292_p1 = scmp.lt.s32.totalorder %s3512_s15, 1  ;;  %v3525_v0 = vmov 0   ;;  %v3526_v1 = vmov 1966171168   ;;  %v502_v3 = vlaneseq }
  0x1e   : > { %1219 = vmatprep.mubr.bf16.mxu0 %v3525_v0  ;;  %1272 = vmatprep.mubr.bf16.mxu1 %v3525_v0  ;;  %v500_v2 = vunpack.c.l.s4 %v3526_v1  ;;  %v453_v6 = vld [vmem:[#allocation2 + $0x1c0] sm:$0xff]  ;;  %v454_v8 = vld [vmem:[#allocation2 + $0x1c8] sm:$0xff]  ;;  %vm958_vm0 = vcmask 1041409   ;;  %vm961_vm1 = vcmask 1042434   ;;  %vm964_vm2 = vcmask 1043459   ;;  %v3634_v34 = vld [vmem:[#allocation2 + $0x1d0] sm:$0xff] }
  0x1f   : > { %s4680_s15 = smov (!%p292_p1, %s3512_s15), 1  ;;  %v3600_v5 = vshrl.u32 %v502_v3, 7  ;;  %v457_v7 = vld [vmem:[#allocation2 + $0x1e0] sm:$0xff]  ;;  %v458_v10 = vld [vmem:[#allocation2 + $0x1e8] sm:$0xff]  ;;  %vm967_vm3 = vcmask 1044484   ;;  %vm970_vm4 = vcmask 1045509  }
  0x20   : > { %v501_v4 = vunpack.c.0.s8 %v500_v2  ;;  %s3207_s29 = sshll.u32 %s4680_s15, 6  ;;  %v3267_v9 = vcombine.high %v453_v6, %v457_v7  ;;  %v3266_v11 = vcombine.low %v453_v6, %v457_v7  ;;  %v445_v12 = vld [vmem:[#allocation2 + $0x180] sm:$0xff]  ;;  %v3269_v14 = vcombine.high %v454_v8, %v458_v10  ;;  %v446_v17 = vld [vmem:[#allocation2 + $0x188] sm:$0xff]  ;;  %v3644_v40 = vld [vmem:[#allocation2 + $0x1f0] sm:$0xff]  ;;  %s3412_s13 = sshll.u32 %s4680_s15, 7 }
  0x21   : > { %v449_v13 = vld [vmem:[#allocation2 + $0x1a0] sm:$0xff]  ;;  %v3268_v15 = vcombine.low %v454_v8, %v458_v10  ;;  %v450_v18 = vld [vmem:[#allocation2 + $0x1a8] sm:$0xff]  ;;  %s3616_s6 = scalar_lea.vmem %s4624_s0, %s3207_s29  ;;  %v3646_v41 = vld [vmem:[#allocation2 + $0x1d8] sm:$0xff]  ;;  %vm973_vm5 = vcmask 1046534   ;;  %v3270_v52 = vcombine.low %v3634_v34, %v3644_v40  ;;  %v3271_v53 = vcombine.high %v3634_v34, %v3644_v40  ;;  %s4214_s7 = sadd.s32 62, %s3207_s29 }
  0x22   : > { %v3259_v16 = vcombine.high %v445_v12, %v449_v13  ;;  %v3603_v19 = vld [vmem:[#allocation2 + $0x140] sm:$0xff]  ;;  %1195 = vmatprep.subr.bf16.mxu0 %v3267_v9  ;;  %v3261_v20 = vcombine.high %v446_v17, %v450_v18  ;;  %v3607_v22 = vld [vmem:[#allocation2 + $0x148] sm:$0xff]  ;;  %v3619_v24 = vsub.s32 %v501_v4, %v3600_v5  ;;  %1248 = vmatprep.subr.bf16.mxu1 %v3269_v14  ;;  %v3656_v47 = vld [vmem:[#allocation2 + $0x1f8] sm:$0xff]  ;;  %vm976_vm6 = vcmask 1047559   ;;  %s315_s10 = scalar_lea.vmem %s4625_s1, %s4214_s7  ;;  %s4483_s18 = scalar_lea.vmem %s4628_s4, %s3412_s13 }
  0x23   : > { %v3605_v21 = vld [vmem:[#allocation2 + $0x160] sm:$0xff]  ;;  %v3609_v23 = vld [vmem:[#allocation2 + $0x168] sm:$0xff]  ;;  %1196 = vmatpush1.bf16.msra.mxu0 %v3266_v11  ;;  %v3258_v25 = vcombine.low %v445_v12, %v449_v13  ;;  %1249 = vmatpush1.bf16.msra.mxu1 %v3268_v15  ;;  %v3260_v29 = vcombine.low %v446_v17, %v450_v18  ;;  %v3658_v48 = vld [vmem:[#allocation2 + $0x190] sm:$0xff]  ;;  %v3272_v59 = vcombine.low %v3646_v41, %v3656_v47  ;;  %vm1180_vm7 = vcmask 523264  }
  0x24   : > { %v3621_v26 = vld [vmem:[#allocation2 + $0x100] sm:$0xff]  ;;  %v3625_v28 = vld [vmem:[#allocation2 + $0x108] sm:$0xff]  ;;  %1197 = vmatprep.subr.bf16.mxu0 %v3259_v16  ;;  %v3251_v30 = vcombine.high %v3603_v19, %v3605_v21  ;;  %v3253_v31 = vcombine.high %v3607_v22, %v3609_v23  ;;  %1250 = vmatprep.subr.bf16.mxu1 %v3261_v20  ;;  %v3250_v35 = vcombine.low %v3603_v19, %v3605_v21  ;;  %v3666_v54 = vld [vmem:[#allocation2 + $0x1b0] sm:$0xff]  ;;  %vm3049_vm8 = vcmask 1043456  }
  0x25   : > { %v3623_v27 = vld [vmem:[#allocation2 + $0x120] sm:$0xff]  ;;  %v3631_v32 = vld [vmem:[#allocation2 + $0x128] sm:$0xff]  ;;  %v3252_v36 = vcombine.low %v3607_v22, %v3609_v23  ;;  %v3668_v55 = vld [vmem:[#allocation2 + $0x198] sm:$0xff]  ;;  %v3273_v60 = vcombine.high %v3646_v41, %v3656_v47  ;;  %v3262_v2 = vcombine.low %v3658_v48, %v3666_v54  ;;  %v3263_v3 = vcombine.high %v3658_v48, %v3666_v54 }
  0x26   : > { %v3211_v33 = vld.sshfl [vmem:[%s3616_s6 + $0x1] sm:$0x1 pattern:$0x75316420]  ;;  %v3243_v37 = vcombine.high %v3621_v26, %v3623_v27  ;;  %v3245_v42 = vcombine.high %v3625_v28, %v3631_v32  ;;  %v3242_v43 = vcombine.low %v3621_v26, %v3623_v27  ;;  %v3244_v44 = vcombine.low %v3625_v28, %v3631_v32  ;;  %v3676_v61 = vld [vmem:[#allocation2 + $0x1b8] sm:$0xff]  ;;  %v3698_v26 = vld [vmem:[#allocation2 + $0x150] sm:$0xff] }
  0x27   : > { %v3212_v38 = vld.sshfl [vmem:[%s3616_s6 + $0x3] sm:$0x1 pattern:$0x75316420]  ;;  %v505_v39 = vrot.slane %v3211_v33, %v3619_v24  ;;  %1198 = vmatpush1.bf16.msra.mxu0 %v3258_v25  ;;  %1251 = vmatpush1.bf16.msra.mxu1 %v3260_v29  ;;  %v3264_v9 = vcombine.low %v3668_v55, %v3676_v61  ;;  %v3265_v14 = vcombine.high %v3668_v55, %v3676_v61  ;;  %vm3062_vm9 = vsmask.f32 3328 }
  0x28   : > { %v3213_v45 = vld.sshfl [vmem:[%s3616_s6 + $0x5] sm:$0x1 pattern:$0x75316420]  ;;  %v519_v46 = vrot.slane %v3212_v38, %v3619_v24  ;;  %1199 = vmatprep.subr.bf16.mxu0 %v3251_v30  ;;  %1252 = vmatprep.subr.bf16.mxu1 %v3253_v31  ;;  %vm3064_vm10 = vcmask 1047556   ;;  %vm3050_vm12 = vcmask 785412   ;;  %vm4521_vm13 = vmand %vm3049_vm8, %vm3062_vm9 }
  0x29   : > { %v3214_v49 = vld.sshfl [vmem:[%s3616_s6 + $0x7] sm:$0x1 pattern:$0x75316420]  ;;  %v533_v50 = vrot.slane %v3213_v45, %v3619_v24  ;;  %v926_v51 = vunpack.c.l.b16 %v505_v39  ;;  %vm3065_vm11 = vsmask.f32 7424 }
  0x2a   : > { %v3215_v56 = vld.sshfl [vmem:[%s3616_s6 + $0x9] sm:$0x1 pattern:$0x75316420]  ;;  %v547_v57 = vrot.slane %v3214_v49, %v3619_v24  ;;  %v927_v58 = vunpack.c.l.b16 %v519_v46  ;;  %v3819_v54 = vld [vmem:[#allocation2 + $0xc0] sm:$0xff]  ;;  %vm4528_vm14 = vmand %vm3064_vm10, %vm3065_vm11 }
  0x2b   : > { %v3216_v62 = vld.sshfl [vmem:[%s3616_s6 + $0xb] sm:$0x1 pattern:$0x75316420]  ;;  %v561_v63 = vrot.slane %v3215_v56, %v3619_v24  ;;  %v928_v1 = vunpack.c.l.b16 %v533_v50  ;;  %1200 = vmatpush1.bf16.msra.mxu0 %v3250_v35  ;;  %1253 = vmatpush1.bf16.msra.mxu1 %v3252_v36  ;;  %v3703_v35 = vld [vmem:[#allocation2 + $0x170] sm:$0xff]  ;;  %v3821_v55 = vld [vmem:[#allocation2 + $0xe0] sm:$0xff] }
  0x2c   : > { %v3217_v4 = vld.sshfl [vmem:[%s3616_s6 + $0xd] sm:$0x1 pattern:$0x75316420]  ;;  %v575_v6 = vrot.slane %v3216_v62, %v3619_v24  ;;  %v929_v7 = vunpack.c.l.b16 %v547_v57  ;;  %v957_v8 = vrot.slane %v927_v58, 7  ;;  %1201 = vmatprep.subr.bf16.mxu0 %v3243_v37  ;;  %1254 = vmatprep.subr.bf16.mxu1 %v3245_v42  ;;  %v3254_v28 = vcombine.low %v3698_v26, %v3703_v35  ;;  %vm4547_vm15 = vmor %vm4528_vm14, %vm4521_vm13 }
  0x2d   : > { %v3218_v10 = vld.sshfl [vmem:[%s3616_s6 + $0xf] sm:$0x1 pattern:$0x75316420]  ;;  %v589_v11 = vrot.slane %v3217_v4, %v3619_v24  ;;  %v930_v12 = vunpack.c.l.b16 %v561_v63  ;;  %v960_v13 = vrot.slane %v928_v1, 6 }
  0x2e   : > { %v3219_v15 = vld.sshfl [vmem:[%s3616_s6 + $0x11] sm:$0x1 pattern:$0x75316420]  ;;  %v603_v16 = vrot.slane %v3218_v10, %v3619_v24  ;;  %v931_v17 = vunpack.c.l.b16 %v575_v6  ;;  %v959_v18 = vsel %vm958_vm0, %v957_v8, %v926_v51  ;;  %v963_v19 = vrot.slane %v929_v7, 5 }
  0x2f   : > { %v3220_v20 = vld.sshfl [vmem:[%s3616_s6 + $0x13] sm:$0x1 pattern:$0x75316420]  ;;  %v617_v21 = vrot.slane %v3219_v15, %v3619_v24  ;;  %v932_v22 = vunpack.c.l.b16 %v589_v11  ;;  %v962_v23 = vsel %vm961_vm1, %v960_v13, %v959_v18  ;;  %v966_v25 = vrot.slane %v930_v12, 4  ;;  %1202 = vmatpush1.bf16.msra.mxu0 %v3242_v43  ;;  %1255 = vmatpush1.bf16.msra.mxu1 %v3244_v44 }
  0x30   : > { %v3221_v27 = vld.sshfl [vmem:[%s3616_s6 + $0x15] sm:$0x1 pattern:$0x75316420]  ;;  %v631_v29 = vrot.slane %v3220_v20, %v3619_v24  ;;  %v933_v30 = vunpack.c.l.b16 %v603_v16  ;;  %v965_v31 = vsel %vm964_vm2, %v963_v19, %v962_v23  ;;  %v969_v33 = vrot.slane %v931_v17, 3  ;;  %1301 = vmatprep.subr.bf16.mxu0 %v3271_v53  ;;  %1354 = vmatprep.subr.bf16.mxu1 %v3273_v60  ;;  %v3732_v20 = vld [vmem:[#allocation2 + $0x158] sm:$0xff] }
  0x31   : > { %v3222_v36 = vld.sshfl [vmem:[%s3616_s6 + $0x17] sm:$0x1 pattern:$0x75316420]  ;;  %v645_v37 = vrot.slane %v3221_v27, %v3619_v24  ;;  %v934_v38 = vunpack.c.l.b16 %v617_v21  ;;  %v968_v39 = vsel %vm967_vm3, %v966_v25, %v965_v31  ;;  %v972_v42 = vrot.slane %v932_v22, 2 }
  0x32   : > { %v3223_v45 = vld.sshfl [vmem:[%s3616_s6 + $0x19] sm:$0x1 pattern:$0x75316420]  ;;  %v659_v46 = vrot.slane %v3222_v36, %v3619_v24  ;;  %v935_v49 = vunpack.c.l.b16 %v631_v29  ;;  %v971_v50 = vsel %vm970_vm4, %v969_v33, %v968_v39  ;;  %v975_v43 = vrot.slane %v933_v30, 1 }
  0x33   : > { %v3224_v51 = vld.sshfl [vmem:[%s3616_s6 + $0x1b] sm:$0x1 pattern:$0x75316420]  ;;  %v673_v56 = vrot.slane %v3223_v45, %v3619_v24  ;;  %v936_v57 = vunpack.c.l.b16 %v645_v37  ;;  %v974_v58 = vsel %vm973_vm5, %v972_v42, %v971_v50  ;;  %v3255_v53 = vcombine.high %v3698_v26, %v3703_v35 }
  0x34   : > { %v3225_v32 = vld.sshfl [vmem:[%s3616_s6 + $0x1d] sm:$0x1 pattern:$0x75316420]  ;;  %v687_v44 = vrot.slane %v3224_v51, %v3619_v24  ;;  %v937_v62 = vunpack.c.l.b16 %v659_v46  ;;  %v978_v63 = vrot.slane %v935_v49, 7  ;;  %v977_v60 = vsel %vm976_vm6, %v975_v43, %v974_v58 }
  0x35   : > { %v3226_v1 = vld.sshfl [vmem:[%s3616_s6 + $0x1f] sm:$0x1 pattern:$0x75316420]  ;;  %v701_v4 = vrot.slane %v3225_v32, %v3619_v24  ;;  %v938_v6 = vunpack.c.l.b16 %v673_v56  ;;  %v980_v7 = vrot.slane %v936_v57, 6 }
  0x36   : > { %v715_v8 = vrot.slane %v3226_v1, %v3619_v24  ;;  %v939_v10 = vunpack.c.l.b16 %v687_v44  ;;  %v979_v11 = vsel %vm958_vm0, %v978_v63, %v934_v38  ;;  %v982_v12 = vrot.slane %v937_v62, 5  ;;  %v3227_v13 = vld.sshfl [vmem:[%s3616_s6 + $0x21] sm:$0x1 pattern:$0x75316420]  ;;  %v3737_v29 = vld [vmem:[#allocation2 + $0x178] sm:$0xff] }
  0x37   : > { %v940_v15 = vunpack.c.l.b16 %v701_v4  ;;  %v981_v16 = vsel %vm961_vm1, %v980_v7, %v979_v11  ;;  %v984_v17 = vrot.slane %v938_v6, 4  ;;  %v3228_v18 = vld.sshfl [vmem:[%s3616_s6 + $0x23] sm:$0x1 pattern:$0x75316420]  ;;  %v729_v19 = vrot.slane %v3227_v13, %v3619_v24 }
  0x38   : > { %v941_v21 = vunpack.c.l.b16 %v715_v8  ;;  %v983_v22 = vsel %vm964_vm2, %v982_v12, %v981_v16  ;;  %v986_v23 = vrot.slane %v939_v10, 3  ;;  %v3229_v25 = vld.sshfl [vmem:[%s3616_s6 + $0x25] sm:$0x1 pattern:$0x75316420]  ;;  %v743_v27 = vrot.slane %v3228_v18, %v3619_v24 }
  0x39   : > { %v985_v30 = vsel %vm967_vm3, %v984_v17, %v983_v22  ;;  %v988_v31 = vrot.slane %v940_v15, 2  ;;  %v3230_v33 = vld.sshfl [vmem:[%s3616_s6 + $0x27] sm:$0x1 pattern:$0x75316420]  ;;  %v757_v36 = vrot.slane %v3229_v25, %v3619_v24  ;;  %v942_v37 = vunpack.c.l.b16 %v729_v19  ;;  %v3767_v19 = vld [vmem:[#allocation2 + $0x110] sm:$0xff] }
  0x3a   : > { %v987_v38 = vsel %vm970_vm4, %v986_v23, %v985_v30  ;;  %v990_v39 = vrot.slane %v941_v21, 1  ;;  %v3231_v42 = vld.sshfl [vmem:[%s3616_s6 + $0x29] sm:$0x1 pattern:$0x75316420]  ;;  %v771_v45 = vrot.slane %v3230_v33, %v3619_v24  ;;  %v943_v46 = vunpack.c.l.b16 %v743_v27  ;;  %v3778_v30 = vld [vmem:[#allocation2 + $0x130] sm:$0xff] }
  0x3b   : > { %v989_v49 = vsel %vm973_vm5, %v988_v31, %v987_v38  ;;  %v3232_v50 = vld.sshfl [vmem:[%s3616_s6 + $0x2b] sm:$0x1 pattern:$0x75316420]  ;;  %v785_v43 = vrot.slane %v3231_v42, %v3619_v24  ;;  %v944_v51 = vunpack.c.l.b16 %v757_v36  ;;  %v3256_v56 = vcombine.low %v3732_v20, %v3737_v29  ;;  %v3796_v36 = vld [vmem:[#allocation2 + $0x118] sm:$0xff] }
  0x3c   : > { %v991_v57 = vsel %vm976_vm6, %v990_v39, %v989_v49  ;;  %v3233_v58 = vld.sshfl [vmem:[%s3616_s6 + $0x2d] sm:$0x1 pattern:$0x75316420]  ;;  %v799_v32 = vrot.slane %v3232_v50, %v3619_v24  ;;  %v945_v44 = vunpack.c.l.b16 %v771_v45  ;;  %v992_v62 = vrot.slane %v943_v46, 7  ;;  %v3802_v46 = vld [vmem:[#allocation2 + $0x138] sm:$0xff] }
  0x3d   : > { %v3753_v63 = vpack.c.b16 %v991_v57, %v977_v60  ;;  %v3234_v1 = vld.sshfl [vmem:[%s3616_s6 + $0x2f] sm:$0x1 pattern:$0x75316420]  ;;  %v813_v4 = vrot.slane %v3233_v58, %v3619_v24  ;;  %v946_v6 = vunpack.c.l.b16 %v785_v43  ;;  %v994_v7 = vrot.slane %v944_v51, 6 }
  0x3e   : > { %v3235_v8 = vld.sshfl [vmem:[%s3616_s6 + $0x31] sm:$0x1 pattern:$0x75316420]  ;;  %v827_v10 = vrot.slane %v3234_v1, %v3619_v24  ;;  %v947_v11 = vunpack.c.l.b16 %v799_v32  ;;  %v993_v12 = vsel %vm958_vm0, %v992_v62, %v942_v37  ;;  %v996_v13 = vrot.slane %v945_v44, 5  ;;  %v3826_v1 = vld [vmem:[#allocation2 + $0xc8] sm:$0xff] }
  0x3f   : > { %3274 = vmatmul.mubr.msk.bf16.vlgmr.msra.gmra.mxu0 %vm1180_vm7, %v3753_v63  ;;  %3276 = vmatmul.mubr.msk.bf16.vlgmr.msra.gmra.mxu1 %vm1180_vm7, %v3753_v63  ;;  %v3236_v60 = vld.sshfl [vmem:[%s3616_s6 + $0x33] sm:$0x1 pattern:$0x75316420]  ;;  %v841_v15 = vrot.slane %v3235_v8, %v3619_v24  ;;  %v948_v16 = vunpack.c.l.b16 %v813_v4  ;;  %v995_v17 = vsel %vm961_vm1, %v994_v7, %v993_v12  ;;  %v998_v18 = vrot.slane %v946_v6, 4  ;;  %v3828_v4 = vld [vmem:[#allocation2 + $0xe8] sm:$0xff] }
  0x40   : > { %1302 = vmatpush1.bf16.msra.mxu0 %v3270_v52  ;;  %1355 = vmatpush1.bf16.msra.mxu1 %v3272_v59  ;;  %v3237_v21 = vld.sshfl [vmem:[%s3616_s6 + $0x35] sm:$0x1 pattern:$0x75316420]  ;;  %v855_v22 = vrot.slane %v3236_v60, %v3619_v24  ;;  %v949_v23 = vunpack.c.l.b16 %v827_v10  ;;  %v997_v25 = vsel %vm964_vm2, %v996_v13, %v995_v17  ;;  %v1000_v27 = vrot.slane %v947_v11, 3  ;;  %v3834_v11 = vld [vmem:[#allocation2 + $0xa0] sm:$0xff] }
  0x41   : > { %1303 = vmatprep.subr.bf16.mxu0 %v3263_v3  ;;  %1356 = vmatprep.subr.bf16.mxu1 %v3265_v14  ;;  %v3238_v34 = vld.sshfl [vmem:[%s3616_s6 + $0x37] sm:$0x1 pattern:$0x75316420]  ;;  %v869_v40 = vrot.slane %v3237_v21, %v3619_v24  ;;  %v999_v41 = vsel %vm967_vm3, %v998_v18, %v997_v25  ;;  %v1002_v47 = vrot.slane %v948_v16, 2  ;;  %v3257_v52 = vcombine.high %v3732_v20, %v3737_v29  ;;  %v3836_v12 = vld [vmem:[#allocation2 + $0x88] sm:$0xff] }
  0x42   : > { %1229 = vmatprep.mubr.bf16.mxu0 %v3525_v0  ;;  %1282 = vmatprep.mubr.bf16.mxu1 %v3525_v0  ;;  %v3239_v59 = vld.sshfl [vmem:[%s3616_s6 + $0x39] sm:$0x1 pattern:$0x75316420]  ;;  %v883_v3 = vrot.slane %v3238_v34, %v3619_v24  ;;  %v950_v31 = vunpack.c.l.b16 %v841_v15  ;;  %v951_v33 = vunpack.c.l.b16 %v855_v22  ;;  %v1001_v14 = vsel %vm970_vm4, %v1000_v27, %v999_v41  ;;  %v3838_v13 = vld [vmem:[#allocation2 + $0xa8] sm:$0xff]  ;;  %v3851_v18 = vld [vmem:[#allocation2 + $0x40] sm:$0xff] }
  0x43   : > { %v3240_v37 = vld.sshfl [vmem:[%s3616_s6 + $0x3b] sm:$0x1 pattern:$0x75316420]  ;;  %v897_v38 = vrot.slane %v3239_v59, %v3619_v24  ;;  %v952_v39 = vunpack.c.l.b16 %v869_v40  ;;  %v1004_v42 = vrot.slane %v949_v23, 1  ;;  %v3246_v45 = vcombine.low %v3767_v19, %v3778_v30  ;;  %v3853_v21 = vld [vmem:[#allocation2 + $0x60] sm:$0xff] }
  0x44   : > { %1304 = vmatpush1.bf16.msra.mxu0 %v3262_v2  ;;  %1357 = vmatpush1.bf16.msra.mxu1 %v3264_v9  ;;  %v3241_v49 = vld.sshfl [vmem:[%s3616_s6 + $0x3d] sm:$0x1 pattern:$0x75316420]  ;;  %v911_v50 = vrot.slane %v3240_v37, %v3619_v24  ;;  %v953_v43 = vunpack.c.l.b16 %v883_v3  ;;  %v1003_v51 = vsel %vm973_vm5, %v1002_v47, %v1001_v14  ;;  %v1006_v57 = vrot.slane %v951_v33, 7  ;;  %v3855_v22 = vld [vmem:[#allocation2 + $0x48] sm:$0xff] }
  0x45   : > { %v925_v58 = vrot.slane %v3241_v49, %v3619_v24  ;;  %v954_v32 = vunpack.c.l.b16 %v897_v38  ;;  %v1008_v44 = vrot.slane %v952_v39, 6  ;;  %1305 = vmatprep.subr.bf16.mxu0 %v3255_v53  ;;  %1358 = vmatprep.subr.bf16.mxu1 %v3257_v52  ;;  %v3247_v48 = vcombine.high %v3767_v19, %v3778_v30  ;;  %v3830_v53 = vld [vmem:[#allocation2 + $0x80] sm:$0xff]  ;;  %v3862_v29 = vld [vmem:[#allocation2 + $0x68] sm:$0xff] }
  0x46   : > { %v955_v61 = vunpack.c.l.b16 %v911_v50  ;;  %v1007_v2 = vsel %vm958_vm0, %v1006_v57, %v950_v31  ;;  %v1010_v9 = vrot.slane %v953_v43, 5  ;;  %v3249_v62 = vcombine.high %v3796_v36, %v3802_v46  ;;  %v3283_v23 = vld.sshfl [vmem:[%s3616_s6 + $0x2] sm:$0x1 pattern:$0x75316420]  ;;  %v3905_v30 = vld [vmem:[#allocation2 + $0x8] sm:$0xff] }
  0x47   : > { %v956_v6 = vunpack.c.l.b16 %v925_v58  ;;  %v1005_v7 = vsel %vm976_vm6, %v1004_v42, %v1003_v51  ;;  %v1009_v8 = vsel %vm961_vm1, %v1008_v44, %v1007_v2  ;;  %v1012_v10 = vrot.slane %v954_v32, 4  ;;  %v3284_v25 = vld.sshfl [vmem:[%s3616_s6 + $0x4] sm:$0x1 pattern:$0x75316420] }
  0x48   : > { %v1011_v60 = vsel %vm964_vm2, %v1010_v9, %v1009_v8  ;;  %v1014_v15 = vrot.slane %v955_v61, 3  ;;  %1306 = vmatpush1.bf16.msra.mxu0 %v3254_v28  ;;  %1359 = vmatpush1.bf16.msra.mxu1 %v3256_v56  ;;  %v3248_v16 = vcombine.low %v3796_v36, %v3802_v46  ;;  %v3337_v17 = vcombine.low %v3819_v54, %v3821_v55  ;;  %v3282_v56 = vld.sshfl [vmem:[%s3616_s6] sm:$0x1 pattern:$0x75316420] }
  0x49   : > { %v1013_v26 = vsel %vm967_vm3, %v1012_v10, %v1011_v60  ;;  %v1016_v35 = vrot.slane %v956_v6, 2  ;;  %1307 = vmatprep.subr.bf16.mxu0 %v3247_v48  ;;  %1360 = vmatprep.subr.bf16.mxu1 %v3249_v62  ;;  %v3338_v28 = vcombine.high %v3819_v54, %v3821_v55  ;;  %v3340_v20 = vcombine.high %v3826_v1, %v3828_v4  ;;  %v3874_v47 = vld [vmem:[#allocation2] sm:$0xff]  ;;  %v3286_v3 = vld.sshfl [vmem:[%s3616_s6 + $0x8] sm:$0x1 pattern:$0x75316420] }
  0x4a   : > { %v1015_v27 = vsel %vm970_vm4, %v1014_v15, %v1013_v26  ;;  %v3339_v34 = vcombine.low %v3826_v1, %v3828_v4  ;;  %v3329_v40 = vcombine.low %v3830_v53, %v3834_v11  ;;  %v3330_v41 = vcombine.high %v3830_v53, %v3834_v11  ;;  %v3876_v52 = vld [vmem:[#allocation2 + $0x20] sm:$0xff]  ;;  %v3287_v31 = vld.sshfl [vmem:[%s3616_s6 + $0xa] sm:$0x1 pattern:$0x75316420] }
  0x4b   : > { %v3285_v59 = vld.sshfl [vmem:[%s3616_s6 + $0x6] sm:$0x1 pattern:$0x75316420]  ;;  %v1017_v33 = vsel %vm973_vm5, %v1016_v35, %v1015_v27  ;;  %v3331_v14 = vcombine.low %v3836_v12, %v3838_v13  ;;  %v3332_v36 = vcombine.high %v3836_v12, %v3838_v13  ;;  %v3321_v37 = vcombine.low %v3851_v18, %v3853_v21 }
  0x4c   : > { %v3288_v38 = vld.sshfl [vmem:[%s3616_s6 + $0xc] sm:$0x1 pattern:$0x75316420]  ;;  %v3889_v39 = vpack.c.b16 %v1017_v33, %v1005_v7  ;;  %1308 = vmatpush1.bf16.msra.mxu0 %v3246_v45  ;;  %1361 = vmatpush1.bf16.msra.mxu1 %v3248_v16  ;;  %v3322_v42 = vcombine.high %v3851_v18, %v3853_v21  ;;  %v3323_v46 = vcombine.low %v3855_v22, %v3862_v29 }
  0x4d   : > { %v3289_v49 = vld.sshfl [vmem:[%s3616_s6 + $0xe] sm:$0x1 pattern:$0x75316420]  ;;  %2125 = vmatprep.subr.bf16.mxu0 %v3338_v28  ;;  %2178 = vmatprep.subr.bf16.mxu1 %v3340_v20  ;;  %v3324_v50 = vcombine.high %v3855_v22, %v3862_v29  ;;  %v3313_v43 = vcombine.low %v3874_v47, %v3876_v52  ;;  %v3314_v19 = vcombine.high %v3874_v47, %v3876_v52 }
  0x4e   : > { %v3907_v45 = vld [vmem:[#allocation2 + $0x28] sm:$0xff]  ;;  %v3290_v51 = vld.sshfl [vmem:[%s3616_s6 + $0x10] sm:$0x1 pattern:$0x75316420]  ;;  %3275 = vmatmul.mubr.msk.bf16.gmra.mxu0 %vm1180_vm7, %v3889_v39  ;;  %3277 = vmatmul.mubr.msk.bf16.gmra.mxu1 %vm1180_vm7, %v3889_v39  ;;  %v1443_v58 = vrot.slane %v3282_v56, %v3619_v24  ;;  %v1457_v32 = vrot.slane %v3283_v23, %v3619_v24  ;;  %v1471_v44 = vrot.slane %v3284_v25, %v3619_v24 }
  0x4f   : > { %v3291_v57 = vld.sshfl [vmem:[%s3616_s6 + $0x12] sm:$0x1 pattern:$0x75316420]  ;;  %1325 = vmatprep.mubr.bf16.mxu0 %v3525_v0  ;;  %1378 = vmatprep.mubr.bf16.mxu1 %v3525_v0  ;;  %v1485_v61 = vrot.slane %v3285_v59, %v3619_v24  ;;  %v1499_v2 = vrot.slane %v3286_v3, %v3619_v24  ;;  %v1513_v9 = vrot.slane %v3287_v31, %v3619_v24 }
  0x50   : > { %v3292_v48 = vld.sshfl [vmem:[%s3616_s6 + $0x14] sm:$0x1 pattern:$0x75316420]  ;;  %v3315_v62 = vcombine.low %v3905_v30, %v3907_v45  ;;  %v1527_v7 = vrot.slane %v3288_v38, %v3619_v24  ;;  %v1541_v8 = vrot.slane %v3289_v49, %v3619_v24  ;;  %v1569_v10 = vrot.slane %v3291_v57, %v3619_v24 }
  0x51   : > { %v3293_v6 = vld.sshfl [vmem:[%s3616_s6 + $0x16] sm:$0x1 pattern:$0x75316420]  ;;  %v1555_v15 = vrot.slane %v3290_v51, %v3619_v24  ;;  %v1583_v16 = vrot.slane %v3292_v48, %v3619_v24  ;;  %v1864_v35 = vunpack.c.l.b16 %v1443_v58  ;;  %v3936_v56 = vunpack.c.l.b16 %v1457_v32 }
  0x52   : > { %v3294_v60 = vld.sshfl [vmem:[%s3616_s6 + $0x18] sm:$0x1 pattern:$0x75316420]  ;;  %v1597_v26 = vrot.slane %v3293_v6, %v3619_v24  ;;  %v3938_v23 = vunpack.c.l.b16 %v1471_v44  ;;  %v3940_v25 = vunpack.c.l.b16 %v1485_v61  ;;  %v3944_v3 = vunpack.c.l.b16 %v1499_v2 }
  0x53   : > { %v3295_v28 = vld.sshfl [vmem:[%s3616_s6 + $0x1a] sm:$0x1 pattern:$0x75316420]  ;;  %v1611_v20 = vrot.slane %v3294_v60, %v3619_v24  ;;  %v3946_v31 = vunpack.c.l.b16 %v1513_v9  ;;  %v3948_v33 = vunpack.c.l.b16 %v1527_v7  ;;  %v3952_v51 = vunpack.c.l.b16 %v1541_v8 }
  0x54   : > { %v3296_v27 = vld.sshfl [vmem:[%s3616_s6 + $0x1c] sm:$0x1 pattern:$0x75316420]  ;;  %v1625_v59 = vrot.slane %v3295_v28, %v3619_v24  ;;  %v3954_v57 = vunpack.c.l.b16 %v1569_v10  ;;  %v3956_v58 = vunpack.c.l.b16 %v1583_v16  ;;  %v3959_v44 = vunpack.c.l.b16 %v1555_v15 }
  0x55   : > { %v3297_v38 = vld.sshfl [vmem:[%s3616_s6 + $0x1e] sm:$0x1 pattern:$0x75316420]  ;;  %v1639_v49 = vrot.slane %v3296_v27, %v3619_v24  ;;  %v3961_v48 = vunpack.c.l.b16 %v1597_v26  ;;  %v3963_v61 = vunpack.c.l.b16 %v1611_v20  ;;  %v1895_v9 = vrot.slane %v3936_v56, 7 }
  0x56   : > { %v1653_v32 = vrot.slane %v3297_v38, %v3619_v24  ;;  %3278 = vmatmul.mubr.msk.bf16.vlgmr.msra.gmra.mxu0 %vm1180_vm7, %v3753_v63  ;;  %3280 = vmatmul.mubr.msk.bf16.vlgmr.msra.gmra.mxu1 %vm1180_vm7, %v3753_v63  ;;  %v3969_v2 = vunpack.c.l.b16 %v1625_v59  ;;  %v1897_v6 = vrot.slane %v3938_v23, 6  ;;  %v1899_v7 = vrot.slane %v3940_v25, 5  ;;  %v4007_v26 = vld [vmem:[#allocation2 + $0xd8] sm:$0xff]  ;;  %v4016_v38 = vld [vmem:[#allocation2 + $0x90] sm:$0xff] }
  0x57   : > { %2126 = vmatpush1.bf16.msra.mxu0 %v3337_v17  ;;  %2179 = vmatpush1.bf16.msra.mxu1 %v3339_v34  ;;  %v3316_v8 = vcombine.high %v3905_v30, %v3907_v45  ;;  %v3982_v63 = vunpack.c.l.b16 %v1639_v49  ;;  %v1901_v60 = vrot.slane %v3944_v3, 4  ;;  %v1896_v54 = vsel %vm958_vm0, %v1895_v9, %v1864_v35  ;;  %v3997_v17 = vld [vmem:[#allocation2 + $0xd0] sm:$0xff]  ;;  %v4014_v59 = vld [vmem:[#allocation2 + $0xf8] sm:$0xff] }
  0x58   : > { %v3984_v10 = vunpack.c.l.b16 %v1653_v32  ;;  %2127 = vmatprep.subr.bf16.mxu0 %v3330_v41  ;;  %2180 = vmatprep.subr.bf16.mxu1 %v3332_v36  ;;  %v1903_v55 = vrot.slane %v3946_v31, 3  ;;  %v1909_v1 = vrot.slane %v3954_v57, 7  ;;  %v1911_v4 = vrot.slane %v3956_v58, 6  ;;  %v3999_v34 = vld [vmem:[#allocation2 + $0xf0] sm:$0xff] }
  0x59   : > { %1335 = vmatprep.mubr.bf16.mxu0 %v3525_v0  ;;  %1388 = vmatprep.mubr.bf16.mxu1 %v3525_v0  ;;  %v1898_v41 = vsel %vm961_vm1, %v1897_v6, %v1896_v54  ;;  %v1905_v36 = vrot.slane %v3948_v33, 2  ;;  %v1913_v15 = vrot.slane %v3961_v48, 5  ;;  %v1915_v16 = vrot.slane %v3963_v61, 4  ;;  %v4018_v49 = vld [vmem:[#allocation2 + $0xb0] sm:$0xff]  ;;  %v4031_v54 = vld [vmem:[#allocation2 + $0x98] sm:$0xff] }
  0x5a   : > { %v1900_v35 = vsel %vm964_vm2, %v1899_v7, %v1898_v41  ;;  %v1907_v28 = vrot.slane %v3952_v51, 1  ;;  %v1910_v20 = vsel %vm958_vm0, %v1909_v1, %v3959_v44  ;;  %v1917_v27 = vrot.slane %v3969_v2, 3  ;;  %v3298_v53 = vld.sshfl [vmem:[%s3616_s6 + $0x20] sm:$0x1 pattern:$0x75316420] }
  0x5b   : > { %2128 = vmatpush1.bf16.msra.mxu0 %v3329_v40  ;;  %2181 = vmatpush1.bf16.msra.mxu1 %v3331_v14  ;;  %v1902_v32 = vsel %vm967_vm3, %v1901_v60, %v1900_v35  ;;  %v1912_v9 = vsel %vm961_vm1, %v1911_v4, %v1910_v20  ;;  %v1919_v6 = vrot.slane %v3982_v63, 2  ;;  %v3341_v7 = vcombine.low %v3997_v17, %v3999_v34  ;;  %v4045_v14 = vld [vmem:[#allocation2 + $0xb8] sm:$0xff]  ;;  %v3299_v60 = vld.sshfl [vmem:[%s3616_s6 + $0x22] sm:$0x1 pattern:$0x75316420] }
  0x5c   : > { %2129 = vmatprep.subr.bf16.mxu0 %v3322_v42  ;;  %2182 = vmatprep.subr.bf16.mxu1 %v3324_v50  ;;  %v1904_v11 = vsel %vm970_vm4, %v1903_v55, %v1902_v32  ;;  %v1914_v12 = vsel %vm964_vm2, %v1913_v15, %v1912_v9  ;;  %v1921_v13 = vrot.slane %v3984_v10, 1  ;;  %v3342_v40 = vcombine.high %v3997_v17, %v3999_v34  ;;  %v3300_v1 = vld.sshfl [vmem:[%s3616_s6 + $0x24] sm:$0x1 pattern:$0x75316420] }
  0x5d   : > { %v1906_v42 = vsel %vm973_vm5, %v1905_v36, %v1904_v11  ;;  %v1916_v4 = vsel %vm967_vm3, %v1915_v16, %v1914_v12  ;;  %v3343_v50 = vcombine.low %v4007_v26, %v4014_v59  ;;  %v3344_v55 = vcombine.high %v4007_v26, %v4014_v59  ;;  %v3301_v41 = vld.sshfl [vmem:[%s3616_s6 + $0x26] sm:$0x1 pattern:$0x75316420] }
  0x5e   : > { %v3302_v15 = vld.sshfl [vmem:[%s3616_s6 + $0x28] sm:$0x1 pattern:$0x75316420]  ;;  %3279 = vmatmul.mubr.msk.bf16.gmra.mxu0 %vm1180_vm7, %v3889_v39  ;;  %3281 = vmatmul.mubr.msk.bf16.gmra.mxu1 %vm1180_vm7, %v3889_v39  ;;  %v1908_v36 = vsel %vm976_vm6, %v1907_v28, %v1906_v42  ;;  %v1918_v16 = vsel %vm970_vm4, %v1917_v27, %v1916_v4  ;;  %v3333_v35 = vcombine.low %v4016_v38, %v4018_v49 }
  0x5f   : > { %v3303_v20 = vld.sshfl [vmem:[%s3616_s6 + $0x2a] sm:$0x1 pattern:$0x75316420]  ;;  %2130 = vmatpush1.bf16.msra.mxu0 %v3321_v37  ;;  %2183 = vmatpush1.bf16.msra.mxu1 %v3323_v46  ;;  %v1920_v26 = vsel %vm973_vm5, %v1919_v6, %v1918_v16  ;;  %v3334_v39 = vcombine.high %v4016_v38, %v4018_v49  ;;  %v3335_v28 = vcombine.low %v4031_v54, %v4045_v14 }
  0x60   : > { %v3304_v27 = vld.sshfl [vmem:[%s3616_s6 + $0x2c] sm:$0x1 pattern:$0x75316420]  ;;  %2131 = vmatprep.subr.bf16.mxu0 %v3314_v19  ;;  %2184 = vmatprep.subr.bf16.mxu1 %v3316_v8  ;;  %v1922_v18 = vsel %vm976_vm6, %v1921_v13, %v1920_v26  ;;  %v3336_v21 = vcombine.high %v4031_v54, %v4045_v14  ;;  %v1667_v29 = vrot.slane %v3298_v53, %v3619_v24  ;;  %v398_v54 = vld [vmem:[#allocation2 + $0x10] sm:$0xff] }
  0x61   : > { %v3305_v22 = vld.sshfl [vmem:[%s3616_s6 + $0x2e] sm:$0x1 pattern:$0x75316420]  ;;  %2149 = vmatprep.mubr.bf16.mxu0 %v3525_v0  ;;  %2202 = vmatprep.mubr.bf16.mxu1 %v3525_v0  ;;  %v4088_v37 = vpack.c.b16 %v1922_v18, %v1908_v36  ;;  %v1681_v59 = vrot.slane %v3299_v60, %v3619_v24  ;;  %v1695_v19 = vrot.slane %v3300_v1, %v3619_v24  ;;  %v402_v14 = vld [vmem:[#allocation2 + $0x30] sm:$0xff] }
  0x62   : > { %v3306_v46 = vld.sshfl [vmem:[%s3616_s6 + $0x30] sm:$0x1 pattern:$0x75316420]  ;;  %v1709_v32 = vrot.slane %v3301_v41, %v3619_v24  ;;  %v1723_v9 = vrot.slane %v3302_v15, %v3619_v24  ;;  %v1737_v6 = vrot.slane %v3303_v20, %v3619_v24  ;;  %v1751_v53 = vrot.slane %v3304_v27, %v3619_v24 }
  0x63   : > { %v3307_v8 = vld.sshfl [vmem:[%s3616_s6 + $0x32] sm:$0x1 pattern:$0x75316420]  ;;  %2132 = vmatpush1.bf16.msra.mxu0 %v3313_v43  ;;  %2185 = vmatpush1.bf16.msra.mxu1 %v3315_v62  ;;  %v1765_v12 = vrot.slane %v3305_v22, %v3619_v24  ;;  %v1779_v13 = vrot.slane %v3306_v46, %v3619_v24  ;;  %v4108_v1 = vunpack.c.l.b16 %v1667_v29  ;;  %v4112_v52 = vunpack.c.l.b16 %v1681_v59 }
  0x64   : > { %v3308_v11 = vld.sshfl [vmem:[%s3616_s6 + $0x34] sm:$0x1 pattern:$0x75316420]  ;;  %v1793_v60 = vrot.slane %v3307_v8, %v3619_v24  ;;  %2231 = vmatprep.subr.bf16.mxu0 %v3342_v40  ;;  %2284 = vmatprep.subr.bf16.mxu1 %v3344_v55  ;;  %v4114_v43 = vunpack.c.l.b16 %v1695_v19  ;;  %v4116_v30 = vunpack.c.l.b16 %v1709_v32  ;;  %v4120_v4 = vunpack.c.l.b16 %v1723_v9 }
  0x65   : > { %v3309_v42 = vld.sshfl [vmem:[%s3616_s6 + $0x36] sm:$0x1 pattern:$0x75316420]  ;;  %v1807_v47 = vrot.slane %v3308_v11, %v3619_v24  ;;  %v4122_v41 = vunpack.c.l.b16 %v1737_v6  ;;  %v4124_v15 = vunpack.c.l.b16 %v1751_v53  ;;  %v4132_v36 = vunpack.c.l.b16 %v1765_v12 }
  0x66   : > { %v3310_v45 = vld.sshfl [vmem:[%s3616_s6 + $0x38] sm:$0x1 pattern:$0x75316420]  ;;  %v1821_v62 = vrot.slane %v3309_v42, %v3619_v24  ;;  %3345 = vmatmul.mubr.msk.bf16.vlgmr.msra.gmra.mxu0 %vm1180_vm7, %v4088_v37  ;;  %3347 = vmatmul.mubr.msk.bf16.vlgmr.msra.gmra.mxu1 %vm1180_vm7, %v4088_v37  ;;  %v4134_v16 = vunpack.c.l.b16 %v1779_v13  ;;  %v4136_v20 = vunpack.c.l.b16 %v1793_v60  ;;  %v1923_v29 = vrot.slane %v4112_v52, 7  ;;  %v406_v6 = vld [vmem:[#allocation2 + $0x50] sm:$0xff] }
  0x67   : > { %v3311_v40 = vld.sshfl [vmem:[%s3616_s6 + $0x3a] sm:$0x1 pattern:$0x75316420]  ;;  %v1835_v55 = vrot.slane %v3310_v45, %v3619_v24  ;;  %2232 = vmatpush1.bf16.msra.mxu0 %v3341_v7  ;;  %2285 = vmatpush1.bf16.msra.mxu1 %v3343_v50  ;;  %v4143_v18 = vunpack.c.l.b16 %v1807_v47  ;;  %v1925_v19 = vrot.slane %v4114_v43, 6  ;;  %v1927_v17 = vrot.slane %v4116_v30, 5 }
  0x68   : > { %v3312_v26 = vld.sshfl [vmem:[%s3616_s6 + $0x3c] sm:$0x1 pattern:$0x75316420]  ;;  %v1849_v27 = vrot.slane %v3311_v40, %v3619_v24  ;;  %v4145_v22 = vunpack.c.l.b16 %v1821_v62  ;;  %2233 = vmatprep.subr.bf16.mxu0 %v3334_v39  ;;  %2286 = vmatprep.subr.bf16.mxu1 %v3336_v21  ;;  %v1924_v7 = vsel %vm958_vm0, %v1923_v29, %v4108_v1  ;;  %v1929_v50 = vrot.slane %v4120_v4, 4  ;;  %v410_v53 = vld [vmem:[#allocation2 + $0x70] sm:$0xff] }
  0x69   : > { %v1863_v46 = vrot.slane %v3312_v26, %v3619_v24  ;;  %v4149_v59 = vunpack.c.l.b16 %v1835_v55  ;;  %2159 = vmatprep.mubr.bf16.mxu0 %v3525_v0  ;;  %2212 = vmatprep.mubr.bf16.mxu1 %v3525_v0  ;;  %v1931_v39 = vrot.slane %v4122_v41, 3  ;;  %v1926_v8 = vsel %vm961_vm1, %v1925_v19, %v1924_v7  ;;  %v407_v42 = vld [vmem:[#allocation2 + $0x58] sm:$0xff] }
  0x6a   : > { %v4155_v34 = vunpack.c.l.b16 %v1849_v27  ;;  %v1933_v32 = vrot.slane %v4124_v15, 2  ;;  %v1935_v9 = vrot.slane %v4132_v36, 1  ;;  %v1928_v11 = vsel %vm964_vm2, %v1927_v17, %v1926_v8  ;;  %v411_v47 = vld [vmem:[#allocation2 + $0x78] sm:$0xff] }
  0x6b   : > { %v4161_v21 = vunpack.c.l.b16 %v1863_v46  ;;  %2234 = vmatpush1.bf16.msra.mxu0 %v3333_v35  ;;  %2287 = vmatpush1.bf16.msra.mxu1 %v3335_v28  ;;  %v1937_v12 = vrot.slane %v4136_v20, 7  ;;  %v1939_v13 = vrot.slane %v4143_v18, 6  ;;  %v1941_v60 = vrot.slane %v4145_v22, 5  ;;  %v399_v26 = vld [vmem:[#allocation2 + $0x18] sm:$0xff] }
  0x6c   : > { %v1930_v45 = vsel %vm967_vm3, %v1929_v50, %v1928_v11  ;;  %v1943_v62 = vrot.slane %v4149_v59, 4  ;;  %v1945_v38 = vrot.slane %v4155_v34, 3  ;;  %v3325_v40 = vcombine.low %v406_v6, %v410_v53  ;;  %v403_v27 = vld [vmem:[#allocation2 + $0x38] sm:$0xff] }
  0x6d   : > { %v1947_v49 = vrot.slane %v4161_v21, 2  ;;  %v1932_v35 = vsel %vm970_vm4, %v1931_v39, %v1930_v45  ;;  %v1938_v28 = vsel %vm958_vm0, %v1937_v12, %v4134_v16  ;;  %v3326_v55 = vcombine.high %v406_v6, %v410_v53  ;;  %v2354_v53 = vld [vmem:[#allocation2 + $0x2c0] sm:$0xff] }
  0x6e   : > { %v1934_v29 = vsel %vm973_vm5, %v1933_v32, %v1932_v35  ;;  %v1940_v46 = vsel %vm961_vm1, %v1939_v13, %v1938_v28  ;;  %v3327_v19 = vcombine.low %v407_v42, %v411_v47  ;;  %v3328_v17 = vcombine.high %v407_v42, %v411_v47  ;;  %v2358_v12 = vld [vmem:[#allocation2 + $0x2e0] sm:$0xff]  ;;  %v2355_v13 = vld [vmem:[#allocation2 + $0x2c8] sm:$0xff] }
  0x6f   : > { %v1936_v7 = vsel %vm976_vm6, %v1935_v9, %v1934_v29  ;;  %v1942_v50 = vsel %vm964_vm2, %v1941_v60, %v1940_v46  ;;  %2235 = vmatprep.subr.bf16.mxu0 %v3326_v55  ;;  %v3318_v8 = vcombine.high %v398_v54, %v402_v14  ;;  %v3317_v11 = vcombine.low %v398_v54, %v402_v14  ;;  %v2359_v42 = vld [vmem:[#allocation2 + $0x2e8] sm:$0xff]  ;;  %v2346_v28 = vld [vmem:[#allocation2 + $0x280] sm:$0xff] }
  0x70   : > { %v1944_v39 = vsel %vm967_vm3, %v1943_v62, %v1942_v50  ;;  %2288 = vmatprep.subr.bf16.mxu1 %v3328_v17  ;;  %2236 = vmatpush1.bf16.msra.mxu0 %v3325_v40  ;;  %v3320_v6 = vcombine.high %v399_v26, %v403_v27  ;;  %v3319_v47 = vcombine.low %v399_v26, %v403_v27  ;;  %v2378_v60 = vrot.slane %v3938_v23, 7  ;;  %v2350_v55 = vld [vmem:[#allocation2 + $0x2a0] sm:$0xff]  ;;  %v2347_v26 = vld [vmem:[#allocation2 + $0x288] sm:$0xff] }
  0x71   : > { %v1946_v32 = vsel %vm970_vm4, %v1945_v38, %v1944_v39  ;;  %2289 = vmatpush1.bf16.msra.mxu1 %v3327_v19  ;;  %2237 = vmatprep.subr.bf16.mxu0 %v3318_v8  ;;  %v2392_v45 = vrot.slane %v3956_v58, 7  ;;  %v3379_v54 = vcombine.high %v2354_v53, %v2358_v12  ;;  %v2380_v14 = vrot.slane %v3940_v25, 6  ;;  %v2351_v27 = vld [vmem:[#allocation2 + $0x2a8] sm:$0xff]  ;;  %v4216_v29 = vld [vmem:[#allocation2 + $0x240] sm:$0xff] }
  0x72   : > { %v1948_v9 = vsel %vm973_vm5, %v1947_v49, %v1946_v32  ;;  %2290 = vmatprep.subr.bf16.mxu1 %v3320_v6  ;;  %v3381_v35 = vcombine.high %v2355_v13, %v2359_v42  ;;  %v2394_v38 = vrot.slane %v3961_v48, 6  ;;  %v2379_v23 = vsel %vm958_vm0, %v2378_v60, %v3936_v56  ;;  %v4220_v50 = vld [vmem:[#allocation2 + $0x260] sm:$0xff]  ;;  %v4222_v8 = vld [vmem:[#allocation2 + $0x248] sm:$0xff] }
  0x73   : > { %v4192_v62 = vpack.c.b16 %v1948_v9, %v1936_v7  ;;  %v2382_v58 = vrot.slane %v3944_v3, 5  ;;  %v2393_v25 = vsel %vm958_vm0, %v2392_v45, %v3954_v57  ;;  %v2396_v49 = vrot.slane %v3963_v61, 5  ;;  %v4250_v9 = vld [vmem:[#allocation2 + $0x220] sm:$0xff] }
  0x74   : > { %2238 = vmatpush1.bf16.msra.mxu0 %v3317_v11  ;;  %v2381_v48 = vsel %vm961_vm1, %v2380_v14, %v2379_v23  ;;  %v2395_v40 = vsel %vm961_vm1, %v2394_v38, %v2393_v25  ;;  %v2384_v56 = vrot.slane %v3946_v31, 4  ;;  %v2398_v3 = vrot.slane %v3969_v2, 4  ;;  %v4224_v31 = vld [vmem:[#allocation2 + $0x268] sm:$0xff] }
  0x75   : > { %3346 = vmatmul.mubr.msk.bf16.gmra.mxu0 %vm1180_vm7, %v4192_v62  ;;  %3348 = vmatmul.mubr.msk.bf16.gmra.mxu1 %vm1180_vm7, %v4192_v62  ;;  %v3378_v57 = vcombine.low %v2354_v53, %v2358_v12  ;;  %v3380_v61 = vcombine.low %v2355_v13, %v2359_v42  ;;  %v2383_v46 = vsel %vm964_vm2, %v2382_v58, %v2381_v48  ;;  %v2386_v2 = vrot.slane %v3948_v33, 3  ;;  %v3353_v60 = vld.sshfl [vmem:[%s315_s10] sm:$0x1 pattern:$0x75316420]  ;;  %v2331_v14 = vld [vmem:[#allocation2 + $0x208] sm:$0xff] }
  0x76   : > { %2291 = vmatpush1.bf16.msra.mxu1 %v3319_v47  ;;  %2255 = vmatprep.mubr.bf16.mxu0 %v3525_v0  ;;  %v2397_v19 = vsel %vm964_vm2, %v2396_v49, %v2395_v40  ;;  %v3371_v17 = vcombine.high %v2346_v28, %v2350_v55  ;;  %v3373_v7 = vcombine.high %v2347_v26, %v2351_v27  ;;  %v2388_v39 = vrot.slane %v3952_v51, 2 }
  0x77   : > { %2308 = vmatprep.mubr.bf16.mxu1 %v3525_v0  ;;  %2608 = vmatprep.subr.bf16.mxu0 %v3379_v54  ;;  %v3370_v11 = vcombine.low %v2346_v28, %v2350_v55  ;;  %v3372_v6 = vcombine.low %v2347_v26, %v2351_v27  ;;  %v2390_v53 = vrot.slane %v3959_v44, 1  ;;  %v2400_v12 = vrot.slane %v3982_v63, 3  ;;  %v2360_v26 = vld [vmem:[#allocation2 + $0x2f0] sm:$0xff]  ;;  %v2361_v27 = vld [vmem:[#allocation2 + $0x2f8] sm:$0xff] }
  0x78   : > { %2661 = vmatprep.subr.bf16.mxu1 %v3381_v35  ;;  %v2385_v33 = vsel %vm967_vm3, %v2384_v56, %v2383_v46  ;;  %v2399_v51 = vsel %vm967_vm3, %v2398_v3, %v2397_v19  ;;  %v2406_v32 = vrot.slane %v4114_v43, 7  ;;  %v2408_v44 = vrot.slane %v4116_v30, 6  ;;  %v2335_v35 = vld [vmem:[#allocation2 + $0x228] sm:$0xff] }
  0x79   : > { %v3362_v63 = vcombine.low %v4216_v29, %v4220_v50  ;;  %v3363_v13 = vcombine.high %v4216_v29, %v4220_v50  ;;  %v3364_v42 = vcombine.low %v4222_v8, %v4224_v31  ;;  %v2410_v47 = vrot.slane %v4120_v4, 5 }
  0x7a   : > { %v3365_v43 = vcombine.high %v4222_v8, %v4224_v31  ;;  %v2402_v30 = vrot.slane %v3984_v10, 2  ;;  %v2407_v45 = vsel %vm958_vm0, %v2406_v32, %v4112_v52  ;;  %v2420_v54 = vrot.slane %v4143_v18, 7  ;;  %v2349_v8 = vld [vmem:[#allocation2 + $0x298] sm:$0xff] }
  0x7b   : > { %v2387_v4 = vsel %vm970_vm4, %v2386_v2, %v2385_v33  ;;  %v2401_v38 = vsel %vm970_vm4, %v2400_v12, %v2399_v51  ;;  %v2409_v23 = vsel %vm961_vm1, %v2408_v44, %v2407_v45  ;;  %v2422_v10 = vrot.slane %v4145_v22, 6  ;;  %v2353_v31 = vld [vmem:[#allocation2 + $0x2b8] sm:$0xff]  ;;  %v2340_v44 = vld [vmem:[#allocation2 + $0x250] sm:$0xff] }
  0x7c   : > { %v2412_v52 = vrot.slane %v4122_v41, 4  ;;  %v2421_v18 = vsel %vm958_vm0, %v2420_v54, %v4136_v20  ;;  %v2424_v25 = vrot.slane %v4149_v59, 5  ;;  %v2404_v49 = vrot.slane %v4108_v1, 1  ;;  %v2356_v20 = vld [vmem:[#allocation2 + $0x2d0] sm:$0xff]  ;;  %v2357_v59 = vld [vmem:[#allocation2 + $0x2d8] sm:$0xff]  ;;  %vm4567_vm0 = vmor %vm3050_vm12, %vm3049_vm8 }
  0x7d   : > { %3349 = vmatmul.mubr.msk.bf16.vlgmr.msra.gmra.mxu0 %vm1180_vm7, %v4088_v37  ;;  %3351 = vmatmul.mubr.msk.bf16.vlgmr.msra.gmra.mxu1 %vm1180_vm7, %v4088_v37  ;;  %v4248_v37 = vld [vmem:[#allocation2 + $0x200] sm:$0xff]  ;;  %v2376_v28 = vrot.slane %v3353_v60, %v3619_v24  ;;  %v2411_v48 = vsel %vm964_vm2, %v2410_v47, %v2409_v23  ;;  %v2423_v22 = vsel %vm961_vm1, %v2422_v10, %v2421_v18  ;;  %v2414_v56 = vrot.slane %v4124_v15, 3  ;;  %v2332_v60 = vld [vmem:[#allocation2 + $0x210] sm:$0xff]  ;;  %v2333_v54 = vld [vmem:[#allocation2 + $0x218] sm:$0xff] }
  0x7e   : > { %2609 = vmatpush1.bf16.msra.mxu0 %v3378_v57  ;;  %2662 = vmatpush1.bf16.msra.mxu1 %v3380_v61  ;;  %v3355_v58 = vcombine.high %v4248_v37, %v4250_v9  ;;  %v3357_v40 = vcombine.high %v2331_v14, %v2335_v35  ;;  %v2389_v41 = vsel %vm973_vm5, %v2388_v39, %v2387_v4  ;;  %v2426_v1 = vrot.slane %v4155_v34, 4  ;;  %v2336_v45 = vld [vmem:[#allocation2 + $0x230] sm:$0xff]  ;;  %vm3078_vm1 = vmand %vm3050_vm12, %vm3065_vm11 }
  0x7f   : > { %2610 = vmatprep.subr.bf16.mxu0 %v3371_v17  ;;  %2663 = vmatprep.subr.bf16.mxu1 %v3373_v7  ;;  %v2403_v55 = vsel %vm973_vm5, %v2402_v30, %v2401_v38  ;;  %v3354_v24 = vcombine.low %v4248_v37, %v4250_v9  ;;  %v2413_v3 = vsel %vm967_vm3, %v2412_v52, %v2411_v48  ;;  %v2377_v29 = vunpack.c.l.b16 %v2376_v28  ;;  %v2352_v17 = vld [vmem:[#allocation2 + $0x2b0] sm:$0xff] }
  0x80   : > { %2265 = vmatprep.mubr.bf16.mxu0 %v3525_v0  ;;  %2318 = vmatprep.mubr.bf16.mxu1 %v3525_v0  ;;  %v2425_v57 = vsel %vm964_vm2, %v2424_v25, %v2423_v22  ;;  %v3356_v61 = vcombine.low %v2331_v14, %v2335_v35  ;;  %v2391_v15 = vsel %vm976_vm6, %v2390_v53, %v2389_v41  ;;  %v2416_v7 = vrot.slane %v4132_v36, 2  ;;  %v2337_v14 = vld [vmem:[#allocation2 + $0x238] sm:$0xff]  ;;  %vm3079_vm2 = vmor %vm3078_vm1, %vm4521_vm13 }
  0x81   : > { %v2405_v34 = vsel %vm976_vm6, %v2404_v49, %v2403_v55  ;;  %v3383_v46 = vcombine.high %v2356_v20, %v2360_v26  ;;  %v3385_v19 = vcombine.high %v2357_v59, %v2361_v27  ;;  %v2428_v50 = vrot.slane %v4161_v21, 3 }
  0x82   : > { %2611 = vmatpush1.bf16.msra.mxu0 %v3370_v11  ;;  %2664 = vmatpush1.bf16.msra.mxu1 %v3372_v6  ;;  %v2415_v2 = vsel %vm970_vm4, %v2414_v56, %v2413_v3  ;;  %v2427_v39 = vsel %vm967_vm3, %v2426_v1, %v2425_v57  ;;  %v2432_v11 = vpack.c.b16 %v2405_v34, %v2391_v15  ;;  %v2418_v36 = vrot.slane %v4134_v16, 1 }
  0x83   : > { %2612 = vmatprep.subr.bf16.mxu0 %v3363_v13  ;;  %2665 = vmatprep.subr.bf16.mxu1 %v3365_v43  ;;  %v3382_v6 = vcombine.low %v2356_v20, %v2360_v26  ;;  %v3384_v53 = vcombine.low %v2357_v59, %v2361_v27  ;;  %v2430_v33 = vrot.slane %v2377_v29, 2  ;;  %v3377_v21 = vcombine.high %v2349_v8, %v2353_v31  ;;  %v2341_v13 = vld [vmem:[#allocation2 + $0x258] sm:$0xff] }
  0x84   : > { %v2417_v51 = vsel %vm973_vm5, %v2416_v7, %v2415_v2  ;;  %v2429_v32 = vsel %vm970_vm4, %v2428_v50, %v2427_v39  ;;  %v3376_v16 = vcombine.low %v2349_v8, %v2353_v31  ;;  %v3359_v23 = vcombine.high %v2332_v60, %v2336_v45 }
  0x85   : > { %3350 = vmatmul.mubr.msk.bf16.gmra.mxu0 %vm1180_vm7, %v4192_v62  ;;  %3352 = vmatmul.mubr.msk.bf16.gmra.mxu1 %vm1180_vm7, %v4192_v62  ;;  %v2348_v62 = vld [vmem:[#allocation2 + $0x290] sm:$0xff]  ;;  %v2419_v9 = vsel %vm976_vm6, %v2418_v36, %v2417_v51  ;;  %v2431_v47 = vsel %vm973_vm5, %v2430_v33, %v2429_v32  ;;  %v3361_v10 = vcombine.high %v2333_v54, %v2337_v14 }
  0x86   : > { %2613 = vmatpush1.bf16.msra.mxu0 %v3362_v63  ;;  %2666 = vmatpush1.bf16.msra.mxu1 %v3364_v42  ;;  %v3375_v12 = vcombine.high %v2348_v62, %v2352_v17  ;;  %v2344_v63 = vld [vmem:[#allocation2 + $0x270] sm:$0xff]  ;;  %v2345_v42 = vld [vmem:[#allocation2 + $0x278] sm:$0xff]  ;;  %v3374_v37 = vcombine.low %v2348_v62, %v2352_v17  ;;  %v2433_v35 = vpack.c.b16 %v2431_v47, %v2419_v9 }
  0x87   : > { %2614 = vmatprep.subr.bf16.mxu0 %v3355_v58  ;;  %2667 = vmatprep.subr.bf16.mxu1 %v3357_v40  ;;  %v3367_v43 = vcombine.high %v2340_v44, %v2344_v63  ;;  %v3369_v30 = vcombine.high %v2341_v13, %v2345_v42  ;;  %v3366_v4 = vcombine.low %v2340_v44, %v2344_v63 }
  0x88   : > { %2632 = vmatprep.mubr.bf16.mxu0 %v3525_v0  ;;  %2685 = vmatprep.mubr.bf16.mxu1 %v3525_v0  ;;  %v3368_v38 = vcombine.low %v2341_v13, %v2345_v42  ;;  %v3358_v58 = vcombine.low %v2332_v60, %v2336_v45  ;;  %v3360_v52 = vcombine.low %v2333_v54, %v2337_v14 }
  0x8a   : > { %2615 = vmatpush1.bf16.msra.mxu0 %v3354_v24  ;;  %2668 = vmatpush1.bf16.msra.mxu1 %v3356_v61 }
  0x8b   : > { %2714 = vmatprep.subr.bf16.mxu0 %v3383_v46  ;;  %2767 = vmatprep.subr.bf16.mxu1 %v3385_v19 }
  0x8d   : > { %3386 = vmatmul.mubr.msk.bf16.vlgmr.msra.gmra.mxu0 %vm1180_vm7, %v2432_v11  ;;  %3388 = vmatmul.mubr.msk.bf16.vlgmr.msra.gmra.mxu1 %vm1180_vm7, %v2432_v11 }
  0x8e   : > { %2715 = vmatpush1.bf16.msra.mxu0 %v3382_v6  ;;  %2768 = vmatpush1.bf16.msra.mxu1 %v3384_v53 }
  0x8f   : > { %2716 = vmatprep.subr.bf16.mxu0 %v3375_v12  ;;  %2769 = vmatprep.subr.bf16.mxu1 %v3377_v21 }
  0x90   : > { %2642 = vmatprep.mubr.bf16.mxu0 %v3525_v0  ;;  %2695 = vmatprep.mubr.bf16.mxu1 %v3525_v0 }
  0x92   : > { %2717 = vmatpush1.bf16.msra.mxu0 %v3374_v37  ;;  %2770 = vmatpush1.bf16.msra.mxu1 %v3376_v16 }
  0x93   : > { %2718 = vmatprep.subr.bf16.mxu0 %v3367_v43  ;;  %2771 = vmatprep.subr.bf16.mxu1 %v3369_v30 }
  0x95   : > { %3387 = vmatmul.mubr.msk.bf16.gmra.mxu0 %vm1180_vm7, %v2433_v35  ;;  %3389 = vmatmul.mubr.msk.bf16.gmra.mxu1 %vm1180_vm7, %v2433_v35 }
  0x96   : > { %2719 = vmatpush1.bf16.msra.mxu0 %v3366_v4  ;;  %2772 = vmatpush1.bf16.msra.mxu1 %v3368_v38  ;;  %v2848_v38 = vsub.s32 0, %v3600_v5 }
  0x97   : > { %2720 = vmatprep.subr.bf16.mxu0 %v3359_v23  ;;  %2773 = vmatprep.subr.bf16.mxu1 %v3361_v10  ;;  %v2856_v23 = vsub.s32 2, %v3600_v5  ;;  %v2844_v10 = vld [vmem:[%s4627_s3] sm:$0xff] }
  0x98   : > { %2738 = vmatprep.mubr.bf16.mxu0 %v3525_v0  ;;  %2791 = vmatprep.mubr.bf16.mxu1 %v3525_v0 }
  0x9a   : > { %2721 = vmatpush1.bf16.msra.mxu0 %v3358_v58  ;;  %2774 = vmatpush1.bf16.msra.mxu1 %v3360_v52  ;;  %v2852_v58 = vsub.s32 1, %v3600_v5  ;;  %v2860_v52 = vsub.s32 3, %v3600_v5 }
  0x9d   : > { %3390 = vmatmul.mubr.msk.bf16.vlgmr.msra.gmra.mxu0 %vm1180_vm7, %v2432_v11  ;;  %3392 = vmatmul.mubr.msk.bf16.vlgmr.msra.gmra.mxu1 %vm1180_vm7, %v2432_v11 }
  0x9e   : > { %2748 = vmatprep.mubr.bf16.mxu0 %v3525_v0  ;;  %2801 = vmatprep.mubr.bf16.mxu1 %v3525_v0 }
  0xa5   : > { %3391 = vmatmul.mubr.msk.bf16.gmra.mxu0 %vm1180_vm7, %v2433_v35  ;;  %3393 = vmatmul.mubr.msk.bf16.gmra.mxu1 %vm1180_vm7, %v2433_v35 }
  0xff   : > { %v4314_v18 = vpop.f32.mrf.mxu0  ;;  %v4316_v25 = vpop.f32.mrf.mxu1 }
 0x101   : > { %v4318_v49 = vpop.f32.mrf.mxu0  ;;  %v4320_v28 = vpop.f32.mrf.mxu1 }
 0x103   : > { %v4322_v48 = vpop.f32.mrf.mxu0  ;;  %v4324_v22 = vpop.f32.mrf.mxu1 }
 0x105   : > { %v4326_v40 = vpop.f32.mrf.mxu0  ;;  %v4328_v41 = vpop.f32.mrf.mxu1 }
 0x10e   : > { %v4330_v0 = vpop.f32.mrf.mxu0  ;;  %v4332_v55 = vpop.f32.mrf.mxu1 }
 0x110   : > { %v4334_v20 = vpop.f32.mrf.mxu0  ;;  %v4336_v26 = vpop.f32.mrf.mxu1 }
 0x112   : > { %v4338_v59 = vpop.f32.mrf.mxu0  ;;  %v4340_v27 = vpop.f32.mrf.mxu1 }
 0x114   : > { %v4342_v56 = vpop.f32.mrf.mxu0  ;;  %v4344_v1 = vpop.f32.mrf.mxu1 }
 0x116   : > { %v4346_v24 = vpop.f32.mrf.mxu0  ;;  %v4348_v3 = vpop.f32.mrf.mxu1 }
 0x118   : > { %v4350_v57 = vpop.f32.mrf.mxu0  ;;  %v4352_v61 = vpop.f32.mrf.mxu1 }
 0x11a   : > { %v4354_v15 = vpop.f32.mrf.mxu0  ;;  %v4356_v34 = vpop.f32.mrf.mxu1 }
 0x11c   : > { %v4358_v29 = vpop.f32.mrf.mxu0  ;;  %v4360_v46 = vpop.f32.mrf.mxu1 }
 0x11d   : > { %4631 = vst [vmem:[#allocation5_spill] sm:$0xff] %v4358_v29  ;;  %4632 = vst [vmem:[#allocation6_spill] sm:$0xff] %v4360_v46  ;;  %v4411_v46 = vrot.slane %v2844_v10, %v2860_v52 }
 0x11e   : > { %v4362_v19 = vpop.f32.mrf.mxu0  ;;  %v4364_v62 = vpop.f32.mrf.mxu1 }
 0x11f   : > { %4633 = vst [vmem:[#allocation7_spill] sm:$0xff] %v4362_v19  ;;  %4634 = vst [vmem:[#allocation8_spill] sm:$0xff] %v4364_v62  ;;  %v4407_v19 = vrot.slane %v2844_v10, %v2856_v23 }
 0x120   : > { %v4366_v17 = vpop.f32.mrf.mxu0  ;;  %v4368_v7 = vpop.f32.mrf.mxu1 }
 0x121   : > { %4635 = vst [vmem:[#allocation9_spill] sm:$0xff] %v4366_v17  ;;  %4636 = vst [vmem:[#allocation10_spill] sm:$0xff] %v4368_v7  ;;  %v2868_v7 = vsub.s32 5, %v3600_v5  ;;  %v2876_v17 = vsub.s32 7, %v3600_v5 }
 0x122   : > { %v4370_v50 = vpop.f32.mrf.mxu0  ;;  %v4372_v8 = vpop.f32.mrf.mxu1 }
 0x123   : > { %4637 = vst [vmem:[#allocation11_spill] sm:$0xff] %v4370_v50  ;;  %4638 = vst [vmem:[#allocation12_spill] sm:$0xff] %v4372_v8  ;;  %v4425_v23 = vrot.slane %v2844_v10, %v2876_v17 }
 0x124   : > { %v4374_v31 = vpop.f32.mrf.mxu0  ;;  %v4376_v2 = vpop.f32.mrf.mxu1 }
 0x125   : > { %4639 = vst [vmem:[#allocation13_spill] sm:$0xff] %v4374_v31  ;;  %4640 = vst [vmem:[#allocation14_spill] sm:$0xff] %v4376_v2  ;;  %v2864_v2 = vsub.s32 4, %v3600_v5  ;;  %v2872_v31 = vsub.s32 6, %v3600_v5 }
 0x126   : > { %v2151_v39 = vpop.f32.mrf.mxu0  ;;  %v2204_v11 = vpop.f32.mrf.mxu1 }
 0x127   : > { %v2205_v5 = vadd.f32 %v2204_v11, %v4316_v25 }
 0x128   : > { %v2153_v6 = vpop.f32.mrf.mxu0  ;;  %v2206_v53 = vpop.f32.mrf.mxu1 }
 0x129   : > { %v2207_v52 = vadd.f32 %v2206_v53, %v4320_v28 }
 0x12a   : > { %v2155_v12 = vpop.f32.mrf.mxu0  ;;  %v2208_v36 = vpop.f32.mrf.mxu1 }
 0x12c   : > { %v2157_v33 = vpop.f32.mrf.mxu0  ;;  %v2210_v21 = vpop.f32.mrf.mxu1 }
 0x12d   : > { %v2211_v25 = vadd.f32 %v2210_v21, %v4328_v41 }
 0x135   : > { %v2161_v51 = vpop.f32.mrf.mxu0  ;;  %v2214_v32 = vpop.f32.mrf.mxu1 }
 0x136   : > { %v2215_v11 = vadd.f32 %v2214_v32, %v4332_v55 }
 0x137   : > { %v2163_v44 = vpop.f32.mrf.mxu0  ;;  %v2216_v63 = vpop.f32.mrf.mxu1 }
 0x138   : > { %v2164_v17 = vadd.f32 %v2163_v44, %v4334_v20 }
 0x139   : > { %v2165_v13 = vpop.f32.mrf.mxu0  ;;  %v2218_v42 = vpop.f32.mrf.mxu1 }
 0x13b   : > { %v2167_v37 = vpop.f32.mrf.mxu0  ;;  %v2220_v16 = vpop.f32.mrf.mxu1 }
 0x13c   : > { %v4447_v41 = vadd.f32 %v2220_v16, %v4344_v1 }
 0x13d   : > { %v2257_v9 = vpop.f32.mrf.mxu0  ;;  %v2310_v47 = vpop.f32.mrf.mxu1 }
 0x13f   : > { %v2259_v43 = vpop.f32.mrf.mxu0  ;;  %v2312_v30 = vpop.f32.mrf.mxu1 }
 0x140   : > { %v4461_v1 = vadd.f32 %v2312_v30, %v4352_v61 }
 0x141   : > { %v2261_v60 = vpop.f32.mrf.mxu0  ;;  %v2314_v45 = vpop.f32.mrf.mxu1 }
 0x142   : > { %v4467_v21 = vadd.f32 %v2314_v45, %v4356_v34 }
 0x143   : > { %v4378_v54 = vpop.f32.mrf.mxu0  ;;  %v4380_v14 = vpop.f32.mrf.mxu1 }
 0x144   : > { %4641 = vst [vmem:[#allocation15_spill] sm:$0xff] %v4378_v54  ;;  %4642 = vst [vmem:[#allocation16_spill] sm:$0xff] %v4380_v14  ;;  %v4409_v14 = vrot.slane %v2844_v10, %v2852_v58  ;;  %v4413_v54 = vrot.slane %v2844_v10, %v2864_v2  ;;  %v2154_v58 = vadd.f32 %v2153_v6, %v4318_v49 }
 0x145   : > { %v4382_v35 = vpop.f32.mrf.mxu0  ;;  %v4384_v4 = vpop.f32.mrf.mxu1  ;;  %v2156_v2 = vadd.f32 %v2155_v12, %v4322_v48  ;;  %v2217_v49 = vadd.f32 %v2216_v63, %v4336_v26  ;;  %v4438_v48 = vadd.f32 %v2165_v13, %v4338_v59  ;;  %v4452_v59 = vadd.f32 %v2257_v9, %v4346_v24 }
 0x146   : > { %4643 = vst [vmem:[#allocation17_spill] sm:$0xff] %v4382_v35  ;;  %4644 = vst [vmem:[#allocation18_spill] sm:$0xff] %v4384_v4  ;;  %v4405_v35 = vrot.slane %v2844_v10, %v2848_v38  ;;  %v4423_v38 = vrot.slane %v2844_v10, %v2868_v7 }
 0x147   : > { %v4395_v8 = vpop.f32.mrf.mxu0  ;;  %v4397_v50 = vpop.f32.mrf.mxu1 }
 0x148   : > { %4645 = vst [vmem:[#allocation19_spill] sm:$0xff] %v4395_v8  ;;  %4646 = vst [vmem:[#allocation20_spill] sm:$0xff] %v4397_v50  ;;  %v4415_v8 = vrot.slane %v2844_v10, %v2872_v31  ;;  %v2152_v50 = vadd.f32 %v2151_v39, %v4314_v18  ;;  %v2209_v31 = vadd.f32 %v2208_v36, %v4324_v22 }
 0x149   : > { %v4401_v4 = vpop.f32.mrf.mxu0  ;;  %v4403_v62 = vpop.f32.mrf.mxu1  ;;  %v2158_v18 = vadd.f32 %v2157_v33, %v4326_v40  ;;  %v2162_v39 = vadd.f32 %v2161_v51, %v4330_v0  ;;  %v4441_v22 = vadd.f32 %v2218_v42, %v4340_v27  ;;  %v4444_v40 = vadd.f32 %v2167_v37, %v4342_v56  ;;  %v4649_v37 = vld [vmem:[#allocation5_spill] sm:$0xff] }
 0x14a   : > { %4647 = vst [vmem:[#allocation21_spill] sm:$0xff] %v4401_v4  ;;  %v4455_v27 = vadd.f32 %v2310_v47, %v4348_v3  ;;  %v4458_v56 = vadd.f32 %v2259_v43, %v4350_v57  ;;  %v4464_v33 = vadd.f32 %v2261_v60, %v4354_v15  ;;  %v4651_v47 = vld [vmem:[#allocation6_spill] sm:$0xff] }
 0x14b   : > { %v4419_v29 = vpop.f32.mrf.mxu0  ;;  %v4421_v4 = vpop.f32.mrf.mxu1  ;;  %v4650_v16 = vld [vmem:[#allocation15_spill] sm:$0xff]  ;;  %v4652_v43 = vld [vmem:[#allocation16_spill] sm:$0xff] }
 0x14c   : > { %4648 = vst [vmem:[#allocation22_spill] sm:$0xff] %v4421_v4  ;;  %v4474_v9 = vadd.f32 %v4650_v16, %v4649_v37  ;;  %v4478_v30 = vadd.f32 %v4652_v43, %v4651_v47 }
 0x14d   : > { %v2634_v7 = vpop.f32.mrf.mxu0  ;;  %v2687_v4 = vpop.f32.mrf.mxu1 }
 0x14e   : > { %v2812_v6 = vadd.f32 %v2634_v7, %v2152_v50  ;;  %v2814_v28 = vadd.f32 %v2687_v4, %v2205_v5 }
 0x14f   : > { %v2636_v0 = vpop.f32.mrf.mxu0  ;;  %v2689_v55 = vpop.f32.mrf.mxu1 }
 0x150   : > { %v2886_v20 = vadd.f32 %v4405_v35, %v2812_v6  ;;  %v2888_v26 = vadd.f32 %v4407_v19, %v2814_v28  ;;  %v2813_v50 = vadd.f32 %v2636_v0, %v2154_v58  ;;  %v2815_v53 = vadd.f32 %v2689_v55, %v2207_v52 }
 0x151   : > { %v2638_v12 = vpop.f32.mrf.mxu0  ;;  %v2691_v36 = vpop.f32.mrf.mxu1 }
 0x152   : > { %v2887_v24 = vadd.f32 %v4409_v14, %v2813_v50  ;;  %v2889_v3 = vadd.f32 %v4411_v46, %v2815_v53  ;;  %v2918_v57 = vmax.f32 %v2886_v20, 0.0  ;;  %v2920_v51 = vmax.f32 %v2888_v26, 0.0  ;;  %v4653_v50 = vld [vmem:[#allocation7_spill] sm:$0xff]  ;;  %v4654_v53 = vld [vmem:[#allocation17_spill] sm:$0xff] }
 0x153   : > { %v2820_v32 = vadd.f32 %v2638_v12, %v2156_v2  ;;  %v2822_v61 = vadd.f32 %v2691_v36, %v2209_v31  ;;  %v2640_v44 = vpop.f32.mrf.mxu0  ;;  %v2693_v63 = vpop.f32.mrf.mxu1  ;;  %v4493_v12 = vadd.f32 %v4654_v53, %v4653_v50  ;;  %v4655_v36 = vld [vmem:[#allocation8_spill] sm:$0xff]  ;;  %v4665_v53 = vld [vmem:[#allocation11_spill] sm:$0xff] }
 0x154   : > { %v2919_v15 = vmax.f32 %v2887_v24, 0.0  ;;  %v2921_v13 = vmax.f32 %v2889_v3, 0.0  ;;  %v2821_v42 = vadd.f32 %v2640_v44, %v2158_v18  ;;  %v2823_v34 = vadd.f32 %v2693_v63, %v2211_v25  ;;  %v4656_v24 = vld [vmem:[#allocation18_spill] sm:$0xff] }
 0x155   : > { %v2894_v60 = vadd.f32 %v4405_v35, %v2820_v32  ;;  %v2896_v45 = vadd.f32 %v4407_v19, %v2822_v61  ;;  %v2644_v4 = vpop.f32.mrf.mxu0  ;;  %v2697_v10 = vpop.f32.mrf.mxu1  ;;  %v4497_v3 = vadd.f32 %v4656_v24, %v4655_v36  ;;  %v4667_v24 = vld [vmem:[#allocation12_spill] sm:$0xff] }
 0x156   : > { %v3413_v5 = vpack.c.bf16 %v2919_v15, %v2918_v57  ;;  %v3414_v58 = vpack.c.bf16 %v2921_v13, %v2920_v51  ;;  %v2895_v52 = vadd.f32 %v4409_v14, %v2821_v42  ;;  %v2897_v2 = vadd.f32 %v4411_v46, %v2823_v34 }
 0x157   : > { %v2926_v31 = vmax.f32 %v2894_v60, 0.0  ;;  %v2928_v18 = vmax.f32 %v2896_v45, 0.0  ;;  %v2828_v25 = vadd.f32 %v2644_v4, %v2162_v39  ;;  %v2830_v7 = vadd.f32 %v2697_v10, %v2215_v11  ;;  %v2646_v6 = vpop.f32.mrf.mxu0  ;;  %v2699_v28 = vpop.f32.mrf.mxu1  ;;  %v4657_v60 = vld [vmem:[#allocation9_spill] sm:$0xff]  ;;  %v4658_v45 = vld [vmem:[#allocation19_spill] sm:$0xff]  ;;  %v4659_v10 = vld [vmem:[#allocation10_spill] sm:$0xff] }
 0x158   : > { %3046 = vst [vmem:[%s4483_s18] sm:$0xff] %v3413_v5  ;;  %3047 = vst [vmem:[%s4483_s18 + $0x8] sm:$0xff] %v3414_v58  ;;  %v2927_v0 = vmax.f32 %v2895_v52, 0.0  ;;  %v2929_v55 = vmax.f32 %v2897_v2, 0.0  ;;  %v2829_v20 = vadd.f32 %v2646_v6, %v2164_v17  ;;  %v2831_v26 = vadd.f32 %v2699_v28, %v2217_v49  ;;  %v4660_v5 = vld [vmem:[#allocation20_spill] sm:$0xff] }
 0x159   : > { %v2902_v39 = vadd.f32 %v4405_v35, %v2828_v25  ;;  %v2904_v11 = vadd.f32 %v4407_v19, %v2830_v7  ;;  %v2648_v57 = vpop.f32.mrf.mxu0  ;;  %v2701_v51 = vpop.f32.mrf.mxu1  ;;  %v4511_v4 = vadd.f32 %v4658_v45, %v4657_v60  ;;  %v4515_v58 = vadd.f32 %v4660_v5, %v4659_v10 }
 0x15a   : > { %v3417_v32 = vpack.c.bf16 %v2927_v0, %v2926_v31  ;;  %v3418_v61 = vpack.c.bf16 %v2929_v55, %v2928_v18  ;;  %v2903_v17 = vadd.f32 %v4409_v14, %v2829_v20  ;;  %v2905_v49 = vadd.f32 %v4411_v46, %v2831_v26 }
 0x15b   : > { %v2934_v44 = vmax.f32 %v2902_v39, 0.0  ;;  %v2936_v63 = vmax.f32 %v2904_v11, 0.0  ;;  %v2836_v15 = vadd.f32 %v2648_v57, %v4438_v48  ;;  %v2838_v13 = vadd.f32 %v2701_v51, %v4441_v22  ;;  %v2650_v42 = vpop.f32.mrf.mxu0  ;;  %v2703_v34 = vpop.f32.mrf.mxu1  ;;  %v3071_v11 = vld [vmem:[%s4483_s18 + $0x68] sm:$0xff] }
 0x15c   : > { %3053 = vst [vmem:[%s4483_s18 + $0x20] sm:$0xff] %v3417_v32  ;;  %3054 = vst [vmem:[%s4483_s18 + $0x28] sm:$0xff] %v3418_v61  ;;  %v2935_v37 = vmax.f32 %v2903_v17, 0.0  ;;  %v2937_v16 = vmax.f32 %v2905_v49, 0.0  ;;  %v2837_v47 = vadd.f32 %v2650_v42, %v4444_v40  ;;  %v2839_v43 = vadd.f32 %v2703_v34, %v4447_v41 }
 0x15d   : > { %v2910_v48 = vadd.f32 %v4405_v35, %v2836_v15  ;;  %v2912_v22 = vadd.f32 %v4407_v19, %v2838_v13  ;;  %v2740_v41 = vpop.f32.mrf.mxu0  ;;  %v2793_v52 = vpop.f32.mrf.mxu1  ;;  %v2325_v39 = vadd.f32 %v4403_v62, %v4667_v24  ;;  %v4674_v35 = vld [vmem:[#allocation22_spill] sm:$0xff] }
 0x15e   : > { %v3421_v2 = vpack.c.bf16 %v2935_v37, %v2934_v44  ;;  %v3422_v31 = vpack.c.bf16 %v2937_v16, %v2936_v63  ;;  %v2911_v18 = vadd.f32 %v4409_v14, %v2837_v47  ;;  %v2913_v19 = vadd.f32 %v4411_v46, %v2839_v43  ;;  %v4666_v46 = vld [vmem:[#allocation21_spill] sm:$0xff] }
 0x15f   : > { %v2942_v25 = vmax.f32 %v2910_v48, 0.0  ;;  %v2944_v7 = vmax.f32 %v2912_v22, 0.0  ;;  %v2816_v6 = vadd.f32 %v2740_v41, %v4452_v59  ;;  %v2818_v28 = vadd.f32 %v2793_v52, %v4455_v27  ;;  %v2742_v0 = vpop.f32.mrf.mxu0  ;;  %v2795_v55 = vpop.f32.mrf.mxu1  ;;  %v3068_v27 = vld [vmem:[%s4483_s18 + $0x60] sm:$0xff] }
 0x160   : > { %3057 = vst [vmem:[%s4483_s18 + $0x40] sm:$0xff] %v3421_v2  ;;  %3058 = vst [vmem:[%s4483_s18 + $0x48] sm:$0xff] %v3422_v31  ;;  %v2943_v14 = vmax.f32 %v2911_v18, 0.0  ;;  %v2945_v20 = vmax.f32 %v2913_v19, 0.0  ;;  %v2817_v26 = vadd.f32 %v2742_v0, %v4458_v56  ;;  %v2819_v50 = vadd.f32 %v2795_v55, %v4461_v1  ;;  %v4672_v2 = vld [vmem:[#allocation13_spill] sm:$0xff]  ;;  %v4673_v18 = vld [vmem:[#allocation14_spill] sm:$0xff] }
 0x161   : > { %v2272_v36 = vadd.f32 %v4666_v46, %v4665_v53  ;;  %v2890_v56 = vadd.f32 %v4413_v54, %v2816_v6  ;;  %v2892_v1 = vadd.f32 %v4415_v8, %v2818_v28  ;;  %v2744_v57 = vpop.f32.mrf.mxu0  ;;  %v2797_v51 = vpop.f32.mrf.mxu1  ;;  %v2274_v31 = vadd.f32 %v4419_v29, %v4672_v2 }
 0x162   : > { %v3425_v32 = vpack.c.bf16 %v2943_v14, %v2942_v25  ;;  %v3426_v62 = vpack.c.bf16 %v2945_v20, %v2944_v7  ;;  %v2891_v61 = vadd.f32 %v4423_v38, %v2817_v26  ;;  %v2893_v17 = vadd.f32 %v4425_v23, %v2819_v50 }
 0x163   : > { %v2922_v49 = vmax.f32 %v2890_v56, 0.0  ;;  %v2924_v44 = vmax.f32 %v2892_v1, 0.0  ;;  %v2824_v63 = vadd.f32 %v2744_v57, %v4464_v33  ;;  %v2826_v15 = vadd.f32 %v2797_v51, %v4467_v21  ;;  %v2746_v13 = vpop.f32.mrf.mxu0  ;;  %v2799_v42 = vpop.f32.mrf.mxu1 }
 0x164   : > { %v3069_v34 = vsel %vm4547_vm15, %v3425_v32, %v3068_v27  ;;  %v3072_v37 = vsel %vm4547_vm15, %v3426_v62, %v3071_v11  ;;  %v2923_v16 = vmax.f32 %v2891_v61, 0.0  ;;  %v2925_v47 = vmax.f32 %v2893_v17, 0.0 }
 0x165   : > { %3070 = vst [vmem:[%s4483_s18 + $0x60] sm:$0xff] %v3069_v34  ;;  %3073 = vst [vmem:[%s4483_s18 + $0x68] sm:$0xff] %v3072_v37  ;;  %v2898_v33 = vadd.f32 %v4413_v54, %v2824_v63  ;;  %v2900_v21 = vadd.f32 %v4415_v8, %v2826_v15  ;;  %v2825_v60 = vadd.f32 %v2746_v13, %v4474_v9  ;;  %v2750_v10 = vpop.f32.mrf.mxu0  ;;  %v2803_v5 = vpop.f32.mrf.mxu1 }
 0x166   : > { %v2827_v45 = vadd.f32 %v2799_v42, %v4478_v30  ;;  %v3415_v48 = vpack.c.bf16 %v2923_v16, %v2922_v49  ;;  %v3416_v22 = vpack.c.bf16 %v2925_v47, %v2924_v44  ;;  %v2832_v41 = vadd.f32 %v2750_v10, %v4493_v12 }
 0x167   : > { %v2834_v52 = vadd.f32 %v2803_v5, %v4497_v3  ;;  %v2327_v19 = vadd.f32 %v4674_v35, %v4673_v18  ;;  %v2899_v25 = vadd.f32 %v4423_v38, %v2825_v60  ;;  %v2752_v7 = vpop.f32.mrf.mxu0  ;;  %v2805_v30 = vpop.f32.mrf.mxu1  ;;  %v2930_v28 = vmax.f32 %v2898_v33, 0.0 }
 0x168   : > { %v2901_v9 = vadd.f32 %v4425_v23, %v2827_v45  ;;  %3048 = vst [vmem:[%s4483_s18 + $0x10] sm:$0xff] %v3415_v48  ;;  %3052 = vst.msk [vmem:[%s4483_s18 + $0x18] sm:$0xff] %vm4567_vm0, %v3416_v22  ;;  %v2906_v12 = vadd.f32 %v4413_v54, %v2832_v41  ;;  %v2833_v6 = vadd.f32 %v2752_v7, %v4511_v4  ;;  %v2932_v0 = vmax.f32 %v2900_v21, 0.0 }
 0x169   : > { %v2908_v3 = vadd.f32 %v4415_v8, %v2834_v52  ;;  %v2835_v29 = vadd.f32 %v2805_v30, %v4515_v58  ;;  %v2931_v55 = vmax.f32 %v2899_v25, 0.0  ;;  %v2754_v20 = vpop.f32.mrf.mxu0  ;;  %v2807_v26 = vpop.f32.mrf.mxu1 }
 0x16a   : > { %v2933_v14 = vmax.f32 %v2901_v9, 0.0  ;;  %v2938_v50 = vmax.f32 %v2906_v12, 0.0  ;;  %v2907_v46 = vadd.f32 %v4423_v38, %v2833_v6  ;;  %v2840_v56 = vadd.f32 %v2754_v20, %v2272_v36 }
 0x16b   : > { %v2940_v53 = vmax.f32 %v2908_v3, 0.0  ;;  %v2909_v24 = vadd.f32 %v4425_v23, %v2835_v29  ;;  %v3419_v27 = vpack.c.bf16 %v2931_v55, %v2930_v28  ;;  %v2842_v4 = vadd.f32 %v2807_v26, %v2325_v39  ;;  %v2756_v58 = vpop.f32.mrf.mxu0  ;;  %v2809_v1 = vpop.f32.mrf.mxu1 }
 0x16c   : > { %v3420_v11 = vpack.c.bf16 %v2933_v14, %v2932_v0  ;;  %v2939_v57 = vmax.f32 %v2907_v46, 0.0  ;;  %v2841_v32 = vadd.f32 %v2756_v58, %v2274_v31  ;;  %v2843_v62 = vadd.f32 %v2809_v1, %v2327_v19 }
 0x16d   : > { %v2941_v51 = vmax.f32 %v2909_v24, 0.0  ;;  %3055 = vst [vmem:[%s4483_s18 + $0x30] sm:$0xff] %v3419_v27  ;;  %v2914_v61 = vadd.f32 %v4413_v54, %v2840_v56  ;;  %v2916_v17 = vadd.f32 %v4415_v8, %v2842_v4  ;;  %v3074_v8 = vld [vmem:[%s4483_s18 + $0x70] sm:$0xff] }
 0x16e   : > { %3056 = vst.msk [vmem:[%s4483_s18 + $0x38] sm:$0xff] %vm4567_vm0, %v3420_v11  ;;  %v3423_v36 = vpack.c.bf16 %v2939_v57, %v2938_v50  ;;  %v2915_v49 = vadd.f32 %v4423_v38, %v2841_v32  ;;  %v2917_v44 = vadd.f32 %v4425_v23, %v2843_v62  ;;  %v3080_v38 = vld [vmem:[%s4483_s18 + $0x78] sm:$0xff] }
 0x16f   : > { %v3424_v39 = vpack.c.bf16 %v2941_v51, %v2940_v53  ;;  %v2946_v63 = vmax.f32 %v2914_v61, 0.0  ;;  %v2948_v15 = vmax.f32 %v2916_v17, 0.0 }
 0x170   : > { %3059 = vst [vmem:[%s4483_s18 + $0x50] sm:$0xff] %v3423_v36  ;;  %v2947_v54 = vmax.f32 %v2915_v49, 0.0  ;;  %v2949_v13 = vmax.f32 %v2917_v44, 0.0 }
 0x171   : > { %3060 = vst.msk [vmem:[%s4483_s18 + $0x58] sm:$0xff] %vm4567_vm0, %v3424_v39 }
 0x172   : > { %v3427_v42 = vpack.c.bf16 %v2947_v54, %v2946_v63  ;;  %v3428_v34 = vpack.c.bf16 %v2949_v13, %v2948_v15 }
 0x174   : > { %v3075_v23 = vsel %vm4547_vm15, %v3427_v42, %v3074_v8  ;;  %v3081_v37 = vsel %vm3079_vm2, %v3428_v34, %v3080_v38 }
 0x175   : > { %3076 = vst [vmem:[%s4483_s18 + $0x70] sm:$0xff] %v3075_v23  ;;  %3082 = vst [vmem:[%s4483_s18 + $0x78] sm:$0xff] %v3081_v37 }
 0x176 PF: > { %s15_s17 = sadd.s32 1, %s3520_s17   ;;  %s4675_s15 = smov %s3516_s16 }
 0x177   : > { %p12_p2 = scmp.ge.s32.totalorder %s15_s17, 4   ;;  %s4676_s16 = smov %s4678_s19 }
 0x179   :  { %14 = sbr.rel (!%p12_p2) target bundleno = 2 (0x2), region = 76 }
 0x17e   :  { %3115 = vsyncpa [#allocation3], 1 }
 0x17f   :  { %3117 = vsyncpa [#allocation3 + $0x1], 1 }

// kernel: rel_conv2d_subsampling8.7
= control target key start
LH: loop header
LB: loop body
LE: loop exit
PB: predicated region body
PF: predicated region fallthrough
CT: control target
= control target key end

     0   :  { %v234_v0 = vmov 0   ;;  %vm145_vm0 = vcmask 785408   ;;  %vm190_vm1 = vcmask 261120   ;;  %vm192_vm2 = vcmask 259072   ;;  %s312_s1 = inlined_call_operand.vmem [shape: bf16[224,32], index: 1, kind: input, shape index: {}]   ;;  %s313_s0 = inlined_call_operand.vmem [shape: bf16[14,224], index: 0, kind: input, shape index: {}]   ;;  %s314_s2 = inlined_call_operand.vmem [shape: f32[1,32], index: 2, kind: input, shape index: {}]   ;;  %s315_s3 = inlined_call_operand.vmem [shape: f32[14,32], index: 3, kind: output, shape index: {}]  }
   0x1   :  { %149 = vmatprep.subr.bf16.mxu0 %v234_v0  ;;  %v217_v1 = vld [vmem:[%s312_s1 + $0x38] sm:$0xff]   ;;  %v218_v2 = vld [vmem:[%s312_s1 + $0x30] sm:$0xff]   ;;  %v219_v3 = vld [vmem:[%s312_s1 + $0x28] sm:$0xff]  }
   0x2   :  { %150 = vmatpush1.bf16.msra.mxu0 %v217_v1  ;;  %v220_v4 = vld [vmem:[%s312_s1 + $0x20] sm:$0xff]   ;;  %v221_v5 = vld [vmem:[%s312_s1 + $0x18] sm:$0xff]   ;;  %v222_v7 = vld [vmem:[%s312_s1 + $0x10] sm:$0xff]  }
   0x3   :  { %151 = vmatprep.subr.bf16.mxu0 %v234_v0  ;;  %v233_v6 = vld [vmem:[%s313_s0 + $0x4] ss:$8 sps:$4 sm:$0x7f]   ;;  %v227_v12 = vld [vmem:[%s312_s1 + $0x58] sm:$0xff]   ;;  %v228_v13 = vld [vmem:[%s312_s1 + $0x50] sm:$0xff]  }
   0x4   :  { %215 = vmatprep.mubr.msk.bf16.mxu0 %vm145_vm0, %v233_v6  ;;  %v223_v8 = vld [vmem:[%s312_s1 + $0x8] sm:$0xff]   ;;  %v224_v9 = vld [vmem:[%s312_s1] sm:$0xff]  }
   0x5   :  { %v225_v10 = vld [vmem:[%s312_s1 + $0x68] sm:$0xff]   ;;  %v226_v11 = vld [vmem:[%s312_s1 + $0x60] sm:$0xff]  }
   0x6   :  { %152 = vmatpush1.bf16.msra.mxu0 %v218_v2  ;;  %v229_v14 = vld [vmem:[%s312_s1 + $0x48] sm:$0xff]   ;;  %v230_v15 = vld [vmem:[%s312_s1 + $0x40] sm:$0xff]  }
   0x7   :  { %153 = vmatprep.subr.bf16.mxu0 %v234_v0  ;;  %v231_v16 = vld [vmem:[%s313_s0] ss:$8 sps:$4 sm:$0x7f]  }
   0x8   :  { %v198_v17 = vld [vmem:[%s314_s2] ss:$0 sm:$0xff] }
   0xa   :  { %154 = vmatpush1.bf16.msra.mxu0 %v219_v3 }
   0xb   :  { %155 = vmatprep.subr.bf16.mxu0 %v234_v0 }
   0xe   :  { %156 = vmatpush1.bf16.msra.mxu0 %v220_v4 }
   0xf   :  { %157 = vmatprep.subr.bf16.mxu0 %v234_v0 }
  0x12   :  { %158 = vmatpush1.bf16.msra.mxu0 %v221_v5 }
  0x13   :  { %159 = vmatprep.subr.bf16.mxu0 %v234_v0 }
  0x16   :  { %160 = vmatpush1.bf16.msra.mxu0 %v222_v7 }
  0x17   :  { %161 = vmatprep.subr.bf16.mxu0 %v234_v0 }
  0x1a   :  { %162 = vmatpush1.bf16.msra.mxu0 %v223_v8 }
  0x1b   :  { %163 = vmatprep.subr.bf16.mxu0 %v234_v0 }
  0x1e   :  { %164 = vmatpush1.bf16.msra.mxu0 %v224_v9 }
  0x1f   :  { %169 = vmatprep.subr.bf16.mxu0 %v234_v0 }
  0x22   :  { %170 = vmatpush2.bf16.msra.mxu0 %v225_v10 }
  0x23   :  { %171 = vmatprep.subr.bf16.mxu0 %v234_v0 }
  0x26   :  { %172 = vmatpush2.bf16.msra.mxu0 %v226_v11 }
  0x27   :  { %173 = vmatprep.subr.bf16.mxu0 %v234_v0 }
  0x2a   :  { %174 = vmatpush2.bf16.msra.mxu0 %v227_v12 }
  0x2b   :  { %175 = vmatprep.subr.bf16.mxu0 %v234_v0 }
  0x2e   :  { %176 = vmatpush2.bf16.msra.mxu0 %v228_v13 }
  0x2f   :  { %177 = vmatprep.subr.bf16.mxu0 %v234_v0 }
  0x32   :  { %178 = vmatpush2.bf16.msra.mxu0 %v229_v14 }
  0x33   :  { %179 = vmatprep.subr.bf16.mxu0 %v234_v0 }
  0x36   :  { %180 = vmatpush2.bf16.msra.mxu0 %v230_v15 }
  0x39   :  { %182 = vmatmul.mubr.bf16.vlgmr.msra.gmra.mxu0 %v231_v16 }
  0xf9   :  { %v183_v18 = vpop.f32.mrf.mxu0 }
  0xfa   :  { %v184_v19 = vadd.f32 %v198_v17, %v183_v18 }
  0xfb   :  { %v185_v20 = vpop.f32.mrf.mxu0 }
  0xfc   :  { %191 = vst.msk [vmem:[%s315_s3] sm:$0xff] %vm190_vm1, %v184_v19 }
  0xfd   :  { %v186_v21 = vpop.f32.mrf.mxu0 }
  0xfe   :  { %v187_v22 = vadd.f32 %v198_v17, %v186_v21 }
  0xff   :  { %v188_v23 = vpop.f32.mrf.mxu0 }
 0x100   :  { %193 = vst.msk [vmem:[%s315_s3 + $0x8] sm:$0x3f] %vm192_vm2, %v187_v22 }

// kernel: rel_conv2d_subsampling8.6
= control target key start
LH: loop header
LB: loop body
LE: loop exit
PB: predicated region body
PF: predicated region fallthrough
CT: control target
= control target key end

     0   :  { %s2915_s15 = smov 0   ;;  %s2917_s16 = smov 0   ;;  %s3499_s0 = inlined_call_operand.vmem [shape: bf16[2,15,7,96], index: 0, kind: input, shape index: {}, may-alias: {0,1}]   ;;  %s3500_s1 = inlined_call_operand.vmem [shape: bf16[2,15,7,96], index: 1, kind: input, shape index: {}, may-alias: {0,1}]   ;;  %s3501_s2 = inlined_call_operand.vmem [shape: bf16[3,96,32], index: 2, kind: input, shape index: {}]   ;;  %s3502_s3 = inlined_call_operand.vmem [shape: f32[1,32], index: 3, kind: input, shape index: {}]   ;;  %s3503_s4 = inlined_call_operand.vmem [shape: bf16[2,7,7,32], index: 4, kind: output, shape index: {}]  }
   0x1   :  { %s2919_s17 = smov 0  }
   0x2 LB: > { %s26_s18 = sadd.s32 1, %s2883_s16  ;;  %p2596_p0 = scmp.ge.s32.totalorder %s2887_s17, 1  ;;  %s2887_s17 = sphi %s2919_s17, %s14_s17   ;;  %s2883_s16 = sphi %s2917_s16, %s3507_s16   ;;  %s2879_s15 = sphi %s2915_s15, %s3506_s15  }
   0x3   : > { %p28_p1 = scmp.ge.s32.totalorder %s26_s18, 2  ;;  %p232_p2 = scmp.lt.s32.totalorder %s2887_s17, 3 }
   0x5   : > { %s3509_s18 = smov (%p28_p1, %s26_s18), 0  ;;  %p233_p3 = pnand %p2596_p0, %p232_p2 }
   0x6   : > { %p292_p4 = scmp.lt.s32.totalorder (!%p233_p3), %s2879_s15, 1 }
   0x7   : > { %236 = sbr.rel (%p233_p3) target bundleno = 340 (0x154), region = 36 }
   0xc   : > { %v2847_v0 = vld [vmem:[%s3501_s2 + $0x58] sm:$0xff]   ;;  %v2848_v1 = vld [vmem:[%s3501_s2 + $0x28] sm:$0xff]   ;;  %v2849_v2 = vld [vmem:[%s3501_s2 + $0x50] sm:$0xff]   ;;  %s3511_s15 = smov (!%p292_p4, %s2879_s15), 1  ;;  %v375_v6 = vlaneseq  ;;  %v2889_v14 = vmov 1966171168  }
   0xd   : > { %2746 = vmatprep.subr.bf16.mxu0 %v2847_v0  ;;  %2766 = vmatprep.subr.bf16.mxu1 %v2848_v1  ;;  %v2850_v3 = vld [vmem:[%s3501_s2 + $0x20] sm:$0xff]   ;;  %v2851_v4 = vld [vmem:[%s3501_s2 + $0x48] sm:$0xff]   ;;  %s2818_s29 = smul.u32 60, %s3511_s15  ;;  %v2852_v5 = vld [vmem:[%s3501_s2 + $0x18] sm:$0xff]   ;;  %v373_v15 = vunpack.c.l.s4 %v2889_v14  ;;  %vm1052_vm0 = vcmask 785408   ;;  %vm2463_vm1 = vcmask 257024  }
   0xe   : > { %2747 = vmatpush3.bf16.msra.mxu0 %v2847_v0  ;;  %2767 = vmatpush3.bf16.msra.mxu1 %v2848_v1  ;;  %v2853_v7 = vld [vmem:[%s3501_s2 + $0x40] sm:$0xff]   ;;  %v2854_v8 = vld [vmem:[%s3501_s2 + $0x10] sm:$0xff]   ;;  %v2855_v9 = vld [vmem:[%s3501_s2 + $0x38] sm:$0xff]   ;;  %v376_v11 = vshrl.u32 %v375_v6, 7  ;;  %vm2464_vm2 = vsmask.f32 3328 }
   0xf   : > { %2748 = vmatprep.subr.bf16.mxu0 %v2849_v2  ;;  %2768 = vmatprep.subr.bf16.mxu1 %v2850_v3  ;;  %s2965_s12 = scalar_lea.vmem %s3499_s0, %s2818_s29  ;;  %v2856_v10 = vld [vmem:[%s3501_s2 + $0x8] sm:$0xff]   ;;  %v2857_v17 = vld [vmem:[%s3501_s2 + $0x30] sm:$0xff]   ;;  %v2858_v18 = vld [vmem:[%s3501_s2] sm:$0xff]   ;;  %v374_v19 = vunpack.c.0.s8 %v373_v15  ;;  %s3224_s10 = sadd.s32 56, %s2818_s29 }
  0x10   : > { %v2607_v12 = vld.sshfl [vmem:[%s2965_s12 + $0x4] sm:$0x33 pattern:$0x75316420]  ;;  %v3001_v41 = vld [vmem:[%s3501_s2 + $0x88] sm:$0xff]   ;;  %s321_s14 = scalar_lea.vmem %s3500_s1, %s3224_s10  ;;  %s2820_s21 = smul.u32 28, %s3511_s15  ;;  %vm3404_vm3 = vmand %vm2463_vm1, %vm2464_vm2 }
  0x11   : > { %v2608_v13 = vld.sshfl [vmem:[%s2965_s12 + $0xc] sm:$0x33 pattern:$0x75316420]  ;;  %v607_v20 = vcombine.high %v2607_v12, %v2607_v12  ;;  %v2984_v25 = vsub.s32 %v374_v19, %v376_v11 }
  0x12   : > { %2749 = vmatpush3.bf16.msra.mxu0 %v2849_v2  ;;  %2769 = vmatpush3.bf16.msra.mxu1 %v2850_v3  ;;  %v2609_v16 = vld.sshfl [vmem:[%s2965_s12 + $0x14] sm:$0x33 pattern:$0x75316420]  ;;  %v631_v21 = vcombine.high %v2608_v13, %v2608_v13  ;;  %s3388_s23 = scalar_lea.vmem %s3503_s4, %s2820_s21 }
  0x13   : > { %2750 = vmatprep.subr.bf16.mxu0 %v2851_v4  ;;  %2770 = vmatprep.subr.bf16.mxu1 %v2852_v5  ;;  %v2600_v22 = vld.sshfl [vmem:[%s2965_s12] sm:$0x33 pattern:$0x75316420]  ;;  %v655_v23 = vcombine.high %v2609_v16, %v2609_v16  ;;  %v614_v30 = vrot.slane %v2607_v12, %v2984_v25  ;;  %v621_v31 = vrot.slane %v607_v20, %v2984_v25 }
  0x14   : > { %v2601_v24 = vld.sshfl [vmem:[%s2965_s12 + $0x8] sm:$0x33 pattern:$0x75316420]  ;;  %v371_v27 = vcombine.high %v2600_v22, %v2600_v22  ;;  %v638_v32 = vrot.slane %v2608_v13, %v2984_v25  ;;  %v645_v33 = vrot.slane %v631_v21, %v2984_v25  ;;  %v2992_v34 = vrot.slane %v2609_v16, %v2984_v25 }
  0x15   : > { %v2602_v26 = vld.sshfl [vmem:[%s2965_s12 + $0x10] sm:$0x33 pattern:$0x75316420]  ;;  %v395_v28 = vcombine.high %v2601_v24, %v2601_v24  ;;  %v2995_v35 = vrot.slane %v655_v23, %v2984_v25  ;;  %v378_v36 = vrot.slane %v2600_v22, %v2984_v25  ;;  %v622_v37 = vcombine.high %v614_v30, %v614_v30 }
  0x16   : > { %2751 = vmatpush3.bf16.msra.mxu0 %v2851_v4  ;;  %2771 = vmatpush3.bf16.msra.mxu1 %v2852_v5  ;;  %v419_v29 = vcombine.high %v2602_v26, %v2602_v26  ;;  %v623_v38 = vcombine.high %v621_v31, %v621_v31  ;;  %v646_v39 = vcombine.high %v638_v32, %v638_v32  ;;  %v776_v44 = vunpack.i.h.s16 %v638_v32  ;;  %v2610_v6 = vld.sshfl [vmem:[%s2965_s12 + $0x1c] sm:$0x33 pattern:$0x75316420] }
  0x17   : > { %2752 = vmatprep.subr.bf16.mxu0 %v2853_v7  ;;  %2772 = vmatprep.subr.bf16.mxu1 %v2854_v8  ;;  %v647_v40 = vcombine.high %v645_v33, %v645_v33  ;;  %v670_v42 = vcombine.high %v2992_v34, %v2992_v34  ;;  %v671_v43 = vcombine.high %v2995_v35, %v2995_v35  ;;  %v778_v45 = vunpack.i.h.s16 %v645_v33  ;;  %v2611_v15 = vld.sshfl [vmem:[%s2965_s12 + $0x24] sm:$0x33 pattern:$0x75316420] }
  0x18   : > { %v780_v46 = vunpack.i.h.s16 %v646_v39  ;;  %v2626_v47 = vpack.i.b16 %v638_v32, %v623_v38  ;;  %v855_v48 = vcombine.low %v614_v30, %v621_v31  ;;  %v385_v49 = vrot.slane %v371_v27, %v2984_v25 }
  0x19   : > { %v2627_v50 = vpack.i.b16 %v645_v33, %v776_v44  ;;  %v2628_v51 = vpack.i.b16 %v646_v39, %v778_v45  ;;  %v386_v52 = vcombine.high %v378_v36, %v378_v36  ;;  %v3009_v53 = vrot.slane %v2601_v24, %v2984_v25 }
  0x1a   : > { %2753 = vmatpush3.bf16.msra.mxu0 %v2853_v7  ;;  %2773 = vmatpush3.bf16.msra.mxu1 %v2854_v8  ;;  %v2629_v54 = vpack.i.b16 %v647_v40, %v780_v46  ;;  %v856_v55 = vcombine.low %v622_v37, %v2626_v47  ;;  %v865_v56 = vrot.slane %v855_v48, %v2984_v25 }
  0x1b   : > { %2754 = vmatprep.subr.bf16.mxu0 %v2855_v9  ;;  %2774 = vmatprep.subr.bf16.mxu1 %v2856_v10  ;;  %v387_v57 = vcombine.high %v385_v49, %v385_v49  ;;  %v857_v58 = vcombine.low %v2627_v50, %v2628_v51  ;;  %v3014_v59 = vrot.slane %v395_v28, %v2984_v25  ;;  %v540_v1 = vunpack.i.h.s16 %v3009_v53  ;;  %v2603_v50 = vld.sshfl [vmem:[%s2965_s12 + $0x18] sm:$0x33 pattern:$0x75316420] }
  0x1c   : > { %v3018_v60 = vcombine.high %v3009_v53, %v3009_v53  ;;  %v3021_v61 = vrot.slane %v2602_v26, %v2984_v25  ;;  %v858_v62 = vcombine.low %v2629_v54, %v2992_v34  ;;  %v872_v63 = vrot.slane %v856_v55, %v2984_v25 }
  0x1d   : > { %v3027_v0 = vrot.slane %v419_v29, %v2984_v25  ;;  %v879_v2 = vrot.slane %v857_v58, %v2984_v25  ;;  %v3033_v3 = vcombine.high %v3014_v59, %v3014_v59  ;;  %v542_v4 = vunpack.i.h.s16 %v3014_v59 }
  0x1e   : > { %2755 = vmatpush3.bf16.msra.mxu0 %v2855_v9  ;;  %2775 = vmatpush3.bf16.msra.mxu1 %v2856_v10  ;;  %v544_v5 = vunpack.i.h.s16 %v3018_v60  ;;  %v886_v7 = vrot.slane %v858_v62, %v2984_v25  ;;  %v887_v8 = vcombine.low %v865_v56, %v872_v63  ;;  %v2648_v9 = vpack.i.b16 %v3009_v53, %v387_v57  ;;  %v2604_v56 = vld.sshfl [vmem:[%s2965_s12 + $0x20] sm:$0x33 pattern:$0x75316420] }
  0x1f   : > { %2756 = vmatprep.subr.bf16.mxu0 %v2857_v17  ;;  %2776 = vmatprep.subr.bf16.mxu1 %v2858_v18  ;;  %v2649_v10 = vpack.i.b16 %v3014_v59, %v540_v1  ;;  %v2650_v11 = vpack.i.b16 %v3018_v60, %v542_v4  ;;  %v1154_v13 = vcombine.low %v378_v36, %v385_v49 }
  0x20   : > { %v2651_v12 = vpack.i.b16 %v3033_v3, %v544_v5  ;;  %v2683_v14 = vpack.i.b16 %v3021_v61, %v3033_v3  ;;  %v888_v16 = vcombine.low %v879_v2, %v886_v7  ;;  %v679_v19 = vcombine.high %v2610_v6, %v2610_v6 }
  0x21   : > { %v1156_v20 = vcombine.low %v2649_v10, %v2650_v11  ;;  %v1164_v22 = vrot.slane %v1154_v13, %v2984_v25  ;;  %v686_v23 = vrot.slane %v2610_v6, %v2984_v25  ;;  %v703_v28 = vcombine.high %v2611_v15, %v2611_v15 }
  0x22   : > { %2757 = vmatpush3.bf16.msra.mxu0 %v2857_v17  ;;  %2777 = vmatpush3.bf16.msra.mxu1 %v2858_v18  ;;  %v895_v17 = vrot.slane %v887_v8, %v2984_v25  ;;  %v1155_v18 = vcombine.low %v386_v52, %v2648_v9  ;;  %v1157_v21 = vcombine.low %v2651_v12, %v3021_v61 }
  0x23   : > { %2786 = vmatprep.subr.bf16.mxu0 %v3001_v41  ;;  %2806 = vmatprep.subr.bf16.mxu1 %v3001_v41  ;;  %v902_v24 = vrot.slane %v888_v16, %v2984_v25  ;;  %v693_v27 = vrot.slane %v679_v19, %v2984_v25  ;;  %v1178_v29 = vrot.slane %v1156_v20, %v2984_v25  ;;  %v790_v40 = vunpack.i.h.s16 %v686_v23 }
  0x24   : > { %v1171_v26 = vrot.slane %v1155_v18, %v2984_v25  ;;  %v1185_v30 = vrot.slane %v1157_v21, %v2984_v25  ;;  %v694_v31 = vcombine.high %v686_v23, %v686_v23  ;;  %v3056_v32 = vrot.slane %v2611_v15, %v2984_v25 }
  0x25   : > { %v903_v33 = vcombine.low %v895_v17, %v902_v24  ;;  %v695_v37 = vcombine.high %v693_v27, %v693_v27  ;;  %v3059_v38 = vrot.slane %v703_v28, %v2984_v25  ;;  %v792_v44 = vunpack.i.h.s16 %v693_v27 }
  0x26   : > { %v1186_v36 = vcombine.low %v1164_v22, %v1171_v26  ;;  %v1187_v39 = vcombine.low %v1178_v29, %v1185_v30  ;;  %v794_v45 = vunpack.i.h.s16 %v694_v31  ;;  %v2630_v47 = vpack.i.b16 %v686_v23, %v671_v43  ;;  %v2612_v23 = vld.sshfl [vmem:[%s2965_s12 + $0x2c] sm:$0x33 pattern:$0x75316420] }
  0x27   : > { %2758 = vmatprep.mubr.msk.bf16.mxu0 %vm1052_vm0, %v903_v33  ;;  %v904_v48 = vcombine.low %v2995_v35, %v670_v42  ;;  %v907_v49 = vcombine.low %v3056_v32, %v3059_v38  ;;  %v2631_v52 = vpack.i.b16 %v693_v27, %v790_v40  ;;  %v2632_v54 = vpack.i.b16 %v694_v31, %v792_v44  ;;  %v2613_v29 = vld.sshfl [vmem:[%s2965_s12 + $0x34] sm:$0x33 pattern:$0x75316420] }
  0x28   : > { %v1194_v46 = vrot.slane %v1186_v36, %v2984_v25  ;;  %v1201_v51 = vrot.slane %v1187_v39, %v2984_v25  ;;  %v2633_v55 = vpack.i.b16 %v695_v37, %v794_v45  ;;  %v3079_v43 = vcombine.high %v3021_v61, %v3021_v61  ;;  %v3126_v39 = vld [vmem:[%s3501_s2 + $0x80] sm:$0xff]  }
  0x29   : > { %v914_v57 = vrot.slane %v904_v48, %v2984_v25  ;;  %v935_v58 = vrot.slane %v907_v49, %v2984_v25  ;;  %v3083_v34 = vcombine.high %v3027_v0, %v3027_v0  ;;  %v905_v42 = vcombine.low %v2630_v47, %v2631_v52 }
  0x2a   : > { %v1202_v35 = vcombine.low %v1194_v46, %v1201_v51  ;;  %v906_v62 = vcombine.low %v2632_v54, %v2633_v55  ;;  %v443_v63 = vcombine.high %v2603_v50, %v2603_v50  ;;  %v3086_v1 = vrot.slane %v2603_v50, %v2984_v25 }
  0x2b   : > { %v467_v2 = vcombine.high %v2604_v56, %v2604_v56  ;;  %v474_v4 = vrot.slane %v2604_v56, %v2984_v25  ;;  %v1203_v5 = vcombine.low %v3027_v0, %v3079_v43  ;;  %v921_v6 = vrot.slane %v905_v42, %v2984_v25 }
  0x2c   : > { %2778 = vmatprep.mubr.msk.bf16.mxu1 %vm1052_vm0, %v1202_v35  ;;  %v928_v7 = vrot.slane %v906_v62, %v2984_v25  ;;  %v3095_v8 = vrot.slane %v443_v63, %v2984_v25  ;;  %v718_v9 = vcombine.high %v3056_v32, %v3056_v32  ;;  %v3101_v10 = vcombine.high %v3086_v1, %v3086_v1  ;;  %v2605_v63 = vld.sshfl [vmem:[%s2965_s12 + $0x28] sm:$0x33 pattern:$0x75316420] }
  0x2d   : > { %v3104_v11 = vrot.slane %v467_v2, %v2984_v25  ;;  %v554_v12 = vunpack.i.h.s16 %v3086_v1  ;;  %v561_v13 = vunpack.i.h.s16 %v474_v4  ;;  %v936_v15 = vcombine.low %v914_v57, %v921_v6  ;;  %v3148_v57 = vld [vmem:[%s3501_s2 + $0x78] sm:$0xff]  }
  0x2e   : > { %v937_v16 = vcombine.low %v928_v7, %v935_v58  ;;  %v459_v17 = vcombine.high %v3095_v8, %v3095_v8  ;;  %v556_v18 = vunpack.i.h.s16 %v3095_v8  ;;  %v558_v19 = vunpack.i.h.s16 %v3101_v10  ;;  %v2606_v7 = vld.sshfl [vmem:[%s2965_s12 + $0x30] sm:$0x33 pattern:$0x75316420] }
  0x2f   : > { %v2652_v20 = vpack.i.b16 %v3086_v1, %v3083_v34  ;;  %v2653_v21 = vpack.i.b16 %v3095_v8, %v554_v12  ;;  %v1206_v22 = vcombine.low %v474_v4, %v3104_v11  ;;  %v944_v24 = vrot.slane %v936_v15, %v2984_v25 }
  0x30   : > { %v951_v26 = vrot.slane %v937_v16, %v2984_v25  ;;  %v2654_v27 = vpack.i.b16 %v3101_v10, %v556_v18  ;;  %v1213_v28 = vrot.slane %v1203_v5, %v2984_v25  ;;  %v2655_v30 = vpack.i.b16 %v459_v17, %v558_v19 }
  0x31   : > { %v1204_v31 = vcombine.low %v2652_v20, %v2653_v21  ;;  %v1234_v32 = vrot.slane %v1206_v22, %v2984_v25  ;;  %v2687_v33 = vpack.i.b16 %v474_v4, %v459_v17  ;;  %v2688_v37 = vpack.i.b16 %v3104_v11, %v561_v13 }
  0x32   : > { %v952_v36 = vcombine.low %v944_v24, %v951_v26  ;;  %v719_v40 = vcombine.high %v3059_v38, %v3059_v38  ;;  %v727_v44 = vcombine.high %v2612_v23, %v2612_v23  ;;  %v1205_v45 = vcombine.low %v2654_v27, %v2655_v30  ;;  %v3166_v26 = vld [vmem:[%s3501_s2 + $0x70] sm:$0xff]  }
  0x33   : > { %v1220_v46 = vrot.slane %v1204_v31, %v2984_v25  ;;  %v734_v47 = vrot.slane %v2612_v23, %v2984_v25  ;;  %v751_v48 = vcombine.high %v2613_v29, %v2613_v29  ;;  %v3133_v49 = vcombine.low %v2687_v33, %v2688_v37 }
  0x34   : > { %2759 = vmatmul.mubr.msk.bf16.vlgmr.msra.gmra.mxu0 %vm1052_vm0, %v952_v36  ;;  %v741_v50 = vrot.slane %v727_v44, %v2984_v25  ;;  %v758_v51 = vrot.slane %v2613_v29, %v2984_v25  ;;  %v3137_v52 = vcombine.high %v474_v4, %v474_v4  ;;  %v1227_v38 = vrot.slane %v1205_v45, %v2984_v25 }
  0x35   : > { %v1235_v54 = vcombine.low %v1213_v28, %v1220_v46  ;;  %2787 = vmatpush3.bf16.msra.mxu0 %v3001_v41  ;;  %v742_v55 = vcombine.high %v734_v47, %v734_v47  ;;  %v3142_v56 = vrot.slane %v751_v48, %v2984_v25  ;;  %v804_v42 = vunpack.i.h.s16 %v734_v47 }
  0x36   : > { %2788 = vmatprep.subr.bf16.mxu0 %v3126_v39  ;;  %v743_v58 = vcombine.high %v741_v50, %v741_v50  ;;  %v766_v35 = vcombine.high %v758_v51, %v758_v51  ;;  %v806_v62 = vunpack.i.h.s16 %v741_v50  ;;  %v1236_v2 = vcombine.low %v1227_v38, %v1234_v32 }
  0x37   : > { %v1243_v4 = vrot.slane %v1235_v54, %v2984_v25  ;;  %v808_v5 = vunpack.i.h.s16 %v742_v55  ;;  %v2634_v6 = vpack.i.b16 %v734_v47, %v719_v40  ;;  %v2635_v12 = vpack.i.b16 %v741_v50, %v804_v42 }
  0x38   : > { %v2636_v13 = vpack.i.b16 %v742_v55, %v806_v62  ;;  %v956_v15 = vcombine.low %v3142_v56, %v766_v35  ;;  %v483_v16 = vcombine.high %v3104_v11, %v3104_v11  ;;  %v1250_v17 = vrot.slane %v1236_v2, %v2984_v25  ;;  %v3214_v35 = vld [vmem:[%s3501_s2 + $0x68] sm:$0xff]  }
  0x39   : > { %2789 = vmatpush3.bf16.msra.mxu0 %v3126_v39  ;;  %v2637_v18 = vpack.i.b16 %v743_v58, %v808_v5  ;;  %v953_v19 = vcombine.low %v718_v9, %v2634_v6  ;;  %v491_v20 = vcombine.high %v2605_v63, %v2605_v63  ;;  %v3161_v23 = vrot.slane %v2605_v63, %v2984_v25 }
  0x3a   : > { %2790 = vmatprep.subr.bf16.mxu0 %v3148_v57  ;;  %v954_v21 = vcombine.low %v2635_v12, %v2636_v13  ;;  %v984_v22 = vrot.slane %v956_v15, %v2984_v25  ;;  %v515_v24 = vcombine.high %v2606_v7, %v2606_v7  ;;  %v1251_v27 = vcombine.low %v1243_v4, %v1250_v17  ;;  %v3240_v15 = vld [vmem:[%s3501_s2 + $0x60] sm:$0xff]  }
  0x3b   : > { %v955_v28 = vcombine.low %v2637_v18, %v758_v51  ;;  %v963_v29 = vrot.slane %v953_v19, %v2984_v25  ;;  %v3170_v9 = vrot.slane %v491_v20, %v2984_v25  ;;  %v3175_v31 = vcombine.high %v3161_v23, %v3161_v23 }
  0x3c   : > { %v970_v30 = vrot.slane %v954_v21, %v2984_v25  ;;  %v3178_v32 = vrot.slane %v2606_v7, %v2984_v25  ;;  %v3181_v33 = vrot.slane %v515_v24, %v2984_v25  ;;  %2779 = vmatmul.mubr.msk.bf16.vlgmr.msra.gmra.mxu1 %vm1052_vm0, %v1251_v27  ;;  %v563_v40 = vunpack.i.h.s16 %v3104_v11 }
  0x3d   : > { %v977_v36 = vrot.slane %v955_v28, %v2984_v25  ;;  %v3187_v37 = vcombine.high %v3170_v9, %v3170_v9  ;;  %v565_v44 = vunpack.i.h.s16 %v3137_v52  ;;  %2791 = vmatpush3.bf16.msra.mxu0 %v3148_v57  ;;  %2812 = vmatpush3.bf16.msra.mxu1 %v3001_v41  ;;  %v568_v47 = vunpack.i.h.s16 %v3161_v23 }
  0x3e   : > { %v985_v45 = vcombine.low %v963_v29, %v970_v30  ;;  %v3195_v46 = vcombine.high %v3178_v32, %v3178_v32  ;;  %v570_v48 = vunpack.i.h.s16 %v3170_v9  ;;  %2792 = vmatprep.subr.bf16.mxu0 %v3166_v26  ;;  %2807 = vmatprep.subr.bf16.mxu1 %v3126_v39  ;;  %v572_v50 = vunpack.i.h.s16 %v3175_v31 }
  0x3f   : > { %v986_v11 = vcombine.low %v977_v36, %v984_v22  ;;  %v2656_v51 = vpack.i.b16 %v3161_v23, %v483_v16  ;;  %v3204_v41 = vpack.i.b16 %v3137_v52, %v563_v40  ;;  %v2657_v54 = vpack.i.b16 %v3170_v9, %v568_v47 }
  0x40   : > { %v993_v38 = vrot.slane %v985_v45, %v2984_v25  ;;  %v2658_v55 = vpack.i.b16 %v3175_v31, %v570_v48  ;;  %v1255_v58 = vcombine.low %v3181_v33, %v3195_v46  ;;  %v2659_v62 = vpack.i.b16 %v3187_v37, %v572_v50 }
  0x41   : > { %v1000_v42 = vrot.slane %v986_v11, %v2984_v25  ;;  %v1252_v63 = vcombine.low %v3137_v52, %v2656_v51  ;;  %v3219_v2 = vpack.i.b16 %v483_v16, %v565_v44  ;;  %2793 = vmatpush3.bf16.msra.mxu0 %v3166_v26  ;;  %2813 = vmatpush3.bf16.msra.mxu1 %v3126_v39  ;;  %v579_v17 = vunpack.i.h.s16 %v3195_v46  ;;  %v2670_v44 = vld.sshfl [vmem:[%s321_s14] sm:$0x33 pattern:$0x75316420] }
  0x42   : > { %v1253_v4 = vcombine.low %v2657_v54, %v2658_v55  ;;  %v1283_v5 = vrot.slane %v1255_v58, %v2984_v25  ;;  %v767_v6 = vcombine.high %v3142_v56, %v3142_v56  ;;  %v531_v7 = vcombine.high %v3181_v33, %v3181_v33  ;;  %2808 = vmatprep.subr.bf16.mxu1 %v3148_v57 }
  0x43   : > { %v1001_v52 = vcombine.low %v993_v38, %v1000_v42  ;;  %v1254_v12 = vcombine.low %v2659_v62, %v3178_v32  ;;  %v1262_v13 = vrot.slane %v1252_v63, %v2984_v25  ;;  %v1548_v39 = vcombine.low %v3204_v41, %v3219_v2  ;;  %2794 = vmatprep.subr.bf16.mxu0 %v3214_v35 }
  0x44   : > { %v1269_v56 = vrot.slane %v1253_v4, %v2984_v25  ;;  %v816_v16 = vunpack.i.l.s16 %v767_v6  ;;  %v580_v18 = vunpack.i.l.s16 %v531_v7  ;;  %v547_v20 = vunpack.i.h.s16 %v3021_v61 }
  0x45   : > { %2762 = vmatprep.mubr.msk.bf16.mxu0 %vm1052_vm0, %v1001_v52  ;;  %v1276_v19 = vrot.slane %v1254_v12, %v2984_v25  ;;  %2795 = vmatpush3.bf16.msra.mxu0 %v3214_v35  ;;  %v549_v21 = vunpack.i.h.s16 %v3027_v0  ;;  %v551_v22 = vunpack.i.h.s16 %v3079_v43  ;;  %v2694_v29 = vpack.i.b16 %v531_v7, %v579_v17 }
  0x46   : > { %v1284_v24 = vcombine.low %v1262_v13, %v1269_v56  ;;  %2814 = vmatpush3.bf16.msra.mxu1 %v3148_v57  ;;  %v1008_v27 = vrot.slane %v816_v16, %v2984_v25  ;;  %v1307_v28 = vrot.slane %v580_v18, %v2984_v25  ;;  %2796 = vmatprep.subr.bf16.mxu0 %v3240_v15  ;;  %v575_v45 = vunpack.i.h.s16 %v3178_v32 }
  0x47   : > { %v1285_v30 = vcombine.low %v1276_v19, %v1283_v5  ;;  %2809 = vmatprep.subr.bf16.mxu1 %v3166_v26  ;;  %v2684_v36 = vpack.i.b16 %v3027_v0, %v547_v20  ;;  %v2685_v40 = vpack.i.b16 %v3079_v43, %v549_v21  ;;  %v2686_v11 = vpack.i.b16 %v3083_v34, %v551_v22 }
  0x48   : > { %v1292_v47 = vrot.slane %v1284_v24, %v2984_v25  ;;  %v1015_v57 = vrot.slane %v1008_v27, %v2984_v25  ;;  %v1314_v48 = vrot.slane %v1307_v28, %v2984_v25  ;;  %v1497_v0 = vcombine.low %v3009_v53, %v3014_v59 }
  0x49   : > { %v1299_v50 = vrot.slane %v1285_v30, %v2984_v25  ;;  %2797 = vmatpush3.bf16.msra.mxu0 %v3240_v15  ;;  %v1498_v43 = vcombine.low %v3018_v60, %v2683_v14  ;;  %v1499_v51 = vcombine.low %v2684_v36, %v2685_v40  ;;  %v1500_v38 = vcombine.low %v2686_v11, %v3086_v1 }
  0x4a   : > { %2763 = vmatmul.mubr.msk.bf16.gmra.mxu0 %vm1052_vm0, %v1015_v57  ;;  %2815 = vmatpush3.bf16.msra.mxu1 %v3166_v26  ;;  %v577_v34 = vunpack.i.h.s16 %v3181_v33  ;;  %v1435_v54 = vcombine.high %v2670_v44, %v2670_v44  ;;  %v1442_v55 = vrot.slane %v2670_v44, %v2984_v25  ;;  %v1507_v53 = vrot.slane %v1497_v0, %v2984_v25 }
  0x4b   : > { %v1300_v58 = vcombine.low %v1292_v47, %v1299_v50  ;;  %2810 = vmatprep.subr.bf16.mxu1 %v3214_v35  ;;  %v1514_v59 = vrot.slane %v1498_v43, %v2984_v25  ;;  %v1521_v60 = vrot.slane %v1499_v51, %v2984_v25  ;;  %v1528_v61 = vrot.slane %v1500_v38, %v2984_v25 }
  0x4c   : > { %v1449_v3 = vrot.slane %v1435_v54, %v2984_v25  ;;  %v1450_v14 = vcombine.high %v1442_v55, %v1442_v55  ;;  %v2691_v1 = vpack.i.b16 %v3178_v32, %v3187_v37  ;;  %v2692_v42 = vpack.i.b16 %v3181_v33, %v575_v45  ;;  %v3327_v54 = vld [vmem:[%s3502_s3] ss:$0 sm:$0xff] }
  0x4d   : > { %2782 = vmatprep.mubr.msk.bf16.mxu1 %vm1052_vm0, %v1300_v58  ;;  %v1529_v26 = vcombine.low %v1507_v53, %v1514_v59  ;;  %v2693_v62 = vpack.i.b16 %v3195_v46, %v577_v34  ;;  %v1597_v63 = vcombine.low %v2694_v29, %v1442_v55  ;;  %v1530_v4 = vcombine.low %v1521_v60, %v1528_v61 }
  0x4e   : > { %2783 = vmatmul.mubr.msk.bf16.gmra.mxu1 %vm1052_vm0, %v1314_v48  ;;  %v1451_v5 = vcombine.high %v1449_v3, %v1449_v3  ;;  %v1595_v6 = vcombine.low %v3175_v31, %v2691_v1  ;;  %v1598_v7 = vcombine.low %v1449_v3, %v1450_v14  ;;  %v1546_v33 = vcombine.low %v3095_v8, %v3101_v10 }
  0x4f   : > { %2816 = vmatpush3.bf16.msra.mxu1 %v3214_v35  ;;  %v1537_v52 = vrot.slane %v1529_v26, %v2984_v25  ;;  %v1596_v32 = vcombine.low %v2692_v42, %v2693_v62  ;;  %v1619_v37 = vrot.slane %v1597_v63, %v2984_v25  ;;  %v1544_v46 = vrot.slane %v1530_v4, %v2984_v25 }
  0x50   : > { %2811 = vmatprep.subr.bf16.mxu1 %v3240_v15  ;;  %v1458_v12 = vunpack.i.l.s16 %v1451_v5  ;;  %v1605_v13 = vrot.slane %v1595_v6, %v2984_v25  ;;  %v1626_v31 = vrot.slane %v1598_v7, %v2984_v25  ;;  %v1549_v35 = vcombine.low %v3161_v23, %v3170_v9 }
  0x51   : > { %v1612_v56 = vrot.slane %v1596_v32, %v2984_v25  ;;  %v1556_v16 = vrot.slane %v1546_v33, %v2984_v25  ;;  %v1563_v17 = vrot.slane %v3133_v49, %v2984_v25  ;;  %v1545_v8 = vcombine.low %v1537_v52, %v1544_v46 }
  0x52   : > { %v1628_v10 = vcombine.low %v1619_v37, %v1626_v31  ;;  %v1570_v18 = vrot.slane %v1548_v39, %v2984_v25  ;;  %v1650_v19 = vrot.slane %v1458_v12, %v2984_v25  ;;  %v1577_v21 = vrot.slane %v1549_v35, %v2984_v25 }
  0x53   : > { %2817 = vmatpush3.bf16.msra.mxu1 %v3240_v15  ;;  %v1627_v20 = vcombine.low %v1605_v13, %v1612_v56  ;;  %v1578_v23 = vcombine.low %v1556_v16, %v1563_v17  ;;  %2798 = vmatprep.mubr.msk.bf16.mxu0 %vm1052_vm0, %v1545_v8 }
  0x54   : > { %v1642_v9 = vrot.slane %v1628_v10, %v2984_v25  ;;  %v1579_v22 = vcombine.low %v1570_v18, %v1577_v21  ;;  %v1657_v41 = vrot.slane %v1650_v19, %v2984_v25 }
  0x55   : > { %v1635_v49 = vrot.slane %v1627_v20, %v2984_v25  ;;  %v1586_v24 = vrot.slane %v1578_v23, %v2984_v25 }
  0x56   : > { %v1593_v39 = vrot.slane %v1579_v22, %v2984_v25 }
  0x57   : > { %v1643_v2 = vcombine.low %v1635_v49, %v1642_v9 }
  0x58   : > { %v1594_v15 = vcombine.low %v1586_v24, %v1593_v39 }
  0x59   : > { %2802 = vmatprep.mubr.msk.bf16.mxu1 %vm1052_vm0, %v1643_v2 }
  0x5a   : > { %2803 = vmatmul.mubr.msk.bf16.vlgmr.msra.gmra.mxu1 %vm1052_vm0, %v1657_v41  ;;  %2799 = vmatmul.mubr.msk.bf16.vlgmr.msra.gmra.mxu0 %vm1052_vm0, %v1594_v15 }
  0xf4   : > { %v2760_v27 = vpop.f32.mrf.mxu0 }
  0xf6   : > { %v1099_v29 = vpop.f32.mrf.mxu0 }
  0xf8   : > { %v2761_v36 = vpop.f32.mrf.mxu0 }
  0xfa   : > { %v1102_v44 = vpop.f32.mrf.mxu0 }
  0xfc   : > { %v2780_v28 = vpop.f32.mrf.mxu1 }
  0xfd   : > { %v1406_v34 = vadd.f32 %v2780_v28, %v2760_v27 }
  0xfe   : > { %v1397_v30 = vpop.f32.mrf.mxu1 }
  0xff   : > { %v1398_v60 = vadd.f32 %v1397_v30, %v1099_v29 }
 0x100   : > { %v2781_v40 = vpop.f32.mrf.mxu1 }
 0x101   : > { %v1409_v4 = vadd.f32 %v2781_v40, %v2761_v36 }
 0x102   : > { %v1400_v45 = vpop.f32.mrf.mxu1 }
 0x103   : > { %v1401_v35 = vadd.f32 %v1400_v45, %v1102_v44 }
 0x10a   : > { %v2764_v47 = vpop.f32.mrf.mxu0 }
 0x10c   : > { %v1115_v57 = vpop.f32.mrf.mxu0 }
 0x10e   : > { %v2784_v48 = vpop.f32.mrf.mxu1  ;;  %v2765_v11 = vpop.f32.mrf.mxu0 }
 0x10f   : > { %v1422_v51 = vadd.f32 %v2784_v48, %v2764_v47 }
 0x110   : > { %v1413_v50 = vpop.f32.mrf.mxu1  ;;  %v1118_v38 = vpop.f32.mrf.mxu0 }
 0x111   : > { %v1414_v58 = vadd.f32 %v1413_v50, %v1115_v57 }
 0x112   : > { %v2785_v0 = vpop.f32.mrf.mxu1 }
 0x114   : > { %v1416_v43 = vpop.f32.mrf.mxu1 }
 0x115   : > { %v1417_v16 = vadd.f32 %v1416_v43, %v1118_v38 }
 0x11a   : > { %v2804_v55 = vpop.f32.mrf.mxu1  ;;  %v2800_v53 = vpop.f32.mrf.mxu0 }
 0x11b   : > { %v1776_v59 = vadd.f32 %v2804_v55, %v1422_v51  ;;  %v1772_v61 = vadd.f32 %v2800_v53, %v1406_v34 }
 0x11c   : > { %v1756_v3 = vpop.f32.mrf.mxu1  ;;  %v1740_v1 = vpop.f32.mrf.mxu0 }
 0x11d   : > { %v1790_v14 = vadd.f32 %v3327_v54, %v1776_v59  ;;  %v1774_v26 = vadd.f32 %v1756_v3, %v1414_v58  ;;  %v1786_v42 = vadd.f32 %v3327_v54, %v1772_v61  ;;  %v1770_v62 = vadd.f32 %v1740_v1, %v1398_v60 }
 0x11e   : > { %v2805_v63 = vpop.f32.mrf.mxu1  ;;  %v2801_v7 = vpop.f32.mrf.mxu0 }
 0x11f   : > { %v1797_v5 = vmax.f32 %v1790_v14, 0.0  ;;  %v1788_v6 = vadd.f32 %v3327_v54, %v1774_v26  ;;  %v1793_v52 = vmax.f32 %v1786_v42, 0.0  ;;  %v1784_v32 = vadd.f32 %v3327_v54, %v1770_v62 }
 0x120   : > { %v1773_v46 = vadd.f32 %v2801_v7, %v1409_v4  ;;  %v1759_v56 = vpop.f32.mrf.mxu1  ;;  %v1743_v21 = vpop.f32.mrf.mxu0 }
 0x121   : > { %v2105_v37 = vrot.slane %v1797_v5, %v2984_v25  ;;  %v1795_v33 = vmax.f32 %v1788_v6, 0.0  ;;  %v1903_v12 = vcombine.high %v1793_v52, %v1793_v52  ;;  %v1910_v13 = vrot.slane %v1793_v52, %v2984_v25 }
 0x122   : > { %v1791_v31 = vmax.f32 %v1784_v32, 0.0  ;;  %v1787_v49 = vadd.f32 %v3327_v54, %v1773_v46  ;;  %v3341_v22 = vadd.f32 %v1759_v56, %v1417_v16  ;;  %v1771_v29 = vadd.f32 %v1743_v21, %v1401_v35 }
 0x123   : > { %v2112_v17 = vrot.slane %v2105_v37, %v2984_v25  ;;  %v2001_v8 = vcombine.high %v1795_v33, %v1795_v33  ;;  %v1917_v10 = vrot.slane %v1903_v12, %v2984_v25  ;;  %v1918_v18 = vcombine.high %v1910_v13, %v1910_v13 }
 0x124   : > { %v1805_v19 = vcombine.high %v1791_v31, %v1791_v31  ;;  %v2008_v20 = vrot.slane %v1795_v33, %v2984_v25  ;;  %v1812_v23 = vrot.slane %v1791_v31, %v2984_v25  ;;  %v1926_v15 = vrot.slane %v1910_v13, %v2984_v25 }
 0x125   : > { %v2015_v9 = vrot.slane %v2001_v8, %v2984_v25  ;;  %v1919_v24 = vcombine.high %v1917_v10, %v1917_v10  ;;  %v1933_v41 = vrot.slane %v1917_v10, %v2984_v25  ;;  %v1940_v2 = vrot.slane %v1918_v18, %v2984_v25 }
 0x126   : > { %v1819_v39 = vrot.slane %v1805_v19, %v2984_v25  ;;  %v3348_v27 = vrot.slane %v2112_v17, %v2984_v25  ;;  %v1820_v28 = vcombine.high %v1812_v23, %v1812_v23  ;;  %v1828_v30 = vrot.slane %v1812_v23, %v2984_v25 }
 0x127   : > { %v2016_v36 = vcombine.high %v2008_v20, %v2008_v20  ;;  %v2017_v40 = vcombine.high %v2015_v9, %v2015_v9  ;;  %v2024_v44 = vrot.slane %v2008_v20, %v2984_v25  ;;  %v2708_v45 = vcombine.high %v1926_v15, %v1940_v2 }
 0x128   : > { %v1821_v47 = vcombine.high %v1819_v39, %v1819_v39  ;;  %v1835_v57 = vrot.slane %v1819_v39, %v2984_v25  ;;  %v1842_v48 = vrot.slane %v1820_v28, %v2984_v25  ;;  %v1947_v11 = vrot.slane %v1919_v24, %v2984_v25 }
 0x129   : > { %v1949_v50 = vcombine.high %v1933_v41, %v1933_v41  ;;  %v2210_v0 = vcombine.low %v1926_v15, %v1940_v2  ;;  %v2031_v43 = vrot.slane %v2015_v9, %v2984_v25  ;;  %v2239_v58 = vrot.slane %v1933_v41, %v2984_v25  ;;  %v2466_v15 = vld [vmem:[%s3388_s23] sm:$0xf] }
 0x12a   : > { %v3357_v51 = vrot.slane %v1821_v47, %v2984_v25  ;;  %v1851_v38 = vcombine.high %v1835_v57, %v1835_v57  ;;  %v2113_v34 = vcombine.low %v1828_v30, %v1842_v48  ;;  %v2706_v55 = vcombine.high %v1828_v30, %v1842_v48 }
 0x12b   : > { %v2038_v53 = vrot.slane %v2016_v36, %v2984_v25  ;;  %v3362_v59 = vrot.slane %v2017_v40, %v2984_v25  ;;  %v2046_v60 = vcombine.high %v2024_v44, %v2024_v44  ;;  %v2232_v61 = vrot.slane %v2708_v45, %v2984_v25 }
 0x12c   : > { %v2115_v3 = vcombine.low %v1835_v57, %v3357_v51  ;;  %v2122_v14 = vrot.slane %v2113_v34, %v2984_v25  ;;  %v2129_v1 = vrot.slane %v2706_v55, %v2984_v25  ;;  %v2257_v26 = vcombine.low %v1947_v11, %v1949_v50 }
 0x12d   : > { %v2047_v42 = vcombine.high %v2031_v43, %v2031_v43  ;;  %v2048_v62 = vcombine.high %v2038_v53, %v2038_v53  ;;  %v2307_v63 = vcombine.low %v2024_v44, %v2038_v53  ;;  %v2143_v5 = vrot.slane %v1851_v38, %v2984_v25 }
 0x12e   : > { %v2136_v4 = vrot.slane %v2115_v3, %v2984_v25  ;;  %v2144_v6 = vcombine.low %v2122_v14, %v2129_v1  ;;  %v1794_v7 = vmax.f32 %v1787_v49, 0.0  ;;  %v2335_v32 = vrot.slane %v2046_v60, %v2984_v25 }
 0x12f   : > { %v2328_v52 = vrot.slane %v2307_v63, %v2984_v25  ;;  %v3373_v37 = vcombine.low %v2048_v62, %v2031_v43  ;;  %v3376_v33 = vcombine.low %v3362_v59, %v2047_v42  ;;  %v3379_v46 = vrot.slane %v2210_v0, %v2984_v25 }
 0x130   : > { %v2145_v12 = vcombine.low %v2136_v4, %v2143_v5  ;;  %v1952_v13 = vcombine.high %v1794_v7, %v1794_v7  ;;  %v1959_v31 = vrot.slane %v1794_v7, %v2984_v25  ;;  %v3382_v56 = vcombine.low %v2232_v61, %v2239_v58 }
 0x131   : > { %v2152_v35 = vrot.slane %v2144_v6, %v2984_v25  ;;  %v2337_v16 = vcombine.low %v2328_v52, %v2335_v32  ;;  %v1951_v17 = vcombine.high %v1947_v11, %v1947_v11  ;;  %v2362_v20 = vrot.slane %v3373_v37, %v2984_v25 }
 0x132   : > { %v2159_v8 = vrot.slane %v2145_v12, %v2984_v25  ;;  %v1966_v10 = vrot.slane %v1952_v13, %v2984_v25  ;;  %v1967_v18 = vcombine.high %v1959_v31, %v1959_v31  ;;  %v1975_v19 = vrot.slane %v1959_v31, %v2984_v25 }
 0x133   : > { %v2369_v21 = vrot.slane %v3376_v33, %v2984_v25  ;;  %v2266_v23 = vrot.slane %v2257_v26, %v2984_v25  ;;  %v1785_v9 = vadd.f32 %v3327_v54, %v1771_v29  ;;  %v1853_v2 = vcombine.high %v3357_v51, %v3357_v51 }
 0x134   : > { %v2160_v49 = vcombine.low %v2152_v35, %v2159_v8  ;;  %v1968_v24 = vcombine.high %v1966_v10, %v1966_v10  ;;  %v1989_v41 = vrot.slane %v1967_v18, %v2984_v25  ;;  %v1982_v28 = vrot.slane %v1966_v10, %v2984_v25  ;;  %v2475_v18 = vld [vmem:[%s3388_s23 + $0xc] sm:$0xf] }
 0x135   : > { %v1997_v30 = vcombine.high %v1975_v19, %v1975_v19  ;;  %v2258_v36 = vcombine.low %v1951_v17, %v1975_v19  ;;  %v1792_v29 = vmax.f32 %v1785_v9, 0.0  ;;  %v1789_v47 = vadd.f32 %v3327_v54, %v3341_v22 }
 0x136   : > { %v2456_v40 = vpack.c.bf16 %v2160_v49, %v2160_v49  ;;  %v1996_v44 = vrot.slane %v1968_v24, %v2984_v25  ;;  %v1999_v45 = vcombine.high %v1989_v41, %v1989_v41  ;;  %v2351_v3 = vrot.slane %v2337_v16, %v2984_v25  ;;  %v2478_v24 = vld [vmem:[%s3388_s23 + $0x10] sm:$0xf] }
 0x137   : > { %v2259_v57 = vcombine.low %v1989_v41, %v1997_v30  ;;  %v2273_v48 = vrot.slane %v2258_v36, %v2984_v25  ;;  %v1854_v11 = vcombine.high %v1792_v29, %v1792_v29  ;;  %v1861_v50 = vrot.slane %v1792_v29, %v2984_v25 }
 0x138   : > { %v2467_v0 = vsel %vm3404_vm3, %v2456_v40, %v2466_v15  ;;  %v2287_v43 = vrot.slane %v1999_v45, %v2984_v25  ;;  %v2305_v51 = vcombine.low %v1982_v28, %v1996_v44  ;;  %v2709_v38 = vcombine.high %v1982_v28, %v1996_v44 }
 0x139   : > { %2468 = vst [vmem:[%s3388_s23] sm:$0xf] %v2467_v0  ;;  %v2280_v34 = vrot.slane %v2259_v57, %v2984_v25  ;;  %v2288_v55 = vcombine.low %v2266_v23, %v2273_v48  ;;  %v1868_v58 = vrot.slane %v1854_v11, %v2984_v25  ;;  %v1869_v54 = vcombine.high %v1861_v50, %v1861_v50 }
 0x13a   : > { %v2314_v22 = vrot.slane %v2305_v51, %v2984_v25  ;;  %v2321_v53 = vrot.slane %v2709_v38, %v2984_v25  ;;  %v1877_v60 = vrot.slane %v1861_v50, %v2984_v25  ;;  %v1796_v61 = vmax.f32 %v1789_v47, 0.0 }
 0x13b   : > { %v2289_v14 = vcombine.low %v2280_v34, %v2287_v43  ;;  %v2296_v1 = vrot.slane %v2288_v55, %v2984_v25  ;;  %v1870_v26 = vcombine.high %v1868_v58, %v1868_v58  ;;  %v1891_v62 = vrot.slane %v1869_v54, %v2984_v25 }
 0x13c   : > { %v2336_v42 = vcombine.low %v2314_v22, %v2321_v53  ;;  %v1899_v63 = vcombine.high %v1877_v60, %v1877_v60  ;;  %v2161_v4 = vcombine.low %v1853_v2, %v1877_v60  ;;  %v1884_v6 = vrot.slane %v1868_v58, %v2984_v25  ;;  %v2472_v60 = vld [vmem:[%s3388_s23 + $0x8] sm:$0xf] }
 0x13d   : > { %v2303_v5 = vrot.slane %v2289_v14, %v2984_v25  ;;  %v1898_v7 = vrot.slane %v1870_v26, %v2984_v25  ;;  %v2050_v52 = vcombine.high %v1796_v61, %v1796_v61  ;;  %v1901_v12 = vcombine.high %v1891_v62, %v1891_v62 }
 0x13e   : > { %v2344_v32 = vrot.slane %v2336_v42, %v2984_v25  ;;  %v2162_v13 = vcombine.low %v1891_v62, %v1899_v63  ;;  %v2170_v31 = vrot.slane %v2161_v4, %v2984_v25  ;;  %v2049_v17 = vcombine.high %v3362_v59, %v3362_v59 }
 0x13f   : > { %v2304_v35 = vcombine.low %v2296_v1, %v2303_v5  ;;  %v2707_v16 = vcombine.high %v1884_v6, %v1898_v7  ;;  %v2057_v8 = vrot.slane %v1796_v61, %v2984_v25  ;;  %v2163_v19 = vcombine.low %v1901_v12, %v1884_v6  ;;  %v2469_v1 = vld [vmem:[%s3388_s23 + $0x4] sm:$0xf]  ;;  %v2484_v12 = vld [vmem:[%s3388_s23 + $0x18] sm:$0xf] }
 0x140   : > { %v2352_v10 = vcombine.low %v2344_v32, %v2351_v3  ;;  %v2177_v23 = vrot.slane %v2162_v13, %v2984_v25  ;;  %v2064_v9 = vrot.slane %v2050_v52, %v2984_v25  ;;  %v2191_v41 = vrot.slane %v1898_v7, %v2984_v25  ;;  %v2481_v52 = vld [vmem:[%s3388_s23 + $0x14] sm:$0xf] }
 0x141   : > { %v2459_v49 = vpack.c.bf16 %v2304_v35, %v2304_v35  ;;  %v2218_v2 = vrot.slane %v2707_v16, %v2984_v25  ;;  %v2065_v15 = vcombine.high %v2057_v8, %v2057_v8  ;;  %v2184_v59 = vrot.slane %v2163_v19, %v2984_v25 }
 0x142   : > { %v2460_v28 = vpack.c.bf16 %v2352_v10, %v2352_v10  ;;  %v2192_v30 = vcombine.low %v2170_v31, %v2177_v23  ;;  %v2066_v36 = vcombine.high %v2064_v9, %v2064_v9  ;;  %v2073_v44 = vrot.slane %v2057_v8, %v2984_v25 }
 0x143   : > { %v2476_v29 = vsel %vm3404_vm3, %v2459_v49, %v2475_v18  ;;  %v2240_v40 = vcombine.low %v2218_v2, %v3379_v46  ;;  %v2087_v45 = vrot.slane %v2065_v15, %v2984_v25  ;;  %v2193_v57 = vcombine.low %v2184_v59, %v2191_v41 }
 0x144   : > { %2477 = vst [vmem:[%s3388_s23 + $0xc] sm:$0xf] %v2476_v29  ;;  %v2479_v47 = vsel %vm3404_vm3, %v2460_v28, %v2478_v24  ;;  %v2080_v48 = vrot.slane %v2064_v9, %v2984_v25  ;;  %v2094_v11 = vrot.slane %v2066_v36, %v2984_v25  ;;  %v2255_v50 = vrot.slane %v3382_v56, %v2984_v25 }
 0x145   : > { %2480 = vst [vmem:[%s3388_s23 + $0x10] sm:$0xf] %v2479_v47  ;;  %v2248_v46 = vrot.slane %v2240_v40, %v2984_v25  ;;  %v2355_v0 = vcombine.low %v2049_v17, %v2073_v44  ;;  %v2710_v43 = vcombine.high %v2073_v44, %v2087_v45  ;;  %v2200_v51 = vrot.slane %v2192_v30, %v2984_v25 }
 0x146   : > { %v2207_v38 = vrot.slane %v2193_v57, %v2984_v25  ;;  %v2402_v34 = vcombine.low %v2080_v48, %v2094_v11  ;;  %v2711_v55 = vcombine.high %v2080_v48, %v2094_v11  ;;  %v2384_v58 = vcombine.low %v2362_v20, %v2369_v21 }
 0x147   : > { %v2256_v56 = vcombine.low %v2248_v46, %v2255_v50  ;;  %v2376_v54 = vrot.slane %v2355_v0, %v2984_v25  ;;  %v2383_v22 = vrot.slane %v2087_v45, %v2984_v25  ;;  %v2410_v61 = vrot.slane %v2710_v43, %v2984_v25 }
 0x148   : > { %v2208_v53 = vcombine.low %v2200_v51, %v2207_v38  ;;  %v2417_v3 = vrot.slane %v2402_v34, %v2984_v25  ;;  %v2424_v14 = vrot.slane %v2711_v55, %v2984_v25  ;;  %v2392_v42 = vrot.slane %v2384_v58, %v2984_v25 }
 0x149   : > { %v2458_v33 = vpack.c.bf16 %v2256_v56, %v2256_v56  ;;  %v2385_v37 = vcombine.low %v2376_v54, %v2383_v22 }
 0x14a   : > { %v2457_v20 = vpack.c.bf16 %v2208_v53, %v2208_v53  ;;  %v2432_v21 = vcombine.low %v2410_v61, %v2417_v3  ;;  %v2433_v26 = vcombine.low %v2424_v14, %v3348_v27 }
 0x14b   : > { %v2473_v62 = vsel %vm3404_vm3, %v2458_v33, %v2472_v60  ;;  %v2399_v63 = vrot.slane %v2385_v37, %v2984_v25 }
 0x14c   : > { %v2470_v4 = vsel %vm3404_vm3, %v2457_v20, %v2469_v1  ;;  %2474 = vst [vmem:[%s3388_s23 + $0x8] sm:$0xf] %v2473_v62  ;;  %v2440_v5 = vrot.slane %v2432_v21, %v2984_v25  ;;  %v2447_v6 = vrot.slane %v2433_v26, %v2984_v25 }
 0x14d   : > { %2471 = vst [vmem:[%s3388_s23 + $0x4] sm:$0xf] %v2470_v4  ;;  %v2400_v7 = vcombine.low %v2392_v42, %v2399_v63 }
 0x14e   : > { %v2448_v27 = vcombine.low %v2440_v5, %v2447_v6 }
 0x14f   : > { %v2461_v32 = vpack.c.bf16 %v2400_v7, %v2400_v7 }
 0x150   : > { %v2462_v13 = vpack.c.bf16 %v2448_v27, %v2448_v27 }
 0x151   : > { %v2482_v31 = vsel %vm3404_vm3, %v2461_v32, %v2481_v52 }
 0x152   : > { %2483 = vst [vmem:[%s3388_s23 + $0x14] sm:$0xf] %v2482_v31  ;;  %v2485_v35 = vsel %vm3404_vm3, %v2462_v13, %v2484_v12 }
 0x153   : > { %2486 = vst [vmem:[%s3388_s23 + $0x18] sm:$0xf] %v2485_v35 }
 0x154 PF: > { %s14_s17 = sadd.s32 1, %s2887_s17   ;;  %s3506_s15 = smov %s2883_s16 }
 0x155   : > { %p11_p5 = scmp.ge.s32.totalorder %s14_s17, 4   ;;  %s3507_s16 = smov %s3509_s18 }
 0x157   :  { %13 = sbr.rel (!%p11_p5) target bundleno = 2 (0x2), region = 71 }

// kernel: rel_conv2d_subsampling8.5
= control target key start
LH: loop header
LB: loop body
LE: loop exit
PB: predicated region body
PF: predicated region fallthrough
CT: control target
= control target key end

     0   :  { %s9732_s15 = smov 0   ;;  %s9734_s16 = smov 0   ;;  %s11373_s0 = inlined_call_operand.vmem [shape: bf16[2,31,15,96], index: 0, kind: input, shape index: {}, may-alias: {0,1}]   ;;  %s11374_s1 = inlined_call_operand.vmem [shape: bf16[2,31,15,96], index: 1, kind: input, shape index: {}, may-alias: {0,1}]   ;;  %s11375_s2 = inlined_call_operand.vmem [shape: bf16[3,96,32], index: 2, kind: input, shape index: {}]   ;;  %s11376_s3 = inlined_call_operand.vmem [shape: f32[1,32], index: 3, kind: input, shape index: {}]   ;;  %s11377_s4 = inlined_call_operand.vmem [shape: bf16[2,15,15,32], index: 4, kind: output, shape index: {}]  }
   0x1   :  { %s9736_s17 = smov 0  }
   0x2 LB: > { %s26_s18 = sadd.s32 1, %s9698_s16  ;;  %p8913_p0 = scmp.ge.s32.totalorder %s9702_s17, 1  ;;  %s9702_s17 = sphi %s9736_s17, %s14_s17   ;;  %s9698_s16 = sphi %s9734_s16, %s11381_s16   ;;  %s9694_s15 = sphi %s9732_s15, %s11380_s15  }
   0x3   : > { %p28_p1 = scmp.ge.s32.totalorder %s26_s18, 2  ;;  %p238_p2 = scmp.lt.s32.totalorder %s9702_s17, 3 }
   0x5   : > { %s11383_s18 = smov (%p28_p1, %s26_s18), 0  ;;  %p239_p3 = pnand %p8913_p0, %p238_p2 }
   0x6   : > { %p304_p4 = scmp.lt.s32.totalorder (!%p239_p3), %s9694_s15, 1 }
   0x7   : > { %242 = sbr.rel (%p239_p3) target bundleno = 576 (0x240), region = 36 }
   0xc   : > { %v9661_v0 = vld [vmem:[%s11375_s2 + $0x58] sm:$0xff]   ;;  %v9704_v1 = vmov 0.0   ;;  %v9662_v2 = vld [vmem:[%s11375_s2 + $0x50] sm:$0xff]   ;;  %v463_v3 = vlaneseq  ;;  %vm9705_vm0 = vmmov 0   ;;  %s11385_s15 = smov (!%p304_p4, %s9694_s15), 1  ;;  %v9663_v4 = vld [vmem:[%s11375_s2 + $0x48] sm:$0xff]  }
   0xd   : > { %9402 = vmatprep.subr.bf16.mxu0 %v9704_v1  ;;  %9618 = vmatprep.subr.bf16.mxu1 %v9704_v1  ;;  %s9630_s25 = smul.u32 248, %s11385_s15  ;;  %v9706_v5 = vmov 1966171168   ;;  %v9664_v8 = vld [vmem:[%s11375_s2 + $0x40] sm:$0xff]   ;;  %v9665_v22 = vld [vmem:[%s11375_s2 + $0x38] sm:$0xff]   ;;  %v9666_v39 = vld [vmem:[%s11375_s2 + $0x30] sm:$0xff]  }
   0xe   : > { %9403 = vmatpush3.bf16.msra.mxu0 %v9661_v0  ;;  %9624 = vmatpush3.bf16.msra.mxu1 %v9661_v0  ;;  %v461_v6 = vunpack.c.l.s4 %v9706_v5  ;;  %v464_v7 = vshrl.u32 %v463_v3, 7  ;;  %vm3246_vm1 = vcmask 785408   ;;  %s9632_s21 = smul.u32 120, %s11385_s15  ;;  %vm8728_vm2 = vcmask 257024  }
   0xf   : > { %9404 = vmatprep.subr.bf16.mxu0 %v9704_v1  ;;  %9619 = vmatprep.subr.bf16.mxu1 %v9704_v1  ;;  %s9777_s28 = scalar_lea.vmem %s11373_s0, %s9630_s25  ;;  %vm8731_vm3 = vsmask.f32 3328 }
  0x10   : > { %9414 = vmatprep.mubr.msk.bf16.mxu0 %vm9705_vm0, %v9704_v1  ;;  %9446 = vmatprep.mubr.msk.bf16.mxu1 %vm9705_vm0, %v9704_v1  ;;  %v8947_v9 = vld.sshfl [vmem:[%s9777_s28 + $0x8] sm:$0x33 pattern:$0x75316420]  ;;  %v462_v10 = vunpack.c.0.s8 %v461_v6  ;;  %s10778_s23 = scalar_lea.vmem %s11377_s4, %s9632_s21  ;;  %vm10790_vm4 = vmand %vm8728_vm2, %vm8731_vm3 }
  0x11   : > { %v8948_v11 = vld.sshfl [vmem:[%s9777_s28 + $0xc] sm:$0x33 pattern:$0x75316420]  ;;  %v1446_v12 = vcombine.high %v8947_v9, %v8947_v9 }
  0x12   : > { %9405 = vmatpush3.bf16.msra.mxu0 %v9662_v2  ;;  %9625 = vmatpush3.bf16.msra.mxu1 %v9662_v2  ;;  %v9787_v13 = vld.sshfl [vmem:[%s9777_s28 + $0x18] sm:$0x33 pattern:$0x75316420]  ;;  %v9789_v14 = vsub.s32 %v462_v10, %v464_v7  ;;  %v1470_v15 = vcombine.high %v8948_v11, %v8948_v11 }
  0x13   : > { %9406 = vmatprep.subr.bf16.mxu0 %v9704_v1  ;;  %9620 = vmatprep.subr.bf16.mxu1 %v9704_v1  ;;  %v8964_v16 = vld.sshfl [vmem:[%s9777_s28 + $0x8c] sm:$0x33 pattern:$0x75316420]  ;;  %v1494_v17 = vcombine.high %v9787_v13, %v9787_v13 }
  0x14   : > { %v1453_v18 = vrot.slane %v8947_v9, %v9789_v14  ;;  %v1460_v19 = vrot.slane %v1446_v12, %v9789_v14  ;;  %v1477_v20 = vrot.slane %v8948_v11, %v9789_v14  ;;  %v1484_v21 = vrot.slane %v1470_v15, %v9789_v14  ;;  %v8965_v24 = vld.sshfl [vmem:[%s9777_s28 + $0x98] sm:$0x33 pattern:$0x75316420]  ;;  %v9667_v11 = vld [vmem:[%s11375_s2 + $0x88] sm:$0xff]  }
  0x15   : > { %v9803_v23 = vrot.slane %v9787_v13, %v9789_v14  ;;  %v1854_v25 = vcombine.high %v8964_v16, %v8964_v16  ;;  %v1861_v26 = vrot.slane %v8964_v16, %v9789_v14  ;;  %v9813_v36 = vld.sshfl [vmem:[%s9777_s28 + $0x9c] sm:$0x33 pattern:$0x75316420]  ;;  %v1878_v37 = vcombine.high %v8965_v24, %v8965_v24 }
  0x16   : > { %9407 = vmatpush3.bf16.msra.mxu0 %v9663_v4  ;;  %9626 = vmatpush3.bf16.msra.mxu1 %v9663_v4  ;;  %v1485_v27 = vcombine.high %v1477_v20, %v1477_v20  ;;  %v1486_v28 = vcombine.high %v1484_v21, %v1484_v21  ;;  %v2510_v29 = vcombine.low %v1453_v18, %v1460_v19  ;;  %v8950_v59 = vld.sshfl [vmem:[%s9777_s28 + $0x1c] sm:$0x33 pattern:$0x75316420] }
  0x17   : > { %9408 = vmatprep.subr.bf16.mxu0 %v9704_v1  ;;  %9621 = vmatprep.subr.bf16.mxu1 %v9704_v1  ;;  %v9045_v30 = vcombine.high %v1453_v18, %v1460_v19  ;;  %v2512_v31 = vcombine.low %v1477_v20, %v1484_v21  ;;  %v1868_v32 = vrot.slane %v1854_v25, %v9789_v14  ;;  %v2175_v43 = vunpack.i.h.s16 %v9803_v23  ;;  %v9836_v2 = vld.sshfl [vmem:[%s9777_s28 + $0x28] sm:$0x33 pattern:$0x75316420] }
  0x18   : > { %v1869_v33 = vcombine.high %v1861_v26, %v1861_v26  ;;  %v8989_v34 = vpack.i.b16 %v9803_v23, %v1486_v28  ;;  %v2520_v35 = vrot.slane %v2510_v29, %v9789_v14  ;;  %v1885_v38 = vrot.slane %v8965_v24, %v9789_v14  ;;  %v9669_v29 = vld [vmem:[%s11375_s2 + $0x80] sm:$0xff]  }
  0x19   : > { %v2527_v40 = vrot.slane %v9045_v30, %v9789_v14  ;;  %v2534_v41 = vrot.slane %v2512_v31, %v9789_v14  ;;  %v1870_v42 = vcombine.high %v1868_v32, %v1868_v32  ;;  %v1892_v45 = vrot.slane %v1878_v37, %v9789_v14 }
  0x1a   : > { %9409 = vmatpush3.bf16.msra.mxu0 %v9664_v8  ;;  %9627 = vmatpush3.bf16.msra.mxu1 %v9664_v8  ;;  %v2513_v44 = vcombine.low %v1485_v27, %v8989_v34  ;;  %v1893_v46 = vcombine.high %v1885_v38, %v1885_v38  ;;  %v2295_v47 = vunpack.i.h.s16 %v1885_v38  ;;  %v9827_v49 = vrot.slane %v9813_v36, %v9789_v14  ;;  %v8967_v34 = vld.sshfl [vmem:[%s9777_s28 + $0xa8] sm:$0x33 pattern:$0x75316420] }
  0x1b   : > { %9410 = vmatprep.subr.bf16.mxu0 %v9704_v1  ;;  %9622 = vmatprep.subr.bf16.mxu1 %v9704_v1  ;;  %v2542_v48 = vcombine.low %v2520_v35, %v2527_v40  ;;  %v9021_v50 = vpack.i.b16 %v1885_v38, %v1870_v42  ;;  %v2902_v51 = vcombine.low %v1861_v26, %v1868_v32  ;;  %v2297_v54 = vunpack.i.h.s16 %v1892_v45 }
  0x1c   : > { %v2541_v52 = vrot.slane %v2513_v44, %v9789_v14  ;;  %v1894_v53 = vcombine.high %v1892_v45, %v1892_v45  ;;  %v2299_v55 = vunpack.i.h.s16 %v1893_v46  ;;  %v9022_v57 = vpack.i.b16 %v1892_v45, %v2295_v47  ;;  %v9872_v47 = vld.sshfl [vmem:[%s9777_s28 + $0xac] sm:$0x33 pattern:$0x75316420] }
  0x1d   : > { %v2550_v56 = vrot.slane %v2542_v48, %v9789_v14  ;;  %v2903_v58 = vcombine.low %v1869_v33, %v9021_v50  ;;  %v2303_v60 = vunpack.i.h.s16 %v9827_v49  ;;  %v9023_v63 = vpack.i.b16 %v1893_v46, %v2297_v54  ;;  %v9668_v50 = vld [vmem:[%s11375_s2 + $0x28] sm:$0xff]  }
  0x1e   : > { %9411 = vmatpush3.bf16.msra.mxu0 %v9665_v22  ;;  %9628 = vmatpush3.bf16.msra.mxu1 %v9665_v22  ;;  %v2543_v61 = vcombine.low %v2534_v41, %v2541_v52  ;;  %v2301_v62 = vunpack.i.h.s16 %v1894_v53  ;;  %v9024_v0 = vpack.i.b16 %v1894_v53, %v2299_v55  ;;  %v2912_v3 = vrot.slane %v2902_v51, %v9789_v14 }
  0x1f   : > { %9412 = vmatprep.subr.bf16.mxu0 %v9704_v1  ;;  %9623 = vmatprep.subr.bf16.mxu1 %v9704_v1  ;;  %v2919_v4 = vrot.slane %v2903_v58, %v9789_v14  ;;  %v1508_v5 = vrot.slane %v1494_v17, %v9789_v14  ;;  %v1509_v6 = vcombine.high %v9803_v23, %v9803_v23 }
  0x20   : > { %v2557_v7 = vrot.slane %v2543_v61, %v9789_v14  ;;  %v9025_v8 = vpack.i.b16 %v9827_v49, %v2301_v62  ;;  %v2904_v9 = vcombine.low %v9022_v57, %v9023_v63  ;;  %v1518_v10 = vcombine.high %v8950_v59, %v8950_v59  ;;  %v9671_v63 = vld [vmem:[%s11375_s2 + $0x78] sm:$0xff]  }
  0x21   : > { %v2934_v12 = vcombine.low %v2912_v3, %v2919_v4  ;;  %v1510_v15 = vcombine.high %v1508_v5, %v1508_v5  ;;  %v1525_v16 = vrot.slane %v8950_v59, %v9789_v14  ;;  %v9854_v13 = vrot.slane %v9836_v2, %v9789_v14 }
  0x22   : > { %9413 = vmatpush3.bf16.msra.mxu0 %v9666_v39  ;;  %9629 = vmatpush3.bf16.msra.mxu1 %v9666_v39  ;;  %v2558_v17 = vcombine.low %v2550_v56, %v2557_v7  ;;  %v2905_v18 = vcombine.low %v9024_v0, %v9025_v8  ;;  %v2926_v19 = vrot.slane %v2904_v9, %v9789_v14  ;;  %v2177_v23 = vunpack.i.h.s16 %v1508_v5  ;;  %v8952_v9 = vld.sshfl [vmem:[%s9777_s28 + $0x2c] sm:$0x33 pattern:$0x75316420] }
  0x23   : > { %9546 = vmatprep.subr.bf16.mxu0 %v9704_v1  ;;  %9474 = vmatprep.subr.bf16.mxu1 %v9704_v1  ;;  %v1532_v20 = vrot.slane %v1518_v10, %v9789_v14  ;;  %v2942_v21 = vrot.slane %v2934_v12, %v9789_v14  ;;  %v1533_v22 = vcombine.high %v1525_v16, %v1525_v16  ;;  %v2179_v24 = vunpack.i.h.s16 %v1509_v6 }
  0x24   : > { %v2933_v25 = vrot.slane %v2905_v18, %v9789_v14  ;;  %v2181_v27 = vunpack.i.h.s16 %v1510_v15  ;;  %v2183_v28 = vunpack.i.h.s16 %v1525_v16  ;;  %v8990_v32 = vpack.i.b16 %v1508_v5, %v2175_v43 }
  0x25   : > { %9415 = vmatmul.mubr.msk.bf16.vlgmr.msra.gmra.mxu0 %vm3246_vm1, %v2558_v17  ;;  %v1534_v26 = vcombine.high %v1532_v20, %v1532_v20  ;;  %v2185_v30 = vunpack.i.h.s16 %v1532_v20  ;;  %v2187_v31 = vunpack.i.h.s16 %v1533_v22  ;;  %v8991_v33 = vpack.i.b16 %v1509_v6, %v2177_v23 }
  0x26   : > { %9547 = vmatpush3.bf16.msra.mxu0 %v9667_v11  ;;  %9418 = vmatprep.mubr.msk.bf16.mxu0 %vm9705_vm0, %v9704_v1  ;;  %v2935_v35 = vcombine.low %v2926_v19, %v2933_v25  ;;  %v8992_v37 = vpack.i.b16 %v1510_v15, %v2179_v24  ;;  %v8993_v38 = vpack.i.b16 %v1525_v16, %v2181_v27  ;;  %v9670_v11 = vld [vmem:[%s11375_s2 + $0x20] sm:$0xff]  }
  0x27   : > { %v8994_v39 = vpack.i.b16 %v1532_v20, %v2183_v28  ;;  %9548 = vmatprep.subr.bf16.mxu0 %v9704_v1  ;;  %v8995_v40 = vpack.i.b16 %v1533_v22, %v2185_v30  ;;  %v8996_v41 = vpack.i.b16 %v1534_v26, %v2187_v31  ;;  %v2559_v42 = vcombine.low %v8990_v32, %v8991_v33  ;;  %v9672_v28 = vld [vmem:[%s11375_s2 + $0x18] sm:$0xff]  }
  0x28   : > { %v1902_v44 = vcombine.high %v9813_v36, %v9813_v36  ;;  %v2949_v45 = vrot.slane %v2935_v35, %v9789_v14  ;;  %v2560_v46 = vcombine.low %v8992_v37, %v8993_v38  ;;  %v1917_v43 = vcombine.high %v9827_v49, %v9827_v49 }
  0x29   : > { %v1926_v48 = vcombine.high %v8967_v34, %v8967_v34  ;;  %v2561_v51 = vcombine.low %v8994_v39, %v8995_v40  ;;  %v2562_v52 = vcombine.low %v8996_v41, %v9854_v13  ;;  %v2569_v53 = vrot.slane %v2559_v42, %v9789_v14  ;;  %v8969_v42 = vld.sshfl [vmem:[%s9777_s28 + $0xb8] sm:$0x33 pattern:$0x75316420] }
  0x2a   : > { %v1916_v36 = vrot.slane %v1902_v44, %v9789_v14  ;;  %9549 = vmatpush3.bf16.msra.mxu0 %v9669_v29  ;;  %v2950_v54 = vcombine.low %v2942_v21, %v2949_v45  ;;  %v2576_v55 = vrot.slane %v2560_v46, %v9789_v14  ;;  %v1933_v56 = vrot.slane %v8967_v34, %v9789_v14 }
  0x2b   : > { %v1940_v57 = vrot.slane %v1926_v48, %v9789_v14  ;;  %9550 = vmatprep.subr.bf16.mxu0 %v9704_v1  ;;  %v2583_v58 = vrot.slane %v2561_v51, %v9789_v14  ;;  %v2590_v59 = vrot.slane %v2562_v52, %v9789_v14  ;;  %v9890_v62 = vrot.slane %v9872_v47, %v9789_v14  ;;  %v8970_v48 = vld.sshfl [vmem:[%s9777_s28 + $0xbc] sm:$0x33 pattern:$0x75316420] }
  0x2c   : > { %v1918_v61 = vcombine.high %v1916_v36, %v1916_v36  ;;  %9447 = vmatmul.mubr.msk.bf16.vlgmr.msra.gmra.mxu1 %vm3246_vm1, %v2950_v54  ;;  %v2591_v0 = vcombine.low %v2569_v53, %v2576_v55  ;;  %v1941_v3 = vcombine.high %v1933_v56, %v1933_v56  ;;  %v2305_v5 = vunpack.i.h.s16 %v1916_v36 }
  0x2d   : > { %v1942_v4 = vcombine.high %v1940_v57, %v1940_v57  ;;  %9475 = vmatpush3.bf16.msra.mxu1 %v9668_v50  ;;  %v2592_v6 = vcombine.low %v2583_v58, %v2590_v59  ;;  %9450 = vmatprep.mubr.msk.bf16.mxu1 %vm9705_vm0, %v9704_v1  ;;  %v2307_v7 = vunpack.i.h.s16 %v1917_v43  ;;  %v9026_v8 = vpack.i.b16 %v1916_v36, %v2303_v60  ;;  %v8953_v60 = vld.sshfl [vmem:[%s9777_s28 + $0x38] sm:$0x33 pattern:$0x75316420]  ;;  %v9674_v50 = vld [vmem:[%s11375_s2 + $0x10] sm:$0xff]   ;;  %v9675_v58 = vld [vmem:[%s11375_s2 + $0x68] sm:$0xff]  }
  0x2e   : > { %v1542_v10 = vcombine.high %v9836_v2, %v9836_v2  ;;  %v2599_v12 = vrot.slane %v2591_v0, %v9789_v14  ;;  %v9027_v15 = vpack.i.b16 %v1917_v43, %v2305_v5  ;;  %v2953_v16 = vcombine.low %v1940_v57, %v1941_v3  ;;  %9476 = vmatprep.subr.bf16.mxu1 %v9704_v1  ;;  %v9676_v5 = vld [vmem:[%s11375_s2 + $0x8] sm:$0xff]  }
  0x2f   : > { %v2954_v17 = vcombine.low %v1942_v4, %v9890_v62  ;;  %v2606_v18 = vrot.slane %v2592_v6, %v9789_v14  ;;  %v9028_v49 = vpack.i.b16 %v1918_v61, %v2307_v7  ;;  %v1557_v2 = vcombine.high %v9854_v13, %v9854_v13  ;;  %9551 = vmatpush3.bf16.msra.mxu0 %v9671_v63  ;;  %v9673_v13 = vld [vmem:[%s11375_s2 + $0x70] sm:$0xff]  }
  0x30   : > { %v1556_v19 = vrot.slane %v1542_v10, %v9789_v14  ;;  %v2951_v20 = vcombine.low %v9026_v8, %v9027_v15  ;;  %v2975_v21 = vrot.slane %v2953_v16, %v9789_v14  ;;  %v1566_v23 = vcombine.high %v8952_v9, %v8952_v9  ;;  %9552 = vmatprep.subr.bf16.mxu0 %v9704_v1  ;;  %v9678_v16 = vld [vmem:[%s11375_s2 + $0x60] sm:$0xff]  }
  0x31   : > { %v2982_v22 = vrot.slane %v2954_v17, %v9789_v14  ;;  %v2607_v24 = vcombine.low %v2599_v12, %v2606_v18  ;;  %v2952_v25 = vcombine.low %v9028_v49, %v1933_v56  ;;  %v1573_v27 = vrot.slane %v8952_v9, %v9789_v14  ;;  %9477 = vmatpush3.bf16.msra.mxu1 %v9670_v11 }
  0x32   : > { %v1558_v26 = vcombine.high %v1556_v19, %v1556_v19  ;;  %v2961_v29 = vrot.slane %v2951_v20, %v9789_v14  ;;  %v1580_v31 = vrot.slane %v1566_v23, %v9789_v14  ;;  %v1590_v32 = vcombine.high %v8953_v60, %v8953_v60  ;;  %9478 = vmatprep.subr.bf16.mxu1 %v9704_v1  ;;  %v8955_v23 = vld.sshfl [vmem:[%s9777_s28 + $0x48] sm:$0x33 pattern:$0x75316420] }
  0x33   : > { %v2984_v30 = vcombine.low %v2975_v21, %v2982_v22  ;;  %9419 = vmatmul.mubr.msk.bf16.gmra.mxu0 %vm3246_vm1, %v2607_v24  ;;  %v2968_v33 = vrot.slane %v2952_v25, %v9789_v14  ;;  %v1581_v34 = vcombine.high %v1573_v27, %v1573_v27  ;;  %v9930_v35 = vrot.slane %v8953_v60, %v9789_v14  ;;  %v9677_v24 = vld [vmem:[%s11375_s2] sm:$0xff]  }
  0x34   : > { %v2608_v37 = vcombine.low %v1556_v19, %v1557_v2  ;;  %9422 = vmatprep.mubr.msk.bf16.mxu0 %vm9705_vm0, %v9704_v1  ;;  %v1582_v39 = vcombine.high %v1580_v31, %v1580_v31  ;;  %v9936_v40 = vrot.slane %v1590_v32, %v9789_v14  ;;  %v2609_v41 = vcombine.low %v1558_v26, %v1573_v27  ;;  %v8954_v19 = vld.sshfl [vmem:[%s9777_s28 + $0x3c] sm:$0x33 pattern:$0x75316420] }
  0x35   : > { %v2998_v38 = vrot.slane %v2984_v30, %v9789_v14  ;;  %v2983_v44 = vcombine.low %v2961_v29, %v2968_v33  ;;  %v2205_v45 = vunpack.i.h.s16 %v9930_v35  ;;  %v2610_v46 = vcombine.low %v1580_v31, %v1581_v34  ;;  %9479 = vmatpush3.bf16.msra.mxu1 %v9672_v28  ;;  %9553 = vmatpush3.bf16.msra.mxu0 %v9673_v13 }
  0x36   : > { %v2618_v43 = vrot.slane %v2608_v37, %v9789_v14  ;;  %v8997_v51 = vpack.i.b16 %v9930_v35, %v1582_v39  ;;  %v2625_v52 = vrot.slane %v2609_v41, %v9789_v14  ;;  %v1950_v53 = vcombine.high %v9872_v47, %v9872_v47  ;;  %9480 = vmatprep.subr.bf16.mxu1 %v9704_v1 }
  0x37   : > { %v1965_v36 = vcombine.high %v9890_v62, %v9890_v62  ;;  %v2991_v54 = vrot.slane %v2983_v44, %v9789_v14  ;;  %v8998_v55 = vpack.i.b16 %v9936_v40, %v2205_v45  ;;  %v2632_v56 = vrot.slane %v2610_v46, %v9789_v14  ;;  %9554 = vmatprep.subr.bf16.mxu0 %v9704_v1 }
  0x38   : > { %v1974_v57 = vcombine.high %v8969_v42, %v8969_v42  ;;  %v2640_v59 = vcombine.low %v2618_v43, %v2625_v52  ;;  %v1964_v47 = vrot.slane %v1950_v53, %v9789_v14  ;;  %v1981_v61 = vrot.slane %v8969_v42, %v9789_v14 }
  0x39   : > { %v1998_v62 = vcombine.high %v8970_v48, %v8970_v48  ;;  %v2999_v63 = vcombine.low %v2991_v54, %v2998_v38  ;;  %v2611_v0 = vcombine.low %v8997_v51, %v8998_v55  ;;  %v9963_v4 = vrot.slane %v8970_v48, %v9789_v14  ;;  %9481 = vmatpush3.bf16.msra.mxu1 %v9674_v50 }
  0x3a   : > { %v1988_v3 = vrot.slane %v1974_v57, %v9789_v14  ;;  %v2648_v6 = vrot.slane %v2640_v59, %v9789_v14  ;;  %v1966_v7 = vcombine.high %v1964_v47, %v1964_v47  ;;  %v1989_v8 = vcombine.high %v1981_v61, %v1981_v61  ;;  %9482 = vmatprep.subr.bf16.mxu1 %v9704_v1  ;;  %v8971_v59 = vld.sshfl [vmem:[%s9777_s28 + $0xc8] sm:$0x33 pattern:$0x75316420] }
  0x3b   : > { %v9970_v9 = vrot.slane %v1998_v62, %v9789_v14  ;;  %9451 = vmatmul.mubr.msk.bf16.gmra.mxu1 %vm3246_vm1, %v2999_v63  ;;  %v2639_v10 = vrot.slane %v2611_v0, %v9789_v14  ;;  %v2325_v12 = vunpack.i.h.s16 %v1981_v61  ;;  %9555 = vmatpush3.bf16.msra.mxu0 %v9675_v58  ;;  %v2333_v18 = vunpack.i.h.s16 %v9963_v4 }
  0x3c   : > { %v1990_v11 = vcombine.high %v1988_v3, %v1988_v3  ;;  %v2327_v15 = vunpack.i.h.s16 %v1988_v3  ;;  %9454 = vmatprep.mubr.msk.bf16.mxu1 %vm9705_vm0, %v9704_v1  ;;  %v2329_v17 = vunpack.i.h.s16 %v1989_v8  ;;  %v9029_v49 = vpack.i.b16 %v1981_v61, %v1966_v7  ;;  %9556 = vmatprep.subr.bf16.mxu0 %v9704_v1 }
  0x3d   : > { %v3000_v60 = vcombine.low %v1964_v47, %v1965_v36  ;;  %v2641_v2 = vcombine.low %v2632_v56, %v2639_v10  ;;  %v9030_v21 = vpack.i.b16 %v1988_v3, %v2325_v12  ;;  %9483 = vmatpush3.bf16.msra.mxu1 %v9676_v5  ;;  %v9034_v26 = vpack.i.b16 %v9970_v9, %v2333_v18  ;;  %v8972_v5 = vld.sshfl [vmem:[%s9777_s28 + $0xcc] sm:$0x33 pattern:$0x75316420] }
  0x3e   : > { %v2331_v20 = vunpack.i.h.s16 %v1990_v11  ;;  %v9031_v22 = vpack.i.b16 %v1989_v8, %v2327_v15  ;;  %v9032_v25 = vpack.i.b16 %v1990_v11, %v2329_v17  ;;  %v1605_v28 = vcombine.high %v9930_v35, %v9930_v35  ;;  %9484 = vmatprep.subr.bf16.mxu1 %v9704_v1 }
  0x3f   : > { %v3010_v27 = vrot.slane %v3000_v60, %v9789_v14  ;;  %v2655_v13 = vrot.slane %v2641_v2, %v9789_v14  ;;  %v3001_v30 = vcombine.low %v9029_v49, %v9030_v21  ;;  %v1606_v31 = vcombine.high %v9936_v40, %v9936_v40  ;;  %9557 = vmatpush3.bf16.msra.mxu0 %v9678_v16 }
  0x40   : > { %v9033_v29 = vpack.i.b16 %v9963_v4, %v2331_v20  ;;  %v3002_v32 = vcombine.low %v9031_v22, %v9032_v25  ;;  %v1614_v33 = vcombine.high %v8954_v19, %v8954_v19  ;;  %v1621_v34 = vrot.slane %v8954_v19, %v9789_v14  ;;  %v8956_v19 = vld.sshfl [vmem:[%s9777_s28 + $0x4c] sm:$0x33 pattern:$0x75316420] }
  0x41   : > { %v1638_v37 = vcombine.high %v8955_v23, %v8955_v23  ;;  %v2656_v38 = vcombine.low %v2648_v6, %v2655_v13  ;;  %v3017_v35 = vrot.slane %v3001_v30, %v9789_v14  ;;  %v9999_v41 = vrot.slane %v8955_v23, %v9789_v14  ;;  %9485 = vmatpush3.bf16.msra.mxu1 %v9677_v24 }
  0x42   : > { %v3003_v39 = vcombine.low %v9033_v29, %v9034_v26  ;;  %v3024_v42 = vrot.slane %v3002_v32, %v9789_v14  ;;  %v1628_v44 = vrot.slane %v1614_v33, %v9789_v14  ;;  %v1629_v45 = vcombine.high %v1621_v34, %v1621_v34  ;;  %v8957_v29 = vld.sshfl [vmem:[%s9777_s28 + $0x58] sm:$0x33 pattern:$0x75316420] }
  0x43   : > { %v10004_v46 = vrot.slane %v1638_v37, %v9789_v14  ;;  %9423 = vmatmul.mubr.msk.bf16.gmra.mxu0 %vm3246_vm1, %v2656_v38  ;;  %v3032_v48 = vcombine.low %v3010_v27, %v3017_v35  ;;  %v2207_v50 = vunpack.i.h.s16 %v9936_v40  ;;  %v2209_v51 = vunpack.i.h.s16 %v1605_v28 }
  0x44   : > { %v3031_v43 = vrot.slane %v3003_v39, %v9789_v14  ;;  %9426 = vmatprep.mubr.msk.bf16.mxu0 %vm9705_vm0, %v9704_v1  ;;  %v1630_v52 = vcombine.high %v1628_v44, %v1628_v44  ;;  %v2211_v53 = vunpack.i.h.s16 %v1606_v31  ;;  %v2213_v36 = vunpack.i.h.s16 %v1621_v34 }
  0x45   : > { %v2215_v54 = vunpack.i.h.s16 %v1628_v44  ;;  %v3040_v56 = vrot.slane %v3032_v48, %v9789_v14  ;;  %v2217_v57 = vunpack.i.h.s16 %v1629_v45  ;;  %v8999_v58 = vpack.i.b16 %v1605_v28, %v2207_v50 }
  0x46   : > { %v3033_v55 = vcombine.low %v3024_v42, %v3031_v43  ;;  %v9000_v47 = vpack.i.b16 %v1606_v31, %v2209_v51  ;;  %v9001_v61 = vpack.i.b16 %v1621_v34, %v2211_v53  ;;  %v9002_v62 = vpack.i.b16 %v1628_v44, %v2213_v36 }
  0x47   : > { %v9003_v63 = vpack.i.b16 %v1629_v45, %v2215_v54  ;;  %v9004_v0 = vpack.i.b16 %v1630_v52, %v2217_v57  ;;  %v2660_v3 = vcombine.low %v9999_v41, %v10004_v46  ;;  %v2013_v6 = vcombine.high %v9963_v4, %v9963_v4 }
  0x48   : > { %v3047_v40 = vrot.slane %v3033_v55, %v9789_v14  ;;  %v2657_v7 = vcombine.low %v8999_v58, %v9000_v47  ;;  %v2658_v8 = vcombine.low %v9001_v61, %v9002_v62  ;;  %v2014_v10 = vcombine.high %v9970_v9, %v9970_v9  ;;  %v8973_v55 = vld.sshfl [vmem:[%s9777_s28 + $0xd8] sm:$0x33 pattern:$0x75316420] }
  0x49   : > { %v2022_v11 = vcombine.high %v8971_v59, %v8971_v59  ;;  %v2659_v15 = vcombine.low %v9003_v63, %v9004_v0  ;;  %v2688_v16 = vrot.slane %v2660_v3, %v9789_v14  ;;  %v2029_v17 = vrot.slane %v8971_v59, %v9789_v14 }
  0x4a   : > { %v3048_v12 = vcombine.low %v3040_v56, %v3047_v40  ;;  %v2667_v18 = vrot.slane %v2657_v7, %v9789_v14  ;;  %v2674_v49 = vrot.slane %v2658_v8, %v9789_v14  ;;  %v2046_v4 = vcombine.high %v8972_v5, %v8972_v5 }
  0x4b   : > { %v2036_v60 = vrot.slane %v2022_v11, %v9789_v14  ;;  %v2681_v2 = vrot.slane %v2659_v15, %v9789_v14  ;;  %v10030_v20 = vrot.slane %v8972_v5, %v9789_v14  ;;  %v2335_v21 = vunpack.i.h.s16 %v9970_v9 }
  0x4c   : > { %9455 = vmatmul.mubr.msk.bf16.gmra.mxu1 %vm3246_vm1, %v3048_v12  ;;  %v2337_v22 = vunpack.i.h.s16 %v2013_v6  ;;  %v2689_v23 = vcombine.low %v2667_v18, %v2674_v49  ;;  %v10036_v24 = vrot.slane %v2046_v4, %v9789_v14  ;;  %v1662_v30 = vcombine.high %v8956_v19, %v8956_v19 }
  0x4d   : > { %9458 = vmatprep.mubr.msk.bf16.mxu1 %vm9705_vm0, %v9704_v1  ;;  %v3050_v25 = vcombine.low %v2029_v17, %v2036_v60  ;;  %v9048_v26 = vcombine.high %v2029_v17, %v2036_v60  ;;  %v2690_v27 = vcombine.low %v2681_v2, %v2688_v16  ;;  %v9035_v28 = vpack.i.b16 %v2013_v6, %v2335_v21 }
  0x4e   : > { %v9036_v13 = vpack.i.b16 %v2014_v10, %v2337_v22  ;;  %v2697_v31 = vrot.slane %v2689_v23, %v9789_v14  ;;  %v3052_v9 = vcombine.low %v10030_v20, %v10036_v24  ;;  %v1669_v38 = vrot.slane %v8956_v19, %v9789_v14 }
  0x4f   : > { %v3066_v32 = vrot.slane %v3050_v25, %v9789_v14  ;;  %v3073_v33 = vrot.slane %v9048_v26, %v9789_v14  ;;  %v2704_v34 = vrot.slane %v2690_v27, %v9789_v14  ;;  %v1676_v39 = vrot.slane %v1662_v30, %v9789_v14 }
  0x50   : > { %v3049_v37 = vcombine.low %v9035_v28, %v9036_v13  ;;  %v3080_v35 = vrot.slane %v3052_v9, %v9789_v14  ;;  %v1686_v42 = vcombine.high %v8957_v29, %v8957_v29  ;;  %v1693_v44 = vrot.slane %v8957_v29, %v9789_v14  ;;  %v8959_v9 = vld.sshfl [vmem:[%s9777_s28 + $0x68] sm:$0x33 pattern:$0x75316420] }
  0x51   : > { %v9046_v45 = vcombine.high %v9999_v41, %v10004_v46  ;;  %v2705_v43 = vcombine.low %v2697_v31, %v2704_v34  ;;  %v1677_v50 = vcombine.high %v1669_v38, %v1669_v38  ;;  %v1678_v51 = vcombine.high %v1676_v39, %v1676_v39  ;;  %v8974_v41 = vld.sshfl [vmem:[%s9777_s28 + $0xdc] sm:$0x33 pattern:$0x75316420] }
  0x52   : > { %v3059_v48 = vrot.slane %v3049_v37, %v9789_v14  ;;  %v3082_v52 = vcombine.low %v3073_v33, %v3080_v35  ;;  %v1700_v53 = vrot.slane %v1686_v42, %v9789_v14  ;;  %v10053_v36 = vcombine.high %v1693_v44, %v1693_v44 }
  0x53   : > { %v2235_v54 = vunpack.i.h.s16 %v1693_v44  ;;  %9427 = vmatmul.mubr.msk.bf16.gmra.mxu0 %vm3246_vm1, %v2705_v43  ;;  %v9005_v57 = vpack.i.b16 %v1693_v44, %v1678_v51  ;;  %v2707_v58 = vcombine.low %v1669_v38, %v1676_v39  ;;  %v2716_v59 = vrot.slane %v9046_v45, %v9789_v14 }
  0x54   : > { %v3081_v56 = vcombine.low %v3059_v48, %v3066_v32  ;;  %v3096_v46 = vrot.slane %v3082_v52, %v9789_v14  ;;  %9430 = vmatprep.mubr.msk.bf16.mxu0 %vm9705_vm0, %v9704_v1  ;;  %v2237_v47 = vunpack.i.h.s16 %v1700_v53  ;;  %v2061_v62 = vcombine.high %v10030_v20, %v10030_v20 }
  0x55   : > { %v9006_v61 = vpack.i.b16 %v1700_v53, %v2235_v54  ;;  %v2708_v40 = vcombine.low %v1677_v50, %v9005_v57  ;;  %v2723_v0 = vrot.slane %v2707_v58, %v9789_v14  ;;  %v2062_v3 = vcombine.high %v10036_v24, %v10036_v24  ;;  %v8958_v24 = vld.sshfl [vmem:[%s9777_s28 + $0x5c] sm:$0x33 pattern:$0x75316420] }
  0x56   : > { %v3089_v63 = vrot.slane %v3081_v56, %v9789_v14  ;;  %v9007_v5 = vpack.i.b16 %v10053_v36, %v2237_v47  ;;  %v2070_v6 = vcombine.high %v8973_v55, %v8973_v55  ;;  %v2077_v7 = vrot.slane %v8973_v55, %v9789_v14 }
  0x57   : > { %v2094_v8 = vcombine.high %v8974_v41, %v8974_v41  ;;  %v2730_v11 = vrot.slane %v2708_v40, %v9789_v14  ;;  %v2738_v12 = vcombine.low %v2716_v59, %v2723_v0  ;;  %v2101_v15 = vrot.slane %v8974_v41, %v9789_v14  ;;  %v8975_v40 = vld.sshfl [vmem:[%s9777_s28 + $0xe8] sm:$0x33 pattern:$0x75316420] }
  0x58   : > { %v3097_v10 = vcombine.low %v3089_v63, %v3096_v46  ;;  %v2709_v16 = vcombine.low %v9006_v61, %v9007_v5  ;;  %v2084_v17 = vrot.slane %v2070_v6, %v9789_v14  ;;  %v2085_v18 = vcombine.high %v2077_v7, %v2077_v7 }
  0x59   : > { %v10074_v49 = vrot.slane %v2094_v8, %v9789_v14  ;;  %v2746_v60 = vrot.slane %v2738_v12, %v9789_v14  ;;  %v10078_v4 = vcombine.high %v2101_v15, %v2101_v15  ;;  %v2355_v19 = vunpack.i.h.s16 %v2077_v7 }
  0x5a   : > { %9459 = vmatmul.mubr.msk.bf16.gmra.mxu1 %vm3246_vm1, %v3097_v10  ;;  %v2363_v2 = vunpack.i.h.s16 %v2101_v15  ;;  %v2737_v20 = vrot.slane %v2709_v16, %v9789_v14  ;;  %v2086_v21 = vcombine.high %v2084_v17, %v2084_v17  ;;  %v2357_v22 = vunpack.i.h.s16 %v2084_v17 }
  0x5b   : > { %9462 = vmatprep.mubr.msk.bf16.mxu1 %vm9705_vm0, %v9704_v1  ;;  %v2359_v23 = vunpack.i.h.s16 %v2085_v18  ;;  %v2365_v25 = vunpack.i.h.s16 %v10074_v49  ;;  %v9037_v26 = vpack.i.b16 %v2077_v7, %v2062_v3  ;;  %v9038_v27 = vpack.i.b16 %v2084_v17, %v2355_v19 }
  0x5c   : > { %v9042_v28 = vpack.i.b16 %v10074_v49, %v2363_v2  ;;  %v2739_v13 = vcombine.low %v2730_v11, %v2737_v20  ;;  %v2361_v29 = vunpack.i.h.s16 %v2086_v21  ;;  %v9039_v30 = vpack.i.b16 %v2085_v18, %v2357_v22  ;;  %v8976_v11 = vld.sshfl [vmem:[%s9777_s28 + $0xec] sm:$0x33 pattern:$0x75316420] }
  0x5d   : > { %v9040_v31 = vpack.i.b16 %v2086_v21, %v2359_v23  ;;  %v9043_v32 = vpack.i.b16 %v10078_v4, %v2365_v25  ;;  %v3098_v33 = vcombine.low %v2061_v62, %v9037_v26  ;;  %v1702_v34 = vcombine.high %v1700_v53, %v1700_v53 }
  0x5e   : > { %v1710_v37 = vcombine.high %v8958_v24, %v8958_v24  ;;  %v2753_v38 = vrot.slane %v2739_v13, %v9789_v14  ;;  %v9041_v39 = vpack.i.b16 %v2101_v15, %v2361_v29  ;;  %v3099_v35 = vcombine.low %v9038_v27, %v9039_v30  ;;  %v8960_v27 = vld.sshfl [vmem:[%s9777_s28 + $0x6c] sm:$0x33 pattern:$0x75316420] }
  0x5f   : > { %v1717_v42 = vrot.slane %v8958_v24, %v9789_v14  ;;  %v3101_v44 = vcombine.low %v9042_v28, %v9043_v32  ;;  %v3108_v45 = vrot.slane %v3098_v33, %v9789_v14  ;;  %v1734_v48 = vcombine.high %v8959_v9, %v8959_v9 }
  0x60   : > { %v1724_v43 = vrot.slane %v1710_v37, %v9789_v14  ;;  %v2754_v50 = vcombine.low %v2746_v60, %v2753_v38  ;;  %v3100_v51 = vcombine.low %v9040_v31, %v9041_v39  ;;  %v3115_v52 = vrot.slane %v3099_v35, %v9789_v14  ;;  %v8961_v38 = vld.sshfl [vmem:[%s9777_s28 + $0x78] sm:$0x33 pattern:$0x75316420] }
  0x61   : > { %v1725_v54 = vcombine.high %v1717_v42, %v1717_v42  ;;  %v3129_v53 = vrot.slane %v3101_v44, %v9789_v14  ;;  %v1741_v56 = vrot.slane %v8959_v9, %v9789_v14  ;;  %v10096_v57 = vrot.slane %v1734_v48, %v9789_v14 }
  0x62   : > { %v1726_v55 = vcombine.high %v1724_v43, %v1724_v43  ;;  %9431 = vmatmul.mubr.msk.bf16.gmra.mxu0 %vm3246_vm1, %v2754_v50  ;;  %v3122_v58 = vrot.slane %v3100_v51, %v9789_v14  ;;  %v3130_v59 = vcombine.low %v3108_v45, %v3115_v52  ;;  %v2239_v41 = vunpack.i.h.s16 %v10053_v36 }
  0x63   : > { %v2241_v46 = vunpack.i.h.s16 %v1702_v34  ;;  %9434 = vmatprep.mubr.msk.bf16.mxu0 %vm9705_vm0, %v9704_v1  ;;  %v1749_v47 = vcombine.high %v1741_v56, %v1741_v56  ;;  %v2243_v61 = vunpack.i.h.s16 %v1717_v42  ;;  %v2245_v62 = vunpack.i.h.s16 %v1724_v43 }
  0x64   : > { %v2247_v63 = vunpack.i.h.s16 %v1725_v54  ;;  %v3131_v0 = vcombine.low %v3122_v58, %v3129_v53  ;;  %v3138_v3 = vrot.slane %v3130_v59, %v9789_v14  ;;  %v9008_v5 = vpack.i.b16 %v1702_v34, %v2239_v41 }
  0x65   : > { %v9009_v6 = vpack.i.b16 %v1717_v42, %v2241_v46  ;;  %v9010_v7 = vpack.i.b16 %v1724_v43, %v2243_v61  ;;  %v9011_v8 = vpack.i.b16 %v1725_v54, %v2245_v62  ;;  %v2758_v36 = vcombine.low %v10096_v57, %v1749_v47 }
  0x66   : > { %v9012_v10 = vpack.i.b16 %v1726_v55, %v2247_v63  ;;  %v3145_v12 = vrot.slane %v3131_v0, %v9789_v14  ;;  %v2110_v16 = vcombine.high %v10074_v49, %v10074_v49  ;;  %v2118_v17 = vcombine.high %v8975_v40, %v8975_v40 }
  0x67   : > { %v2755_v15 = vcombine.low %v9008_v5, %v9009_v6  ;;  %v2756_v18 = vcombine.low %v9010_v7, %v9011_v8  ;;  %v2786_v19 = vrot.slane %v2758_v36, %v9789_v14  ;;  %v2125_v2 = vrot.slane %v8975_v40, %v9789_v14 }
  0x68   : > { %v2757_v60 = vcombine.low %v9012_v10, %v1741_v56  ;;  %v3146_v20 = vcombine.low %v3138_v3, %v3145_v12  ;;  %v2132_v22 = vrot.slane %v2118_v17, %v9789_v14  ;;  %v2142_v23 = vcombine.high %v8976_v11, %v8976_v11  ;;  %v8962_v3 = vld.sshfl [vmem:[%s9777_s28 + $0x7c] sm:$0x33 pattern:$0x75316420] }
  0x69   : > { %v2765_v21 = vrot.slane %v2755_v15, %v9789_v14  ;;  %v2772_v24 = vrot.slane %v2756_v18, %v9789_v14  ;;  %v2133_v26 = vcombine.high %v2125_v2, %v2125_v2  ;;  %v2149_v49 = vrot.slane %v8976_v11, %v9789_v14  ;;  %v8963_v15 = vld.sshfl [vmem:[%s9777_s28 + $0x88] sm:$0x33 pattern:$0x75316420] }
  0x6a   : > { %v2779_v25 = vrot.slane %v2757_v60, %v9789_v14  ;;  %9463 = vmatmul.mubr.msk.bf16.gmra.mxu1 %vm3246_vm1, %v3146_v20  ;;  %v2134_v28 = vcombine.high %v2132_v22, %v2132_v22  ;;  %v2156_v13 = vrot.slane %v2142_v23, %v9789_v14  ;;  %v2367_v29 = vunpack.i.h.s16 %v10078_v4 }
  0x6b   : > { %v1750_v30 = vcombine.high %v10096_v57, %v10096_v57  ;;  %v2787_v31 = vcombine.low %v2765_v21, %v2772_v24  ;;  %9466 = vmatprep.mubr.msk.bf16.mxu1 %vm9705_vm0, %v9704_v1  ;;  %v2157_v32 = vcombine.high %v2149_v49, %v2149_v49  ;;  %v3148_v33 = vcombine.low %v2132_v22, %v2133_v26 }
  0x6c   : > { %v2788_v9 = vcombine.low %v2779_v25, %v2786_v19  ;;  %v9044_v34 = vpack.i.b16 %v2110_v16, %v2367_v29  ;;  %v3149_v37 = vcombine.low %v2134_v28, %v2149_v49  ;;  %v1758_v39 = vcombine.high %v8960_v27, %v8960_v27 }
  0x6d   : > { %v1765_v35 = vrot.slane %v8960_v27, %v9789_v14  ;;  %v2795_v42 = vrot.slane %v2787_v31, %v9789_v14  ;;  %v3150_v44 = vcombine.low %v2156_v13, %v2157_v32  ;;  %v3164_v45 = vrot.slane %v3148_v33, %v9789_v14 }
  0x6e   : > { %v2802_v4 = vrot.slane %v2788_v9, %v9789_v14  ;;  %v3147_v43 = vcombine.low %v9044_v34, %v2125_v2  ;;  %v3171_v48 = vrot.slane %v3149_v37, %v9789_v14  ;;  %v1772_v50 = vrot.slane %v1758_v39, %v9789_v14  ;;  %v8917_v9 = vld.sshfl [vmem:[%s9777_s28] sm:$0x33 pattern:$0x75316420] }
  0x6f   : > { %v1773_v51 = vcombine.high %v1765_v35, %v1765_v35  ;;  %v3178_v54 = vrot.slane %v3150_v44, %v9789_v14  ;;  %v1782_v53 = vcombine.high %v8961_v38, %v8961_v38  ;;  %v1789_v55 = vrot.slane %v8961_v38, %v9789_v14 }
  0x70   : > { %v2803_v52 = vcombine.low %v2795_v42, %v2802_v4  ;;  %v3157_v56 = vrot.slane %v3147_v43, %v9789_v14  ;;  %v1774_v57 = vcombine.high %v1772_v50, %v1772_v50  ;;  %v2804_v58 = vcombine.low %v1750_v30, %v1765_v35  ;;  %v8918_v4 = vld.sshfl [vmem:[%s9777_s28 + $0x4] sm:$0x33 pattern:$0x75316420] }
  0x71   : > { %v2805_v59 = vcombine.low %v1772_v50, %v1773_v51  ;;  %v3180_v41 = vcombine.low %v3171_v48, %v3178_v54  ;;  %v1796_v46 = vrot.slane %v1782_v53, %v9789_v14  ;;  %v1797_v47 = vcombine.high %v1789_v55, %v1789_v55  ;;  %v8919_v43 = vld.sshfl [vmem:[%s9777_s28 + $0x10] sm:$0x33 pattern:$0x75316420] }
  0x72   : > { %9435 = vmatmul.mubr.msk.bf16.gmra.mxu0 %vm3246_vm1, %v2803_v52  ;;  %v2265_v61 = vunpack.i.h.s16 %v1789_v55  ;;  %v3179_v62 = vcombine.low %v3157_v56, %v3164_v45  ;;  %v9013_v63 = vpack.i.b16 %v1789_v55, %v1774_v57  ;;  %v2814_v40 = vrot.slane %v2804_v58, %v9789_v14 }
  0x73   : > { %9438 = vmatprep.mubr.msk.bf16.mxu0 %vm9705_vm0, %v9704_v1  ;;  %v2821_v0 = vrot.slane %v2805_v59, %v9789_v14  ;;  %v3194_v5 = vrot.slane %v3180_v41, %v9789_v14  ;;  %v1798_v6 = vcombine.high %v1796_v46, %v1796_v46  ;;  %v2267_v7 = vunpack.i.h.s16 %v1796_v46 }
  0x74   : > { %v2269_v8 = vunpack.i.h.s16 %v1797_v47  ;;  %v3187_v10 = vrot.slane %v3179_v62, %v9789_v14  ;;  %v9014_v36 = vpack.i.b16 %v1796_v46, %v2265_v61  ;;  %v2158_v12 = vcombine.high %v2156_v13, %v2156_v13 }
  0x75   : > { %v2836_v11 = vcombine.low %v2814_v40, %v2821_v0  ;;  %v9015_v16 = vpack.i.b16 %v1797_v47, %v2267_v7  ;;  %v1806_v18 = vcombine.high %v8962_v3, %v8962_v3  ;;  %v1813_v60 = vrot.slane %v8962_v3, %v9789_v14  ;;  %v8920_v0 = vld.sshfl [vmem:[%s9777_s28 + $0x14] sm:$0x33 pattern:$0x75316420] }
  0x76   : > { %v9016_v17 = vpack.i.b16 %v1798_v6, %v2269_v8  ;;  %v3195_v19 = vcombine.low %v3187_v10, %v3194_v5  ;;  %v2806_v2 = vcombine.low %v9013_v63, %v9014_v36  ;;  %v2383_v21 = vunpack.i.l.s16 %v2158_v12 }
  0x77   : > { %v2844_v20 = vrot.slane %v2836_v11, %v9789_v14  ;;  %v1820_v23 = vrot.slane %v1806_v18, %v9789_v14  ;;  %v1821_v24 = vcombine.high %v1813_v60, %v1813_v60  ;;  %v1830_v25 = vcombine.high %v8963_v15, %v8963_v15 }
  0x78   : > { %v2807_v22 = vcombine.low %v9015_v16, %v9016_v17  ;;  %9467 = vmatmul.mubr.msk.bf16.gmra.mxu1 %vm3246_vm1, %v3195_v19  ;;  %v2828_v26 = vrot.slane %v2806_v2, %v9789_v14  ;;  %v3202_v49 = vrot.slane %v2383_v21, %v9789_v14  ;;  %v1837_v27 = vrot.slane %v8963_v15, %v9789_v14 }
  0x79   : > { %v2271_v28 = vunpack.i.h.s16 %v1798_v6  ;;  %9470 = vmatprep.mubr.msk.bf16.mxu1 %vm9705_vm0, %v9704_v1  ;;  %v1822_v29 = vcombine.high %v1820_v23, %v1820_v23  ;;  %v1844_v30 = vrot.slane %v1830_v25, %v9789_v14  ;;  %v2273_v31 = vunpack.i.h.s16 %v1813_v60  ;;  %v10177_v6 = vld.sshfl [vmem:[%s9777_s28 + $0x20] sm:$0x33 pattern:$0x75316420] }
  0x7a   : > { %v2835_v13 = vrot.slane %v2807_v22, %v9789_v14  ;;  %v3209_v32 = vrot.slane %v3202_v49, %v9789_v14  ;;  %v2275_v33 = vunpack.i.h.s16 %v1820_v23  ;;  %v2277_v34 = vunpack.i.h.s16 %v1821_v24 }
  0x7b   : > { %v9017_v37 = vpack.i.b16 %v1813_v60, %v2271_v28  ;;  %v9018_v39 = vpack.i.b16 %v1820_v23, %v2273_v31  ;;  %v2855_v35 = vcombine.low %v1837_v27, %v1844_v30  ;;  %v9047_v42 = vcombine.high %v1837_v27, %v1844_v30 }
  0x7c   : > { %v2837_v38 = vcombine.low %v2828_v26, %v2835_v13  ;;  %v9019_v44 = vpack.i.b16 %v1821_v24, %v2275_v33  ;;  %v9020_v45 = vpack.i.b16 %v1822_v29, %v2277_v34  ;;  %v459_v48 = vcombine.high %v8917_v9, %v8917_v9 }
  0x7d   : > { %v466_v50 = vrot.slane %v8917_v9, %v9789_v14  ;;  %v2853_v52 = vcombine.low %v9017_v37, %v9018_v39  ;;  %v2877_v54 = vrot.slane %v2855_v35, %v9789_v14  ;;  %v2884_v53 = vrot.slane %v9047_v42, %v9789_v14 }
  0x7e   : > { %v2851_v51 = vrot.slane %v2837_v38, %v9789_v14  ;;  %v2854_v55 = vcombine.low %v9019_v44, %v9020_v45  ;;  %v473_v56 = vrot.slane %v459_v48, %v9789_v14  ;;  %v483_v57 = vcombine.high %v8918_v4, %v8918_v4 }
  0x7f   : > { %v490_v58 = vrot.slane %v8918_v4, %v9789_v14  ;;  %v2863_v41 = vrot.slane %v2853_v52, %v9789_v14  ;;  %v2886_v46 = vcombine.low %v2877_v54, %v2884_v53  ;;  %v514_v47 = vrot.slane %v8919_v43, %v9789_v14 }
  0x80   : > { %v2852_v59 = vcombine.low %v2844_v20, %v2851_v51  ;;  %9471 = vmatmul.mubr.msk.bf16.gmra.mxu1 %vm3246_vm1, %v3209_v32  ;;  %v2870_v61 = vrot.slane %v2854_v55, %v9789_v14  ;;  %v497_v62 = vrot.slane %v483_v57, %v9789_v14  ;;  %v3557_v40 = vcombine.low %v466_v50, %v473_v56 }
  0x81   : > { %v498_v63 = vcombine.high %v490_v58, %v490_v58  ;;  %v2900_v3 = vrot.slane %v2886_v46, %v9789_v14  ;;  %9486 = vmatprep.mubr.msk.bf16.mxu1 %vm9705_vm0, %v9704_v1  ;;  %v9126_v5 = vcombine.high %v466_v50, %v473_v56  ;;  %v507_v7 = vcombine.high %v8919_v43, %v8919_v43 }
  0x82   : > { %9439 = vmatmul.mubr.msk.bf16.gmra.mxu0 %vm3246_vm1, %v2852_v59  ;;  %v1188_v8 = vunpack.i.h.s16 %v514_v47  ;;  %v2885_v10 = vcombine.low %v2863_v41, %v2870_v61  ;;  %v499_v36 = vcombine.high %v497_v62, %v497_v62  ;;  %v3559_v11 = vcombine.low %v490_v58, %v497_v62  ;;  %v8922_v59 = vld.sshfl [vmem:[%s9777_s28 + $0x24] sm:$0x33 pattern:$0x75316420] }
  0x83   : > { %9442 = vmatprep.mubr.msk.bf16.mxu0 %vm9705_vm0, %v9704_v1  ;;  %v3567_v12 = vrot.slane %v3557_v40, %v9789_v14  ;;  %v3574_v15 = vrot.slane %v9126_v5, %v9789_v14  ;;  %v521_v16 = vrot.slane %v507_v7, %v9789_v14  ;;  %v531_v17 = vcombine.high %v8920_v0, %v8920_v0 }
  0x84   : > { %v538_v18 = vrot.slane %v8920_v0, %v9789_v14  ;;  %v2893_v60 = vrot.slane %v2885_v10, %v9789_v14  ;;  %v9070_v19 = vpack.i.b16 %v514_v47, %v499_v36  ;;  %v3581_v2 = vrot.slane %v3559_v11, %v9789_v14  ;;  %v8923_v0 = vld.sshfl [vmem:[%s9777_s28 + $0x30] sm:$0x33 pattern:$0x75316420] }
  0x85   : > { %v10189_v20 = vrot.slane %v10177_v6, %v9789_v14  ;;  %v3589_v21 = vcombine.low %v3567_v12, %v3574_v15  ;;  %v545_v22 = vrot.slane %v531_v17, %v9789_v14  ;;  %v4681_v24 = vcombine.low %v514_v47, %v521_v16 }
  0x86   : > { %v546_v23 = vcombine.high %v538_v18, %v538_v18  ;;  %v2901_v25 = vcombine.low %v2893_v60, %v2900_v3  ;;  %v3560_v26 = vcombine.low %v498_v63, %v9070_v19  ;;  %v9221_v49 = vcombine.high %v514_v47, %v521_v16 }
  0x87   : > { %v522_v27 = vcombine.high %v514_v47, %v514_v47  ;;  %v3597_v28 = vrot.slane %v3589_v21, %v9789_v14  ;;  %v547_v13 = vcombine.high %v545_v22, %v545_v22  ;;  %v4683_v29 = vcombine.low %v538_v18, %v545_v22 }
  0x88   : > { %v4691_v30 = vrot.slane %v4681_v24, %v9789_v14  ;;  %v3588_v31 = vrot.slane %v3560_v26, %v9789_v14  ;;  %v4698_v9 = vrot.slane %v9221_v49, %v9789_v14  ;;  %v523_v32 = vcombine.high %v521_v16, %v521_v16 }
  0x89   : > { %v1190_v33 = vunpack.i.h.s16 %v521_v16  ;;  %v9165_v34 = vpack.i.b16 %v10189_v20, %v547_v13  ;;  %v4705_v37 = vrot.slane %v4683_v29, %v9789_v14  ;;  %v1192_v38 = vunpack.i.h.s16 %v522_v27 }
  0x8a   : > { %9443 = vmatmul.mubr.msk.bf16.gmra.mxu0 %vm3246_vm1, %v2901_v25  ;;  %v1196_v39 = vunpack.i.h.s16 %v538_v18  ;;  %v3590_v35 = vcombine.low %v3581_v2, %v3588_v31  ;;  %v4713_v42 = vcombine.low %v4691_v30, %v4698_v9  ;;  %v1194_v4 = vunpack.i.h.s16 %v523_v32 }
  0x8b   : > { %9558 = vmatprep.mubr.msk.bf16.mxu0 %vm9705_vm0, %v9704_v1  ;;  %v1198_v44 = vunpack.i.h.s16 %v545_v22  ;;  %v4684_v45 = vcombine.low %v546_v23, %v9165_v34  ;;  %v1200_v43 = vunpack.i.h.s16 %v546_v23  ;;  %v9071_v48 = vpack.i.b16 %v521_v16, %v1188_v8 }
  0x8c   : > { %v9072_v50 = vpack.i.b16 %v522_v27, %v1190_v33  ;;  %v3604_v51 = vrot.slane %v3590_v35, %v9789_v14  ;;  %v4721_v52 = vrot.slane %v4713_v42, %v9789_v14  ;;  %v9073_v54 = vpack.i.b16 %v523_v32, %v1192_v38 }
  0x8d   : > { %v9074_v53 = vpack.i.b16 %v538_v18, %v1194_v4  ;;  %v4712_v55 = vrot.slane %v4684_v45, %v9789_v14  ;;  %v9075_v56 = vpack.i.b16 %v545_v22, %v1196_v39  ;;  %v9076_v57 = vpack.i.b16 %v546_v23, %v1198_v44 }
  0x8e   : > { %v9077_v58 = vpack.i.b16 %v547_v13, %v1200_v43  ;;  %v3605_v41 = vcombine.low %v3597_v28, %v3604_v51  ;;  %v3606_v46 = vcombine.low %v9071_v48, %v9072_v50  ;;  %v555_v61 = vcombine.high %v10177_v6, %v10177_v6 }
  0x8f   : > { %v3607_v47 = vcombine.low %v9073_v54, %v9074_v53  ;;  %v4714_v62 = vcombine.low %v4705_v37, %v4712_v55  ;;  %v3608_v63 = vcombine.low %v9075_v56, %v9076_v57  ;;  %v570_v3 = vcombine.high %v10189_v20, %v10189_v20  ;;  %v8924_v55 = vld.sshfl [vmem:[%s9777_s28 + $0x34] sm:$0x33 pattern:$0x75316420] }
  0x90   : > { %v3609_v40 = vcombine.low %v9077_v58, %v10189_v20  ;;  %9487 = vmatmul.mubr.msk.bf16.vlgmr.msra.gmra.mxu1 %vm3246_vm1, %v3605_v41  ;;  %v3616_v5 = vrot.slane %v3606_v46, %v9789_v14  ;;  %v569_v8 = vrot.slane %v555_v61, %v9789_v14  ;;  %v579_v10 = vcombine.high %v8922_v59, %v8922_v59 }
  0x91   : > { %v3623_v7 = vrot.slane %v3607_v47, %v9789_v14  ;;  %v4728_v36 = vrot.slane %v4714_v62, %v9789_v14  ;;  %9490 = vmatprep.mubr.msk.bf16.mxu1 %vm9705_vm0, %v9704_v1  ;;  %v3630_v6 = vrot.slane %v3608_v63, %v9789_v14  ;;  %v586_v12 = vrot.slane %v8922_v59, %v9789_v14  ;;  %v8925_v59 = vld.sshfl [vmem:[%s9777_s28 + $0x40] sm:$0x33 pattern:$0x75316420] }
  0x92   : > { %v3637_v11 = vrot.slane %v3609_v40, %v9789_v14  ;;  %v571_v16 = vcombine.high %v569_v8, %v569_v8  ;;  %v593_v17 = vrot.slane %v579_v10, %v9789_v14  ;;  %v603_v18 = vcombine.high %v8923_v0, %v8923_v0 }
  0x93   : > { %v3638_v15 = vcombine.low %v3616_v5, %v3623_v7  ;;  %v4729_v60 = vcombine.low %v4721_v52, %v4728_v36  ;;  %v594_v2 = vcombine.high %v586_v12, %v586_v12  ;;  %v610_v21 = vrot.slane %v8923_v0, %v9789_v14 }
  0x94   : > { %v3639_v19 = vcombine.low %v3630_v6, %v3637_v11  ;;  %v595_v23 = vcombine.high %v593_v17, %v593_v17  ;;  %v1203_v24 = vunpack.i.h.s16 %v10189_v20  ;;  %v1205_v25 = vunpack.i.h.s16 %v569_v8 }
  0x95   : > { %v3646_v22 = vrot.slane %v3638_v15, %v9789_v14  ;;  %9559 = vmatmul.mubr.msk.bf16.vlgmr.msra.gmra.mxu0 %vm3246_vm1, %v4729_v60  ;;  %v1207_v49 = vunpack.i.h.s16 %v570_v3  ;;  %v1209_v27 = vunpack.i.h.s16 %v571_v16  ;;  %v1211_v28 = vunpack.i.h.s16 %v586_v12 }
  0x96   : > { %v3653_v26 = vrot.slane %v3639_v19, %v9789_v14  ;;  %9562 = vmatprep.mubr.msk.bf16.mxu0 %vm9705_vm0, %v9704_v1  ;;  %v1213_v13 = vunpack.i.h.s16 %v593_v17  ;;  %v1215_v29 = vunpack.i.h.s16 %v594_v2  ;;  %v9166_v30 = vpack.i.b16 %v569_v8, %v1203_v24 }
  0x97   : > { %v9167_v31 = vpack.i.b16 %v570_v3, %v1205_v25  ;;  %v9168_v32 = vpack.i.b16 %v571_v16, %v1207_v49  ;;  %v9169_v33 = vpack.i.b16 %v586_v12, %v1209_v27  ;;  %v9170_v34 = vpack.i.b16 %v593_v17, %v1211_v28 }
  0x98   : > { %v3654_v9 = vcombine.low %v3646_v22, %v3653_v26  ;;  %v9171_v20 = vpack.i.b16 %v594_v2, %v1213_v13  ;;  %v9172_v37 = vpack.i.b16 %v595_v23, %v1215_v29  ;;  %v10230_v39 = vrot.slane %v603_v18, %v9789_v14 }
  0x99   : > { %v4730_v38 = vcombine.low %v9166_v30, %v9167_v31  ;;  %v4731_v35 = vcombine.low %v9168_v32, %v9169_v33  ;;  %v1218_v42 = vunpack.i.h.s16 %v610_v21  ;;  %v9078_v4 = vpack.i.b16 %v610_v21, %v595_v23 }
  0x9a   : > { %9491 = vmatmul.mubr.msk.bf16.gmra.mxu1 %vm3246_vm1, %v3654_v9  ;;  %v3655_v44 = vcombine.low %v569_v8, %v570_v3  ;;  %v4732_v45 = vcombine.low %v9170_v34, %v9171_v20  ;;  %v4733_v43 = vcombine.low %v9172_v37, %v610_v21  ;;  %v3656_v50 = vcombine.low %v571_v16, %v586_v12 }
  0x9b   : > { %v4740_v48 = vrot.slane %v4730_v38, %v9789_v14  ;;  %9494 = vmatprep.mubr.msk.bf16.mxu1 %vm9705_vm0, %v9704_v1  ;;  %v4747_v51 = vrot.slane %v4731_v35, %v9789_v14  ;;  %v9079_v52 = vpack.i.b16 %v10230_v39, %v1218_v42  ;;  %v3657_v54 = vcombine.low %v593_v17, %v594_v2  ;;  %v8926_v35 = vld.sshfl [vmem:[%s9777_s28 + $0x44] sm:$0x33 pattern:$0x75316420] }
  0x9c   : > { %v3665_v53 = vrot.slane %v3655_v44, %v9789_v14  ;;  %v4754_v56 = vrot.slane %v4732_v45, %v9789_v14  ;;  %v4761_v57 = vrot.slane %v4733_v43, %v9789_v14  ;;  %v3672_v58 = vrot.slane %v3656_v50, %v9789_v14  ;;  %v8927_v43 = vld.sshfl [vmem:[%s9777_s28 + $0x50] sm:$0x33 pattern:$0x75316420] }
  0x9d   : > { %v618_v41 = vcombine.high %v610_v21, %v610_v21  ;;  %v4762_v46 = vcombine.low %v4740_v48, %v4747_v51  ;;  %v3658_v47 = vcombine.low %v9078_v4, %v9079_v52  ;;  %v3679_v61 = vrot.slane %v3657_v54, %v9789_v14 }
  0x9e   : > { %v619_v62 = vcombine.high %v10230_v39, %v10230_v39  ;;  %v4763_v63 = vcombine.low %v4754_v56, %v4761_v57  ;;  %v3687_v40 = vcombine.low %v3665_v53, %v3672_v58  ;;  %v627_v0 = vcombine.high %v8924_v55, %v8924_v55 }
  0x9f   : > { %v634_v3 = vrot.slane %v8924_v55, %v9789_v14  ;;  %v4770_v5 = vrot.slane %v4762_v46, %v9789_v14  ;;  %v3686_v7 = vrot.slane %v3658_v47, %v9789_v14  ;;  %v651_v8 = vcombine.high %v8925_v59, %v8925_v59 }
  0xa0   : > { %v10251_v10 = vrot.slane %v8925_v59, %v9789_v14  ;;  %v4777_v36 = vrot.slane %v4763_v63, %v9789_v14  ;;  %v3695_v6 = vrot.slane %v3687_v40, %v9789_v14  ;;  %v641_v11 = vrot.slane %v627_v0, %v9789_v14 }
  0xa1   : > { %v642_v12 = vcombine.high %v634_v3, %v634_v3  ;;  %v3688_v15 = vcombine.low %v3679_v61, %v3686_v7  ;;  %v10257_v16 = vrot.slane %v651_v8, %v9789_v14  ;;  %v4779_v18 = vcombine.low %v10230_v39, %v618_v41 }
  0xa2   : > { %v1233_v17 = vunpack.i.h.s16 %v10251_v10  ;;  %v4778_v60 = vcombine.low %v4770_v5, %v4777_v36  ;;  %v643_v19 = vcombine.high %v641_v11, %v641_v11  ;;  %v4780_v2 = vcombine.low %v619_v62, %v634_v3 }
  0xa3   : > { %v4781_v21 = vcombine.low %v641_v11, %v642_v12  ;;  %v3702_v22 = vrot.slane %v3688_v15, %v9789_v14  ;;  %v4789_v24 = vrot.slane %v4779_v18, %v9789_v14  ;;  %v1220_v25 = vunpack.i.h.s16 %v10230_v39 }
  0xa4   : > { %v9174_v23 = vpack.i.b16 %v10257_v16, %v1233_v17  ;;  %9563 = vmatmul.mubr.msk.bf16.gmra.mxu0 %vm3246_vm1, %v4778_v60  ;;  %v9173_v26 = vpack.i.b16 %v10251_v10, %v643_v19  ;;  %v4796_v49 = vrot.slane %v4780_v2, %v9789_v14  ;;  %v1222_v28 = vunpack.i.h.s16 %v618_v41 }
  0xa5   : > { %v4803_v27 = vrot.slane %v4781_v21, %v9789_v14  ;;  %v3703_v13 = vcombine.low %v3695_v6, %v3702_v22  ;;  %9566 = vmatprep.mubr.msk.bf16.mxu0 %vm9705_vm0, %v9704_v1  ;;  %v1224_v29 = vunpack.i.h.s16 %v619_v62  ;;  %v1226_v30 = vunpack.i.h.s16 %v634_v3 }
  0xa6   : > { %v1228_v31 = vunpack.i.h.s16 %v641_v11  ;;  %v4782_v9 = vcombine.low %v9173_v26, %v9174_v23  ;;  %v4811_v32 = vcombine.low %v4789_v24, %v4796_v49  ;;  %v1230_v33 = vunpack.i.h.s16 %v642_v12 }
  0xa7   : > { %v9080_v34 = vpack.i.b16 %v618_v41, %v1220_v25  ;;  %9495 = vmatmul.mubr.msk.bf16.gmra.mxu1 %vm3246_vm1, %v3703_v13  ;;  %v9081_v20 = vpack.i.b16 %v619_v62, %v1222_v28  ;;  %v9082_v37 = vpack.i.b16 %v634_v3, %v1224_v29  ;;  %v9083_v38 = vpack.i.b16 %v641_v11, %v1226_v30  ;;  %v8928_v30 = vld.sshfl [vmem:[%s9777_s28 + $0x54] sm:$0x33 pattern:$0x75316420] }
  0xa8   : > { %v9084_v39 = vpack.i.b16 %v642_v12, %v1228_v31  ;;  %v4810_v42 = vrot.slane %v4782_v9, %v9789_v14  ;;  %v4819_v4 = vrot.slane %v4811_v32, %v9789_v14  ;;  %9498 = vmatprep.mubr.msk.bf16.mxu1 %vm9705_vm0, %v9704_v1  ;;  %v9085_v44 = vpack.i.b16 %v643_v19, %v1230_v33 }
  0xa9   : > { %v3707_v45 = vcombine.low %v10251_v10, %v10257_v16  ;;  %v3704_v48 = vcombine.low %v9080_v34, %v9081_v20  ;;  %v3705_v50 = vcombine.low %v9082_v37, %v9083_v38  ;;  %v666_v51 = vcombine.high %v10251_v10, %v10251_v10 }
  0xaa   : > { %v667_v52 = vcombine.high %v10257_v16, %v10257_v16  ;;  %v4812_v54 = vcombine.low %v4803_v27, %v4810_v42  ;;  %v3706_v53 = vcombine.low %v9084_v39, %v9085_v44  ;;  %v675_v56 = vcombine.high %v8926_v35, %v8926_v35  ;;  %v8929_v39 = vld.sshfl [vmem:[%s9777_s28 + $0x60] sm:$0x33 pattern:$0x75316420] }
  0xab   : > { %v3735_v55 = vrot.slane %v3707_v45, %v9789_v14  ;;  %v3714_v57 = vrot.slane %v3704_v48, %v9789_v14  ;;  %v3721_v58 = vrot.slane %v3705_v50, %v9789_v14  ;;  %v682_v59 = vrot.slane %v8926_v35, %v9789_v14 }
  0xac   : > { %v699_v41 = vcombine.high %v8927_v43, %v8927_v43  ;;  %v4826_v46 = vrot.slane %v4812_v54, %v9789_v14  ;;  %v3728_v47 = vrot.slane %v3706_v53, %v9789_v14  ;;  %v689_v61 = vrot.slane %v675_v56, %v9789_v14 }
  0xad   : > { %v10292_v62 = vrot.slane %v8927_v43, %v9789_v14  ;;  %v3736_v63 = vcombine.low %v3714_v57, %v3721_v58  ;;  %v690_v40 = vcombine.high %v682_v59, %v682_v59  ;;  %v1235_v3 = vunpack.i.h.s16 %v10257_v16 }
  0xae   : > { %v10295_v0 = vrot.slane %v699_v41, %v9789_v14  ;;  %v4827_v5 = vcombine.low %v4819_v4, %v4826_v46  ;;  %v3737_v7 = vcombine.low %v3728_v47, %v3735_v55  ;;  %v691_v8 = vcombine.high %v689_v61, %v689_v61 }
  0xaf   : > { %v1237_v36 = vunpack.i.h.s16 %v666_v51  ;;  %v3744_v6 = vrot.slane %v3736_v63, %v9789_v14  ;;  %v1239_v11 = vunpack.i.h.s16 %v667_v52  ;;  %v1241_v12 = vunpack.i.h.s16 %v682_v59 }
  0xb0   : > { %v1243_v15 = vunpack.i.h.s16 %v689_v61  ;;  %9567 = vmatmul.mubr.msk.bf16.gmra.mxu0 %vm3246_vm1, %v4827_v5  ;;  %v3751_v17 = vrot.slane %v3737_v7, %v9789_v14  ;;  %v1245_v18 = vunpack.i.h.s16 %v690_v40  ;;  %v9175_v60 = vpack.i.b16 %v666_v51, %v1235_v3 }
  0xb1   : > { %v9176_v19 = vpack.i.b16 %v667_v52, %v1237_v36  ;;  %9570 = vmatprep.mubr.msk.bf16.mxu0 %vm9705_vm0, %v9704_v1  ;;  %v9177_v2 = vpack.i.b16 %v682_v59, %v1239_v11  ;;  %v9178_v21 = vpack.i.b16 %v689_v61, %v1241_v12  ;;  %v4831_v23 = vcombine.low %v10292_v62, %v10295_v0 }
  0xb2   : > { %v9179_v22 = vpack.i.b16 %v690_v40, %v1243_v15  ;;  %v3752_v24 = vcombine.low %v3744_v6, %v3751_v17  ;;  %v9180_v25 = vpack.i.b16 %v691_v8, %v1245_v18  ;;  %v10307_v49 = vcombine.high %v10292_v62, %v10292_v62 }
  0xb3   : > { %v4828_v26 = vcombine.low %v9175_v60, %v9176_v19  ;;  %v4829_v27 = vcombine.low %v9177_v2, %v9178_v21  ;;  %v4859_v28 = vrot.slane %v4831_v23, %v9789_v14  ;;  %v1248_v13 = vunpack.i.h.s16 %v10292_v62 }
  0xb4   : > { %v1250_v29 = vunpack.i.h.s16 %v10295_v0  ;;  %9499 = vmatmul.mubr.msk.bf16.gmra.mxu1 %vm3246_vm1, %v3752_v24  ;;  %v4830_v31 = vcombine.low %v9179_v22, %v9180_v25  ;;  %v9086_v32 = vpack.i.b16 %v10292_v62, %v691_v8  ;;  %v9127_v33 = vcombine.high %v10251_v10, %v10257_v16  ;;  %v8930_v25 = vld.sshfl [vmem:[%s9777_s28 + $0x64] sm:$0x33 pattern:$0x75316420] }
  0xb5   : > { %v4838_v9 = vrot.slane %v4828_v26, %v9789_v14  ;;  %v4845_v34 = vrot.slane %v4829_v27, %v9789_v14  ;;  %9502 = vmatprep.mubr.msk.bf16.mxu1 %vm9705_vm0, %v9704_v1  ;;  %v9087_v20 = vpack.i.b16 %v10295_v0, %v1248_v13  ;;  %v3754_v38 = vcombine.low %v682_v59, %v689_v61 }
  0xb6   : > { %v9088_v37 = vpack.i.b16 %v10307_v49, %v1250_v29  ;;  %v4852_v35 = vrot.slane %v4830_v31, %v9789_v14  ;;  %v3755_v42 = vcombine.low %v690_v40, %v9086_v32  ;;  %v3763_v4 = vrot.slane %v9127_v33, %v9789_v14  ;;  %v8931_v31 = vld.sshfl [vmem:[%s9777_s28 + $0x70] sm:$0x33 pattern:$0x75316420] }
  0xb7   : > { %v723_v44 = vcombine.high %v8928_v30, %v8928_v30  ;;  %v4860_v45 = vcombine.low %v4838_v9, %v4845_v34  ;;  %v3770_v10 = vrot.slane %v3754_v38, %v9789_v14  ;;  %v730_v16 = vrot.slane %v8928_v30, %v9789_v14 }
  0xb8   : > { %v3756_v43 = vcombine.low %v9087_v20, %v9088_v37  ;;  %v4861_v48 = vcombine.low %v4852_v35, %v4859_v28  ;;  %v3777_v50 = vrot.slane %v3755_v42, %v9789_v14  ;;  %v747_v52 = vcombine.high %v8929_v39, %v8929_v39 }
  0xb9   : > { %v737_v51 = vrot.slane %v723_v44, %v9789_v14  ;;  %v4868_v54 = vrot.slane %v4860_v45, %v9789_v14  ;;  %v3785_v55 = vcombine.low %v3763_v4, %v3770_v10  ;;  %v738_v56 = vcombine.high %v730_v16, %v730_v16 }
  0xba   : > { %v3784_v53 = vrot.slane %v3756_v43, %v9789_v14  ;;  %v4875_v57 = vrot.slane %v4861_v48, %v9789_v14  ;;  %v754_v59 = vrot.slane %v8929_v39, %v9789_v14  ;;  %v761_v41 = vrot.slane %v747_v52, %v9789_v14 }
  0xbb   : > { %v739_v58 = vcombine.high %v737_v51, %v737_v51  ;;  %v3793_v47 = vrot.slane %v3785_v55, %v9789_v14  ;;  %v9222_v61 = vcombine.high %v10292_v62, %v10295_v0  ;;  %v4878_v63 = vcombine.low %v730_v16, %v737_v51 }
  0xbc   : > { %v3786_v46 = vcombine.low %v3777_v50, %v3784_v53  ;;  %v4876_v40 = vcombine.low %v4868_v54, %v4875_v57  ;;  %v10338_v3 = vcombine.high %v754_v59, %v754_v59  ;;  %v1263_v5 = vunpack.i.h.s16 %v754_v59 }
  0xbd   : > { %v1265_v7 = vunpack.i.h.s16 %v761_v41  ;;  %v9181_v36 = vpack.i.b16 %v754_v59, %v739_v58  ;;  %v4887_v6 = vrot.slane %v9222_v61, %v9789_v14  ;;  %v4894_v11 = vrot.slane %v4878_v63, %v9789_v14 }
  0xbe   : > { %v3800_v8 = vrot.slane %v3786_v46, %v9789_v14  ;;  %9571 = vmatmul.mubr.msk.bf16.gmra.mxu0 %vm3246_vm1, %v4876_v40  ;;  %v9182_v12 = vpack.i.b16 %v761_v41, %v1263_v5  ;;  %v715_v62 = vcombine.high %v10295_v0, %v10295_v0  ;;  %v1252_v17 = vunpack.i.h.s16 %v10307_v49 }
  0xbf   : > { %v9183_v15 = vpack.i.b16 %v10338_v3, %v1265_v7  ;;  %9574 = vmatprep.mubr.msk.bf16.mxu0 %vm9705_vm0, %v9704_v1  ;;  %v4879_v60 = vcombine.low %v738_v56, %v9181_v36  ;;  %v4909_v19 = vcombine.low %v4887_v6, %v4894_v11  ;;  %v1256_v2 = vunpack.i.h.s16 %v730_v16 }
  0xc0   : > { %v3801_v18 = vcombine.low %v3793_v47, %v3800_v8  ;;  %v1254_v22 = vunpack.i.h.s16 %v715_v62  ;;  %v1258_v23 = vunpack.i.h.s16 %v737_v51  ;;  %v1260_v24 = vunpack.i.h.s16 %v738_v56 }
  0xc1   : > { %v4880_v21 = vcombine.low %v9182_v12, %v9183_v15  ;;  %v4901_v26 = vrot.slane %v4879_v60, %v9789_v14  ;;  %v4917_v0 = vrot.slane %v4909_v19, %v9789_v14  ;;  %v9089_v49 = vpack.i.b16 %v715_v62, %v1252_v17 }
  0xc2   : > { %9503 = vmatmul.mubr.msk.bf16.gmra.mxu1 %vm3246_vm1, %v3801_v18  ;;  %v9091_v27 = vpack.i.b16 %v737_v51, %v1256_v2  ;;  %v9090_v13 = vpack.i.b16 %v730_v16, %v1254_v22  ;;  %v9092_v29 = vpack.i.b16 %v738_v56, %v1258_v23  ;;  %v9093_v30 = vpack.i.b16 %v739_v58, %v1260_v24  ;;  %v8932_v18 = vld.sshfl [vmem:[%s9777_s28 + $0x74] sm:$0x33 pattern:$0x75316420] }
  0xc3   : > { %v4908_v28 = vrot.slane %v4880_v21, %v9789_v14  ;;  %9506 = vmatprep.mubr.msk.bf16.mxu1 %vm9705_vm0, %v9704_v1  ;;  %v3805_v9 = vcombine.low %v761_v41, %v10338_v3  ;;  %v10359_v32 = vcombine.high %v761_v41, %v761_v41  ;;  %v771_v33 = vcombine.high %v8930_v25, %v8930_v25 }
  0xc4   : > { %v778_v34 = vrot.slane %v8930_v25, %v9789_v14  ;;  %v3802_v37 = vcombine.low %v9089_v49, %v9090_v13  ;;  %v3803_v38 = vcombine.low %v9091_v27, %v9092_v29  ;;  %v3804_v39 = vcombine.low %v9093_v30, %v754_v59  ;;  %v8933_v27 = vld.sshfl [vmem:[%s9777_s28 + $0x80] sm:$0x33 pattern:$0x75316420] }
  0xc5   : > { %v4910_v20 = vcombine.low %v4901_v26, %v4908_v28  ;;  %v3833_v35 = vrot.slane %v3805_v9, %v9789_v14  ;;  %v785_v42 = vrot.slane %v771_v33, %v9789_v14  ;;  %v795_v44 = vcombine.high %v8931_v31, %v8931_v31 }
  0xc6   : > { %v786_v4 = vcombine.high %v778_v34, %v778_v34  ;;  %v3812_v43 = vrot.slane %v3802_v37, %v9789_v14  ;;  %v3819_v10 = vrot.slane %v3803_v38, %v9789_v14  ;;  %v3826_v16 = vrot.slane %v3804_v39, %v9789_v14 }
  0xc7   : > { %v4924_v45 = vrot.slane %v4910_v20, %v9789_v14  ;;  %v787_v48 = vcombine.high %v785_v42, %v785_v42  ;;  %v802_v50 = vrot.slane %v8931_v31, %v9789_v14  ;;  %v809_v51 = vrot.slane %v795_v44, %v9789_v14 }
  0xc8   : > { %v1267_v52 = vunpack.i.h.s16 %v10338_v3  ;;  %v3834_v53 = vcombine.low %v3812_v43, %v3819_v10  ;;  %v3835_v55 = vcombine.low %v3826_v16, %v3833_v35  ;;  %v1269_v56 = vunpack.i.h.s16 %v10359_v32 }
  0xc9   : > { %v4925_v54 = vcombine.low %v4917_v0, %v4924_v45  ;;  %v810_v57 = vcombine.high %v802_v50, %v802_v50  ;;  %v1271_v58 = vunpack.i.h.s16 %v778_v34  ;;  %v1273_v59 = vunpack.i.h.s16 %v785_v42 }
  0xca   : > { %v1275_v41 = vunpack.i.h.s16 %v786_v4  ;;  %v3842_v46 = vrot.slane %v3834_v53, %v9789_v14  ;;  %v3849_v47 = vrot.slane %v3835_v55, %v9789_v14  ;;  %v9184_v61 = vpack.i.b16 %v10359_v32, %v1267_v52 }
  0xcb   : > { %9575 = vmatmul.mubr.msk.bf16.gmra.mxu0 %vm3246_vm1, %v4925_v54  ;;  %v9185_v63 = vpack.i.b16 %v778_v34, %v1269_v56  ;;  %v9186_v40 = vpack.i.b16 %v785_v42, %v1271_v58  ;;  %v9187_v3 = vpack.i.b16 %v786_v4, %v1273_v59  ;;  %v4929_v7 = vcombine.low %v809_v51, %v810_v57 }
  0xcc   : > { %9578 = vmatprep.mubr.msk.bf16.mxu0 %vm9705_vm0, %v9704_v1  ;;  %v9188_v5 = vpack.i.b16 %v787_v48, %v1275_v41  ;;  %v3850_v8 = vcombine.low %v3842_v46, %v3849_v47  ;;  %v10378_v6 = vcombine.high %v809_v51, %v809_v51  ;;  %v1278_v11 = vunpack.i.h.s16 %v802_v50 }
  0xcd   : > { %v4926_v36 = vcombine.low %v9184_v61, %v9185_v63  ;;  %v4927_v12 = vcombine.low %v9186_v40, %v9187_v3  ;;  %v4957_v62 = vrot.slane %v4929_v7, %v9789_v14  ;;  %v1280_v17 = vunpack.i.h.s16 %v809_v51 }
  0xce   : > { %v4928_v15 = vcombine.low %v9188_v5, %v802_v50  ;;  %9507 = vmatmul.mubr.msk.bf16.gmra.mxu1 %vm3246_vm1, %v3850_v8  ;;  %v1282_v19 = vunpack.i.h.s16 %v810_v57  ;;  %v9094_v2 = vpack.i.b16 %v802_v50, %v787_v48  ;;  %v9095_v21 = vpack.i.b16 %v809_v51, %v1278_v11  ;;  %v8934_v8 = vld.sshfl [vmem:[%s9777_s28 + $0x84] sm:$0x33 pattern:$0x75316420] }
  0xcf   : > { %v4936_v60 = vrot.slane %v4926_v36, %v9789_v14  ;;  %v4943_v22 = vrot.slane %v4927_v12, %v9789_v14  ;;  %9510 = vmatprep.mubr.msk.bf16.mxu1 %vm9705_vm0, %v9704_v1  ;;  %v9096_v24 = vpack.i.b16 %v810_v57, %v1280_v17  ;;  %v3851_v25 = vcombine.low %v10359_v32, %v778_v34 }
  0xd0   : > { %v4950_v23 = vrot.slane %v4928_v15, %v9789_v14  ;;  %v9097_v26 = vpack.i.b16 %v10378_v6, %v1282_v19  ;;  %v3852_v0 = vcombine.low %v785_v42, %v786_v4  ;;  %v3853_v49 = vcombine.low %v9094_v2, %v9095_v21 }
  0xd1   : > { %v819_v28 = vcombine.high %v8932_v18, %v8932_v18  ;;  %v4958_v13 = vcombine.low %v4936_v60, %v4943_v22  ;;  %v3861_v30 = vrot.slane %v3851_v25, %v9789_v14  ;;  %v826_v31 = vrot.slane %v8932_v18, %v9789_v14 }
  0xd2   : > { %v4959_v29 = vcombine.low %v4950_v23, %v4957_v62  ;;  %v3854_v9 = vcombine.low %v9096_v24, %v9097_v26  ;;  %v3868_v33 = vrot.slane %v3852_v0, %v9789_v14  ;;  %v3875_v20 = vrot.slane %v3853_v49, %v9789_v14  ;;  %v8935_v62 = vld.sshfl [vmem:[%s9777_s28 + $0x90] sm:$0x33 pattern:$0x75316420] }
  0xd3   : > { %v833_v37 = vrot.slane %v819_v28, %v9789_v14  ;;  %v4966_v32 = vrot.slane %v4958_v13, %v9789_v14  ;;  %v834_v38 = vcombine.high %v826_v31, %v826_v31  ;;  %v843_v39 = vcombine.high %v8933_v27, %v8933_v27 }
  0xd4   : > { %v4973_v34 = vrot.slane %v4959_v29, %v9789_v14  ;;  %v3882_v35 = vrot.slane %v3854_v9, %v9789_v14  ;;  %v3883_v42 = vcombine.low %v3861_v30, %v3868_v33  ;;  %v850_v44 = vrot.slane %v8933_v27, %v9789_v14 }
  0xd5   : > { %v835_v4 = vcombine.high %v833_v37, %v833_v37  ;;  %v857_v43 = vrot.slane %v843_v39, %v9789_v14  ;;  %v4975_v10 = vcombine.low %v10378_v6, %v826_v31  ;;  %v4976_v16 = vcombine.low %v833_v37, %v834_v38 }
  0xd6   : > { %v4974_v45 = vcombine.low %v4966_v32, %v4973_v34  ;;  %v3884_v48 = vcombine.low %v3875_v20, %v3882_v35  ;;  %v3891_v50 = vrot.slane %v3883_v42, %v9789_v14  ;;  %v858_v51 = vcombine.high %v850_v44, %v850_v44 }
  0xd7   : > { %v1293_v52 = vunpack.i.h.s16 %v850_v44  ;;  %v859_v54 = vcombine.high %v857_v43, %v857_v43  ;;  %v1295_v53 = vunpack.i.h.s16 %v857_v43  ;;  %v9189_v55 = vpack.i.b16 %v850_v44, %v835_v4 }
  0xd8   : > { %9579 = vmatmul.mubr.msk.bf16.gmra.mxu0 %vm3246_vm1, %v4974_v45  ;;  %v4985_v56 = vrot.slane %v4975_v10, %v9789_v14  ;;  %v3898_v57 = vrot.slane %v3884_v48, %v9789_v14  ;;  %v1297_v58 = vunpack.i.h.s16 %v858_v51  ;;  %v4992_v41 = vrot.slane %v4976_v16, %v9789_v14  ;;  %v8936_v45 = vld.sshfl [vmem:[%s9777_s28 + $0x94] sm:$0x33 pattern:$0x75316420] }
  0xd9   : > { %9582 = vmatprep.mubr.msk.bf16.mxu0 %vm9705_vm0, %v9704_v1  ;;  %v9190_v59 = vpack.i.b16 %v857_v43, %v1293_v52  ;;  %v9191_v46 = vpack.i.b16 %v858_v51, %v1295_v53  ;;  %v1284_v47 = vunpack.i.h.s16 %v10378_v6  ;;  %v1286_v61 = vunpack.i.h.s16 %v826_v31 }
  0xda   : > { %v1288_v63 = vunpack.i.h.s16 %v833_v37  ;;  %v3899_v40 = vcombine.low %v3891_v50, %v3898_v57  ;;  %v9192_v3 = vpack.i.b16 %v859_v54, %v1297_v58  ;;  %v5007_v7 = vcombine.low %v4985_v56, %v4992_v41 }
  0xdb   : > { %v4977_v5 = vcombine.low %v9189_v55, %v9190_v59  ;;  %v1290_v36 = vunpack.i.h.s16 %v834_v38  ;;  %v9098_v11 = vpack.i.b16 %v826_v31, %v1284_v47  ;;  %v9099_v12 = vpack.i.b16 %v833_v37, %v1286_v61 }
  0xdc   : > { %v9100_v15 = vpack.i.b16 %v834_v38, %v1288_v63  ;;  %9511 = vmatmul.mubr.msk.bf16.gmra.mxu1 %vm3246_vm1, %v3899_v40  ;;  %v4978_v17 = vcombine.low %v9191_v46, %v9192_v3  ;;  %v5015_v60 = vrot.slane %v5007_v7, %v9789_v14  ;;  %v3902_v6 = vcombine.low %v850_v44, %v857_v43 }
  0xdd   : > { %v4999_v18 = vrot.slane %v4977_v5, %v9789_v14  ;;  %9514 = vmatprep.mubr.msk.bf16.mxu1 %vm9705_vm0, %v9704_v1  ;;  %v9101_v19 = vpack.i.b16 %v835_v4, %v1290_v36  ;;  %v3900_v2 = vcombine.low %v9098_v11, %v9099_v12  ;;  %v9128_v21 = vcombine.high %v850_v44, %v857_v43 }
  0xde   : > { %v867_v22 = vcombine.high %v8934_v8, %v8934_v8  ;;  %v5006_v23 = vrot.slane %v4978_v17, %v9789_v14  ;;  %v3924_v24 = vrot.slane %v3902_v6, %v9789_v14  ;;  %v10420_v25 = vrot.slane %v8934_v8, %v9789_v14 }
  0xdf   : > { %v891_v26 = vcombine.high %v8935_v62, %v8935_v62  ;;  %v3901_v0 = vcombine.low %v9100_v15, %v9101_v19  ;;  %v3910_v49 = vrot.slane %v3900_v2, %v9789_v14  ;;  %v3931_v27 = vrot.slane %v9128_v21, %v9789_v14 }
  0xe0   : > { %v10425_v28 = vrot.slane %v867_v22, %v9789_v14  ;;  %v5008_v13 = vcombine.low %v4999_v18, %v5006_v23  ;;  %v882_v29 = vcombine.high %v10420_v25, %v10420_v25  ;;  %v898_v30 = vrot.slane %v8935_v62, %v9789_v14  ;;  %v10465_v22 = vld.sshfl [vmem:[%s9777_s28 + $0xa4] sm:$0x33 pattern:$0x75316420] }
  0xe1   : > { %v905_v31 = vrot.slane %v891_v26, %v9789_v14  ;;  %v3917_v9 = vrot.slane %v3901_v0, %v9789_v14  ;;  %v3933_v33 = vcombine.low %v3924_v24, %v3931_v27  ;;  %v1299_v37 = vunpack.i.h.s16 %v859_v54 }
  0xe2   : > { %v883_v20 = vcombine.high %v10425_v28, %v10425_v28  ;;  %v5022_v32 = vrot.slane %v5008_v13, %v9789_v14  ;;  %v1301_v34 = vunpack.i.h.s16 %v10420_v25  ;;  %v1303_v38 = vunpack.i.h.s16 %v10425_v28 }
  0xe3   : > { %v1305_v39 = vunpack.i.h.s16 %v882_v29  ;;  %v3932_v35 = vcombine.low %v3910_v49, %v3917_v9  ;;  %v3947_v42 = vrot.slane %v3933_v33, %v9789_v14  ;;  %v9193_v4 = vpack.i.b16 %v10420_v25, %v1299_v37 }
  0xe4   : > { %v5026_v44 = vcombine.low %v898_v30, %v905_v31  ;;  %v5023_v43 = vcombine.low %v5015_v60, %v5022_v32  ;;  %v9194_v10 = vpack.i.b16 %v10425_v28, %v1301_v34  ;;  %v9195_v16 = vpack.i.b16 %v882_v29, %v1303_v38  ;;  %v8937_v60 = vld.sshfl [vmem:[%s9777_s28 + $0xa0] sm:$0x33 pattern:$0x75316420] }
  0xe5   : > { %v9196_v48 = vpack.i.b16 %v883_v20, %v1305_v39  ;;  %v10441_v50 = vpop.f32.mrf.mxu0  ;;  %v3940_v51 = vrot.slane %v3932_v35, %v9789_v14  ;;  %v9223_v52 = vcombine.high %v898_v30, %v905_v31  ;;  %v906_v53 = vcombine.high %v898_v30, %v898_v30 }
  0xe6   : > { %v5048_v54 = vrot.slane %v5026_v44, %v9789_v14  ;;  %9583 = vmatmul.mubr.msk.bf16.gmra.mxu0 %vm3246_vm1, %v5023_v43  ;;  %v5024_v55 = vcombine.low %v9193_v4, %v9194_v10  ;;  %v907_v57 = vcombine.high %v905_v31, %v905_v31  ;;  %v10447_v58 = vrot.slane %v8936_v45, %v9789_v14 }
  0xe7   : > { %v5025_v56 = vcombine.low %v9195_v16, %v9196_v48  ;;  %v9416_v59 = vpop.f32.mrf.mxu0  ;;  %v3948_v41 = vcombine.low %v3940_v51, %v3947_v42  ;;  %9586 = vmatprep.mubr.msk.bf16.mxu0 %vm9705_vm0, %v9704_v1  ;;  %v5055_v46 = vrot.slane %v9223_v52, %v9789_v14  ;;  %v1308_v47 = vunpack.i.h.s16 %v898_v30 }
  0xe8   : > { %v1310_v61 = vunpack.i.h.s16 %v905_v31  ;;  %v5034_v63 = vrot.slane %v5024_v55, %v9789_v14  ;;  %v1312_v3 = vunpack.i.h.s16 %v906_v53  ;;  %v1314_v5 = vunpack.i.h.s16 %v907_v57 }
  0xe9   : > { %v5041_v40 = vrot.slane %v5025_v56, %v9789_v14  ;;  %v10454_v7 = vpop.f32.mrf.mxu0  ;;  %9515 = vmatmul.mubr.msk.bf16.gmra.mxu1 %vm3246_vm1, %v3948_v41  ;;  %v5057_v8 = vcombine.low %v5048_v54, %v5055_v46  ;;  %v9102_v36 = vpack.i.b16 %v898_v30, %v883_v20  ;;  %v9103_v11 = vpack.i.b16 %v905_v31, %v1308_v47 }
  0xea   : > { %v9104_v12 = vpack.i.b16 %v906_v53, %v1310_v61  ;;  %9518 = vmatprep.mubr.msk.bf16.mxu1 %vm9705_vm0, %v9704_v1  ;;  %v9105_v62 = vpack.i.b16 %v907_v57, %v1312_v3  ;;  %v9106_v17 = vpack.i.b16 %v10447_v58, %v1314_v5  ;;  %v3949_v18 = vcombine.low %v10420_v25, %v10425_v28 }
  0xeb   : > { %v5056_v15 = vcombine.low %v5034_v63, %v5041_v40  ;;  %v9417_v6 = vpop.f32.mrf.mxu0  ;;  %v5071_v19 = vrot.slane %v5057_v8, %v9789_v14  ;;  %v3950_v2 = vcombine.low %v882_v29, %v9102_v36  ;;  %v915_v23 = vcombine.high %v8936_v45, %v8936_v45 }
  0xec   : > { %v3951_v21 = vcombine.low %v9103_v11, %v9104_v12  ;;  %v3952_v26 = vcombine.low %v9105_v62, %v9106_v17  ;;  %v3959_v0 = vrot.slane %v3949_v18, %v9789_v14  ;;  %v930_v49 = vcombine.high %v10447_v58, %v10447_v58  ;;  %v10471_v27 = vpop.f32.mrf.mxu1  ;;  %v8939_v6 = vld.sshfl [vmem:[%s9777_s28 + $0xb0] sm:$0x33 pattern:$0x75316420] }
  0xed   : > { %v5064_v24 = vrot.slane %v5056_v15, %v9789_v14  ;;  %v3966_v25 = vrot.slane %v3950_v2, %v9789_v14  ;;  %v929_v13 = vrot.slane %v915_v23, %v9789_v14  ;;  %v939_v29 = vcombine.high %v8937_v60, %v8937_v60 }
  0xee   : > { %v3973_v28 = vrot.slane %v3951_v21, %v9789_v14  ;;  %v3980_v31 = vrot.slane %v3952_v26, %v9789_v14  ;;  %v946_v9 = vrot.slane %v8937_v60, %v9789_v14  ;;  %v10480_v33 = vrot.slane %v10465_v22, %v9789_v14  ;;  %v9448_v20 = vpop.f32.mrf.mxu1 }
  0xef   : > { %v5072_v30 = vcombine.low %v5064_v24, %v5071_v19  ;;  %v3981_v37 = vcombine.low %v3959_v0, %v3966_v25  ;;  %v931_v32 = vcombine.high %v929_v13, %v929_v13  ;;  %v953_v34 = vrot.slane %v939_v29, %v9789_v14  ;;  %v8940_v24 = vld.sshfl [vmem:[%s9777_s28 + $0xb4] sm:$0x33 pattern:$0x75316420] }
  0xf0   : > { %v5073_v38 = vcombine.low %v10447_v58, %v929_v13  ;;  %v3982_v39 = vcombine.low %v3973_v28, %v3980_v31  ;;  %v954_v35 = vcombine.high %v946_v9, %v946_v9  ;;  %v1323_v42 = vunpack.i.h.s16 %v946_v9  ;;  %v10486_v44 = vpop.f32.mrf.mxu1 }
  0xf1   : > { %9587 = vmatmul.mubr.msk.bf16.gmra.mxu0 %vm3246_vm1, %v5072_v30  ;;  %v1316_v4 = vunpack.i.h.s16 %v10447_v58  ;;  %v3989_v45 = vrot.slane %v3981_v37, %v9789_v14  ;;  %v955_v43 = vcombine.high %v953_v34, %v953_v34  ;;  %v1325_v10 = vunpack.i.h.s16 %v953_v34 }
  0xf2   : > { %9590 = vmatprep.mubr.msk.bf16.mxu0 %vm9705_vm0, %v9704_v1  ;;  %v9197_v16 = vpack.i.b16 %v946_v9, %v931_v32  ;;  %v3996_v48 = vrot.slane %v3982_v39, %v9789_v14  ;;  %v1327_v51 = vunpack.i.h.s16 %v954_v35  ;;  %v9198_v52 = vpack.i.b16 %v953_v34, %v1323_v42  ;;  %v9449_v53 = vpop.f32.mrf.mxu1 }
  0xf3   : > { %v5083_v54 = vrot.slane %v5073_v38, %v9789_v14  ;;  %v1329_v55 = vunpack.i.h.s16 %v955_v43  ;;  %v9199_v56 = vpack.i.b16 %v954_v35, %v1325_v10  ;;  %v1318_v58 = vunpack.i.h.s16 %v929_v13  ;;  %v10493_v59 = vpop.f32.mrf.mxu0 }
  0xf4   : > { %v5074_v57 = vcombine.low %v930_v49, %v9197_v16  ;;  %v3997_v41 = vcombine.low %v3989_v45, %v3996_v48  ;;  %v9200_v46 = vpack.i.b16 %v955_v43, %v1327_v51  ;;  %v1320_v47 = vunpack.i.h.s16 %v930_v49 }
  0xf5   : > { %v9107_v61 = vpack.i.b16 %v929_v13, %v1316_v4  ;;  %v9201_v63 = vpack.i.b16 %v10480_v33, %v1329_v55  ;;  %v5075_v40 = vcombine.low %v9198_v52, %v9199_v56  ;;  %v9108_v5 = vpack.i.b16 %v930_v49, %v1318_v58  ;;  %v9420_v8 = vpop.f32.mrf.mxu0 }
  0xf6   : > { %v5090_v3 = vrot.slane %v5074_v57, %v9789_v14  ;;  %9519 = vmatmul.mubr.msk.bf16.gmra.mxu1 %vm3246_vm1, %v3997_v41  ;;  %v9109_v36 = vpack.i.b16 %v931_v32, %v1320_v47  ;;  %v4000_v11 = vcombine.low %v953_v34, %v954_v35  ;;  %v4001_v12 = vcombine.low %v955_v43, %v10480_v33 }
  0xf7   : > { %v963_v15 = vcombine.high %v10465_v22, %v10465_v22  ;;  %v5076_v62 = vcombine.low %v9200_v46, %v9201_v63  ;;  %v5097_v17 = vrot.slane %v5075_v40, %v9789_v14  ;;  %9522 = vmatprep.mubr.msk.bf16.mxu1 %vm9705_vm0, %v9704_v1  ;;  %v3998_v60 = vcombine.low %v9107_v61, %v9108_v5  ;;  %v10505_v19 = vpop.f32.mrf.mxu0 }
  0xf8   : > { %v5105_v18 = vcombine.low %v5083_v54, %v5090_v3  ;;  %v3999_v2 = vcombine.low %v9109_v36, %v946_v9  ;;  %v4022_v21 = vrot.slane %v4000_v11, %v9789_v14  ;;  %v4029_v23 = vrot.slane %v4001_v12, %v9789_v14 }
  0xf9   : > { %v10511_v26 = vrot.slane %v963_v15, %v9789_v14  ;;  %v5104_v22 = vrot.slane %v5076_v62, %v9789_v14  ;;  %v4008_v49 = vrot.slane %v3998_v60, %v9789_v14  ;;  %v10518_v25 = vcombine.high %v10480_v33, %v10480_v33  ;;  %v9421_v28 = vpop.f32.mrf.mxu0 }
  0xfa   : > { %v5113_v0 = vrot.slane %v5105_v18, %v9789_v14  ;;  %v4015_v13 = vrot.slane %v3999_v2, %v9789_v14  ;;  %v4031_v29 = vcombine.low %v4022_v21, %v4029_v23  ;;  %v987_v31 = vcombine.high %v8939_v6, %v8939_v6  ;;  %v8942_v28 = vld.sshfl [vmem:[%s9777_s28 + $0xc4] sm:$0x33 pattern:$0x75316420] }
  0xfb   : > { %v979_v30 = vcombine.high %v10511_v26, %v10511_v26  ;;  %v5106_v9 = vcombine.low %v5097_v17, %v5104_v22  ;;  %v994_v20 = vrot.slane %v8939_v6, %v9789_v14  ;;  %v1011_v37 = vcombine.high %v8940_v24, %v8940_v24  ;;  %v10525_v34 = vpop.f32.mrf.mxu1 }
  0xfc   : > { %v1018_v32 = vrot.slane %v8940_v24, %v9789_v14  ;;  %v4030_v38 = vcombine.low %v4008_v49, %v4015_v13  ;;  %v4045_v39 = vrot.slane %v4031_v29, %v9789_v14  ;;  %v1001_v35 = vrot.slane %v987_v31, %v9789_v14  ;;  %v8941_v24 = vld.sshfl [vmem:[%s9777_s28 + $0xc0] sm:$0x33 pattern:$0x75316420] }
  0xfd   : > { %v1331_v42 = vunpack.i.h.s16 %v10480_v33  ;;  %v5120_v4 = vrot.slane %v5106_v9, %v9789_v14  ;;  %v1002_v45 = vcombine.high %v994_v20, %v994_v20  ;;  %v1333_v43 = vunpack.i.h.s16 %v10511_v26  ;;  %v9452_v16 = vpop.f32.mrf.mxu1 }
  0xfe   : > { %v1335_v10 = vunpack.i.h.s16 %v10518_v25  ;;  %v4038_v48 = vrot.slane %v4030_v38, %v9789_v14  ;;  %v1003_v51 = vcombine.high %v1001_v35, %v1001_v35  ;;  %v10536_v54 = vrot.slane %v1011_v37, %v9789_v14 }
  0xff   : > { %v9202_v52 = vpack.i.b16 %v10511_v26, %v1331_v42  ;;  %v5121_v53 = vcombine.low %v5113_v0, %v5120_v4  ;;  %v9203_v55 = vpack.i.b16 %v10518_v25, %v1333_v43  ;;  %v5124_v56 = vcombine.low %v1001_v35, %v1002_v45  ;;  %v10539_v57 = vpop.f32.mrf.mxu1 }
 0x100   : > { %v9204_v33 = vpack.i.b16 %v979_v30, %v1335_v10  ;;  %v4046_v58 = vcombine.low %v4038_v48, %v4045_v39  ;;  %v5125_v41 = vcombine.low %v1003_v51, %v1018_v32  ;;  %v1338_v46 = vunpack.i.h.s16 %v994_v20 }
 0x101   : > { %v1340_v47 = vunpack.i.h.s16 %v1001_v35  ;;  %9591 = vmatmul.mubr.msk.bf16.gmra.mxu0 %vm3246_vm1, %v5121_v53  ;;  %v5122_v61 = vcombine.low %v9202_v52, %v9203_v55  ;;  %v5146_v40 = vrot.slane %v5124_v56, %v9789_v14  ;;  %v1342_v3 = vunpack.i.h.s16 %v1002_v45  ;;  %v9453_v5 = vpop.f32.mrf.mxu1 }
 0x102   : > { %v5123_v63 = vcombine.low %v9204_v33, %v994_v20  ;;  %9523 = vmatmul.mubr.msk.bf16.gmra.mxu1 %vm3246_vm1, %v4046_v58  ;;  %9594 = vmatprep.mubr.msk.bf16.mxu0 %vm9705_vm0, %v9704_v1  ;;  %v5153_v8 = vrot.slane %v5125_v41, %v9789_v14  ;;  %v1344_v36 = vunpack.i.h.s16 %v1003_v51  ;;  %v1346_v11 = vunpack.i.h.s16 %v1018_v32 }
 0x103   : > { %v9110_v12 = vpack.i.b16 %v994_v20, %v979_v30  ;;  %v5132_v15 = vrot.slane %v5122_v61, %v9789_v14  ;;  %9526 = vmatprep.mubr.msk.bf16.mxu1 %vm9705_vm0, %v9704_v1  ;;  %v9111_v17 = vpack.i.b16 %v1001_v35, %v1338_v46  ;;  %v9112_v18 = vpack.i.b16 %v1002_v45, %v1340_v47  ;;  %v10551_v60 = vpop.f32.mrf.mxu0 }
 0x104   : > { %v5139_v62 = vrot.slane %v5123_v63, %v9789_v14  ;;  %v5155_v6 = vcombine.low %v5146_v40, %v5153_v8  ;;  %v9113_v2 = vpack.i.b16 %v1003_v51, %v1342_v3  ;;  %v9114_v21 = vpack.i.b16 %v1018_v32, %v1344_v36 }
 0x105   : > { %v9115_v23 = vpack.i.b16 %v10536_v54, %v1346_v11  ;;  %v4047_v0 = vcombine.low %v10511_v26, %v10518_v25  ;;  %v4048_v49 = vcombine.low %v9110_v12, %v9111_v17  ;;  %v1026_v13 = vcombine.high %v1018_v32, %v1018_v32  ;;  %v9424_v29 = vpop.f32.mrf.mxu0 }
 0x106   : > { %v5154_v22 = vcombine.low %v5132_v15, %v5139_v62  ;;  %v5169_v30 = vrot.slane %v5155_v6, %v9789_v14  ;;  %v4049_v31 = vcombine.low %v9112_v18, %v9113_v2  ;;  %v1027_v20 = vcombine.high %v10536_v54, %v10536_v54 }
 0x107   : > { %v4050_v9 = vcombine.low %v9114_v21, %v9115_v23  ;;  %v4057_v38 = vrot.slane %v4047_v0, %v9789_v14  ;;  %v4064_v39 = vrot.slane %v4048_v49, %v9789_v14  ;;  %v1035_v35 = vcombine.high %v8941_v24, %v8941_v24  ;;  %v10564_v42 = vpop.f32.mrf.mxu0 }
 0x108   : > { %v5162_v37 = vrot.slane %v5154_v22, %v9789_v14  ;;  %v4071_v26 = vrot.slane %v4049_v31, %v9789_v14  ;;  %v1042_v32 = vrot.slane %v8941_v24, %v9789_v14  ;;  %v1059_v4 = vcombine.high %v8942_v28, %v8942_v28 }
 0x109   : > { %v4078_v25 = vrot.slane %v4050_v9, %v9789_v14  ;;  %v4079_v43 = vcombine.low %v4057_v38, %v4064_v39  ;;  %v1049_v10 = vrot.slane %v1035_v35, %v9789_v14  ;;  %v1066_v16 = vrot.slane %v8942_v28, %v9789_v14  ;;  %v9425_v48 = vpop.f32.mrf.mxu0  ;;  %v8943_v28 = vld.sshfl [vmem:[%s9777_s28 + $0xd0] sm:$0x33 pattern:$0x75316420] }
 0x10a   : > { %v5170_v45 = vcombine.low %v5162_v37, %v5169_v30  ;;  %v1050_v52 = vcombine.high %v1042_v32, %v1042_v32  ;;  %v10572_v53 = vrot.slane %v1059_v4, %v9789_v14  ;;  %v1353_v55 = vunpack.i.h.s16 %v1042_v32  ;;  %v8944_v9 = vld.sshfl [vmem:[%s9777_s28 + $0xd4] sm:$0x33 pattern:$0x75316420] }
 0x10b   : > { %v4080_v51 = vcombine.low %v4071_v26, %v4078_v25  ;;  %v4087_v33 = vrot.slane %v4079_v43, %v9789_v14  ;;  %v1051_v56 = vcombine.high %v1049_v10, %v1049_v10  ;;  %v1355_v58 = vunpack.i.h.s16 %v1049_v10 }
 0x10c   : > { %9595 = vmatmul.mubr.msk.bf16.gmra.mxu0 %vm3246_vm1, %v5170_v45  ;;  %v1361_v41 = vunpack.i.h.s16 %v1066_v16  ;;  %v10576_v46 = vpop.f32.mrf.mxu1  ;;  %v1357_v61 = vunpack.i.h.s16 %v1050_v52  ;;  %v9205_v63 = vpack.i.b16 %v1042_v32, %v1027_v20  ;;  %v9206_v40 = vpack.i.b16 %v1049_v10, %v1353_v55 }
 0x10d   : > { %v4094_v47 = vrot.slane %v4080_v51, %v9789_v14  ;;  %9598 = vmatprep.mubr.msk.bf16.mxu0 %vm9705_vm0, %v9704_v1  ;;  %v1359_v3 = vunpack.i.h.s16 %v1051_v56  ;;  %v9207_v5 = vpack.i.b16 %v1050_v52, %v1355_v58  ;;  %v5171_v36 = vcombine.low %v10536_v54, %v1026_v13 }
 0x10e   : > { %v9210_v8 = vpack.i.b16 %v10572_v53, %v1361_v41  ;;  %v9456_v11 = vpop.f32.mrf.mxu1  ;;  %v9208_v15 = vpack.i.b16 %v1051_v56, %v1357_v61  ;;  %v5172_v62 = vcombine.low %v9205_v63, %v9206_v40  ;;  %v1348_v17 = vunpack.i.h.s16 %v10536_v54 }
 0x10f   : > { %v4095_v12 = vcombine.low %v4087_v33, %v4094_v47  ;;  %v9209_v18 = vpack.i.b16 %v1066_v16, %v1359_v3  ;;  %v5181_v6 = vrot.slane %v5171_v36, %v9789_v14  ;;  %v1350_v2 = vunpack.i.h.s16 %v1026_v13 }
 0x110   : > { %v4097_v21 = vcombine.low %v1042_v32, %v1049_v10  ;;  %v10585_v23 = vpop.f32.mrf.mxu1  ;;  %v5173_v24 = vcombine.low %v9207_v5, %v9208_v15  ;;  %v5188_v22 = vrot.slane %v5172_v62, %v9789_v14  ;;  %v9116_v0 = vpack.i.b16 %v1026_v13, %v1348_v17 }
 0x111   : > { %9527 = vmatmul.mubr.msk.bf16.gmra.mxu1 %vm3246_vm1, %v4095_v12  ;;  %v9129_v49 = vcombine.high %v1042_v32, %v1049_v10  ;;  %v5174_v29 = vcombine.low %v9209_v18, %v9210_v8  ;;  %v9117_v54 = vpack.i.b16 %v1027_v20, %v1350_v2  ;;  %v4099_v30 = vcombine.low %v1066_v16, %v10572_v53 }
 0x112   : > { %9530 = vmatprep.mubr.msk.bf16.mxu1 %vm9705_vm0, %v9704_v1  ;;  %v4113_v31 = vrot.slane %v4097_v21, %v9789_v14  ;;  %v9457_v37 = vpop.f32.mrf.mxu1  ;;  %v5195_v38 = vrot.slane %v5173_v24, %v9789_v14  ;;  %v5203_v39 = vcombine.low %v5181_v6, %v5188_v22  ;;  %v10597_v26 = vcombine.high %v1066_v16, %v1066_v16 }
 0x113   : > { %v4120_v35 = vrot.slane %v9129_v49, %v9789_v14  ;;  %v5202_v13 = vrot.slane %v5174_v29, %v9789_v14  ;;  %v4096_v25 = vcombine.low %v9116_v0, %v9117_v54  ;;  %v4127_v32 = vrot.slane %v4099_v30, %v9789_v14  ;;  %v10603_v4 = vpop.f32.mrf.mxu0 }
 0x114   : > { %v1075_v20 = vcombine.high %v10572_v53, %v10572_v53  ;;  %v5211_v45 = vrot.slane %v5203_v39, %v9789_v14  ;;  %v1083_v43 = vcombine.high %v8943_v28, %v8943_v28  ;;  %v1090_v10 = vrot.slane %v8943_v28, %v9789_v14 }
 0x115   : > { %v1107_v48 = vcombine.high %v8944_v9, %v8944_v9  ;;  %v5204_v51 = vcombine.low %v5195_v38, %v5202_v13  ;;  %v4106_v16 = vrot.slane %v4096_v25, %v9789_v14  ;;  %v4129_v52 = vcombine.low %v4120_v35, %v4127_v32  ;;  %v9428_v33 = vpop.f32.mrf.mxu0 }
 0x116   : > { %v1114_v55 = vrot.slane %v8944_v9, %v9789_v14  ;;  %v1097_v56 = vrot.slane %v1083_v43, %v9789_v14  ;;  %v1363_v41 = vunpack.i.h.s16 %v10572_v53  ;;  %v1365_v47 = vunpack.i.h.s16 %v10597_v26 }
 0x117   : > { %v1121_v58 = vrot.slane %v1107_v48, %v9789_v14  ;;  %v5218_v61 = vrot.slane %v5204_v51, %v9789_v14  ;;  %v4128_v63 = vcombine.low %v4106_v16, %v4113_v31  ;;  %v4143_v40 = vrot.slane %v4129_v52, %v9789_v14  ;;  %v10615_v5 = vpop.f32.mrf.mxu0  ;;  %v8945_v51 = vld.sshfl [vmem:[%s9777_s28 + $0xe0] sm:$0x33 pattern:$0x75316420] }
 0x118   : > { %v1098_v3 = vcombine.high %v1090_v10, %v1090_v10  ;;  %v9211_v8 = vpack.i.b16 %v10597_v26, %v1363_v41  ;;  %v9212_v36 = vpack.i.b16 %v1075_v20, %v1365_v47  ;;  %v5221_v11 = vcombine.low %v1090_v10, %v1097_v56  ;;  %v8946_v47 = vld.sshfl [vmem:[%s9777_s28 + $0xe4] sm:$0x33 pattern:$0x75316420]  ;;  %s9308_s28 = sadd.s32 240, %s9630_s25 }
 0x119   : > { %v9224_v12 = vcombine.high %v1090_v10, %v1097_v56  ;;  %v5219_v15 = vcombine.low %v5211_v45, %v5218_v61  ;;  %v4136_v62 = vrot.slane %v4128_v63, %v9789_v14  ;;  %v5223_v17 = vcombine.low %v1114_v55, %v1121_v58  ;;  %v9429_v6 = vpop.f32.mrf.mxu0  ;;  %s337_s14 = scalar_lea.vmem %s11374_s1, %s9308_s28 }
 0x11a   : > { %v1099_v53 = vcombine.high %v1097_v56, %v1097_v56  ;;  %v10619_v18 = vpop.f32.mrf.mxu1  ;;  %v5220_v2 = vcombine.low %v9211_v8, %v9212_v36  ;;  %v5237_v21 = vrot.slane %v5221_v11, %v9789_v14  ;;  %v10623_v22 = vcombine.high %v1114_v55, %v1114_v55 }
 0x11b   : > { %v5244_v24 = vrot.slane %v9224_v12, %v9789_v14  ;;  %9599 = vmatmul.mubr.msk.bf16.gmra.mxu0 %vm3246_vm1, %v5219_v15  ;;  %v4144_v0 = vcombine.low %v4136_v62, %v4143_v40  ;;  %v5251_v49 = vrot.slane %v5223_v17, %v9789_v14  ;;  %v1368_v28 = vunpack.i.h.s16 %v1090_v10 }
 0x11c   : > { %v1370_v29 = vunpack.i.h.s16 %v1097_v56  ;;  %v9460_v54 = vpop.f32.mrf.mxu1  ;;  %9602 = vmatprep.mubr.msk.bf16.mxu0 %vm9705_vm0, %v9704_v1  ;;  %v5230_v30 = vrot.slane %v5220_v2, %v9789_v14  ;;  %v1372_v31 = vunpack.i.h.s16 %v1098_v3  ;;  %v1374_v9 = vunpack.i.h.s16 %v1099_v53 }
 0x11d   : > { %v1376_v37 = vunpack.i.h.s16 %v1114_v55  ;;  %9531 = vmatmul.mubr.msk.bf16.gmra.mxu1 %vm3246_vm1, %v4144_v0  ;;  %v5253_v38 = vcombine.low %v5244_v24, %v5251_v49  ;;  %v1378_v39 = vunpack.i.h.s16 %v1121_v58  ;;  %v9118_v35 = vpack.i.b16 %v1090_v10, %v1075_v20 }
 0x11e   : > { %v9119_v13 = vpack.i.b16 %v1097_v56, %v1368_v28  ;;  %v10631_v25 = vpop.f32.mrf.mxu1  ;;  %v5252_v32 = vcombine.low %v5230_v30, %v5237_v21  ;;  %9534 = vmatprep.mubr.msk.bf16.mxu1 %vm9705_vm0, %v9704_v1  ;;  %v9120_v45 = vpack.i.b16 %v1098_v3, %v1370_v29  ;;  %v9121_v43 = vpack.i.b16 %v1099_v53, %v1372_v31 }
 0x11f   : > { %v9122_v48 = vpack.i.b16 %v1114_v55, %v1374_v9  ;;  %v5267_v16 = vrot.slane %v5253_v38, %v9789_v14  ;;  %v9123_v52 = vpack.i.b16 %v1121_v58, %v1376_v37  ;;  %v9124_v33 = vpack.i.b16 %v10623_v22, %v1378_v39 }
 0x120   : > { %v4145_v41 = vcombine.low %v10597_v26, %v9118_v35  ;;  %v9461_v20 = vpop.f32.mrf.mxu1  ;;  %v5260_v10 = vrot.slane %v5252_v32, %v9789_v14  ;;  %v4146_v56 = vcombine.low %v9119_v13, %v9120_v45  ;;  %v1123_v63 = vcombine.high %v1121_v58, %v1121_v58 }
 0x121   : > { %v4147_v61 = vcombine.low %v9121_v43, %v9122_v48  ;;  %v4148_v40 = vcombine.low %v9123_v52, %v9124_v33  ;;  %v1131_v8 = vcombine.high %v8945_v51, %v8945_v51  ;;  %v10643_v55 = vrot.slane %v8945_v51, %v9789_v14 }
 0x122   : > { %v4155_v3 = vrot.slane %v4145_v41, %v9789_v14  ;;  %v5268_v36 = vcombine.low %v5260_v10, %v5267_v16  ;;  %v4162_v11 = vrot.slane %v4146_v56, %v9789_v14  ;;  %v1155_v12 = vcombine.high %v8946_v47, %v8946_v47  ;;  %v10647_v15 = vpop.f32.mrf.mxu0 }
 0x123   : > { %v4169_v26 = vrot.slane %v4147_v61, %v9789_v14  ;;  %v4176_v62 = vrot.slane %v4148_v40, %v9789_v14  ;;  %v1145_v58 = vrot.slane %v1131_v8, %v9789_v14  ;;  %v1146_v17 = vcombine.high %v10643_v55, %v10643_v55  ;;  %v9151_v40 = vld.sshfl [vmem:[%s337_s14] sm:$0x33 pattern:$0x75316420] }
 0x124   : > { %v1162_v53 = vrot.slane %v8946_v47, %v9789_v14  ;;  %9603 = vmatmul.mubr.msk.bf16.gmra.mxu0 %vm3246_vm1, %v5268_v36  ;;  %v4177_v6 = vcombine.low %v4155_v3, %v4162_v11  ;;  %v1169_v2 = vrot.slane %v1155_v12, %v9789_v14  ;;  %v1383_v21 = vunpack.i.h.s16 %v10643_v55  ;;  %v9432_v0 = vpop.f32.mrf.mxu0  ;;  %v9152_v12 = vld.sshfl [vmem:[%s337_s14 + $0x4] sm:$0x33 pattern:$0x75316420] }
 0x125   : > { %v9213_v24 = vpack.i.b16 %v10643_v55, %v1123_v63  ;;  %v4178_v49 = vcombine.low %v4169_v26, %v4176_v62  ;;  %9606 = vmatprep.mubr.msk.bf16.mxu0 %vm9705_vm0, %v9704_v1  ;;  %v1147_v28 = vcombine.high %v1145_v58, %v1145_v58  ;;  %v1385_v54 = vunpack.i.h.s16 %v1145_v58 }
 0x126   : > { %v1170_v29 = vcombine.high %v1162_v53, %v1162_v53  ;;  %v4185_v30 = vrot.slane %v4177_v6, %v9789_v14  ;;  %v1387_v31 = vunpack.i.h.s16 %v1146_v17  ;;  %v1391_v9 = vunpack.i.h.s16 %v1162_v53  ;;  %v10663_v38 = vpop.f32.mrf.mxu0 }
 0x127   : > { %v1393_v37 = vunpack.i.h.s16 %v1169_v2  ;;  %v4192_v39 = vrot.slane %v4178_v49, %v9789_v14  ;;  %v1389_v35 = vunpack.i.h.s16 %v1147_v28  ;;  %v9214_v13 = vpack.i.b16 %v1145_v58, %v1383_v21 }
 0x128   : > { %v9215_v32 = vpack.i.b16 %v1146_v17, %v1385_v54  ;;  %v9216_v45 = vpack.i.b16 %v1147_v28, %v1387_v31  ;;  %v9218_v43 = vpack.i.b16 %v1169_v2, %v1391_v9  ;;  %v5269_v51 = vcombine.low %v10623_v22, %v9213_v24  ;;  %v9433_v16 = vpop.f32.mrf.mxu0 }
 0x129   : > { %v9219_v48 = vpack.i.b16 %v1170_v29, %v1393_v37  ;;  %v4193_v52 = vcombine.low %v4185_v30, %v4192_v39  ;;  %v9217_v33 = vpack.i.b16 %v1162_v53, %v1389_v35  ;;  %v1380_v47 = vunpack.i.h.s16 %v10623_v22 }
 0x12a   : > { %v5270_v41 = vcombine.low %v9214_v13, %v9215_v32  ;;  %v5279_v10 = vrot.slane %v5269_v51, %v9789_v14  ;;  %v4195_v56 = vcombine.low %v1145_v58, %v1146_v17  ;;  %v4196_v61 = vcombine.low %v1147_v28, %v1162_v53  ;;  %v10672_v3 = vpop.f32.mrf.mxu1 }
 0x12b   : > { %v5272_v20 = vcombine.low %v9218_v43, %v9219_v48  ;;  %9535 = vmatmul.mubr.msk.bf16.gmra.mxu1 %vm3246_vm1, %v4193_v52  ;;  %v5271_v8 = vcombine.low %v9216_v45, %v9217_v33  ;;  %v9125_v11 = vpack.i.b16 %v1123_v63, %v1380_v47  ;;  %v4197_v26 = vcombine.low %v1169_v2, %v1170_v29 }
 0x12c   : > { %v5286_v36 = vrot.slane %v5270_v41, %v9789_v14  ;;  %9538 = vmatprep.mubr.msk.bf16.mxu1 %vm9705_vm0, %v9704_v1  ;;  %v4211_v22 = vrot.slane %v4195_v56, %v9789_v14  ;;  %v4218_v58 = vrot.slane %v4196_v61, %v9789_v14  ;;  %v1171_v17 = vcombine.high %v1169_v2, %v1169_v2  ;;  %v9464_v53 = vpop.f32.mrf.mxu1 }
 0x12d   : > { %v5300_v62 = vrot.slane %v5272_v20, %v9789_v14  ;;  %v5293_v6 = vrot.slane %v5271_v8, %v9789_v14  ;;  %v4194_v24 = vcombine.low %v9125_v11, %v10643_v55  ;;  %v4225_v63 = vrot.slane %v4197_v26, %v9789_v14 }
 0x12e   : > { %v5301_v21 = vcombine.low %v5279_v10, %v5286_v36  ;;  %v1395_v0 = vunpack.i.h.s16 %v1170_v29  ;;  %v4499_v49 = vcombine.high %v9151_v40, %v9151_v40  ;;  %v4506_v28 = vrot.slane %v9151_v40, %v9789_v14  ;;  %v10685_v30 = vpop.f32.mrf.mxu1 }
 0x12f   : > { %v4523_v54 = vcombine.high %v9152_v12, %v9152_v12  ;;  %v5302_v31 = vcombine.low %v5293_v6, %v5300_v62  ;;  %v4204_v2 = vrot.slane %v4194_v24, %v9789_v14  ;;  %v4227_v37 = vcombine.low %v4218_v58, %v4225_v63 }
 0x130   : > { %v5309_v9 = vrot.slane %v5301_v21, %v9789_v14  ;;  %v4513_v39 = vrot.slane %v4499_v49, %v9789_v14  ;;  %v4514_v35 = vcombine.high %v4506_v28, %v4506_v28  ;;  %v4530_v55 = vrot.slane %v9152_v12, %v9789_v14  ;;  %v9465_v29 = vpop.f32.mrf.mxu1 }
 0x131   : > { %v4537_v13 = vrot.slane %v4523_v54, %v9789_v14  ;;  %v5316_v32 = vrot.slane %v5302_v31, %v9789_v14  ;;  %v4226_v45 = vcombine.low %v4204_v2, %v4211_v22  ;;  %v4241_v43 = vrot.slane %v4227_v37, %v9789_v14 }
 0x132   : > { %v9220_v48 = vpack.i.b16 %v1171_v17, %v1395_v0  ;;  %v10694_v51 = vpop.f32.mrf.mxu0  ;;  %v4515_v16 = vcombine.high %v4513_v39, %v4513_v39  ;;  %v4538_v52 = vcombine.high %v4530_v55, %v4530_v55  ;;  %v5319_v33 = vcombine.low %v4513_v39, %v4514_v35 }
 0x133   : > { %v5317_v41 = vcombine.low %v5309_v9, %v5316_v32  ;;  %v4234_v47 = vrot.slane %v4226_v45, %v9789_v14  ;;  %v1396_v10 = vunpack.i.l.s16 %v1171_v17  ;;  %v4539_v22 = vcombine.high %v4537_v13, %v4537_v13 }
 0x134   : > { %v5318_v20 = vcombine.low %v9220_v48, %v4506_v28  ;;  %v9436_v56 = vpop.f32.mrf.mxu0  ;;  %v5320_v61 = vcombine.low %v4515_v16, %v4530_v55  ;;  %v5321_v40 = vcombine.low %v4537_v13, %v4538_v52  ;;  %v5335_v8 = vrot.slane %v5319_v33, %v9789_v14 }
 0x135   : > { %9607 = vmatmul.mubr.msk.bf16.gmra.mxu0 %vm3246_vm1, %v5317_v41  ;;  %v4242_v36 = vcombine.low %v4234_v47, %v4241_v43  ;;  %v4249_v17 = vrot.slane %v1396_v10, %v9789_v14  ;;  %v4554_v0 = vunpack.i.l.s16 %v4539_v22  ;;  %v10738_v56 = vld [vmem:[%s11376_s3] ss:$0 sm:$0xff] }
 0x136   : > { %v5328_v11 = vrot.slane %v5318_v20, %v9789_v14  ;;  %v10700_v26 = vpop.f32.mrf.mxu0  ;;  %9610 = vmatprep.mubr.msk.bf16.mxu0 %vm9705_vm0, %v9704_v1  ;;  %v5342_v12 = vrot.slane %v5320_v61, %v9789_v14  ;;  %v5349_v62 = vrot.slane %v5321_v40, %v9789_v14 }
 0x137   : > { %9539 = vmatmul.mubr.msk.bf16.gmra.mxu1 %vm3246_vm1, %v4242_v36  ;;  %v4256_v28 = vrot.slane %v4249_v17, %v9789_v14  ;;  %v5373_v9 = vrot.slane %v4554_v0, %v9789_v14 }
 0x138   : > { %v5350_v58 = vcombine.low %v5328_v11, %v5335_v8  ;;  %v9437_v53 = vpop.f32.mrf.mxu0  ;;  %v5351_v6 = vcombine.low %v5342_v12, %v5349_v62  ;;  %9542 = vmatprep.mubr.msk.bf16.mxu1 %vm9705_vm0, %v9704_v1  ;;  %v10710_v21 = vpop.f32.mrf.mxu1 }
 0x139   : > { %v5380_v35 = vrot.slane %v5373_v9, %v9789_v14 }
 0x13a   : > { %v5358_v24 = vrot.slane %v5350_v58, %v9789_v14  ;;  %v5365_v63 = vrot.slane %v5351_v6, %v9789_v14  ;;  %v9468_v49 = vpop.f32.mrf.mxu1 }
 0x13c   : > { %v5366_v54 = vcombine.low %v5358_v24, %v5365_v63  ;;  %v10715_v31 = vpop.f32.mrf.mxu1 }
 0x13e   : > { %9611 = vmatmul.mubr.msk.bf16.gmra.mxu0 %vm3246_vm1, %v5366_v54  ;;  %v9469_v2 = vpop.f32.mrf.mxu1 }
 0x13f   : > { %9543 = vmatmul.mubr.msk.bf16.gmra.mxu1 %vm3246_vm1, %v4256_v28  ;;  %9614 = vmatprep.mubr.msk.bf16.mxu0 %vm9705_vm0, %v9704_v1 }
 0x140   : > { %v10722_v37 = vpop.f32.mrf.mxu1 }
 0x142   : > { %v10724_v39 = vpop.f32.mrf.mxu0  ;;  %v9472_v55 = vpop.f32.mrf.mxu1 }
 0x144   : > { %v9440_v13 = vpop.f32.mrf.mxu0  ;;  %v3441_v29 = vpop.f32.mrf.mxu1 }
 0x146   : > { %v10727_v32 = vpop.f32.mrf.mxu0  ;;  %9615 = vmatmul.mubr.msk.bf16.gmra.mxu0 %vm3246_vm1, %v5380_v35  ;;  %v9473_v45 = vpop.f32.mrf.mxu1 }
 0x148   : > { %v9441_v43 = vpop.f32.mrf.mxu0 }
 0x14a   : > { %v10730_v48 = vpop.f32.mrf.mxu0 }
 0x14c   : > { %v9444_v16 = vpop.f32.mrf.mxu0 }
 0x14e   : > { %v10732_v52 = vpop.f32.mrf.mxu0 }
 0x150   : > { %v9445_v1 = vpop.f32.mrf.mxu0  ;;  %v4372_v33 = vpop.f32.mrf.mxu1 }
 0x151   : > { %v4373_v47 = vadd.f32 %v4372_v33, %v10441_v50 }
 0x152   : > { %v9488_v41 = vpop.f32.mrf.mxu1 }
 0x154   : > { %v4375_v20 = vpop.f32.mrf.mxu1 }
 0x155   : > { %v5496_v10 = vpop.f32.mrf.mxu0  ;;  %v4376_v36 = vadd.f32 %v4375_v20, %v10454_v7 }
 0x156   : > { %v9489_v61 = vpop.f32.mrf.mxu1  ;;  %v5614_v40 = vadd.f32 %v5496_v10, %v4373_v47 }
 0x157   : > { %v9560_v8 = vpop.f32.mrf.mxu0 }
 0x158   : > { %v5650_v11 = vadd.f32 %v10738_v56, %v5614_v40 }
 0x159   : > { %v5499_v62 = vpop.f32.mrf.mxu0 }
 0x15a   : > { %v4380_v12 = vpop.f32.mrf.mxu1  ;;  %v5679_v22 = vmax.f32 %v5650_v11, 0.0  ;;  %v5615_v58 = vadd.f32 %v5499_v62, %v4376_v36 }
 0x15b   : > { %v9561_v50 = vpop.f32.mrf.mxu0  ;;  %v4381_v1 = vadd.f32 %v4380_v12, %v10493_v59 }
 0x15c   : > { %v9492_v17 = vpop.f32.mrf.mxu1  ;;  %v5737_v53 = vcombine.high %v5679_v22, %v5679_v22  ;;  %v5744_v6 = vrot.slane %v5679_v22, %v9789_v14  ;;  %v5651_v24 = vadd.f32 %v10738_v56, %v5615_v58 }
 0x15e   : > { %v4383_v63 = vpop.f32.mrf.mxu1  ;;  %v5751_v0 = vrot.slane %v5737_v53, %v9789_v14  ;;  %v5752_v49 = vcombine.high %v5744_v6, %v5744_v6  ;;  %v5680_v28 = vmax.f32 %v5651_v24, 0.0  ;;  %v5760_v9 = vrot.slane %v5744_v6, %v9789_v14 }
 0x160   : > { %v9493_v54 = vpop.f32.mrf.mxu1  ;;  %v5753_v7 = vcombine.high %v5751_v0, %v5751_v0  ;;  %v5774_v2 = vrot.slane %v5752_v49, %v9789_v14  ;;  %v5786_v35 = vcombine.high %v5680_v28, %v5680_v28  ;;  %v5767_v55 = vrot.slane %v5751_v0, %v9789_v14 }
 0x161   : > { %v5793_v13 = vrot.slane %v5680_v28, %v9789_v14  ;;  %v4384_v49 = vadd.f32 %v4383_v63, %v10505_v19 }
 0x162   : > { %v5781_v29 = vrot.slane %v5753_v7, %v9789_v14  ;;  %v7123_v45 = vcombine.low %v5760_v9, %v5774_v2  ;;  %v9247_v43 = vcombine.high %v5760_v9, %v5774_v2  ;;  %v5800_v16 = vrot.slane %v5786_v35, %v9789_v14 }
 0x163   : > { %v5801_v33 = vcombine.high %v5793_v13, %v5793_v13  ;;  %v5809_v41 = vrot.slane %v5793_v13, %v9789_v14 }
 0x164   : > { %v7125_v47 = vcombine.low %v5767_v55, %v5781_v29  ;;  %v9248_v20 = vcombine.high %v5767_v55, %v5781_v29  ;;  %v7133_v10 = vrot.slane %v7123_v45, %v9789_v14  ;;  %v7140_v61 = vrot.slane %v9247_v43, %v9789_v14  ;;  %v5504_v40 = vpop.f32.mrf.mxu0 }
 0x165   : > { %v5802_v8 = vcombine.high %v5800_v16, %v5800_v16  ;;  %v5816_v36 = vrot.slane %v5800_v16, %v9789_v14  ;;  %v5823_v11 = vrot.slane %v5801_v33, %v9789_v14  ;;  %v5616_v62 = vadd.f32 %v5504_v40, %v4381_v1 }
 0x166   : > { %v7147_v22 = vrot.slane %v7125_v47, %v9789_v14  ;;  %v7154_v59 = vrot.slane %v9248_v20, %v9789_v14  ;;  %v7155_v12 = vcombine.low %v7133_v10, %v7140_v61  ;;  %v9564_v58 = vpop.f32.mrf.mxu0 }
 0x167   : > { %v5830_v17 = vrot.slane %v5802_v8, %v9789_v14  ;;  %v5832_v50 = vcombine.high %v5816_v36, %v5816_v36  ;;  %v7172_v53 = vcombine.low %v5809_v41, %v5823_v11  ;;  %v9249_v6 = vcombine.high %v5809_v41, %v5823_v11  ;;  %v10760_v24 = vpop.f32.mrf.mxu1 }
 0x168   : > { %v7156_v0 = vcombine.low %v7147_v22, %v7154_v59  ;;  %v5652_v28 = vadd.f32 %v10738_v56, %v5616_v62  ;;  %v5507_v54 = vpop.f32.mrf.mxu0  ;;  %v7163_v55 = vrot.slane %v7155_v12, %v9789_v14 }
 0x169   : > { %v7174_v7 = vcombine.low %v5816_v36, %v5830_v17  ;;  %v7181_v9 = vrot.slane %v7172_v53, %v9789_v14  ;;  %v7188_v2 = vrot.slane %v9249_v6, %v9789_v14  ;;  %v9496_v35 = vpop.f32.mrf.mxu1  ;;  %v5617_v45 = vadd.f32 %v5507_v54, %v4384_v49 }
 0x16a   : > { %v7170_v13 = vrot.slane %v7156_v0, %v9789_v14  ;;  %v5681_v29 = vmax.f32 %v5652_v28, 0.0  ;;  %v9565_v43 = vpop.f32.mrf.mxu0  ;;  %v7202_v19 = vrot.slane %v5832_v50, %v9789_v14  ;;  %v5834_v61 = vcombine.high %v5830_v17, %v5830_v17 }
 0x16b   : > { %v7195_v16 = vrot.slane %v7174_v7, %v9789_v14  ;;  %v7203_v63 = vcombine.low %v7181_v9, %v7188_v2  ;;  %v10771_v1 = vpop.f32.mrf.mxu1  ;;  %v5653_v20 = vadd.f32 %v10738_v56, %v5617_v45  ;;  %v8733_v9 = vld [vmem:[%s10778_s23 + $0x4] sm:$0xf] }
 0x16c   : > { %v7171_v33 = vcombine.low %v7163_v55, %v7170_v13  ;;  %v5835_v41 = vcombine.high %v5681_v29, %v5681_v29  ;;  %v5842_v47 = vrot.slane %v5681_v29, %v9789_v14 }
 0x16d   : > { %v7204_v10 = vcombine.low %v7195_v16, %v7202_v19  ;;  %v9497_v40 = vpop.f32.mrf.mxu1  ;;  %v7211_v22 = vrot.slane %v7203_v63, %v9789_v14  ;;  %v5682_v12 = vmax.f32 %v5653_v20, 0.0 }
 0x16e   : > { %v9309_v8 = vpack.c.bf16 %v7171_v33, %v7171_v33  ;;  %v5849_v36 = vrot.slane %v5835_v41, %v9789_v14  ;;  %v5850_v11 = vcombine.high %v5842_v47, %v5842_v47  ;;  %v5858_v62 = vrot.slane %v5842_v47, %v9789_v14 }
 0x16f   : > { %v7218_v59 = vrot.slane %v7204_v10, %v9789_v14  ;;  %v5884_v28 = vcombine.high %v5682_v12, %v5682_v12  ;;  %v5891_v54 = vrot.slane %v5682_v12, %v9789_v14  ;;  %v4389_v40 = vadd.f32 %v10760_v24, %v10551_v60 }
 0x170   : > { %8729 = vst.msk [vmem:[%s10778_s23] sm:$0xf] %vm8728_vm2, %v9309_v8  ;;  %v5851_v58 = vcombine.high %v5849_v36, %v5849_v36  ;;  %v5865_v50 = vrot.slane %v5849_v36, %v9789_v14  ;;  %v5872_v17 = vrot.slane %v5850_v11, %v9789_v14  ;;  %v5880_v53 = vcombine.high %v5858_v62, %v5858_v62  ;;  %v5512_v6 = vpop.f32.mrf.mxu0 }
 0x171   : > { %v7219_v0 = vcombine.low %v7211_v22, %v7218_v59  ;;  %v7220_v49 = vcombine.low %v5834_v61, %v5858_v62  ;;  %v5898_v16 = vrot.slane %v5884_v28, %v9789_v14  ;;  %v5899_v19 = vcombine.high %v5891_v54, %v5891_v54 }
 0x172   : > { %v5879_v2 = vrot.slane %v5851_v58, %v9789_v14  ;;  %v5881_v35 = vcombine.high %v5865_v50, %v5865_v50  ;;  %v5882_v55 = vcombine.high %v5872_v17, %v5872_v17  ;;  %v7221_v13 = vcombine.low %v5872_v17, %v5880_v53  ;;  %v9568_v29 = vpop.f32.mrf.mxu0 }
 0x173   : > { %v9310_v45 = vpack.c.bf16 %v7219_v0, %v7219_v0  ;;  %v7230_v43 = vrot.slane %v7220_v49, %v9789_v14  ;;  %v5900_v8 = vcombine.high %v5898_v16, %v5898_v16  ;;  %v5907_v36 = vrot.slane %v5891_v54, %v9789_v14 }
 0x174   : > { %v7222_v63 = vcombine.low %v5882_v55, %v5865_v50  ;;  %v7223_v33 = vcombine.low %v5879_v2, %v5881_v35  ;;  %v7237_v41 = vrot.slane %v7221_v13, %v9789_v14  ;;  %v5883_v47 = vcombine.high %v5879_v2, %v5879_v2  ;;  %v4396_v20 = vpop.f32.mrf.mxu1  ;;  %v5515_v10 = vpop.f32.mrf.mxu0 }
 0x175   : > { %v8734_v61 = vsel %vm10790_vm4, %v9310_v45, %v8733_v9  ;;  %v5921_v59 = vrot.slane %v5899_v19, %v9789_v14  ;;  %v5928_v50 = vrot.slane %v5900_v8, %v9789_v14  ;;  %v5929_v17 = vcombine.high %v5907_v36, %v5907_v36 }
 0x176   : > { %8735 = vst [vmem:[%s10778_s23 + $0x4] sm:$0xf] %v8734_v61  ;;  %v7244_v11 = vrot.slane %v7222_v63, %v9789_v14  ;;  %v7251_v62 = vrot.slane %v7223_v33, %v9789_v14  ;;  %v7252_v22 = vcombine.low %v7230_v43, %v7237_v41  ;;  %v9500_v12 = vpop.f32.mrf.mxu1  ;;  %v9569_v58 = vpop.f32.mrf.mxu0  ;;  %v7269_v53 = vcombine.low %v5883_v47, %v5907_v36 }
 0x177   : > { %v5618_v0 = vadd.f32 %v5512_v6, %v4389_v40  ;;  %v5914_v60 = vrot.slane %v5898_v16, %v9789_v14  ;;  %v5931_v24 = vcombine.high %v5921_v59, %v5921_v59  ;;  %v4392_v28 = vadd.f32 %v10771_v1, %v10564_v42 }
 0x178   : > { %v7253_v49 = vcombine.low %v7244_v11, %v7251_v62  ;;  %v4399_v54 = vpop.f32.mrf.mxu1  ;;  %v7260_v9 = vrot.slane %v7252_v22, %v9789_v14  ;;  %v7270_v2 = vcombine.low %v5921_v59, %v5929_v17  ;;  %v7278_v35 = vrot.slane %v7269_v53, %v9789_v14 }
 0x179   : > { %v7271_v13 = vcombine.low %v5931_v24, %v5914_v60  ;;  %v5654_v29 = vadd.f32 %v10738_v56, %v5618_v0  ;;  %v5619_v45 = vadd.f32 %v5515_v10, %v4392_v28  ;;  %v7299_v16 = vrot.slane %v5928_v50, %v9789_v14 }
 0x17a   : > { %v7267_v55 = vrot.slane %v7253_v49, %v9789_v14  ;;  %v9501_v6 = vpop.f32.mrf.mxu1  ;;  %v7285_v43 = vrot.slane %v7270_v2, %v9789_v14  ;;  %v9250_v19 = vcombine.high %v5914_v60, %v5928_v50  ;;  %v4397_v47 = vadd.f32 %v4396_v20, %v10603_v4  ;;  %v8737_v2 = vld [vmem:[%s10778_s23 + $0xc] sm:$0xf] }
 0x17b   : > { %v7292_v1 = vrot.slane %v7271_v13, %v9789_v14  ;;  %v5683_v63 = vmax.f32 %v5654_v29, 0.0  ;;  %v5655_v33 = vadd.f32 %v10738_v56, %v5619_v45  ;;  %v10824_v22 = vadd.f32 %v4399_v54, %v10615_v5 }
 0x17c   : > { %v7268_v42 = vcombine.low %v7260_v9, %v7267_v55  ;;  %v7300_v41 = vcombine.low %v7278_v35, %v7285_v43  ;;  %v7327_v11 = vrot.slane %v9250_v19, %v9789_v14 }
 0x17d   : > { %v7301_v40 = vcombine.low %v7292_v1, %v7299_v16  ;;  %v5933_v8 = vcombine.high %v5683_v63, %v5683_v63  ;;  %v5940_v10 = vrot.slane %v5683_v63, %v9789_v14  ;;  %v5684_v62 = vmax.f32 %v5655_v33, 0.0 }
 0x17e   : > { %v9311_v61 = vpack.c.bf16 %v7268_v42, %v7268_v42  ;;  %v5520_v36 = vpop.f32.mrf.mxu0  ;;  %v7308_v12 = vrot.slane %v7300_v41, %v9789_v14 }
 0x17f   : > { %v5620_v59 = vadd.f32 %v5520_v36, %v4397_v47  ;;  %v7315_v4 = vrot.slane %v7301_v40, %v9789_v14  ;;  %v5947_v20 = vrot.slane %v5933_v8, %v9789_v14  ;;  %v5948_v58 = vcombine.high %v5940_v10, %v5940_v10 }
 0x180   : > { %8736 = vst.msk [vmem:[%s10778_s23 + $0x8] sm:$0xf] %vm8728_vm2, %v9311_v61  ;;  %v9572_v50 = vpop.f32.mrf.mxu0  ;;  %v5956_v17 = vrot.slane %v5940_v10, %v9789_v14  ;;  %v5982_v53 = vcombine.high %v5684_v62, %v5684_v62  ;;  %v5989_v0 = vrot.slane %v5684_v62, %v9789_v14 }
 0x181   : > { %v5656_v5 = vadd.f32 %v10738_v56, %v5620_v59  ;;  %v7316_v60 = vcombine.low %v7308_v12, %v7315_v4  ;;  %v5949_v24 = vcombine.high %v5947_v20, %v5947_v20  ;;  %v5963_v28 = vrot.slane %v5947_v20, %v9789_v14 }
 0x182   : > { %v4404_v49 = vpop.f32.mrf.mxu1  ;;  %v5970_v54 = vrot.slane %v5948_v58, %v9789_v14  ;;  %v5523_v9 = vpop.f32.mrf.mxu0  ;;  %v5996_v35 = vrot.slane %v5982_v53, %v9789_v14  ;;  %v5997_v55 = vcombine.high %v5989_v0, %v5989_v0  ;;  %v6005_v13 = vrot.slane %v5989_v0, %v9789_v14 }
 0x183   : > { %v5685_v29 = vmax.f32 %v5656_v5, 0.0  ;;  %v9312_v6 = vpack.c.bf16 %v7316_v60, %v7316_v60  ;;  %v5977_v43 = vrot.slane %v5949_v24, %v9789_v14 }
 0x184   : > { %v9504_v45 = vpop.f32.mrf.mxu1  ;;  %v7318_v16 = vcombine.low %v5956_v17, %v5970_v54  ;;  %v9251_v19 = vcombine.high %v5956_v17, %v5970_v54  ;;  %v9573_v42 = vpop.f32.mrf.mxu0  ;;  %v5998_v1 = vcombine.high %v5996_v35, %v5996_v35  ;;  %v6012_v63 = vrot.slane %v5996_v35, %v9789_v14 }
 0x185   : > { %v6019_v33 = vrot.slane %v5997_v55, %v9789_v14  ;;  %v6031_v41 = vcombine.high %v5685_v29, %v5685_v29  ;;  %v8738_v61 = vsel %vm10790_vm4, %v9312_v6, %v8737_v2  ;;  %v7320_v40 = vcombine.low %v5963_v28, %v5977_v43 }
 0x186   : > { %v4407_v47 = vpop.f32.mrf.mxu1  ;;  %v7334_v8 = vrot.slane %v7318_v16, %v9789_v14  ;;  %v7341_v10 = vrot.slane %v9251_v19, %v9789_v14  ;;  %8739 = vst [vmem:[%s10778_s23 + $0xc] sm:$0xf] %v8738_v61  ;;  %v9252_v36 = vcombine.high %v5963_v28, %v5977_v43  ;;  %v6026_v62 = vrot.slane %v5998_v1, %v9789_v14 }
 0x187   : > { %v6028_v59 = vcombine.high %v6012_v63, %v6012_v63  ;;  %v7367_v12 = vcombine.low %v6005_v13, %v6019_v33  ;;  %v7348_v20 = vrot.slane %v7320_v40, %v9789_v14  ;;  %v9253_v50 = vcombine.high %v6005_v13, %v6019_v33 }
 0x188   : > { %v9505_v4 = vpop.f32.mrf.mxu1  ;;  %v7349_v58 = vcombine.low %v7327_v11, %v7334_v8  ;;  %v7396_v17 = vrot.slane %v6012_v63, %v9789_v14  ;;  %v7375_v53 = vrot.slane %v9252_v36, %v9789_v14  ;;  %v6030_v60 = vcombine.high %v6026_v62, %v6026_v62 }
 0x189   : > { %v7382_v0 = vrot.slane %v7367_v12, %v9789_v14  ;;  %v7414_v5 = vcombine.low %v6026_v62, %v6028_v59  ;;  %v7350_v24 = vcombine.low %v7341_v10, %v7348_v20  ;;  %v7389_v54 = vrot.slane %v9253_v50, %v9789_v14  ;;  %v8741_v50 = vld [vmem:[%s10778_s23 + $0x14] sm:$0xf] }
 0x18a   : > { %v7357_v28 = vrot.slane %v7349_v58, %v9789_v14  ;;  %v6038_v2 = vrot.slane %v5685_v29, %v9789_v14  ;;  %v6045_v11 = vrot.slane %v6031_v41, %v9789_v14  ;;  %v4405_v45 = vadd.f32 %v4404_v49, %v10647_v15 }
 0x18b   : > { %v5528_v35 = vpop.f32.mrf.mxu0  ;;  %v7397_v55 = vcombine.low %v7375_v53, %v7382_v0  ;;  %v7424_v13 = vrot.slane %v7414_v5, %v9789_v14  ;;  %v7364_v6 = vrot.slane %v7350_v24, %v9789_v14  ;;  %v7398_v43 = vcombine.low %v7389_v54, %v7396_v17 }
 0x18c   : > { %v6046_v16 = vcombine.high %v6038_v2, %v6038_v2  ;;  %v6054_v19 = vrot.slane %v6038_v2, %v9789_v14  ;;  %v6047_v63 = vcombine.high %v6045_v11, %v6045_v11  ;;  %v6061_v29 = vrot.slane %v6045_v11, %v9789_v14 }
 0x18d   : > { %v9576_v42 = vpop.f32.mrf.mxu0  ;;  %v7405_v1 = vrot.slane %v7397_v55, %v9789_v14  ;;  %v5621_v33 = vadd.f32 %v5523_v9, %v10824_v22  ;;  %v7365_v61 = vcombine.low %v7357_v28, %v7364_v6  ;;  %v7412_v41 = vrot.slane %v7398_v43, %v9789_v14 }
 0x18e   : > { %v6068_v15 = vrot.slane %v6046_v16, %v9789_v14  ;;  %v6076_v49 = vcombine.high %v6054_v19, %v6054_v19  ;;  %v4412_v40 = vpop.f32.mrf.mxu1  ;;  %v6075_v10 = vrot.slane %v6047_v63, %v9789_v14  ;;  %v6077_v36 = vcombine.high %v6061_v29, %v6061_v29 }
 0x18f   : > { %v5531_v8 = vpop.f32.mrf.mxu0  ;;  %v7415_v62 = vcombine.low %v6030_v60, %v6054_v19  ;;  %v5657_v59 = vadd.f32 %v10738_v56, %v5621_v33  ;;  %v9313_v12 = vpack.c.bf16 %v7365_v61, %v7365_v61  ;;  %v7413_v4 = vcombine.low %v7405_v1, %v7412_v41 }
 0x190   : > { %v6078_v20 = vcombine.high %v6068_v15, %v6068_v15  ;;  %v7416_v22 = vcombine.low %v6068_v15, %v6076_v49  ;;  %v9508_v9 = vpop.f32.mrf.mxu1  ;;  %v7463_v53 = vcombine.low %v6075_v10, %v6077_v36  ;;  %v6079_v5 = vcombine.high %v6075_v10, %v6075_v10 }
 0x191   : > { %v9577_v58 = vpop.f32.mrf.mxu0  ;;  %v7431_v17 = vrot.slane %v7415_v62, %v9789_v14  ;;  %v5686_v0 = vmax.f32 %v5657_v59, 0.0  ;;  %8740 = vst.msk [vmem:[%s10778_s23 + $0x10] sm:$0xf] %vm8728_vm2, %v9313_v12  ;;  %v9314_v24 = vpack.c.bf16 %v7413_v4, %v7413_v4  ;;  %v4408_v54 = vadd.f32 %v4407_v47, %v10663_v38 }
 0x192   : > { %v7417_v28 = vcombine.low %v6078_v20, %v6061_v29  ;;  %v7438_v60 = vrot.slane %v7416_v22, %v9789_v14  ;;  %v4415_v2 = vpop.f32.mrf.mxu1  ;;  %v7472_v43 = vrot.slane %v7463_v53, %v9789_v14  ;;  %v5622_v42 = vadd.f32 %v5528_v35, %v4405_v45 }
 0x193   : > { %v7446_v55 = vcombine.low %v7424_v13, %v7431_v17  ;;  %v6080_v11 = vcombine.high %v5686_v0, %v5686_v0  ;;  %v6087_v6 = vrot.slane %v5686_v0, %v9789_v14  ;;  %v8742_v16 = vsel %vm10790_vm4, %v9314_v24, %v8741_v50 }
 0x194   : > { %v7445_v19 = vrot.slane %v7417_v28, %v9789_v14  ;;  %v4413_v1 = vadd.f32 %v4412_v40, %v10694_v51  ;;  %v9509_v63 = vpop.f32.mrf.mxu1  ;;  %8743 = vst [vmem:[%s10778_s23 + $0x14] sm:$0xf] %v8742_v16  ;;  %v5658_v61 = vadd.f32 %v10738_v56, %v5622_v42  ;;  %v5623_v41 = vadd.f32 %v5531_v8, %v4408_v54 }
 0x195   : > { %v7454_v29 = vrot.slane %v7446_v55, %v9789_v14  ;;  %v6094_v38 = vrot.slane %v6080_v11, %v9789_v14  ;;  %v6095_v47 = vcombine.high %v6087_v6, %v6087_v6  ;;  %v6103_v13 = vrot.slane %v6087_v6, %v9789_v14 }
 0x196   : > { %v7447_v33 = vcombine.low %v7438_v60, %v7445_v19  ;;  %v10885_v15 = vadd.f32 %v4415_v2, %v10700_v26  ;;  %v5687_v62 = vmax.f32 %v5658_v61, 0.0  ;;  %v5659_v59 = vadd.f32 %v10738_v56, %v5623_v41 }
 0x197   : > { %v6096_v49 = vcombine.high %v6094_v38, %v6094_v38  ;;  %v6110_v35 = vrot.slane %v6094_v38, %v9789_v14  ;;  %v6117_v51 = vrot.slane %v6095_v47, %v9789_v14  ;;  %v6125_v45 = vcombine.high %v6103_v13, %v6103_v13 }
 0x198   : > { %v5536_v40 = vpop.f32.mrf.mxu0  ;;  %v7461_v10 = vrot.slane %v7447_v33, %v9789_v14  ;;  %v7464_v36 = vcombine.low %v6079_v5, %v6103_v13  ;;  %v6129_v58 = vcombine.high %v5687_v62, %v5687_v62  ;;  %v6136_v50 = vrot.slane %v5687_v62, %v9789_v14 }
 0x199   : > { %v6124_v12 = vrot.slane %v6096_v49, %v9789_v14  ;;  %v6127_v4 = vcombine.high %v6117_v51, %v6117_v51  ;;  %v7465_v8 = vcombine.low %v6117_v51, %v6125_v45  ;;  %v5624_v20 = vadd.f32 %v5536_v40, %v4413_v1 }
 0x19a   : > { %v9580_v26 = vpop.f32.mrf.mxu0  ;;  %v7462_v22 = vcombine.low %v7454_v29, %v7461_v10  ;;  %v7479_v9 = vrot.slane %v7464_v36, %v9789_v14  ;;  %v6143_v54 = vrot.slane %v6129_v58, %v9789_v14  ;;  %v6144_v2 = vcombine.high %v6136_v50, %v6136_v50 }
 0x19b   : > { %v7486_v17 = vrot.slane %v7465_v8, %v9789_v14  ;;  %v7493_v53 = vrot.slane %v6127_v4, %v9789_v14  ;;  %v7511_v0 = vcombine.low %v6110_v35, %v6124_v12  ;;  %v9254_v5 = vcombine.high %v6110_v35, %v6124_v12  ;;  %v8745_v12 = vld [vmem:[%s10778_s23 + $0x1c] sm:$0xf] }
 0x19c   : > { %v10896_v24 = vpop.f32.mrf.mxu0  ;;  %v9315_v28 = vpack.c.bf16 %v7462_v22, %v7462_v22  ;;  %v7494_v60 = vcombine.low %v7472_v43, %v7479_v9  ;;  %v4420_v55 = vpop.f32.mrf.mxu1  ;;  %v6152_v19 = vrot.slane %v6136_v50, %v9789_v14  ;;  %v6145_v63 = vcombine.high %v6143_v54, %v6143_v54 }
 0x19d   : > { %v7495_v11 = vcombine.low %v7486_v17, %v7493_v53  ;;  %v7521_v6 = vrot.slane %v7511_v0, %v9789_v14  ;;  %v7528_v16 = vrot.slane %v9254_v5, %v9789_v14  ;;  %v6159_v29 = vrot.slane %v6143_v54, %v9789_v14 }
 0x19e   : > { %v9581_v42 = vpop.f32.mrf.mxu0  ;;  %8744 = vst.msk [vmem:[%s10778_s23 + $0x18] sm:$0xf] %vm8728_vm2, %v9315_v28  ;;  %v7502_v1 = vrot.slane %v7494_v60, %v9789_v14  ;;  %v6166_v43 = vrot.slane %v6144_v2, %v9789_v14  ;;  %v9512_v38 = vpop.f32.mrf.mxu1  ;;  %v5688_v33 = vmax.f32 %v5659_v59, 0.0  ;;  %v5660_v61 = vadd.f32 %v10738_v56, %v5624_v20 }
 0x19f   : > { %v7509_v47 = vrot.slane %v7495_v11, %v9789_v14  ;;  %v7543_v13 = vcombine.low %v7521_v6, %v7528_v16  ;;  %v6173_v41 = vrot.slane %v6145_v63, %v9789_v14  ;;  %v10911_v51 = vadd.f32 %v4420_v55, %v10724_v39 }
 0x1a0   : > { %v7513_v49 = vcombine.low %v6152_v19, %v6166_v43  ;;  %v9255_v35 = vcombine.high %v6152_v19, %v6166_v43  ;;  %v10913_v45 = vpop.f32.mrf.mxu1  ;;  %v6178_v36 = vcombine.high %v5688_v33, %v5688_v33  ;;  %v6185_v62 = vrot.slane %v5688_v33, %v9789_v14 }
 0x1a1   : > { %v7510_v40 = vcombine.low %v7502_v1, %v7509_v47  ;;  %v7551_v10 = vrot.slane %v7543_v13, %v9789_v14  ;;  %v7560_v8 = vcombine.low %v6159_v29, %v6173_v41  ;;  %v9256_v20 = vcombine.high %v6159_v29, %v6173_v41 }
 0x1a2   : > { %v7535_v59 = vrot.slane %v7513_v49, %v9789_v14  ;;  %v7542_v4 = vrot.slane %v9255_v35, %v9789_v14  ;;  %v9513_v26 = vpop.f32.mrf.mxu1  ;;  %v6192_v39 = vrot.slane %v6178_v36, %v9789_v14  ;;  %v6193_v9 = vcombine.high %v6185_v62, %v6185_v62 }
 0x1a3   : > { %v9316_v22 = vpack.c.bf16 %v7510_v40, %v7510_v40  ;;  %v6201_v58 = vrot.slane %v6185_v62, %v9789_v14  ;;  %v7569_v17 = vrot.slane %v7560_v8, %v9789_v14  ;;  %v7576_v53 = vrot.slane %v9256_v20, %v9789_v14 }
 0x1a4   : > { %v7544_v50 = vcombine.low %v7535_v59, %v7542_v4  ;;  %v5689_v0 = vmax.f32 %v5660_v61, 0.0  ;;  %v6194_v28 = vcombine.high %v6192_v39, %v6192_v39  ;;  %v6208_v60 = vrot.slane %v6192_v39, %v9789_v14 }
 0x1a5   : > { %v8746_v5 = vsel %vm10790_vm4, %v9316_v22, %v8745_v12  ;;  %v6215_v54 = vrot.slane %v6193_v9, %v9789_v14  ;;  %v7591_v55 = vcombine.low %v7569_v17, %v7576_v53  ;;  %v6223_v11 = vcombine.high %v6201_v58, %v6201_v58 }
 0x1a6   : > { %8747 = vst [vmem:[%s10778_s23 + $0x1c] sm:$0xf] %v8746_v5  ;;  %v7558_v2 = vrot.slane %v7544_v50, %v9789_v14  ;;  %v6227_v6 = vcombine.high %v5689_v0, %v5689_v0  ;;  %v5544_v16 = vpop.f32.mrf.mxu0  ;;  %v6222_v19 = vrot.slane %v6194_v28, %v9789_v14  ;;  %v6224_v42 = vcombine.high %v6208_v60, %v6208_v60 }
 0x1a7   : > { %v6225_v1 = vcombine.high %v6215_v54, %v6215_v54  ;;  %v7562_v63 = vcombine.low %v6201_v58, %v6215_v54  ;;  %v7599_v43 = vrot.slane %v7591_v55, %v9789_v14  ;;  %v7590_v38 = vrot.slane %v6223_v11, %v9789_v14 }
 0x1a8   : > { %v7559_v29 = vcombine.low %v7551_v10, %v7558_v2  ;;  %v6234_v47 = vrot.slane %v5689_v0, %v9789_v14  ;;  %v9584_v13 = vpop.f32.mrf.mxu0  ;;  %v7609_v41 = vcombine.low %v6222_v19, %v6224_v42  ;;  %v6226_v49 = vcombine.high %v6222_v19, %v6222_v19  ;;  %v8749_v42 = vld [vmem:[%s10778_s23 + $0x24] sm:$0xf] }
 0x1a9   : > { %v7583_v33 = vrot.slane %v7562_v63, %v9789_v14  ;;  %v7608_v61 = vcombine.low %v6225_v1, %v6208_v60  ;;  %v4428_v35 = vpop.f32.mrf.mxu1  ;;  %v6241_v36 = vrot.slane %v6227_v6, %v9789_v14  ;;  %v5625_v20 = vadd.f32 %v10896_v24, %v10885_v15 }
 0x1aa   : > { %v9317_v40 = vpack.c.bf16 %v7559_v29, %v7559_v29  ;;  %v6242_v62 = vcombine.high %v6234_v47, %v6234_v47  ;;  %v6250_v10 = vrot.slane %v6234_v47, %v9789_v14  ;;  %v5547_v12 = vpop.f32.mrf.mxu0  ;;  %v7625_v8 = vrot.slane %v7609_v41, %v9789_v14 }
 0x1ab   : > { %v7592_v59 = vcombine.low %v7583_v33, %v7590_v38  ;;  %v7618_v4 = vrot.slane %v7608_v61, %v9789_v14  ;;  %v9516_v26 = vpop.f32.mrf.mxu1  ;;  %v6243_v22 = vcombine.high %v6241_v36, %v6241_v36  ;;  %v6257_v39 = vrot.slane %v6241_v36, %v9789_v14 }
 0x1ac   : > { %8748 = vst.msk [vmem:[%s10778_s23 + $0x20] sm:$0xf] %vm8728_vm2, %v9317_v40  ;;  %v6264_v9 = vrot.slane %v6242_v62, %v9789_v14  ;;  %v6272_v58 = vcombine.high %v6250_v10, %v6250_v10  ;;  %v9585_v50 = vpop.f32.mrf.mxu0  ;;  %v7610_v0 = vcombine.low %v6226_v49, %v6250_v10  ;;  %v5661_v5 = vadd.f32 %v10738_v56, %v5625_v20 }
 0x1ad   : > { %v7606_v17 = vrot.slane %v7592_v59, %v9789_v14  ;;  %v7640_v53 = vcombine.low %v7618_v4, %v7625_v8  ;;  %v10947_v28 = vpop.f32.mrf.mxu1  ;;  %v6271_v15 = vrot.slane %v6243_v22, %v9789_v14  ;;  %v6273_v24 = vcombine.high %v6257_v39, %v6257_v39 }
 0x1ae   : > { %v6274_v60 = vcombine.high %v6264_v9, %v6264_v9  ;;  %v7611_v54 = vcombine.low %v6264_v9, %v6272_v58  ;;  %v7632_v11 = vrot.slane %v7610_v0, %v9789_v14  ;;  %v5690_v6 = vmax.f32 %v5661_v5, 0.0 }
 0x1af   : > { %v7607_v2 = vcombine.low %v7599_v43, %v7606_v17  ;;  %v7648_v55 = vrot.slane %v7640_v53, %v9789_v14  ;;  %v9517_v19 = vpop.f32.mrf.mxu1  ;;  %v7658_v29 = vcombine.low %v6271_v15, %v6273_v24  ;;  %v6275_v38 = vcombine.high %v6271_v15, %v6271_v15 }
 0x1b0   : > { %v7639_v1 = vrot.slane %v7611_v54, %v9789_v14  ;;  %v7657_v63 = vcombine.low %v6274_v60, %v6257_v39  ;;  %v6276_v33 = vcombine.high %v5690_v6, %v5690_v6  ;;  %v6283_v61 = vrot.slane %v5690_v6, %v9789_v14 }
 0x1b1   : > { %v5552_v47 = vpop.f32.mrf.mxu0  ;;  %v9318_v13 = vpack.c.bf16 %v7607_v2, %v7607_v2  ;;  %v4424_v43 = vadd.f32 %v10913_v45, %v10727_v32  ;;  %v7673_v40 = vrot.slane %v7658_v29, %v9789_v14  ;;  %v5626_v36 = vadd.f32 %v5544_v16, %v10911_v51 }
 0x1b2   : > { %v7641_v41 = vcombine.low %v7632_v11, %v7639_v1  ;;  %v7666_v49 = vrot.slane %v7657_v63, %v9789_v14  ;;  %v6290_v59 = vrot.slane %v6276_v33, %v9789_v14  ;;  %v6291_v4 = vcombine.high %v6283_v61, %v6283_v61 }
 0x1b3   : > { %v9588_v62 = vpop.f32.mrf.mxu0  ;;  %v8750_v10 = vsel %vm10790_vm4, %v9318_v13, %v8749_v42  ;;  %v6299_v8 = vrot.slane %v6283_v61, %v9789_v14  ;;  %v5662_v45 = vadd.f32 %v10738_v56, %v5626_v36  ;;  %v4429_v26 = vadd.f32 %v4428_v35, %v10730_v48 }
 0x1b4   : > { %8751 = vst [vmem:[%s10778_s23 + $0x24] sm:$0xf] %v8750_v10  ;;  %v7655_v20 = vrot.slane %v7641_v41, %v9789_v14  ;;  %v7688_v32 = vcombine.low %v7666_v49, %v7673_v40  ;;  %v6292_v51 = vcombine.high %v6290_v59, %v6290_v59  ;;  %v6306_v16 = vrot.slane %v6290_v59, %v9789_v14 }
 0x1b5   : > { %v10968_v22 = vpop.f32.mrf.mxu0  ;;  %v6313_v39 = vrot.slane %v6291_v4, %v9789_v14  ;;  %v7659_v9 = vcombine.low %v6275_v38, %v6299_v8  ;;  %v5691_v17 = vmax.f32 %v5662_v45, 0.0  ;;  %v5627_v53 = vadd.f32 %v5547_v12, %v4424_v43 }
 0x1b6   : > { %v7656_v58 = vcombine.low %v7648_v55, %v7655_v20  ;;  %v7696_v50 = vrot.slane %v7688_v32, %v9789_v14  ;;  %v10973_v0 = vpop.f32.mrf.mxu1  ;;  %v6320_v15 = vrot.slane %v6292_v51, %v9789_v14  ;;  %v4432_v41 = vadd.f32 %v10947_v28, %v10732_v52  ;;  %v8753_v32 = vld [vmem:[%s10778_s23 + $0x2c] sm:$0xf] }
 0x1b7   : > { %v9589_v5 = vpop.f32.mrf.mxu0  ;;  %v7680_v48 = vrot.slane %v7659_v9, %v9789_v14  ;;  %v7687_v35 = vrot.slane %v6313_v39, %v9789_v14  ;;  %v9257_v24 = vcombine.high %v6299_v8, %v6313_v39  ;;  %v6325_v54 = vcombine.high %v5691_v17, %v5691_v17 }
 0x1b8   : > { %v9319_v60 = vpack.c.bf16 %v7656_v58, %v7656_v58  ;;  %v6332_v2 = vrot.slane %v5691_v17, %v9789_v14  ;;  %v5663_v55 = vadd.f32 %v10738_v56, %v5627_v53  ;;  %v9520_v11 = vpop.f32.mrf.mxu1  ;;  %v7706_v12 = vcombine.low %v6306_v16, %v6320_v15 }
 0x1b9   : > { %v7689_v6 = vcombine.low %v7680_v48, %v7687_v35  ;;  %v9258_v19 = vcombine.high %v6306_v16, %v6320_v15  ;;  %v7715_v42 = vrot.slane %v9257_v24, %v9789_v14  ;;  %v6339_v1 = vrot.slane %v6325_v54, %v9789_v14 }
 0x1ba   : > { %8752 = vst.msk [vmem:[%s10778_s23 + $0x28] sm:$0xf] %vm8728_vm2, %v9319_v60  ;;  %v6340_v63 = vcombine.high %v6332_v2, %v6332_v2  ;;  %v6348_v29 = vrot.slane %v6332_v2, %v9789_v14  ;;  %v5692_v38 = vmax.f32 %v5663_v55, 0.0  ;;  %v10985_v13 = vpop.f32.mrf.mxu1  ;;  %v7722_v61 = vrot.slane %v7706_v12, %v9789_v14 }
 0x1bb   : > { %v7703_v33 = vrot.slane %v7689_v6, %v9789_v14  ;;  %v7729_v43 = vrot.slane %v9258_v19, %v9789_v14  ;;  %v6341_v49 = vcombine.high %v6339_v1, %v6339_v1  ;;  %v6355_v40 = vrot.slane %v6339_v1, %v9789_v14 }
 0x1bc   : > { %v6362_v36 = vrot.slane %v6340_v63, %v9789_v14  ;;  %v6374_v62 = vcombine.high %v5692_v38, %v5692_v38  ;;  %v9521_v10 = vpop.f32.mrf.mxu1  ;;  %v7737_v4 = vcombine.low %v7715_v42, %v7722_v61  ;;  %v6381_v8 = vrot.slane %v5692_v38, %v9789_v14 }
 0x1bd   : > { %v7704_v59 = vcombine.low %v7696_v50, %v7703_v33  ;;  %v5628_v20 = vadd.f32 %v5552_v47, %v4429_v26  ;;  %v6369_v45 = vrot.slane %v6341_v49, %v9789_v14 }
 0x1be   : > { %v7708_v51 = vcombine.low %v6348_v29, %v6362_v36  ;;  %v9259_v16 = vcombine.high %v6348_v29, %v6362_v36  ;;  %v6388_v52 = vrot.slane %v6374_v62, %v9789_v14  ;;  %v7745_v28 = vrot.slane %v7737_v4, %v9789_v14 }
 0x1bf   : > { %v9320_v39 = vpack.c.bf16 %v7704_v59, %v7704_v59  ;;  %v6389_v9 = vcombine.high %v6381_v8, %v6381_v8  ;;  %v6397_v58 = vrot.slane %v6381_v8, %v9789_v14  ;;  %v7755_v17 = vcombine.low %v6355_v40, %v6369_v45 }
 0x1c0   : > { %v7736_v50 = vrot.slane %v7708_v51, %v9789_v14  ;;  %v9260_v53 = vcombine.high %v6355_v40, %v6369_v45  ;;  %v7763_v47 = vrot.slane %v9259_v16, %v9789_v14  ;;  %v6390_v5 = vcombine.high %v6388_v52, %v6388_v52 }
 0x1c1   : > { %v8754_v26 = vsel %vm10790_vm4, %v9320_v39, %v8753_v32  ;;  %v6404_v15 = vrot.slane %v6388_v52, %v9789_v14  ;;  %v6411_v48 = vrot.slane %v6389_v9, %v9789_v14  ;;  %v5560_v35 = vpop.f32.mrf.mxu0  ;;  %v7770_v60 = vrot.slane %v7755_v17, %v9789_v14 }
 0x1c2   : > { %8755 = vst [vmem:[%s10778_s23 + $0x2c] sm:$0xf] %v8754_v26  ;;  %v7738_v24 = vcombine.low %v7729_v43, %v7736_v50  ;;  %v6419_v54 = vcombine.high %v6397_v58, %v6397_v58  ;;  %v7777_v2 = vrot.slane %v9260_v53, %v9789_v14  ;;  %v4444_v55 = vpop.f32.mrf.mxu1  ;;  %v6418_v11 = vrot.slane %v6390_v5, %v9789_v14 }
 0x1c3   : > { %v6420_v6 = vcombine.high %v6404_v15, %v6404_v15  ;;  %v6421_v12 = vcombine.high %v6411_v48, %v6411_v48  ;;  %v7784_v19 = vrot.slane %v6397_v58, %v9789_v14  ;;  %v9592_v42 = vpop.f32.mrf.mxu0  ;;  %v7785_v63 = vcombine.low %v7763_v47, %v7770_v60  ;;  %v8757_v47 = vld [vmem:[%s10778_s23 + $0x34] sm:$0xf] }
 0x1c4   : > { %v7752_v1 = vrot.slane %v7738_v24, %v9789_v14  ;;  %v7802_v29 = vcombine.low %v6411_v48, %v6419_v54  ;;  %v5664_v38 = vadd.f32 %v10738_v56, %v5628_v20  ;;  %v9524_v33 = vpop.f32.mrf.mxu1  ;;  %v6422_v40 = vcombine.high %v6418_v11, %v6418_v11 }
 0x1c5   : > { %v7786_v61 = vcombine.low %v7777_v2, %v7784_v19  ;;  %v7803_v43 = vcombine.low %v6421_v12, %v6404_v15  ;;  %v7804_v49 = vcombine.low %v6418_v11, %v6420_v6  ;;  %v11013_v36 = vpop.f32.mrf.mxu0  ;;  %v7793_v10 = vrot.slane %v7785_v63, %v9789_v14 }
 0x1c6   : > { %v7753_v62 = vcombine.low %v7745_v28, %v7752_v1  ;;  %v7812_v59 = vrot.slane %v7802_v29, %v9789_v14  ;;  %v5693_v4 = vmax.f32 %v5664_v38, 0.0  ;;  %v11017_v8 = vpop.f32.mrf.mxu1  ;;  %v4437_v45 = vadd.f32 %v10973_v0, %v10471_v27 }
 0x1c7   : > { %v7800_v32 = vrot.slane %v7786_v61, %v9789_v14  ;;  %v7819_v56 = vrot.slane %v7803_v43, %v9789_v14  ;;  %v7826_v20 = vrot.slane %v7804_v49, %v9789_v14  ;;  %v9593_v51 = vpop.f32.mrf.mxu0  ;;  %v5629_v39 = vadd.f32 %v10968_v22, %v4432_v41  ;;  %v11038_v22 = vld [vmem:[%s11376_s3] ss:$0 sm:$0xff] }
 0x1c8   : > { %v9321_v16 = vpack.c.bf16 %v7753_v62, %v7753_v62  ;;  %v6423_v52 = vcombine.high %v5693_v4, %v5693_v4  ;;  %v6430_v28 = vrot.slane %v5693_v4, %v9789_v14  ;;  %v9525_v9 = vpop.f32.mrf.mxu1  ;;  %v11028_v17 = vadd.f32 %v10985_v13, %v10486_v44 }
 0x1c9   : > { %v7801_v58 = vcombine.low %v7793_v10, %v7800_v32  ;;  %v7834_v50 = vcombine.low %v7812_v59, %v7819_v56  ;;  %v5630_v53 = vadd.f32 %v5560_v35, %v4437_v45  ;;  %v5665_v41 = vadd.f32 %v11038_v22, %v5629_v39 }
 0x1ca   : > { %8756 = vst.msk [vmem:[%s10778_s23 + $0x30] sm:$0xf] %vm8728_vm2, %v9321_v16  ;;  %v6437_v27 = vrot.slane %v6423_v52, %v9789_v14  ;;  %v6438_v0 = vcombine.high %v6430_v28, %v6430_v28  ;;  %v6446_v26 = vrot.slane %v6430_v28, %v9789_v14  ;;  %v11044_v15 = vadd.f32 %v4444_v55, %v10525_v34 }
 0x1cb   : > { %v7842_v44 = vrot.slane %v7834_v50, %v9789_v14  ;;  %v9322_v13 = vpack.c.bf16 %v7801_v58, %v7801_v58  ;;  %v5666_v5 = vadd.f32 %v11038_v22, %v5630_v53  ;;  %v5694_v6 = vmax.f32 %v5665_v41, 0.0 }
 0x1cc   : > { %v11046_v48 = vpop.f32.mrf.mxu0  ;;  %v6439_v35 = vcombine.high %v6437_v27, %v6437_v27  ;;  %v6453_v24 = vrot.slane %v6437_v27, %v9789_v14  ;;  %v6460_v60 = vrot.slane %v6438_v0, %v9789_v14  ;;  %v6468_v54 = vcombine.high %v6446_v26, %v6446_v26 }
 0x1cd   : > { %v8758_v2 = vsel %vm10790_vm4, %v9322_v13, %v8757_v47  ;;  %v7805_v11 = vcombine.low %v6422_v40, %v6446_v26  ;;  %v5695_v12 = vmax.f32 %v5666_v5, 0.0  ;;  %v6472_v29 = vcombine.high %v5694_v6, %v5694_v6 }
 0x1ce   : > { %v9596_v19 = vpop.f32.mrf.mxu0  ;;  %8759 = vst [vmem:[%s10778_s23 + $0x34] sm:$0xf] %v8758_v2  ;;  %v6467_v42 = vrot.slane %v6439_v35, %v9789_v14  ;;  %v6469_v34 = vcombine.high %v6453_v24, %v6453_v24  ;;  %v6470_v55 = vcombine.high %v6460_v60, %v6460_v60  ;;  %v7851_v1 = vcombine.low %v6460_v60, %v6468_v54 }
 0x1cf   : > { %v7833_v63 = vrot.slane %v7805_v11, %v9789_v14  ;;  %v6479_v38 = vrot.slane %v5694_v6, %v9789_v14  ;;  %v6521_v33 = vcombine.high %v5695_v12, %v5695_v12  ;;  %v6486_v4 = vrot.slane %v6472_v29, %v9789_v14 }
 0x1d0   : > { %v11056_v61 = vpop.f32.mrf.mxu0  ;;  %v6471_v43 = vcombine.high %v6467_v42, %v6467_v42  ;;  %v7852_v49 = vcombine.low %v6470_v55, %v6453_v24  ;;  %v7853_v40 = vcombine.low %v6467_v42, %v6469_v34  ;;  %v7860_v62 = vrot.slane %v7851_v1, %v9789_v14 }
 0x1d1   : > { %v11059_v10 = vpop.f32.mrf.mxu1  ;;  %v7835_v59 = vcombine.low %v7826_v20, %v7833_v63  ;;  %v6487_v32 = vcombine.high %v6479_v38, %v6479_v38  ;;  %v6495_v56 = vrot.slane %v6479_v38, %v9789_v14  ;;  %v6528_v28 = vrot.slane %v5695_v12, %v9789_v14  ;;  %v8761_v63 = vld [vmem:[%s10778_s23 + $0x3c] sm:$0xf] }
 0x1d2   : > { %v9597_v45 = vpop.f32.mrf.mxu0  ;;  %v7867_v51 = vrot.slane %v7852_v49, %v9789_v14  ;;  %v7874_v16 = vrot.slane %v7853_v40, %v9789_v14  ;;  %v7881_v52 = vrot.slane %v6471_v43, %v9789_v14  ;;  %v6488_v58 = vcombine.high %v6486_v4, %v6486_v4 }
 0x1d3   : > { %v9528_v39 = vpop.f32.mrf.mxu1  ;;  %v7849_v9 = vrot.slane %v7835_v59, %v9789_v14  ;;  %v6502_v20 = vrot.slane %v6486_v4, %v9789_v14  ;;  %v6509_v50 = vrot.slane %v6487_v32, %v9789_v14  ;;  %v6535_v27 = vrot.slane %v6521_v33, %v9789_v14 }
 0x1d4   : > { %v7882_v53 = vcombine.low %v7860_v62, %v7867_v51  ;;  %v7883_v47 = vcombine.low %v7874_v16, %v7881_v52  ;;  %v6536_v0 = vcombine.high %v6528_v28, %v6528_v28  ;;  %v6516_v13 = vrot.slane %v6488_v58, %v9789_v14 }
 0x1d5   : > { %v11071_v26 = vpop.f32.mrf.mxu1  ;;  %v7850_v41 = vcombine.low %v7842_v44, %v7849_v9  ;;  %v7899_v5 = vcombine.low %v6495_v56, %v6509_v50  ;;  %v9261_v35 = vcombine.high %v6495_v56, %v6509_v50  ;;  %v6537_v54 = vcombine.high %v6535_v27, %v6535_v27 }
 0x1d6   : > { %v7890_v24 = vrot.slane %v7882_v53, %v9789_v14  ;;  %v7897_v60 = vrot.slane %v7883_v47, %v9789_v14  ;;  %v6544_v2 = vrot.slane %v6528_v28, %v9789_v14  ;;  %v7901_v12 = vcombine.low %v6502_v20, %v6516_v13 }
 0x1d7   : > { %v9529_v11 = vpop.f32.mrf.mxu1  ;;  %v9323_v6 = vpack.c.bf16 %v7850_v41, %v7850_v41  ;;  %v9262_v19 = vcombine.high %v6502_v20, %v6516_v13  ;;  %v7909_v42 = vrot.slane %v7899_v5, %v9789_v14  ;;  %v7916_v34 = vrot.slane %v9261_v35, %v9789_v14 }
 0x1d8   : > { %v7898_v44 = vcombine.low %v7890_v24, %v7897_v60  ;;  %v6551_v55 = vrot.slane %v6535_v27, %v9789_v14  ;;  %v6558_v1 = vrot.slane %v6536_v0, %v9789_v14  ;;  %v7923_v29 = vrot.slane %v7901_v12, %v9789_v14 }
 0x1d9   : > { %8760 = vst.msk [vmem:[%s10778_s23 + $0x38] sm:$0xf] %vm8728_vm2, %v9323_v6  ;;  %v7930_v38 = vrot.slane %v9262_v19, %v9789_v14  ;;  %v6565_v33 = vrot.slane %v6537_v54, %v9789_v14  ;;  %v5631_v43 = vadd.f32 %v11013_v36, %v11028_v17  ;;  %v7931_v40 = vcombine.low %v7909_v42, %v7916_v34 }
 0x1da   : > { %v9324_v49 = vpack.c.bf16 %v7898_v44, %v7898_v44  ;;  %v6567_v62 = vcombine.high %v6551_v55, %v6551_v55  ;;  %v7948_v59 = vcombine.low %v6544_v2, %v6558_v1  ;;  %v9263_v32 = vcombine.high %v6544_v2, %v6558_v1 }
 0x1db   : > { %v7932_v4 = vcombine.low %v7923_v29, %v7930_v38  ;;  %v7950_v56 = vcombine.low %v6551_v55, %v6565_v33  ;;  %v5667_v45 = vadd.f32 %v11038_v22, %v5631_v43  ;;  %v11090_v51 = vpop.f32.mrf.mxu0  ;;  %v7939_v52 = vrot.slane %v7931_v40, %v9789_v14 }
 0x1dc   : > { %v8762_v16 = vsel %vm10790_vm4, %v9324_v49, %v8761_v63  ;;  %v7957_v28 = vrot.slane %v7948_v59, %v9789_v14  ;;  %v7978_v36 = vrot.slane %v6567_v62, %v9789_v14  ;;  %v7964_v39 = vrot.slane %v9263_v32, %v9789_v14  ;;  %v8765_v63 = vld [vmem:[%s10778_s23 + $0x44] sm:$0xf] }
 0x1dd   : > { %8763 = vst [vmem:[%s10778_s23 + $0x3c] sm:$0xf] %v8762_v16  ;;  %v7946_v17 = vrot.slane %v7932_v4, %v9789_v14  ;;  %v7971_v9 = vrot.slane %v7950_v56, %v9789_v14  ;;  %v5696_v58 = vmax.f32 %v5667_v45, 0.0  ;;  %v11101_v20 = vpop.f32.mrf.mxu1  ;;  %v9600_v50 = vpop.f32.mrf.mxu0  ;;  %v6569_v53 = vcombine.high %v6565_v33, %v6565_v33 }
 0x1de   : > { %v4448_v47 = vadd.f32 %v11017_v8, %v10539_v57  ;;  %v5632_v27 = vadd.f32 %v11046_v48, %v11044_v15  ;;  %v7979_v41 = vcombine.low %v7957_v28, %v7964_v39  ;;  %v4453_v2 = vadd.f32 %v11059_v10, %v10576_v46 }
 0x1df   : > { %v7947_v0 = vcombine.low %v7939_v52, %v7946_v17  ;;  %v7980_v13 = vcombine.low %v7971_v9, %v7978_v36  ;;  %v6570_v5 = vcombine.high %v5696_v58, %v5696_v58  ;;  %v9532_v35 = vpop.f32.mrf.mxu1  ;;  %v11107_v24 = vpop.f32.mrf.mxu0  ;;  %v6577_v60 = vrot.slane %v5696_v58, %v9789_v14 }
 0x1e0   : > { %v5668_v54 = vadd.f32 %v11038_v22, %v5632_v27  ;;  %v5633_v57 = vadd.f32 %v11056_v61, %v4448_v47  ;;  %v7987_v15 = vrot.slane %v7979_v41, %v9789_v14  ;;  %v11122_v46 = vadd.f32 %v11071_v26, %v10585_v23 }
 0x1e1   : > { %v9325_v8 = vpack.c.bf16 %v7947_v0, %v7947_v0  ;;  %v7994_v48 = vrot.slane %v7980_v13, %v9789_v14  ;;  %v6584_v11 = vrot.slane %v6570_v5, %v9789_v14  ;;  %v11117_v6 = vpop.f32.mrf.mxu1  ;;  %v9601_v12 = vpop.f32.mrf.mxu0  ;;  %v6585_v19 = vcombine.high %v6577_v60, %v6577_v60 }
 0x1e2   : > { %v6593_v42 = vrot.slane %v6577_v60, %v9789_v14  ;;  %v5697_v44 = vmax.f32 %v5668_v54, 0.0  ;;  %v5669_v55 = vadd.f32 %v11038_v22, %v5633_v57 }
 0x1e3   : > { %8764 = vst.msk [vmem:[%s10778_s23 + $0x40] sm:$0xf] %vm8728_vm2, %v9325_v8  ;;  %v7995_v61 = vcombine.low %v7987_v15, %v7994_v48  ;;  %v6586_v10 = vcombine.high %v6584_v11, %v6584_v11  ;;  %v6600_v34 = vrot.slane %v6584_v11, %v9789_v14  ;;  %v9533_v1 = vpop.f32.mrf.mxu1  ;;  %v6607_v29 = vrot.slane %v6585_v19, %v9789_v14 }
 0x1e4   : > { %v6615_v38 = vcombine.high %v6593_v42, %v6593_v42  ;;  %v7996_v33 = vcombine.low %v6569_v53, %v6593_v42  ;;  %v6619_v43 = vcombine.high %v5697_v44, %v5697_v44  ;;  %v11130_v49 = vpop.f32.mrf.mxu0  ;;  %v6626_v62 = vrot.slane %v5697_v44, %v9789_v14 }
 0x1e5   : > { %v9326_v23 = vpack.c.bf16 %v7995_v61, %v7995_v61  ;;  %v6614_v26 = vrot.slane %v6586_v10, %v9789_v14  ;;  %v6616_v40 = vcombine.high %v6600_v34, %v6600_v34  ;;  %v6617_v59 = vcombine.high %v6607_v29, %v6607_v29 }
 0x1e6   : > { %v7997_v4 = vcombine.low %v6607_v29, %v6615_v38  ;;  %v8006_v32 = vrot.slane %v7996_v33, %v9789_v14  ;;  %v6633_v56 = vrot.slane %v6619_v43, %v9789_v14  ;;  %v9604_v45 = vpop.f32.mrf.mxu0  ;;  %v6634_v36 = vcombine.high %v6626_v62, %v6626_v62 }
 0x1e7   : > { %v8766_v16 = vsel %vm10790_vm4, %v9326_v23, %v8765_v63  ;;  %v7999_v52 = vcombine.low %v6614_v26, %v6616_v40  ;;  %v6618_v28 = vcombine.high %v6614_v26, %v6614_v26  ;;  %v7998_v17 = vcombine.low %v6617_v59, %v6600_v34 }
 0x1e8   : > { %8767 = vst [vmem:[%s10778_s23 + $0x44] sm:$0xf] %v8766_v16  ;;  %v8013_v39 = vrot.slane %v7997_v4, %v9789_v14  ;;  %v6635_v9 = vcombine.high %v6633_v56, %v6633_v56  ;;  %v6642_v58 = vrot.slane %v6626_v62, %v9789_v14  ;;  %v11141_v50 = vpop.f32.mrf.mxu0  ;;  %v6649_v47 = vrot.slane %v6633_v56, %v9789_v14 }
 0x1e9   : > { %v8027_v53 = vrot.slane %v7999_v52, %v9789_v14  ;;  %v6656_v27 = vrot.slane %v6634_v36, %v9789_v14  ;;  %v5698_v0 = vmax.f32 %v5669_v55, 0.0  ;;  %v8020_v41 = vrot.slane %v7998_v17, %v9789_v14 }
 0x1ea   : > { %v8028_v13 = vcombine.low %v8006_v32, %v8013_v39  ;;  %v6663_v5 = vrot.slane %v6635_v9, %v9789_v14  ;;  %v6664_v35 = vcombine.high %v6642_v58, %v6642_v58  ;;  %v9605_v60 = vpop.f32.mrf.mxu0  ;;  %v8045_v57 = vcombine.low %v6618_v28, %v6642_v58 }
 0x1eb   : > { %v6666_v54 = vcombine.high %v6656_v27, %v6656_v27  ;;  %v6668_v8 = vcombine.high %v5698_v0, %v5698_v0  ;;  %v6675_v15 = vrot.slane %v5698_v0, %v9789_v14  ;;  %v11149_v48 = vpop.f32.mrf.mxu1  ;;  %v8029_v11 = vcombine.low %v8020_v41, %v8027_v53  ;;  %v8769_v60 = vld [vmem:[%s10778_s23 + $0x4c] sm:$0xf] }
 0x1ec   : > { %v8036_v12 = vrot.slane %v8028_v13, %v9789_v14  ;;  %v8046_v19 = vcombine.low %v6656_v27, %v6664_v35  ;;  %v5634_v42 = vadd.f32 %v11090_v51, %v4453_v2  ;;  %v8054_v61 = vrot.slane %v8045_v57, %v9789_v14 }
 0x1ed   : > { %v8047_v44 = vcombine.low %v6666_v54, %v6649_v47  ;;  %v9264_v10 = vcombine.high %v6649_v47, %v6663_v5  ;;  %v6682_v34 = vrot.slane %v6668_v8, %v9789_v14  ;;  %v9536_v55 = vpop.f32.mrf.mxu1  ;;  %v8043_v1 = vrot.slane %v8029_v11, %v9789_v14 }
 0x1ee   : > { %v8061_v63 = vrot.slane %v8046_v19, %v9789_v14  ;;  %v8075_v29 = vrot.slane %v6663_v5, %v9789_v14  ;;  %v6683_v38 = vcombine.high %v6675_v15, %v6675_v15  ;;  %v6691_v51 = vrot.slane %v6675_v15, %v9789_v14 }
 0x1ef   : > { %v8068_v33 = vrot.slane %v8047_v44, %v9789_v14  ;;  %v8103_v43 = vrot.slane %v9264_v10, %v9789_v14  ;;  %v6684_v23 = vcombine.high %v6682_v34, %v6682_v34  ;;  %v11161_v2 = vpop.f32.mrf.mxu1  ;;  %v8044_v26 = vcombine.low %v8036_v12, %v8043_v1 }
 0x1f0   : > { %v8076_v40 = vcombine.low %v8054_v61, %v8061_v63  ;;  %v6705_v62 = vrot.slane %v6683_v38, %v9789_v14  ;;  %v5670_v59 = vadd.f32 %v11038_v22, %v5634_v42  ;;  %v6698_v32 = vrot.slane %v6682_v34, %v9789_v14 }
 0x1f1   : > { %v8077_v4 = vcombine.low %v8068_v33, %v8075_v29  ;;  %v6712_v56 = vrot.slane %v6684_v23, %v9789_v14  ;;  %v5635_v45 = vadd.f32 %v11107_v24, %v11122_v46  ;;  %v9537_v16 = vpop.f32.mrf.mxu1  ;;  %v9327_v52 = vpack.c.bf16 %v8044_v26, %v8044_v26 }
 0x1f2   : > { %v8084_v28 = vrot.slane %v8076_v40, %v9789_v14  ;;  %v8094_v36 = vcombine.low %v6691_v51, %v6705_v62  ;;  %v9265_v17 = vcombine.high %v6691_v51, %v6705_v62  ;;  %v5699_v53 = vmax.f32 %v5670_v59, 0.0 }
 0x1f3   : > { %v8091_v39 = vrot.slane %v8077_v4, %v9789_v14  ;;  %v8096_v9 = vcombine.low %v6698_v32, %v6712_v56  ;;  %v9266_v58 = vcombine.high %v6698_v32, %v6712_v56  ;;  %8768 = vst.msk [vmem:[%s10778_s23 + $0x48] sm:$0xf] %vm8728_vm2, %v9327_v52  ;;  %v4461_v24 = vadd.f32 %v11101_v20, %v10619_v18 }
 0x1f4   : > { %v8110_v47 = vrot.slane %v8094_v36, %v9789_v14  ;;  %v8117_v27 = vrot.slane %v9265_v17, %v9789_v14  ;;  %v5671_v46 = vadd.f32 %v11038_v22, %v5635_v45  ;;  %v6717_v13 = vcombine.high %v5699_v53, %v5699_v53 }
 0x1f5   : > { %v8092_v0 = vcombine.low %v8084_v28, %v8091_v39  ;;  %v8124_v41 = vrot.slane %v8096_v9, %v9789_v14  ;;  %v11181_v5 = vadd.f32 %v11117_v6, %v10631_v25  ;;  %v11183_v35 = vpop.f32.mrf.mxu0  ;;  %v6724_v57 = vrot.slane %v5699_v53, %v9789_v14 }
 0x1f6   : > { %v8125_v54 = vcombine.low %v8103_v43, %v8110_v47  ;;  %v5700_v8 = vmax.f32 %v5671_v46, 0.0  ;;  %v5636_v15 = vadd.f32 %v11130_v49, %v4461_v24  ;;  %v8151_v11 = vrot.slane %v9266_v58, %v9789_v14 }
 0x1f7   : > { %v9328_v18 = vpack.c.bf16 %v8092_v0, %v8092_v0  ;;  %v8126_v20 = vcombine.low %v8117_v27, %v8124_v41  ;;  %v6731_v12 = vrot.slane %v6717_v13, %v9789_v14  ;;  %v11190_v19 = vpop.f32.mrf.mxu1  ;;  %v9608_v25 = vpop.f32.mrf.mxu0  ;;  %v6732_v42 = vcombine.high %v6724_v57, %v6724_v57 }
 0x1f8   : > { %v8133_v6 = vrot.slane %v8125_v54, %v9789_v14  ;;  %v6740_v44 = vrot.slane %v6724_v57, %v9789_v14  ;;  %v6766_v61 = vcombine.high %v5700_v8, %v5700_v8  ;;  %v6773_v38 = vrot.slane %v5700_v8, %v9789_v14 }
 0x1f9   : > { %v8770_v10 = vsel %vm10790_vm4, %v9328_v18, %v8769_v60  ;;  %v8140_v49 = vrot.slane %v8126_v20, %v9789_v14  ;;  %v6733_v34 = vcombine.high %v6731_v12, %v6731_v12  ;;  %v6747_v55 = vrot.slane %v6731_v12, %v9789_v14  ;;  %v9540_v1 = vpop.f32.mrf.mxu1  ;;  %v11198_v63 = vpop.f32.mrf.mxu0 }
 0x1fa   : > { %8771 = vst [vmem:[%s10778_s23 + $0x4c] sm:$0xf] %v8770_v10  ;;  %v6754_v29 = vrot.slane %v6732_v42, %v9789_v14  ;;  %v6780_v33 = vrot.slane %v6766_v61, %v9789_v14  ;;  %v5672_v43 = vadd.f32 %v11038_v22, %v5636_v15  ;;  %v6781_v56 = vcombine.high %v6773_v38, %v6773_v38 }
 0x1fb   : > { %v8141_v23 = vcombine.low %v8133_v6, %v8140_v49  ;;  %v6761_v51 = vrot.slane %v6733_v34, %v9789_v14  ;;  %v6763_v26 = vcombine.high %v6747_v55, %v6747_v55  ;;  %v8172_v40 = vrot.slane %v6747_v55, %v9789_v14  ;;  %v11207_v62 = vpop.f32.mrf.mxu1  ;;  %v9609_v59 = vpop.f32.mrf.mxu0 }
 0x1fc   : > { %v8143_v4 = vcombine.low %v6740_v44, %v6754_v29  ;;  %v9267_v32 = vcombine.high %v6740_v44, %v6754_v29  ;;  %v6782_v45 = vcombine.high %v6780_v33, %v6780_v33  ;;  %v6789_v36 = vrot.slane %v6773_v38, %v9789_v14 }
 0x1fd   : > { %v9329_v16 = vpack.c.bf16 %v8141_v23, %v8141_v23  ;;  %v8190_v52 = vcombine.low %v6761_v51, %v6763_v26  ;;  %v6765_v28 = vcombine.high %v6761_v51, %v6761_v51  ;;  %v9541_v17 = vpop.f32.mrf.mxu1  ;;  %v6796_v58 = vrot.slane %v6780_v33, %v9789_v14 }
 0x1fe   : > { %v8158_v39 = vrot.slane %v8143_v4, %v9789_v14  ;;  %v8165_v9 = vrot.slane %v9267_v32, %v9789_v14  ;;  %v6803_v53 = vrot.slane %v6781_v56, %v9789_v14  ;;  %v11214_v47 = vpop.f32.mrf.mxu0  ;;  %v6810_v27 = vrot.slane %v6782_v45, %v9789_v14 }
 0x1ff   : > { %8772 = vst.msk [vmem:[%s10778_s23 + $0x50] sm:$0xf] %vm8728_vm2, %v9329_v16  ;;  %v6811_v24 = vcombine.high %v6789_v36, %v6789_v36  ;;  %v8191_v46 = vcombine.low %v6765_v28, %v6789_v36  ;;  %v4469_v0 = vadd.f32 %v11149_v48, %v10672_v3  ;;  %v11221_v41 = vpop.f32.mrf.mxu1  ;;  %v6812_v54 = vcombine.high %v6796_v58, %v6796_v58 }
 0x200   : > { %v8173_v13 = vcombine.low %v8151_v11, %v8158_v39  ;;  %v8174_v60 = vcombine.low %v8165_v9, %v8172_v40  ;;  %v6813_v57 = vcombine.high %v6803_v53, %v6803_v53  ;;  %v9612_v8 = vpop.f32.mrf.mxu0  ;;  %v8200_v18 = vrot.slane %v8190_v52, %v9789_v14 }
 0x201   : > { %v8192_v15 = vcombine.low %v6803_v53, %v6811_v24  ;;  %v8207_v20 = vrot.slane %v8191_v46, %v9789_v14  ;;  %v5701_v12 = vmax.f32 %v5672_v43, 0.0  ;;  %v9544_v25 = vpop.f32.mrf.mxu1  ;;  %v8239_v48 = vcombine.low %v6810_v27, %v6812_v54  ;;  %v8773_v43 = vld [vmem:[%s10778_s23 + $0x54] sm:$0xf] }
 0x202   : > { %v8181_v6 = vrot.slane %v8173_v13, %v9789_v14  ;;  %v8188_v42 = vrot.slane %v8174_v60, %v9789_v14  ;;  %v8193_v3 = vcombine.low %v6813_v57, %v6796_v58  ;;  %v11227_v44 = vpop.f32.mrf.mxu0  ;;  %v6814_v61 = vcombine.high %v6810_v27, %v6810_v27 }
 0x203   : > { %v8222_v11 = vcombine.low %v8200_v18, %v8207_v20  ;;  %v6815_v10 = vcombine.high %v5701_v12, %v5701_v12  ;;  %v6822_v49 = vrot.slane %v5701_v12, %v9789_v14  ;;  %v4487_v34 = vpop.f32.mrf.mxu1  ;;  %v8214_v1 = vrot.slane %v8192_v15, %v9789_v14 }
 0x204   : > { %v8189_v55 = vcombine.low %v8181_v6, %v8188_v42  ;;  %v8221_v29 = vrot.slane %v8193_v3, %v9789_v14  ;;  %v5637_v38 = vadd.f32 %v11141_v50, %v11181_v5  ;;  %v9613_v33 = vpop.f32.mrf.mxu0  ;;  %v8248_v40 = vrot.slane %v8239_v48, %v9789_v14 }
 0x205   : > { %v6829_v23 = vrot.slane %v6815_v10, %v9789_v14  ;;  %v6830_v51 = vcombine.high %v6822_v49, %v6822_v49  ;;  %v6838_v26 = vrot.slane %v6822_v49, %v9789_v14  ;;  %v9545_v59 = vpop.f32.mrf.mxu1  ;;  %v8230_v56 = vrot.slane %v8222_v11, %v9789_v14 }
 0x206   : > { %v9330_v4 = vpack.c.bf16 %v8189_v55, %v8189_v55  ;;  %v8223_v32 = vcombine.low %v8214_v1, %v8221_v29  ;;  %v5673_v45 = vadd.f32 %v11038_v22, %v5637_v38  ;;  %v11240_v16 = vpop.f32.mrf.mxu0  ;;  %v5638_v46 = vadd.f32 %v11183_v35, %v4469_v0  ;;  %v8777_v59 = vld [vmem:[%s10778_s23 + $0x5c] sm:$0xf] }
 0x207   : > { %v6831_v50 = vcombine.high %v6829_v23, %v6829_v23  ;;  %v6845_v5 = vrot.slane %v6829_v23, %v9789_v14  ;;  %v6852_v52 = vrot.slane %v6830_v51, %v9789_v14  ;;  %v6860_v28 = vcombine.high %v6838_v26, %v6838_v26 }
 0x208   : > { %v8774_v36 = vsel %vm10790_vm4, %v9330_v4, %v8773_v43  ;;  %v8237_v17 = vrot.slane %v8223_v32, %v9789_v14  ;;  %v8240_v39 = vcombine.low %v6814_v61, %v6838_v26  ;;  %v5702_v9 = vmax.f32 %v5673_v45, 0.0  ;;  %v9616_v58 = vpop.f32.mrf.mxu0 }
 0x209   : > { %8775 = vst [vmem:[%s10778_s23 + $0x54] sm:$0xf] %v8774_v36  ;;  %v6859_v53 = vrot.slane %v6831_v50, %v9789_v14  ;;  %v6862_v27 = vcombine.high %v6852_v52, %v6852_v52  ;;  %v8241_v24 = vcombine.low %v6852_v52, %v6860_v28  ;;  %v4472_v61 = vadd.f32 %v11161_v2, %v10685_v30 }
 0x20a   : > { %v8238_v13 = vcombine.low %v8230_v56, %v8237_v17  ;;  %v8255_v60 = vrot.slane %v8240_v39, %v9789_v14  ;;  %v6864_v54 = vcombine.high %v5702_v9, %v5702_v9  ;;  %v6871_v57 = vrot.slane %v5702_v9, %v9789_v14  ;;  %v5611_v8 = vpop.f32.mrf.mxu0 }
 0x20b   : > { %v8262_v15 = vrot.slane %v8241_v24, %v9789_v14  ;;  %v8269_v18 = vrot.slane %v6862_v27, %v9789_v14  ;;  %v8287_v20 = vcombine.low %v6845_v5, %v6859_v53  ;;  %v9268_v12 = vcombine.high %v6845_v5, %v6859_v53 }
 0x20c   : > { %v9331_v25 = vpack.c.bf16 %v8238_v13, %v8238_v13  ;;  %v8270_v6 = vcombine.low %v8248_v40, %v8255_v60  ;;  %v6878_v42 = vrot.slane %v6864_v54, %v9789_v14  ;;  %v6879_v3 = vcombine.high %v6871_v57, %v6871_v57  ;;  %v9617_v35 = vpop.f32.mrf.mxu0 }
 0x20d   : > { %v8271_v0 = vcombine.low %v8262_v15, %v8269_v18  ;;  %v8297_v48 = vrot.slane %v8287_v20, %v9789_v14  ;;  %v8304_v11 = vrot.slane %v9268_v12, %v9789_v14  ;;  %v6887_v34 = vrot.slane %v6871_v57, %v9789_v14 }
 0x20e   : > { %8776 = vst.msk [vmem:[%s10778_s23 + $0x58] sm:$0xf] %vm8728_vm2, %v9331_v25  ;;  %v8278_v10 = vrot.slane %v8270_v6, %v9789_v14  ;;  %v6880_v49 = vcombine.high %v6878_v42, %v6878_v42  ;;  %v6901_v55 = vrot.slane %v6879_v3, %v9789_v14  ;;  %v6894_v29 = vrot.slane %v6878_v42, %v9789_v14 }
 0x20f   : > { %v8285_v1 = vrot.slane %v8271_v0, %v9789_v14  ;;  %v5674_v38 = vadd.f32 %v11038_v22, %v5638_v46  ;;  %v5639_v2 = vadd.f32 %v11198_v63, %v4472_v61  ;;  %v8319_v51 = vcombine.low %v8297_v48, %v8304_v11 }
 0x210   : > { %v6908_v33 = vrot.slane %v6880_v49, %v9789_v14  ;;  %v8289_v43 = vcombine.low %v6887_v34, %v6901_v55  ;;  %v9269_v30 = vcombine.high %v6887_v34, %v6901_v55  ;;  %v4477_v40 = vadd.f32 %v11190_v19, %v10710_v21 }
 0x211   : > { %v8286_v23 = vcombine.low %v8278_v10, %v8285_v1  ;;  %v5703_v26 = vmax.f32 %v5674_v38, 0.0  ;;  %v5675_v63 = vadd.f32 %v11038_v22, %v5639_v2  ;;  %v8327_v53 = vrot.slane %v8319_v51, %v9789_v14 }
 0x212   : > { %v8311_v4 = vrot.slane %v8289_v43, %v9789_v14  ;;  %v8318_v32 = vrot.slane %v9269_v30, %v9789_v14  ;;  %v8336_v56 = vcombine.low %v6894_v29, %v6908_v33  ;;  %v9270_v45 = vcombine.high %v6894_v29, %v6908_v33 }
 0x213   : > { %v9332_v50 = vpack.c.bf16 %v8286_v23, %v8286_v23  ;;  %v6913_v5 = vcombine.high %v5703_v26, %v5703_v26  ;;  %v6920_v52 = vrot.slane %v5703_v26, %v9789_v14  ;;  %v5640_v21 = vadd.f32 %v11214_v47, %v4477_v40 }
 0x214   : > { %v8320_v28 = vcombine.low %v8311_v4, %v8318_v32  ;;  %v8345_v36 = vrot.slane %v8336_v56, %v9789_v14  ;;  %v8352_v17 = vrot.slane %v9270_v45, %v9789_v14  ;;  %v5704_v46 = vmax.f32 %v5675_v63, 0.0 }
 0x215   : > { %v8778_v19 = vsel %vm10790_vm4, %v9332_v50, %v8777_v59  ;;  %v6927_v39 = vrot.slane %v6913_v5, %v9789_v14  ;;  %v6928_v9 = vcombine.high %v6920_v52, %v6920_v52  ;;  %v6936_v58 = vrot.slane %v6920_v52, %v9789_v14 }
 0x216   : > { %8779 = vst [vmem:[%s10778_s23 + $0x5c] sm:$0xf] %v8778_v19  ;;  %v8334_v27 = vrot.slane %v8320_v28, %v9789_v14  ;;  %v8367_v24 = vcombine.low %v8345_v36, %v8352_v17  ;;  %v6962_v8 = vcombine.high %v5704_v46, %v5704_v46  ;;  %v6969_v15 = vrot.slane %v5704_v46, %v9789_v14  ;;  %v8781_v17 = vld [vmem:[%s10778_s23 + $0x64] sm:$0xf] }
 0x217   : > { %v6929_v13 = vcombine.high %v6927_v39, %v6927_v39  ;;  %v6943_v60 = vrot.slane %v6927_v39, %v9789_v14  ;;  %v6950_v47 = vrot.slane %v6928_v9, %v9789_v14  ;;  %v6958_v54 = vcombine.high %v6936_v58, %v6936_v58 }
 0x218   : > { %v8335_v57 = vcombine.low %v8327_v53, %v8334_v27  ;;  %v5676_v18 = vadd.f32 %v11038_v22, %v5640_v21  ;;  %v6976_v35 = vrot.slane %v6962_v8, %v9789_v14  ;;  %v6977_v0 = vcombine.high %v6969_v15, %v6969_v15 }
 0x219   : > { %v6957_v20 = vrot.slane %v6929_v13, %v9789_v14  ;;  %v6959_v12 = vcombine.high %v6943_v60, %v6943_v60  ;;  %v6960_v25 = vcombine.high %v6950_v47, %v6950_v47  ;;  %v8338_v6 = vcombine.low %v6936_v58, %v6950_v47 }
 0x21a   : > { %v9333_v42 = vpack.c.bf16 %v8335_v57, %v8335_v57  ;;  %v8366_v3 = vrot.slane %v6958_v54, %v9789_v14  ;;  %v6978_v49 = vcombine.high %v6976_v35, %v6976_v35  ;;  %v6985_v34 = vrot.slane %v6969_v15, %v9789_v14 }
 0x21b   : > { %v8359_v48 = vrot.slane %v8338_v6, %v9789_v14  ;;  %v8384_v11 = vcombine.low %v6960_v25, %v6943_v60  ;;  %v8385_v61 = vcombine.low %v6957_v20, %v6959_v12  ;;  %v6961_v10 = vcombine.high %v6957_v20, %v6957_v20 }
 0x21c   : > { %8780 = vst.msk [vmem:[%s10778_s23 + $0x60] sm:$0xf] %vm8728_vm2, %v9333_v42  ;;  %v6992_v55 = vrot.slane %v6976_v35, %v9789_v14  ;;  %v6999_v1 = vrot.slane %v6977_v0, %v9789_v14  ;;  %v5705_v43 = vmax.f32 %v5676_v18, 0.0  ;;  %v7006_v30 = vrot.slane %v6978_v49, %v9789_v14 }
 0x21d   : > { %v8368_v29 = vcombine.low %v8359_v48, %v8366_v3  ;;  %v8394_v38 = vrot.slane %v8384_v11, %v9789_v14  ;;  %v8401_v33 = vrot.slane %v8385_v61, %v9789_v14  ;;  %v7007_v2 = vcombine.high %v6985_v34, %v6985_v34 }
 0x21e   : > { %v7008_v23 = vcombine.high %v6992_v55, %v6992_v55  ;;  %v7009_v51 = vcombine.high %v6999_v1, %v6999_v1  ;;  %v8375_v26 = vrot.slane %v8367_v24, %v9789_v14  ;;  %v8386_v59 = vcombine.low %v6961_v10, %v6985_v34 }
 0x21f   : > { %v8382_v40 = vrot.slane %v8368_v29, %v9789_v14  ;;  %v7011_v4 = vcombine.high %v5705_v43, %v5705_v43  ;;  %v8387_v32 = vcombine.low %v6999_v1, %v7007_v2  ;;  %v4480_v50 = vadd.f32 %v11207_v62, %v10715_v31 }
 0x220   : > { %v8433_v56 = vcombine.low %v7009_v51, %v6992_v55  ;;  %v8434_v45 = vcombine.low %v7006_v30, %v7008_v23  ;;  %v8408_v52 = vrot.slane %v8386_v59, %v9789_v14  ;;  %v7010_v63 = vcombine.high %v7006_v30, %v7006_v30 }
 0x221   : > { %v8383_v5 = vcombine.low %v8375_v26, %v8382_v40  ;;  %v7018_v28 = vrot.slane %v5705_v43, %v9789_v14  ;;  %v8416_v36 = vcombine.low %v8394_v38, %v8401_v33  ;;  %v8415_v21 = vrot.slane %v8387_v32, %v9789_v14  ;;  %v8785_v38 = vld [vmem:[%s10778_s23 + $0x6c] sm:$0xf] }
 0x222   : > { %v8442_v19 = vrot.slane %v8433_v56, %v9789_v14  ;;  %v7025_v39 = vrot.slane %v7011_v4, %v9789_v14  ;;  %v8449_v58 = vrot.slane %v8434_v45, %v9789_v14  ;;  %v4485_v24 = vadd.f32 %v11221_v41, %v10722_v37 }
 0x223   : > { %v9334_v9 = vpack.c.bf16 %v8383_v5, %v8383_v5  ;;  %v7026_v53 = vcombine.high %v7018_v28, %v7018_v28  ;;  %v7034_v31 = vrot.slane %v7018_v28, %v9789_v14  ;;  %v8417_v62 = vcombine.low %v8408_v52, %v8415_v21 }
 0x224   : > { %v7027_v27 = vcombine.high %v7025_v39, %v7025_v39  ;;  %v5641_v47 = vadd.f32 %v11227_v44, %v4480_v50  ;;  %v8424_v54 = vrot.slane %v8416_v36, %v9789_v14  ;;  %v5642_v15 = vadd.f32 %v11240_v16, %v4485_v24 }
 0x225   : > { %v8782_v46 = vsel %vm10790_vm4, %v9334_v9, %v8781_v17  ;;  %v7048_v13 = vrot.slane %v7026_v53, %v9789_v14  ;;  %v8435_v60 = vcombine.low %v7010_v63, %v7034_v31  ;;  %v8431_v57 = vrot.slane %v8417_v62, %v9789_v14 }
 0x226   : > { %8783 = vst [vmem:[%s10778_s23 + $0x64] sm:$0xf] %v8782_v46  ;;  %v7055_v8 = vrot.slane %v7027_v27, %v9789_v14  ;;  %v8464_v18 = vcombine.low %v8442_v19, %v8449_v58  ;;  %v5677_v20 = vadd.f32 %v11038_v22, %v5641_v47  ;;  %v7041_v44 = vrot.slane %v7025_v39, %v9789_v14  ;;  %v8789_v46 = vld [vmem:[%s10778_s23 + $0x74] sm:$0xf] }
 0x227   : > { %v8456_v37 = vrot.slane %v8435_v60, %v9789_v14  ;;  %v8463_v41 = vrot.slane %v7048_v13, %v9789_v14  ;;  %v8432_v12 = vcombine.low %v8424_v54, %v8431_v57  ;;  %v5678_v25 = vadd.f32 %v11038_v22, %v5642_v15 }
 0x228   : > { %v5706_v42 = vmax.f32 %v5677_v20, 0.0  ;;  %v8482_v35 = vcombine.low %v7041_v44, %v7055_v8  ;;  %v8472_v16 = vrot.slane %v8464_v18, %v9789_v14  ;;  %v9271_v10 = vcombine.high %v7034_v31, %v7048_v13 }
 0x229   : > { %v8465_v6 = vcombine.low %v8456_v37, %v8463_v41  ;;  %v9335_v3 = vpack.c.bf16 %v8432_v12, %v8432_v12  ;;  %v5707_v0 = vmax.f32 %v5678_v25, 0.0  ;;  %v9272_v1 = vcombine.high %v7041_v44, %v7055_v8 }
 0x22a   : > { %v7060_v11 = vcombine.high %v5706_v42, %v5706_v42  ;;  %v7067_v61 = vrot.slane %v5706_v42, %v9789_v14  ;;  %v8498_v29 = vrot.slane %v8482_v35, %v9789_v14  ;;  %v8491_v23 = vrot.slane %v9271_v10, %v9789_v14 }
 0x22b   : > { %v8479_v48 = vrot.slane %v8465_v6, %v9789_v14  ;;  %8784 = vst.msk [vmem:[%s10778_s23 + $0x68] sm:$0xf] %vm8728_vm2, %v9335_v3  ;;  %v7115_v49 = vrot.slane %v5707_v0, %v9789_v14  ;;  %v8505_v56 = vrot.slane %v9272_v1, %v9789_v14 }
 0x22c   : > { %v7074_v22 = vrot.slane %v7060_v11, %v9789_v14  ;;  %v7075_v55 = vcombine.high %v7067_v61, %v7067_v61  ;;  %v7083_v30 = vrot.slane %v7067_v61, %v9789_v14  ;;  %v8513_v45 = vcombine.low %v8491_v23, %v8498_v29 }
 0x22d   : > { %v8480_v34 = vcombine.low %v8472_v16, %v8479_v48  ;;  %v7122_v26 = vrot.slane %v7115_v49, %v9789_v14 }
 0x22e   : > { %v7076_v43 = vcombine.high %v7074_v22, %v7074_v22  ;;  %v7097_v2 = vrot.slane %v7075_v55, %v9789_v14  ;;  %v7090_v51 = vrot.slane %v7074_v22, %v9789_v14  ;;  %v8521_v19 = vrot.slane %v8513_v45, %v9789_v14 }
 0x22f   : > { %v9336_v33 = vpack.c.bf16 %v8480_v34, %v8480_v34  ;;  %v8560_v63 = vrot.slane %v7122_v26, %v9789_v14 }
 0x230   : > { %v7104_v59 = vrot.slane %v7076_v43, %v9789_v14  ;;  %v8484_v4 = vcombine.low %v7083_v30, %v7097_v2  ;;  %v9273_v32 = vcombine.high %v7083_v30, %v7097_v2 }
 0x231   : > { %v8786_v40 = vsel %vm10790_vm4, %v9336_v33, %v8785_v38 }
 0x232   : > { %8787 = vst [vmem:[%s10778_s23 + $0x6c] sm:$0xf] %v8786_v40  ;;  %v8512_v50 = vrot.slane %v8484_v4, %v9789_v14  ;;  %v8531_v5 = vcombine.low %v7090_v51, %v7104_v59  ;;  %v9274_v52 = vcombine.high %v7090_v51, %v7104_v59  ;;  %v8539_v36 = vrot.slane %v9273_v32, %v9789_v14 }
 0x234   : > { %v8514_v28 = vcombine.low %v8505_v56, %v8512_v50  ;;  %v8546_v17 = vrot.slane %v8531_v5, %v9789_v14  ;;  %v8553_v21 = vrot.slane %v9274_v52, %v9789_v14 }
 0x236   : > { %v8528_v39 = vrot.slane %v8514_v28, %v9789_v14  ;;  %v8561_v9 = vcombine.low %v8539_v36, %v8546_v17  ;;  %v8562_v58 = vcombine.low %v8553_v21, %v8560_v63 }
 0x238   : > { %v8529_v53 = vcombine.low %v8521_v19, %v8528_v39  ;;  %v8569_v31 = vrot.slane %v8561_v9, %v9789_v14  ;;  %v8576_v62 = vrot.slane %v8562_v58, %v9789_v14 }
 0x23a   : > { %v9337_v27 = vpack.c.bf16 %v8529_v53, %v8529_v53  ;;  %v8577_v24 = vcombine.low %v8569_v31, %v8576_v62 }
 0x23c   : > { %8788 = vst.msk [vmem:[%s10778_s23 + $0x70] sm:$0xf] %vm8728_vm2, %v9337_v27  ;;  %v9338_v13 = vpack.c.bf16 %v8577_v24, %v8577_v24 }
 0x23e   : > { %v8790_v60 = vsel %vm10790_vm4, %v9338_v13, %v8789_v46 }
 0x23f   : > { %8791 = vst [vmem:[%s10778_s23 + $0x74] sm:$0xf] %v8790_v60 }
 0x240 PF: > { %s14_s17 = sadd.s32 1, %s9702_s17   ;;  %s11380_s15 = smov %s9698_s16 }
 0x241   : > { %p11_p5 = scmp.ge.s32.totalorder %s14_s17, 4   ;;  %s11381_s16 = smov %s11383_s18 }
 0x243   :  { %13 = sbr.rel (!%p11_p5) target bundleno = 2 (0x2), region = 71 }

</bundles_post_ra>
